<compile_context>
chip_gen: v7x
topology: tpu7x:2x2x1
jax: 0.10.0
libtpu: 0.0.40
codegen_flags: <defaults>
</compile_context>

<pallas_src>
from functools import partial

import jax
import jax.numpy as jnp
from jax.experimental import pallas as pl
from jax.experimental.pallas import tpu as pltpu


# ----------------------------- in-kernel helpers -----------------------------

def _layernorm(x, gamma, beta, eps=1e-5):
    # x: (M, D) f32; gamma/beta kept 2-D (1, D) to avoid 1-D relayouts.
    mean = jnp.mean(x, axis=-1, keepdims=True)
    var = jnp.mean((x - mean) ** 2, axis=-1, keepdims=True)
    return (x - mean) * jax.lax.rsqrt(var + eps) * gamma + beta


# ----------------------------- fused kernel ----------------------------------

def _transformer_layer_kernel(x_ref, vecs_ref, b1_ref,
                              wqkv_ref, wout_ref, w1_ref, w2_ref,
                              o_ref, *, heads, dim_head_padded):
    """grid = (batch_blocks, depth).  One invocation = one transformer layer for one
    batch block.  The output block maps to the same VMEM tile for every depth step, so
    the residual stream never leaves VMEM between layers.  Weights are fully resident
    (constant block index) and sliced per layer with pl.program_id(1)."""
    layer = pl.program_id(1)

    # Seed the resident activation from the (HBM-aliased) input on layer 0.
    @pl.when(layer == 0)
    def _():
        o_ref[...] = x_ref[...]

    bb, n, d_model = o_ref.shape
    x = o_ref[...].astype(jnp.float32).reshape(bb * n, d_model)   # residual stream

    # Per-layer small vectors (packed): [ln1_g, ln1_b, b_out, ln2_g, ln2_b, b2].
    vecs = vecs_ref[layer].astype(jnp.float32)                    # (6, D)
    ln1_g, ln1_b = vecs[0:1], vecs[1:2]
    b_out = vecs[2:3]
    ln2_g, ln2_b = vecs[3:4], vecs[4:5]
    b2 = vecs[5:6]
    b1 = b1_ref[layer].astype(jnp.float32)                        # (1, mlp_dim)

    dhp = dim_head_padded
    hd = heads * dhp

    # ---------------- PreNorm + multi-head self-attention ----------------
    xn = _layernorm(x, ln1_g, ln1_b)
    # One wide MXU matmul produces q/k/v for all heads; the attention scale is folded
    # into the packed W_q columns, pad columns are zero.
    qkv = jnp.dot(xn.astype(jnp.bfloat16), wqkv_ref[layer],
                  preferred_element_type=jnp.float32)             # (bb*n, 3*H*dhp) f32

    ctx_heads = []
    for h in range(heads):                                        # static, typically 1
        q = qkv[:, h * dhp:(h + 1) * dhp].reshape(bb, n, dhp).astype(jnp.bfloat16)
        k = qkv[:, hd + h * dhp: hd + (h + 1) * dhp].reshape(bb, n, dhp).astype(jnp.bfloat16)
        v = qkv[:, 2 * hd + h * dhp: 2 * hd + (h + 1) * dhp].reshape(bb, n, dhp).astype(jnp.bfloat16)
        s = jnp.einsum('bnd,bmd->bnm', q, k,
                       preferred_element_type=jnp.float32)        # (bb, n, n) f32
        m = jnp.max(s, axis=-1, keepdims=True)
        p = jnp.exp(s - m)
        # EUP reciprocal instead of a VPU divide.
        attn = p * pl.reciprocal(jnp.sum(p, axis=-1, keepdims=True), approx=True)
        ctx_h = jnp.einsum('bnm,bmd->bnd', attn.astype(jnp.bfloat16), v,
                           preferred_element_type=jnp.float32)    # (bb, n, dhp)
        ctx_heads.append(ctx_h.reshape(bb * n, dhp))
    ctx = ctx_heads[0] if heads == 1 else jnp.concatenate(ctx_heads, axis=-1)

    # Output projection: the head contraction happens inside the MXU accumulator
    # (W_out packed as (H*dhp, D) with zero pad rows).
    y = jnp.dot(ctx.astype(jnp.bfloat16), wout_ref[layer],
                preferred_element_type=jnp.float32)               # (bb*n, D)
    x = x + y + b_out                                             # residual

    # ---------------- PreNorm + feed-forward ----------------
    xn2 = _layernorm(x, ln2_g, ln2_b)
    h1 = jnp.dot(xn2.astype(jnp.bfloat16), w1_ref[layer],
                 preferred_element_type=jnp.float32) + b1
    # tanh GELU routes to the EUP (nn.GELU() default is exact erf; approx accepted).
    h1 = jax.nn.gelu(h1, approximate=True)
    y2 = jnp.dot(h1.astype(jnp.bfloat16), w2_ref[layer],
                 preferred_element_type=jnp.float32) + b2

    o_ref[...] = (x + y2).reshape(bb, n, d_model).astype(o_ref.dtype)   # residual


# ----------------------------- wrapper ----------------------------------------

def transformer_forward(x, kparams, *, heads, dim_head_padded, block_b=None):
    """x: (B, N, D) f32.  kparams: kernel-layout params from pack_params."""
    B, N, D = x.shape
    depth = kparams["w_qkv"].shape[0]

    if block_b is None:
        block_b = next(bb for bb in (8, 4, 2, 1) if B % bb == 0)
        block_b = min(block_b, B)
    assert B % block_b == 0

    act_spec = pl.BlockSpec((block_b, N, D), lambda b, l: (b, 0, 0))

    def resident(arr):
        # Full array as one block, constant block index -> fetched from HBM once,
        # resident in VMEM for the whole grid.
        return pl.BlockSpec(tuple(arr.shape),
                            lambda b, l, _n=arr.ndim: (0,) * _n)

    kernel = partial(_transformer_layer_kernel, heads=heads,
                     dim_head_padded=dim_head_padded)
    return pl.pallas_call(
        kernel,
        out_shape=jax.ShapeDtypeStruct((B, N, D), x.dtype),
        grid_spec=pltpu.PrefetchScalarGridSpec(
            num_scalar_prefetch=0,
            grid=(B // block_b, depth),              # sequential depth axis last
            in_specs=[
                act_spec,                            # x (aliased with output)
                resident(kparams["vecs"]),           # packed LN/bias vectors (depth,6,D)
                resident(kparams["b1"]),             # (depth,1,mlp_dim)
                resident(kparams["w_qkv"]),          # (depth, D, 3*H*dhp) bf16
                resident(kparams["w_out"]),          # (depth, H*dhp, D) bf16
                resident(kparams["w1"]),             # (depth, D, mlp_dim) bf16
                resident(kparams["w2"]),             # (depth, mlp_dim, D) bf16
            ],
            out_specs=act_spec,
        ),
        # Residual stream is read-modify-write in place: no second (B,N,D) HBM buffer.
        input_output_aliases={0: 0},
        compiler_params=pltpu.CompilerParams(
            dimension_semantics=("parallel", "arbitrary"),
            vmem_limit_bytes=48 * 1024 * 1024,       # > v6e default, < v7x physical
        ),
    )(x, kparams["vecs"], kparams["b1"], kparams["w_qkv"], kparams["w_out"],
      kparams["w1"], kparams["w2"])


# ----------------------------- params -----------------------------------------

def init_params(key, depth, dim, heads, dim_head, mlp_dim):
    """f32 parameters in the natural (PyTorch-like) math layout, stacked over depth."""
    inner = heads * dim_head
    ks = jax.random.split(key, 7)
    s = 0.02
    return {
        "ln1_g": jnp.ones((depth, 1, dim), jnp.float32),
        "ln1_b": jnp.zeros((depth, 1, dim), jnp.float32),
        "w_qkv": s * jax.random.normal(ks[0], (depth, dim, 3 * inner), jnp.float32),
        "w_out": s * jax.random.normal(ks[1], (depth, inner, dim), jnp.float32),
        "b_out": s * jax.random.normal(ks[2], (depth, 1, dim), jnp.float32),
        "ln2_g": jnp.ones((depth, 1, dim), jnp.float32),
        "ln2_b": jnp.zeros((depth, 1, dim), jnp.float32),
        "w1": s * jax.random.normal(ks[3], (depth, dim, mlp_dim), jnp.float32),
        "b1": s * jax.random.normal(ks[4], (depth, 1, mlp_dim), jnp.float32),
        "w2": s * jax.random.normal(ks[5], (depth, mlp_dim, dim), jnp.float32),
        "b2": s * jax.random.normal(ks[6], (depth, 1, dim), jnp.float32),
    }


def pack_params(p, heads, dim_head, dim_head_padded):
    """Rearrange math-layout f32 params into the kernel layout:
       * dim_head zero-padded to dim_head_padded (multiple of 128 lanes);
       * attention scale folded into W_q;
       * W_qkv -> (depth, D, 3*H*dhp); W_out -> (depth, H*dhp, D); matmul weights bf16;
       * the six small per-layer (1, D) vectors packed into one (depth, 6, D) array."""
    depth, dim, _ = p["w_qkv"].shape
    dhp = dim_head_padded
    pad = dhp - dim_head
    scale = dim_head ** (-0.5)

    wqkv = p["w_qkv"].reshape(depth, dim, 3, heads, dim_head)
    wqkv = wqkv.at[:, :, 0].multiply(scale)                       # fold 1/sqrt(dh) into W_q
    wqkv = jnp.pad(wqkv, ((0, 0), (0, 0), (0, 0), (0, 0), (0, pad)))
    wqkv = wqkv.reshape(depth, dim, 3 * heads * dhp)

    wout = p["w_out"].reshape(depth, heads, dim_head, dim)
    wout = jnp.pad(wout, ((0, 0), (0, 0), (0, pad), (0, 0)))
    wout = wout.reshape(depth, heads * dhp, dim)

    vecs = jnp.stack([p["ln1_g"][:, 0], p["ln1_b"][:, 0], p["b_out"][:, 0],
                      p["ln2_g"][:, 0], p["ln2_b"][:, 0], p["b2"][:, 0]],
                     axis=1).astype(jnp.float32)                  # (depth, 6, D)

    return {
        "vecs": vecs,
        "b1": p["b1"].astype(jnp.float32),
        "w_qkv": wqkv.astype(jnp.bfloat16),
        "w_out": wout.astype(jnp.bfloat16),
        "w1": p["w1"].astype(jnp.bfloat16),
        "w2": p["w2"].astype(jnp.bfloat16),
    }


# ----------------------------- f32 reference (PyTorch semantics) ---------------

def transformer_reference(x, p, heads, dim_head):
    depth = p["w_qkv"].shape[0]
    B, N, _ = x.shape
    inner = heads * dim_head

    def ln(z, g, b, eps=1e-5):
        mu = jnp.mean(z, axis=-1, keepdims=True)
        var = jnp.mean((z - mu) ** 2, axis=-1, keepdims=True)
        return (z - mu) / jnp.sqrt(var + eps) * g + b

    for l in range(depth):
        xn = ln(x, p["ln1_g"][l], p["ln1_b"][l])
        qkv = xn @ p["w_qkv"][l]
        q, k, v = jnp.split(qkv, 3, axis=-1)
        hf = lambda t: t.reshape(B, N, heads, dim_head).transpose(0, 2, 1, 3)
        q, k, v = hf(q), hf(k), hf(v)
        s = jnp.einsum('bhnd,bhmd->bhnm', q, k) * dim_head ** (-0.5)
        a = jax.nn.softmax(s, axis=-1)
        ctx = jnp.einsum('bhnm,bhmd->bhnd', a, v)
        ctx = ctx.transpose(0, 2, 1, 3).reshape(B, N, inner)
        x = x + ctx @ p["w_out"][l] + p["b_out"][l]
        xn2 = ln(x, p["ln2_g"][l], p["ln2_b"][l])
        h = jax.nn.gelu(xn2 @ p["w1"][l] + p["b1"][l], approximate=False)
        x = x + h @ p["w2"][l] + p["b2"][l]
    return x


# ----------------------------- main --------------------------------------------

if __name__ == "__main__":
    # Config mirrors the ResNet's transformer_block_2:
    #   Transformer(dim=128, heads=1, dim_head=64, mlp_dim=512)
    # with a small sequence length and depth=2 to exercise the fused depth loop.
    B, N = 2, 128
    dim, depth, heads, dim_head, mlp_dim = 128, 2, 1, 64, 512
    dim_head_padded = ((dim_head + 127) // 128) * 128    # pad head dim to full lanes

    key = jax.random.PRNGKey(0)
    kx, kp = jax.random.split(key)
    x = jax.random.normal(kx, (B, N, dim), jnp.float32)
    params = init_params(kp, depth, dim, heads, dim_head, mlp_dim)

    # f32 reference first (the kernel may donate x via the in/out alias).
    ref = jax.block_until_ready(transformer_reference(x, params, heads, dim_head))

    fwd = jax.jit(partial(transformer_forward, heads=heads,
                          dim_head_padded=dim_head_padded),
                  donate_argnums=(0,))
    out = jax.block_until_ready(
        fwd(x, pack_params(params, heads, dim_head, dim_head_padded)))

    assert out.shape == (B, N, dim) and out.dtype == jnp.float32
    assert bool(jnp.allclose(out, ref, atol=5e-2, rtol=5e-2)), "mismatch vs f32 reference"
    print("KERNEL_OK")
</pallas_src>

<mosaic_0001>
module attributes {stable_mosaic.version = 11 : i64} {
  func.func @_transformer_layer_kernel(%arg0: i32, %arg1: i32, %arg2: memref<2x128x128xf32, #tpu.memory_space<vmem>>, %arg3: memref<2x6x128xf32, #tpu.memory_space<vmem>>, %arg4: memref<2x1x512xf32, #tpu.memory_space<vmem>>, %arg5: memref<2x128x384xbf16, #tpu.memory_space<vmem>>, %arg6: memref<2x128x128xbf16, #tpu.memory_space<vmem>>, %arg7: memref<2x128x512xbf16, #tpu.memory_space<vmem>>, %arg8: memref<2x512x128xbf16, #tpu.memory_space<vmem>>, %arg9: memref<2x128x128xf32, #tpu.memory_space<vmem>>) attributes {dimension_semantics = [#tpu.dimension_semantics<parallel>, #tpu.dimension_semantics<arbitrary>], iteration_bounds = array<i64: 1, 2>, scalar_prefetch = 0 : i64, scratch_operands = 0 : i64, tpu.core_type = #tpu.core_type<tc>, window_params = [{transform_indices = @transform_0, window_bounds = array<i64: 2, 128, 128>}, {pipeline_mode = #tpu.pipeline_mode<synchronous>, transform_indices = @transform_1, window_bounds = array<i64: 2, 6, 128>}, {pipeline_mode = #tpu.pipeline_mode<synchronous>, transform_indices = @transform_2, window_bounds = array<i64: 2, 1, 512>}, {pipeline_mode = #tpu.pipeline_mode<synchronous>, transform_indices = @transform_3, window_bounds = array<i64: 2, 128, 384>}, {pipeline_mode = #tpu.pipeline_mode<synchronous>, transform_indices = @transform_4, window_bounds = array<i64: 2, 128, 128>}, {pipeline_mode = #tpu.pipeline_mode<synchronous>, transform_indices = @transform_5, window_bounds = array<i64: 2, 128, 512>}, {pipeline_mode = #tpu.pipeline_mode<synchronous>, transform_indices = @transform_6, window_bounds = array<i64: 2, 512, 128>}, {transform_indices = @transform_7, window_bounds = array<i64: 2, 128, 128>}]} {
    %c0_i32 = arith.constant 0 : i32
    %0 = arith.cmpi eq, %arg1, %c0_i32 : i32
    %1 = arith.extui %0 : i1 to i32
    %c0_i32_0 = arith.constant 0 : i32
    %2 = arith.cmpi ne, %1, %c0_i32_0 : i32
    scf.if %2 {
      %c0_39 = arith.constant 0 : index
      %c0_40 = arith.constant 0 : index
      %c0_41 = arith.constant 0 : index
      %127 = vector.load %arg2[%c0_39, %c0_40, %c0_41] : memref<2x128x128xf32, #tpu.memory_space<vmem>>, vector<2x128x128xf32>
      %c0_42 = arith.constant 0 : index
      %c0_43 = arith.constant 0 : index
      %c0_44 = arith.constant 0 : index
      %128 = vector.load %arg9[%c0_42, %c0_43, %c0_44] : memref<2x128x128xf32, #tpu.memory_space<vmem>>, vector<2x128x128xf32>
      tpu.vector_store %arg9[%c0_42, %c0_43, %c0_44], %127 {strides = array<i32>} : memref<2x128x128xf32, #tpu.memory_space<vmem>>, vector<2x128x128xf32>,
    } else {
    }
    %c0 = arith.constant 0 : index
    %c0_1 = arith.constant 0 : index
    %c0_2 = arith.constant 0 : index
    %3 = vector.load %arg9[%c0, %c0_1, %c0_2] : memref<2x128x128xf32, #tpu.memory_space<vmem>>, vector<2x128x128xf32>
    %4 = vector.shape_cast %3 : vector<2x128x128xf32> to vector<256x128xf32>
    %5 = arith.index_cast %arg1 : i32 to index
    %c0_3 = arith.constant 0 : index
    %c0_4 = arith.constant 0 : index
    %6 = vector.load %arg3[%5, %c0_3, %c0_4] : memref<2x6x128xf32, #tpu.memory_space<vmem>>, vector<1x6x128xf32>
    %7 = vector.shape_cast %6 : vector<1x6x128xf32> to vector<6x128xf32>
    %8 = vector.extract_strided_slice %7 {offsets = [0, 0], sizes = [1, 128], strides = [1, 1]} : vector<6x128xf32> to vector<1x128xf32>
    %9 = vector.extract_strided_slice %7 {offsets = [1, 0], sizes = [1, 128], strides = [1, 1]} : vector<6x128xf32> to vector<1x128xf32>
    %10 = vector.extract_strided_slice %7 {offsets = [2, 0], sizes = [1, 128], strides = [1, 1]} : vector<6x128xf32> to vector<1x128xf32>
    %11 = vector.extract_strided_slice %7 {offsets = [3, 0], sizes = [1, 128], strides = [1, 1]} : vector<6x128xf32> to vector<1x128xf32>
    %12 = vector.extract_strided_slice %7 {offsets = [4, 0], sizes = [1, 128], strides = [1, 1]} : vector<6x128xf32> to vector<1x128xf32>
    %13 = vector.extract_strided_slice %7 {offsets = [5, 0], sizes = [1, 128], strides = [1, 1]} : vector<6x128xf32> to vector<1x128xf32>
    %14 = arith.index_cast %arg1 : i32 to index
    %c0_5 = arith.constant 0 : index
    %c0_6 = arith.constant 0 : index
    %15 = vector.load %arg4[%14, %c0_5, %c0_6] : memref<2x1x512xf32, #tpu.memory_space<vmem>>, vector<1x1x512xf32>
    %16 = vector.shape_cast %15 : vector<1x1x512xf32> to vector<1x512xf32>
    %cst = arith.constant dense<0.000000e+00> : vector<256xf32>
    %17 = vector.multi_reduction <add>, %4, %cst [1] : vector<256x128xf32> to vector<256xf32>
    %18 = vector.shape_cast %17 : vector<256xf32> to vector<256x1xf32>
    %cst_7 = arith.constant 1.280000e+02 : f32
    %19 = vector.broadcast %cst_7 : f32 to vector<256x1xf32>
    %20 = arith.divf %18, %19 : vector<256x1xf32>
    %21 = vector.broadcast %20 : vector<256x1xf32> to vector<256x128xf32>
    %22 = arith.subf %4, %21 : vector<256x128xf32>
    %23 = arith.mulf %22, %22 : vector<256x128xf32>
    %cst_8 = arith.constant dense<0.000000e+00> : vector<256xf32>
    %24 = vector.multi_reduction <add>, %23, %cst_8 [1] : vector<256x128xf32> to vector<256xf32>
    %25 = vector.shape_cast %24 : vector<256xf32> to vector<256x1xf32>
    %cst_9 = arith.constant 1.280000e+02 : f32
    %26 = vector.broadcast %cst_9 : f32 to vector<256x1xf32>
    %27 = arith.divf %25, %26 : vector<256x1xf32>
    %28 = vector.broadcast %20 : vector<256x1xf32> to vector<256x128xf32>
    %29 = arith.subf %4, %28 : vector<256x128xf32>
    %cst_10 = arith.constant 9.99999974E-6 : f32
    %30 = vector.broadcast %cst_10 : f32 to vector<256x1xf32>
    %31 = arith.addf %27, %30 : vector<256x1xf32>
    %32 = math.rsqrt %31 : vector<256x1xf32>
    %33 = vector.broadcast %32 : vector<256x1xf32> to vector<256x128xf32>
    %34 = arith.mulf %29, %33 : vector<256x128xf32>
    %35 = vector.broadcast %8 : vector<1x128xf32> to vector<256x128xf32>
    %36 = arith.mulf %34, %35 : vector<256x128xf32>
    %37 = vector.broadcast %9 : vector<1x128xf32> to vector<256x128xf32>
    %38 = arith.addf %36, %37 : vector<256x128xf32>
    %39 = arith.truncf %38 : vector<256x128xf32> to vector<256x128xbf16>
    %40 = arith.index_cast %arg1 : i32 to index
    %c0_11 = arith.constant 0 : index
    %c0_12 = arith.constant 0 : index
    %41 = vector.load %arg5[%40, %c0_11, %c0_12] : memref<2x128x384xbf16, #tpu.memory_space<vmem>>, vector<1x128x384xbf16>
    %42 = vector.shape_cast %41 : vector<1x128x384xbf16> to vector<128x384xbf16>
    %cst_13 = arith.constant dense<0.000000e+00> : vector<256x384xf32>
    %43 = tpu.matmul %39, %42, %cst_13 {dimension_numbers = #tpu.dot_dimension_numbers<[1], [0], [0], [1], [0, 0, 1, 1], [], []>} : vector<256x128xbf16>, vector<128x384xbf16>, vector<256x384xf32> -> vector<256x384xf32>
    %44 = vector.extract_strided_slice %43 {offsets = [0, 0], sizes = [256, 128], strides = [1, 1]} : vector<256x384xf32> to vector<256x128xf32>
    %45 = vector.shape_cast %44 : vector<256x128xf32> to vector<2x128x128xf32>
    %46 = arith.truncf %45 : vector<2x128x128xf32> to vector<2x128x128xbf16>
    %47 = vector.extract_strided_slice %43 {offsets = [0, 128], sizes = [256, 128], strides = [1, 1]} : vector<256x384xf32> to vector<256x128xf32>
    %48 = vector.shape_cast %47 : vector<256x128xf32> to vector<2x128x128xf32>
    %49 = arith.truncf %48 : vector<2x128x128xf32> to vector<2x128x128xbf16>
    %50 = vector.extract_strided_slice %43 {offsets = [0, 256], sizes = [256, 128], strides = [1, 1]} : vector<256x384xf32> to vector<256x128xf32>
    %51 = vector.shape_cast %50 : vector<256x128xf32> to vector<2x128x128xf32>
    %52 = arith.truncf %51 : vector<2x128x128xf32> to vector<2x128x128xbf16>
    "tpu.trace_start"() <{level = 10 : i32, message = "bnd,bmd->bnm"}> : () -> ()
    %cst_14 = arith.constant dense<0.000000e+00> : vector<2x128x128xf32>
    %53 = tpu.matmul %46, %49, %cst_14 {dimension_numbers = #tpu.dot_dimension_numbers<[2], [2], [1], [1], [0, 0, 0, 1, 1, 1], [0], [0]>} : vector<2x128x128xbf16>, vector<2x128x128xbf16>, vector<2x128x128xf32> -> vector<2x128x128xf32>
    "tpu.trace_stop"() : () -> ()
    %cst_15 = arith.constant dense<0xFF800000> : vector<2x128xf32>
    %54 = vector.multi_reduction <maximumf>, %53, %cst_15 [2] : vector<2x128x128xf32> to vector<2x128xf32>
    %55 = vector.shape_cast %54 : vector<2x128xf32> to vector<2x128x1xf32>
    %56 = vector.broadcast %55 : vector<2x128x1xf32> to vector<2x128x128xf32>
    %57 = arith.subf %53, %56 : vector<2x128x128xf32>
    %58 = math.exp %57 : vector<2x128x128xf32>
    %cst_16 = arith.constant dense<0.000000e+00> : vector<2x128xf32>
    %59 = vector.multi_reduction <add>, %58, %cst_16 [2] : vector<2x128x128xf32> to vector<2x128xf32>
    %60 = vector.shape_cast %59 : vector<2x128xf32> to vector<2x128x1xf32>
    %61 = tpu.reciprocal %60 {approx = true} : vector<2x128x1xf32> -> vector<2x128x1xf32>
    %62 = vector.broadcast %61 : vector<2x128x1xf32> to vector<2x128x128xf32>
    %63 = arith.mulf %58, %62 : vector<2x128x128xf32>
    %64 = arith.truncf %63 : vector<2x128x128xf32> to vector<2x128x128xbf16>
    "tpu.trace_start"() <{level = 10 : i32, message = "bnm,bmd->bnd"}> : () -> ()
    %cst_17 = arith.constant dense<0.000000e+00> : vector<2x128x128xf32>
    %65 = tpu.matmul %64, %52, %cst_17 {dimension_numbers = #tpu.dot_dimension_numbers<[2], [1], [1], [2], [0, 0, 0, 1, 1, 2], [0], [0]>} : vector<2x128x128xbf16>, vector<2x128x128xbf16>, vector<2x128x128xf32> -> vector<2x128x128xf32>
    "tpu.trace_stop"() : () -> ()
    %66 = vector.shape_cast %65 : vector<2x128x128xf32> to vector<256x128xf32>
    %67 = arith.truncf %66 : vector<256x128xf32> to vector<256x128xbf16>
    %68 = arith.index_cast %arg1 : i32 to index
    %c0_18 = arith.constant 0 : index
    %c0_19 = arith.constant 0 : index
    %69 = vector.load %arg6[%68, %c0_18, %c0_19] : memref<2x128x128xbf16, #tpu.memory_space<vmem>>, vector<1x128x128xbf16>
    %70 = vector.shape_cast %69 : vector<1x128x128xbf16> to vector<128x128xbf16>
    %cst_20 = arith.constant dense<0.000000e+00> : vector<256x128xf32>
    %71 = tpu.matmul %67, %70, %cst_20 {dimension_numbers = #tpu.dot_dimension_numbers<[1], [0], [0], [1], [0, 0, 1, 1], [], []>} : vector<256x128xbf16>, vector<128x128xbf16>, vector<256x128xf32> -> vector<256x128xf32>
    %72 = arith.addf %4, %71 : vector<256x128xf32>
    %73 = vector.broadcast %10 : vector<1x128xf32> to vector<256x128xf32>
    %74 = arith.addf %72, %73 : vector<256x128xf32>
    %cst_21 = arith.constant dense<0.000000e+00> : vector<256xf32>
    %75 = vector.multi_reduction <add>, %74, %cst_21 [1] : vector<256x128xf32> to vector<256xf32>
    %76 = vector.shape_cast %75 : vector<256xf32> to vector<256x1xf32>
    %cst_22 = arith.constant 1.280000e+02 : f32
    %77 = vector.broadcast %cst_22 : f32 to vector<256x1xf32>
    %78 = arith.divf %76, %77 : vector<256x1xf32>
    %79 = vector.broadcast %78 : vector<256x1xf32> to vector<256x128xf32>
    %80 = arith.subf %74, %79 : vector<256x128xf32>
    %81 = arith.mulf %80, %80 : vector<256x128xf32>
    %cst_23 = arith.constant dense<0.000000e+00> : vector<256xf32>
    %82 = vector.multi_reduction <add>, %81, %cst_23 [1] : vector<256x128xf32> to vector<256xf32>
    %83 = vector.shape_cast %82 : vector<256xf32> to vector<256x1xf32>
    %cst_24 = arith.constant 1.280000e+02 : f32
    %84 = vector.broadcast %cst_24 : f32 to vector<256x1xf32>
    %85 = arith.divf %83, %84 : vector<256x1xf32>
    %86 = vector.broadcast %78 : vector<256x1xf32> to vector<256x128xf32>
    %87 = arith.subf %74, %86 : vector<256x128xf32>
    %cst_25 = arith.constant 9.99999974E-6 : f32
    %88 = vector.broadcast %cst_25 : f32 to vector<256x1xf32>
    %89 = arith.addf %85, %88 : vector<256x1xf32>
    %90 = math.rsqrt %89 : vector<256x1xf32>
    %91 = vector.broadcast %90 : vector<256x1xf32> to vector<256x128xf32>
    %92 = arith.mulf %87, %91 : vector<256x128xf32>
    %93 = vector.broadcast %11 : vector<1x128xf32> to vector<256x128xf32>
    %94 = arith.mulf %92, %93 : vector<256x128xf32>
    %95 = vector.broadcast %12 : vector<1x128xf32> to vector<256x128xf32>
    %96 = arith.addf %94, %95 : vector<256x128xf32>
    %97 = arith.truncf %96 : vector<256x128xf32> to vector<256x128xbf16>
    %98 = arith.index_cast %arg1 : i32 to index
    %c0_26 = arith.constant 0 : index
    %c0_27 = arith.constant 0 : index
    %99 = vector.load %arg7[%98, %c0_26, %c0_27] : memref<2x128x512xbf16, #tpu.memory_space<vmem>>, vector<1x128x512xbf16>
    %100 = vector.shape_cast %99 : vector<1x128x512xbf16> to vector<128x512xbf16>
    %cst_28 = arith.constant dense<0.000000e+00> : vector<256x512xf32>
    %101 = tpu.matmul %97, %100, %cst_28 {dimension_numbers = #tpu.dot_dimension_numbers<[1], [0], [0], [1], [0, 0, 1, 1], [], []>} : vector<256x128xbf16>, vector<128x512xbf16>, vector<256x512xf32> -> vector<256x512xf32>
    %102 = vector.broadcast %16 : vector<1x512xf32> to vector<256x512xf32>
    %103 = arith.addf %101, %102 : vector<256x512xf32>
    %104 = arith.mulf %103, %103 : vector<256x512xf32>
    %105 = arith.mulf %103, %104 : vector<256x512xf32>
    %cst_29 = arith.constant 4.471500e-02 : f32
    %106 = vector.broadcast %cst_29 : f32 to vector<256x512xf32>
    %107 = arith.mulf %106, %105 : vector<256x512xf32>
    %108 = arith.addf %103, %107 : vector<256x512xf32>
    %cst_30 = arith.constant 0.797884583 : f32
    %109 = vector.broadcast %cst_30 : f32 to vector<256x512xf32>
    %110 = arith.mulf %109, %108 : vector<256x512xf32>
    %111 = math.tanh %110 : vector<256x512xf32>
    %cst_31 = arith.constant 1.000000e+00 : f32
    %112 = vector.broadcast %cst_31 : f32 to vector<256x512xf32>
    %113 = arith.addf %112, %111 : vector<256x512xf32>
    %cst_32 = arith.constant 5.000000e-01 : f32
    %114 = vector.broadcast %cst_32 : f32 to vector<256x512xf32>
    %115 = arith.mulf %114, %113 : vector<256x512xf32>
    %116 = arith.mulf %103, %115 : vector<256x512xf32>
    %117 = arith.truncf %116 : vector<256x512xf32> to vector<256x512xbf16>
    %118 = arith.index_cast %arg1 : i32 to index
    %c0_33 = arith.constant 0 : index
    %c0_34 = arith.constant 0 : index
    %119 = vector.load %arg8[%118, %c0_33, %c0_34] : memref<2x512x128xbf16, #tpu.memory_space<vmem>>, vector<1x512x128xbf16>
    %120 = vector.shape_cast %119 : vector<1x512x128xbf16> to vector<512x128xbf16>
    %cst_35 = arith.constant dense<0.000000e+00> : vector<256x128xf32>
    %121 = tpu.matmul %117, %120, %cst_35 {dimension_numbers = #tpu.dot_dimension_numbers<[1], [0], [0], [1], [0, 0, 1, 1], [], []>} : vector<256x512xbf16>, vector<512x128xbf16>, vector<256x128xf32> -> vector<256x128xf32>
    %122 = vector.broadcast %13 : vector<1x128xf32> to vector<256x128xf32>
    %123 = arith.addf %121, %122 : vector<256x128xf32>
    %124 = arith.addf %74, %123 : vector<256x128xf32>
    %125 = vector.shape_cast %124 : vector<256x128xf32> to vector<2x128x128xf32>
    %c0_36 = arith.constant 0 : index
    %c0_37 = arith.constant 0 : index
    %c0_38 = arith.constant 0 : index
    %126 = vector.load %arg9[%c0_36, %c0_37, %c0_38] : memref<2x128x128xf32, #tpu.memory_space<vmem>>, vector<2x128x128xf32>
    tpu.vector_store %arg9[%c0_36, %c0_37, %c0_38], %125 {strides = array<i32>} : memref<2x128x128xf32, #tpu.memory_space<vmem>>, vector<2x128x128xf32>,
    return
  }
  func.func @transform_0(%arg0: i32, %arg1: i32) -> (i32, i32, i32) {
    %c0_i32 = arith.constant 0 : i32
    %c0_i32_0 = arith.constant 0 : i32
    %c0_i32_1 = arith.constant 0 : i32
    return %arg0, %c0_i32, %c0_i32_0 : i32, i32, i32
  }
  func.func @transform_1(%arg0: i32, %arg1: i32) -> (i32, i32, i32) {
    %c0_i32 = arith.constant 0 : i32
    %c0_i32_0 = arith.constant 0 : i32
    %c0_i32_1 = arith.constant 0 : i32
    %c0_i32_2 = arith.constant 0 : i32
    return %c0_i32, %c0_i32_0, %c0_i32_1 : i32, i32, i32
  }
  func.func @transform_2(%arg0: i32, %arg1: i32) -> (i32, i32, i32) {
    %c0_i32 = arith.constant 0 : i32
    %c0_i32_0 = arith.constant 0 : i32
    %c0_i32_1 = arith.constant 0 : i32
    %c0_i32_2 = arith.constant 0 : i32
    return %c0_i32, %c0_i32_0, %c0_i32_1 : i32, i32, i32
  }
  func.func @transform_3(%arg0: i32, %arg1: i32) -> (i32, i32, i32) {
    %c0_i32 = arith.constant 0 : i32
    %c0_i32_0 = arith.constant 0 : i32
    %c0_i32_1 = arith.constant 0 : i32
    %c0_i32_2 = arith.constant 0 : i32
    return %c0_i32, %c0_i32_0, %c0_i32_1 : i32, i32, i32
  }
  func.func @transform_4(%arg0: i32, %arg1: i32) -> (i32, i32, i32) {
    %c0_i32 = arith.constant 0 : i32
    %c0_i32_0 = arith.constant 0 : i32
    %c0_i32_1 = arith.constant 0 : i32
    %c0_i32_2 = arith.constant 0 : i32
    return %c0_i32, %c0_i32_0, %c0_i32_1 : i32, i32, i32
  }
  func.func @transform_5(%arg0: i32, %arg1: i32) -> (i32, i32, i32) {
    %c0_i32 = arith.constant 0 : i32
    %c0_i32_0 = arith.constant 0 : i32
    %c0_i32_1 = arith.constant 0 : i32
    %c0_i32_2 = arith.constant 0 : i32
    return %c0_i32, %c0_i32_0, %c0_i32_1 : i32, i32, i32
  }
  func.func @transform_6(%arg0: i32, %arg1: i32) -> (i32, i32, i32) {
    %c0_i32 = arith.constant 0 : i32
    %c0_i32_0 = arith.constant 0 : i32
    %c0_i32_1 = arith.constant 0 : i32
    %c0_i32_2 = arith.constant 0 : i32
    return %c0_i32, %c0_i32_0, %c0_i32_1 : i32, i32, i32
  }
  func.func @transform_7(%arg0: i32, %arg1: i32) -> (i32, i32, i32) {
    %c0_i32 = arith.constant 0 : i32
    %c0_i32_0 = arith.constant 0 : i32
    %c0_i32_1 = arith.constant 0 : i32
    return %arg0, %c0_i32, %c0_i32_0 : i32, i32, i32
  }
}

</mosaic_0001>

<bundles_post_ra>
// kernel: transformer_forward.1
= control target key start
LH: loop header
LB: loop body
LE: loop exit
PB: predicated region body
PF: predicated region fallthrough
CT: control target
= control target key end

     0   :  { %12 = vsyncpa [#allocation3], 0  ;;  %s10575_s0 = inlined_call_operand.hbm [shape: f32[2,128,128], index: 0, kind: input, shape index: {}, may-alias: {0,7}]   ;;  %s10576_s1 = inlined_call_operand.vmem [shape: f32[2,6,128], index: 1, kind: input, shape index: {}]   ;;  %s10577_s2 = inlined_call_operand.vmem [shape: f32[2,1,512], index: 2, kind: input, shape index: {}]   ;;  %s10578_s3 = inlined_call_operand.hbm [shape: bf16[2,128,384], index: 3, kind: input, shape index: {}]   ;;  %s10579_s4 = inlined_call_operand.hbm [shape: bf16[2,128,128], index: 4, kind: input, shape index: {}]   ;;  %s10580_s5 = inlined_call_operand.hbm [shape: bf16[2,128,512], index: 5, kind: input, shape index: {}]   ;;  %s10581_s6 = inlined_call_operand.hbm [shape: bf16[2,512,128], index: 6, kind: input, shape index: {}]   ;;  %s10582_s7 = inlined_call_operand.hbm [shape: f32[2,128,128], index: 7, kind: output, shape index: {}, may-alias: {0,7}]  }
   0x1   :  { %13 = vsyncpa [#allocation6], 0 }
   0x2   :  { %14 = vsyncpa [#allocation9], 0 }
   0x3   :  { %15 = vsyncpa [#allocation4], 0  ;;  %s7208_s24 = smov 0   ;;  %s7210_s25 = smov 0  }
   0x4   :  { %s7212_s26 = smov 0  }
   0x5 LB: > { %s7151_s27 = smov [#allocation5]   ;;  %s5484_s29 = sadd.s32 4294967295, %s7149_s26   ;;  %s7149_s26 = sphi %s7212_s26, %s21_s26   ;;  %s7145_s25 = sphi %s7210_s25, %s11091_s25   ;;  %s7141_s24 = sphi %s7208_s24, %s11090_s24  }
   0x6   : > { %s251_s28 = sshll.u32 %s7151_s27, 4  ;;  %p5485_p0 = scmp.ge.s32.totalorder %s7149_s26, 1  ;;  %s7232_s28 = int_to_ptr.vmem [resolvable:$true] %s251_s28 }
   0x7   : > { %p216_p1 = scmp.lt.s32.totalorder %s7149_s26, 3  ;;  %p7228_p2 = scmp.eq.s32.totalorder %s5484_s29, 0 }
   0x8   : > { %s7152_s9 = smov [#allocation8]   ;;  %s6945_s14 = scalar_lea.hbm %s10578_s3, 6144 }
   0x9   : > { %s10714_s30 = scalar_select %p7228_p2, 1, 0 }
   0xa   : > { %p7234_p3 = pnand %p5485_p0, %p216_p1  ;;  %s277_s10 = sshll.u32 %s7152_s9, 4  ;;  %s7240_s10 = int_to_ptr.vmem [resolvable:$true] %s277_s10 }
   0xb   : > { %p6946_p6 = scmp.ne.s32.totalorder %s10578_s3, %s6945_s14  ;;  %p6952_p10 = scmp.lt.u32.totalorder %s6945_s14, %s10578_s3 }
   0xc   : > { %s10715_s8 = scalar_select %p7234_p3, 1, 0 }
   0xd   : > { %p6210_p4 = pneg %p7234_p3 }
   0xf   : > { %p7244_p5 = pnand %p7228_p2, %p6210_p4 }
  0x11   : > { %p7256_p7 = pneg %p7244_p5 }
  0x13   : > { %p6948_p8 = pnand %p7256_p7, %p6946_p6 }
  0x15   : > { %p6949_p9 = pneg %p6948_p8 }
  0x17   : > { %p6954_p11 = pnand %p6952_p10, %p6949_p9 }
  0x19   : > { %6957 = shalt.err (!%p6954_p11)
}
  0x1a   : > { %s6958_s20 = scalar_lea.vmem %s7232_s28, 6144  ;;  %p6966_p1 = scmp.lt.s32.totalorder %s7232_s28, %s7232_s28 }
  0x1b   : > { %p6959_p12 = scmp.ne.s32.totalorder %s7232_s28, %s6958_s20  ;;  %p6967_p4 = scmp.lt.s32.totalorder %s6958_s20, %s6958_s20 }
  0x1d   : > { %p6961_p13 = pnand %p6959_p12, %p7256_p7  ;;  %p6968_p6 = por %p6967_p4, %p6966_p1 }
  0x1f   : > { %p6962_p0 = pneg %p6961_p13 }
  0x21   : > { %p6969_p8 = pnand %p6968_p6, %p6962_p0 }
  0x23   : > { %6972 = shalt.err (!%p6969_p8)
}
  0x24   : > { %s7153_s21 = smov 192   ;;  %s7154_s22 = smov 12  }
  0x25   : > { %6216 = dma.hbm_to_vmem [thread:$0]  (!%p7244_p5), %s10578_s3, 6144, %s7232_s28, [#allocation6], %s7153_s21, %s7153_s21, %s7154_s22  }
  0x26   : > { %s6973_s13 = scalar_lea.hbm %s10580_s5, 8192 }
  0x27   : > { %p6974_p9 = scmp.ne.s32.totalorder %s10580_s5, %s6973_s13  ;;  %p6980_p12 = scmp.lt.u32.totalorder %s6973_s13, %s10580_s5 }
  0x29   : > { %p6976_p10 = pnand %p6974_p9, %p7256_p7 }
  0x2b   : > { %p6977_p11 = pneg %p6976_p10 }
  0x2d   : > { %p6982_p13 = pnand %p6980_p12, %p6977_p11 }
  0x2f   : > { %6985 = shalt.err (!%p6982_p13)
}
  0x30   : > { %s6986_s28 = scalar_lea.vmem %s7240_s10, 8192  ;;  %p6994_p6 = scmp.lt.s32.totalorder %s7240_s10, %s7240_s10 }
  0x31   : > { %p6987_p0 = scmp.ne.s32.totalorder %s7240_s10, %s6986_s28  ;;  %p6995_p8 = scmp.lt.s32.totalorder %s6986_s28, %s6986_s28 }
  0x33   : > { %p6989_p1 = pnand %p6987_p0, %p7256_p7  ;;  %p6996_p9 = por %p6995_p8, %p6994_p6 }
  0x35   : > { %p6990_p4 = pneg %p6989_p1 }
  0x37   : > { %p6997_p10 = pnand %p6996_p9, %p6990_p4 }
  0x39   : > { %7000 = shalt.err (!%p6997_p10)
}
  0x3a   : > { %s7155_s19 = smov 256   ;;  %s7156_s20 = smov 16  }
  0x3b   : > { %6222 = dma.hbm_to_vmem [thread:$0]  (!%p7244_p5), %s10580_s5, 8192, %s7240_s10, [#allocation9], %s7155_s19, %s7155_s19, %s7156_s20  }
  0x3c   : > { %s30_s23 = sadd.s32 1, %s7145_s25  ;;  %s7157_s27 = smov [#allocation2]  }
  0x3d   : > { %p31_p11 = scmp.ge.s32.totalorder %s30_s23, 2  ;;  %s232_s9 = sshll.u32 %s7157_s27, 4  ;;  %s233_s9 = int_to_ptr.vmem [resolvable:$true] %s232_s9 }
  0x3e   : > { %s7001_s14 = scalar_lea.hbm %s10575_s0, 4096 }
  0x3f   : > { %s11093_s23 = smov (%p31_p11, %s30_s23), 0  ;;  %p7002_p12 = scmp.ne.s32.totalorder %s10575_s0, %s7001_s14 }
  0x40   : > { %p7008_p1 = scmp.lt.u32.totalorder %s7001_s14, %s10575_s0 }
  0x41   : > { %p7004_p13 = pnand %p7002_p12, %p7256_p7 }
  0x43   : > { %p7005_p0 = pneg %p7004_p13 }
  0x45   : > { %p7010_p4 = pnand %p7008_p1, %p7005_p0 }
  0x47   : > { %7013 = shalt.err (!%p7010_p4)
}
  0x48   : > { %s7014_s28 = scalar_lea.vmem %s233_s9, 4096  ;;  %p7022_p10 = scmp.lt.s32.totalorder %s233_s9, %s233_s9 }
  0x49   : > { %p7015_p6 = scmp.ne.s32.totalorder %s233_s9, %s7014_s28  ;;  %p7023_p11 = scmp.lt.s32.totalorder %s7014_s28, %s7014_s28 }
  0x4b   : > { %p7017_p8 = pnand %p7015_p6, %p7256_p7  ;;  %p7024_p2 = por %p7023_p11, %p7022_p10 }
  0x4d   : > { %p7018_p9 = pneg %p7017_p8 }
  0x4f   : > { %p7025_p3 = pnand %p7024_p2, %p7018_p9 }
  0x51   : > { %7028 = shalt.err (!%p7025_p3)
}
  0x52   : > { %s7158_s19 = smov 128   ;;  %s7159_s20 = smov 8  }
  0x53   : > { %6213 = dma.hbm_to_vmem [thread:$0]  (!%p7244_p5), %s10575_s0, 4096, %s233_s9, [#allocation3], %s7158_s19, %s7158_s19, %s7159_s20  }
  0x54   : > { %s7160_s27 = smov [#allocation7]   ;;  %s7029_s15 = scalar_lea.hbm %s10579_s4, 2048 }
  0x55   : > { %s264_s12 = sshll.u32 %s7160_s27, 4  ;;  %p7030_p2 = scmp.ne.s32.totalorder %s10579_s4, %s7029_s15  ;;  %s265_s12 = int_to_ptr.vmem [resolvable:$true] %s264_s12 }
  0x56   : > { %p7036_p13 = scmp.lt.u32.totalorder %s7029_s15, %s10579_s4 }
  0x57   : > { %p7032_p3 = pnand %p7030_p2, %p7256_p7 }
  0x59   : > { %p7033_p12 = pneg %p7032_p3 }
  0x5b   : > { %p7038_p0 = pnand %p7036_p13, %p7033_p12 }
  0x5d   : > { %7041 = shalt.err (!%p7038_p0)
}
  0x5e   : > { %s7042_s9 = scalar_lea.vmem %s265_s12, 2048  ;;  %p7050_p8 = scmp.lt.s32.totalorder %s265_s12, %s265_s12 }
  0x5f   : > { %p7043_p1 = scmp.ne.s32.totalorder %s265_s12, %s7042_s9  ;;  %p7051_p9 = scmp.lt.s32.totalorder %s7042_s9, %s7042_s9 }
  0x61   : > { %p7045_p4 = pnand %p7043_p1, %p7256_p7  ;;  %p7052_p10 = por %p7051_p9, %p7050_p8 }
  0x63   : > { %p7046_p6 = pneg %p7045_p4 }
  0x65   : > { %p7053_p11 = pnand %p7052_p10, %p7046_p6 }
  0x67   : > { %7056 = shalt.err (!%p7053_p11)
}
  0x68   : > { %s7161_s19 = smov 64   ;;  %s7162_s20 = smov 4  }
  0x69   : > { %6219 = dma.hbm_to_vmem [thread:$0]  (!%p7244_p5), %s10579_s4, 2048, %s265_s12, [#allocation6], %s7161_s19, %s7161_s19, %s7162_s20  }
  0x6a   : > { %s7163_s27 = smov [#allocation10]   ;;  %s7057_s16 = scalar_lea.hbm %s10581_s6, 8192 }
  0x6b   : > { %s290_s13 = sshll.u32 %s7163_s27, 4  ;;  %p7058_p2 = scmp.ne.s32.totalorder %s10581_s6, %s7057_s16  ;;  %s291_s13 = int_to_ptr.vmem [resolvable:$true] %s290_s13 }
  0x6c   : > { %p7064_p13 = scmp.lt.u32.totalorder %s7057_s16, %s10581_s6 }
  0x6d   : > { %p7060_p3 = pnand %p7058_p2, %p7256_p7 }
  0x6f   : > { %p7061_p12 = pneg %p7060_p3 }
  0x71   : > { %p7066_p0 = pnand %p7064_p13, %p7061_p12 }
  0x73   : > { %7069 = shalt.err (!%p7066_p0)
}
  0x74   : > { %s7070_s12 = scalar_lea.vmem %s291_s13, 8192  ;;  %p7078_p8 = scmp.lt.s32.totalorder %s291_s13, %s291_s13 }
  0x75   : > { %p7071_p1 = scmp.ne.s32.totalorder %s291_s13, %s7070_s12  ;;  %p7079_p9 = scmp.lt.s32.totalorder %s7070_s12, %s7070_s12 }
  0x77   : > { %p7073_p4 = pnand %p7071_p1, %p7256_p7  ;;  %p7080_p10 = por %p7079_p9, %p7078_p8 }
  0x79   : > { %p7074_p6 = pneg %p7073_p4 }
  0x7b   : > { %p7081_p11 = pnand %p7080_p10, %p7074_p6 }
  0x7d   : > { %7084 = shalt.err (!%p7081_p11)
}
  0x7e   : > { %6225 = dma.hbm_to_vmem [thread:$0]  (!%p7244_p5), %s10581_s6, 8192, %s291_s13, [#allocation9], %s7161_s19, %s7161_s19, %s7162_s20  }
  0x7f   : > { %p10718_p2 = scmp.ne.s32.totalorder %s10715_s8, 0 }
  0x81   : > { %306 = sbr.rel (%p10718_p2) target bundleno = 2842 (0xb1a), region = 48 }
  0x88   : > { %p10719_p3 = scmp.ne.s32.totalorder %s10714_s30, 0 }
  0x8a   : > { %7124 = dma.done.wait (%p10719_p3), [#allocation3], 4096  }
  0x8b   : > { %7126 = vsyncadd (%p10719_p3), [#allocation3], 4294963200 }
  0x8c   : > { %7128 = dma.done.wait (%p10719_p3), [#allocation6], 8192  }
  0x8d   : > { %7130 = vsyncadd (%p10719_p3), [#allocation6], 4294959104 }
  0x8e   : > { %7132 = dma.done.wait (%p10719_p3), [#allocation9], 16384  }
  0x8f   : > { %7134 = vsyncadd (%p10719_p3), [#allocation9], 4294950912  ;;  %p5497_p5 = scmp.ne.s32.totalorder %s7141_s24, 0 }
  0x90   : > { %v351_v0 = vld [vmem:[#allocation2] sm:$0xff] (!%p5497_p5)  ;;  %v352_v1 = vld [vmem:[#allocation2 + $0x8] sm:$0xff] (!%p5497_p5)  ;;  %v353_v2 = vld [vmem:[#allocation2 + $0x10] sm:$0xff] (!%p5497_p5) }
  0x91   : > { %350 = sbr.rel (%p5497_p5) target bundleno = 161 (0xa1), region = 72  ;;  %383 = vst [vmem:[#allocation11] sm:$0xff] (!%p5497_p5), %v351_v0  ;;  %384 = vst [vmem:[#allocation11 + $0x8] sm:$0xff] (!%p5497_p5), %v352_v1  ;;  %v354_v3 = vld [vmem:[#allocation2 + $0x18] sm:$0xff] (!%p5497_p5)  ;;  %v355_v4 = vld [vmem:[#allocation2 + $0x20] sm:$0xff] (!%p5497_p5) }
  0x92   : > { %385 = vst [vmem:[#allocation11 + $0x10] sm:$0xff] (!%p5497_p5), %v353_v2  ;;  %v356_v5 = vld [vmem:[#allocation2 + $0x28] sm:$0xff] (!%p5497_p5)  ;;  %386 = vst [vmem:[#allocation11 + $0x18] sm:$0xff] (!%p5497_p5), %v354_v3  ;;  %v357_v6 = vld [vmem:[#allocation2 + $0x30] sm:$0xff] (!%p5497_p5) }
  0x93   : > { %387 = vst [vmem:[#allocation11 + $0x20] sm:$0xff] (!%p5497_p5), %v355_v4  ;;  %388 = vst [vmem:[#allocation11 + $0x28] sm:$0xff] (!%p5497_p5), %v356_v5  ;;  %v358_v7 = vld [vmem:[#allocation2 + $0x38] sm:$0xff] (!%p5497_p5)  ;;  %v359_v8 = vld [vmem:[#allocation2 + $0x40] sm:$0xff] (!%p5497_p5) }
  0x94   : > { %389 = vst [vmem:[#allocation11 + $0x30] sm:$0xff] (!%p5497_p5), %v357_v6  ;;  %390 = vst [vmem:[#allocation11 + $0x38] sm:$0xff] (!%p5497_p5), %v358_v7  ;;  %v360_v9 = vld [vmem:[#allocation2 + $0x48] sm:$0xff] (!%p5497_p5)  ;;  %v361_v10 = vld [vmem:[#allocation2 + $0x50] sm:$0xff] (!%p5497_p5) }
  0x95   : > { %391 = vst [vmem:[#allocation11 + $0x40] sm:$0xff] (!%p5497_p5), %v359_v8  ;;  %v362_v11 = vld [vmem:[#allocation2 + $0x58] sm:$0xff] (!%p5497_p5)  ;;  %392 = vst [vmem:[#allocation11 + $0x48] sm:$0xff] (!%p5497_p5), %v360_v9  ;;  %v363_v12 = vld [vmem:[#allocation2 + $0x60] sm:$0xff] (!%p5497_p5) }
  0x96   : > { %393 = vst [vmem:[#allocation11 + $0x50] sm:$0xff] (!%p5497_p5), %v361_v10  ;;  %394 = vst [vmem:[#allocation11 + $0x58] sm:$0xff] (!%p5497_p5), %v362_v11  ;;  %v364_v13 = vld [vmem:[#allocation2 + $0x68] sm:$0xff] (!%p5497_p5)  ;;  %v365_v14 = vld [vmem:[#allocation2 + $0x70] sm:$0xff] (!%p5497_p5) }
  0x97   : > { %395 = vst [vmem:[#allocation11 + $0x60] sm:$0xff] (!%p5497_p5), %v363_v12  ;;  %396 = vst [vmem:[#allocation11 + $0x68] sm:$0xff] (!%p5497_p5), %v364_v13  ;;  %v366_v15 = vld [vmem:[#allocation2 + $0x78] sm:$0xff] (!%p5497_p5)  ;;  %v367_v16 = vld [vmem:[#allocation2 + $0x80] sm:$0xff] (!%p5497_p5) }
  0x98   : > { %397 = vst [vmem:[#allocation11 + $0x70] sm:$0xff] %v365_v14  ;;  %v368_v17 = vld [vmem:[#allocation2 + $0x88] sm:$0xff]  ;;  %398 = vst [vmem:[#allocation11 + $0x78] sm:$0xff] %v366_v15  ;;  %v369_v18 = vld [vmem:[#allocation2 + $0x90] sm:$0xff] }
  0x99   : > { %399 = vst [vmem:[#allocation11 + $0x80] sm:$0xff] %v367_v16  ;;  %400 = vst [vmem:[#allocation11 + $0x88] sm:$0xff] %v368_v17  ;;  %v370_v19 = vld [vmem:[#allocation2 + $0x98] sm:$0xff]  ;;  %v371_v20 = vld [vmem:[#allocation2 + $0xa0] sm:$0xff] }
  0x9a   : > { %401 = vst [vmem:[#allocation11 + $0x90] sm:$0xff] %v369_v18  ;;  %402 = vst [vmem:[#allocation11 + $0x98] sm:$0xff] %v370_v19  ;;  %v372_v21 = vld [vmem:[#allocation2 + $0xa8] sm:$0xff]  ;;  %v373_v22 = vld [vmem:[#allocation2 + $0xb0] sm:$0xff] }
  0x9b   : > { %403 = vst [vmem:[#allocation11 + $0xa0] sm:$0xff] %v371_v20  ;;  %v374_v23 = vld [vmem:[#allocation2 + $0xb8] sm:$0xff]  ;;  %404 = vst [vmem:[#allocation11 + $0xa8] sm:$0xff] %v372_v21  ;;  %v375_v24 = vld [vmem:[#allocation2 + $0xc0] sm:$0xff] }
  0x9c   : > { %405 = vst [vmem:[#allocation11 + $0xb0] sm:$0xff] %v373_v22  ;;  %406 = vst [vmem:[#allocation11 + $0xb8] sm:$0xff] %v374_v23  ;;  %v376_v25 = vld [vmem:[#allocation2 + $0xc8] sm:$0xff]  ;;  %v377_v26 = vld [vmem:[#allocation2 + $0xd0] sm:$0xff] }
  0x9d   : > { %407 = vst [vmem:[#allocation11 + $0xc0] sm:$0xff] %v375_v24  ;;  %408 = vst [vmem:[#allocation11 + $0xc8] sm:$0xff] %v376_v25  ;;  %v378_v27 = vld [vmem:[#allocation2 + $0xd8] sm:$0xff]  ;;  %v379_v28 = vld [vmem:[#allocation2 + $0xe0] sm:$0xff] }
  0x9e   : > { %409 = vst [vmem:[#allocation11 + $0xd0] sm:$0xff] %v377_v26  ;;  %v380_v29 = vld [vmem:[#allocation2 + $0xe8] sm:$0xff]  ;;  %410 = vst [vmem:[#allocation11 + $0xd8] sm:$0xff] %v378_v27  ;;  %v381_v30 = vld [vmem:[#allocation2 + $0xf0] sm:$0xff] }
  0x9f   : > { %411 = vst [vmem:[#allocation11 + $0xe0] sm:$0xff] %v379_v28  ;;  %412 = vst [vmem:[#allocation11 + $0xe8] sm:$0xff] %v380_v29  ;;  %v382_v31 = vld [vmem:[#allocation2 + $0xf8] sm:$0xff] }
  0xa0   : > { %413 = vst [vmem:[#allocation11 + $0xf0] sm:$0xff] %v381_v30  ;;  %414 = vst [vmem:[#allocation11 + $0xf8] sm:$0xff] %v382_v31 }
  0xa1 PF: > { %v415_v32 = vld [vmem:[#allocation11] sm:$0xff]  ;;  %v416_v34 = vld [vmem:[#allocation11 + $0x8] sm:$0xff]  ;;  %v7417_v50 = vld [vmem:[#allocation11 + $0x90] sm:$0xff]  ;;  %s5606_s30 = smul.u32 192, %s7141_s24  ;;  %s5498_s11 = sshll.u32 %s7141_s24, 3 }
  0xa2   : > { %v417_v33 = vld [vmem:[#allocation11 + $0x10] sm:$0xff]  ;;  %453 = vadd.xlane.f32.xlu0 %v415_v32  ;;  %v7372_v35 = vld [vmem:[#allocation11 + $0x18] sm:$0xff]  ;;  %v7411_v48 = vld [vmem:[#allocation11 + $0x80] sm:$0xff]  ;;  %s7588_s20 = scalar_lea.vmem %s10576_s1, %s5498_s11  ;;  %s5607_s27 = sshll.u32 %s7141_s24, 6 }
  0xa3   : > { %457 = vadd.xlane.f32.xlu1 %v417_v33  ;;  %v7375_v36 = vld [vmem:[#allocation11 + $0x20] sm:$0xff]  ;;  %v7377_v37 = vld [vmem:[#allocation11 + $0x28] sm:$0xff]  ;;  %v7419_v51 = vld [vmem:[#allocation11 + $0x98] sm:$0xff]  ;;  %s7424_s8 = scalar_lea.vmem [#allocation5], %s5606_s30  ;;  %s2169_s13 = scalar_lea.vmem [#allocation7], %s5607_s27 }
  0xa4   : > { %v7381_v38 = vld [vmem:[#allocation11 + $0x30] sm:$0xff]  ;;  %v7383_v39 = vld [vmem:[#allocation11 + $0x38] sm:$0xff]  ;;  %v7413_v49 = vld [vmem:[#allocation11 + $0x88] sm:$0xff]  ;;  %s5608_s14 = sshll.u32 %s7141_s24, 8  ;;  %s5499_s18 = sshll.u32 %s7141_s24, 2 }
  0xa5   : > { %v7387_v40 = vld [vmem:[#allocation11 + $0x40] sm:$0xff]  ;;  %v7389_v41 = vld [vmem:[#allocation11 + $0x48] sm:$0xff]  ;;  %v7455_v14 = vld [vmem:[#allocation11 + $0xb0] sm:$0xff]  ;;  %s8260_s15 = scalar_lea.vmem [#allocation8], %s5608_s14  ;;  %s8322_s16 = scalar_lea.vmem [#allocation10], %s5608_s14 }
  0xa6   : > { %455 = vadd.xlane.f32.xlu0 %v416_v34  ;;  %v7393_v42 = vld [vmem:[#allocation11 + $0x50] sm:$0xff]  ;;  %v7395_v43 = vld [vmem:[#allocation11 + $0x58] sm:$0xff]  ;;  %v6281_v53 = vld [vmem:[%s7424_s8] ss:$12 sps:$4 sm:$0xff]   ;;  %s451_s9 = scalar_lea.vmem %s10577_s2, %s5499_s18  ;;  %s7165_s24 = smov [#allocation11]  }
  0xa7   : > { %459 = vadd.xlane.f32.xlu1 %v7372_v35  ;;  %v7399_v44 = vld [vmem:[#allocation11 + $0x60] sm:$0xff]  ;;  %v7401_v45 = vld [vmem:[#allocation11 + $0x68] sm:$0xff]  ;;  %v7464_v20 = vld [vmem:[#allocation11 + $0xb8] sm:$0xff]  ;;  %s5379_s12 = sshll.u32 %s7165_s24, 4  ;;  %p10539_p7 = scmp.eq.s32.totalorder %s5484_s29, 1  ;;  %s5380_s12 = int_to_ptr.vmem [resolvable:$true] %s5379_s12 }
  0xa8   : > { %v7405_v46 = vld [vmem:[#allocation11 + $0x70] sm:$0xff]  ;;  %v7407_v47 = vld [vmem:[#allocation11 + $0x78] sm:$0xff]  ;;  %v7437_v3 = vld [vmem:[#allocation11 + $0xa0] sm:$0xff]  ;;  %s7085_s22 = scalar_lea.vmem %s5380_s12, 4096  ;;  %p7092_p1 = scmp.lt.s32.totalorder %s5380_s12, %s5380_s12 }
  0xa9   : > { %v6279_v52 = vld [vmem:[%s7424_s8 + $0x4] ss:$12 sps:$4 sm:$0xff]   ;;  %v6282_v54 = vld [vmem:[%s7424_s8 + $0x1c] ss:$12 sps:$4 sm:$0xff]   ;;  %v6285_v22 = vld [vmem:[%s7424_s8 + $0x34] ss:$12 sps:$4 sm:$0xff]   ;;  %p7086_p12 = scmp.ne.s32.totalorder %s5380_s12, %s7085_s22  ;;  %p7093_p4 = scmp.lt.s32.totalorder %s7085_s22, %s7085_s22 }
  0xaa   : > { %461 = vadd.xlane.f32.xlu0 %v7375_v36  ;;  %1057 = vmatprep.subr.bf16.mxu0 %v6279_v52  ;;  %v7447_v9 = vld [vmem:[#allocation11 + $0xa8] sm:$0xff]  ;;  %v6284_v19 = vld [vmem:[%s7424_s8 + $0x18] ss:$12 sps:$4 sm:$0xff]   ;;  %v6287_v26 = vld [vmem:[%s7424_s8 + $0x30] ss:$12 sps:$4 sm:$0xff]  }
  0xab   : > { %463 = vadd.xlane.f32.xlu1 %v7377_v37  ;;  %6170 = vmatprep.subr.bf16.mxu1 %v6279_v52  ;;  %v7474_v27 = vld [vmem:[#allocation11 + $0xc0] sm:$0xff]  ;;  %v6288_v29 = vld [vmem:[%s7424_s8 + $0x4c] ss:$12 sps:$4 sm:$0xff]   ;;  %p7087_p13 = pnand %p7086_p12, %p10539_p7  ;;  %p7094_p6 = por %p7093_p4, %p7092_p1 }
  0xac   : > { %1058 = vmatpush1.bf16.msra.mxu0 %v6281_v53  ;;  %6178 = vmatpush1.bf16.msra.mxu1 %v6281_v53  ;;  %v6293_v53 = vld [vmem:[%s7424_s8 + $0x60] ss:$12 sps:$4 sm:$0xff]  }
  0xad   : > { %1059 = vmatprep.subr.bf16.mxu0 %v6282_v54  ;;  %6171 = vmatprep.subr.bf16.mxu1 %v6282_v54  ;;  %v7494_v54 = vld [vmem:[#allocation11 + $0xd0] sm:$0xff]  ;;  %p7088_p0 = pneg %p7087_p13 }
  0xae   : > { %465 = vadd.xlane.f32.xlu0 %v7381_v38 }
  0xaf   : > { %467 = vadd.xlane.f32.xlu1 %v7383_v39  ;;  %p7095_p8 = pnand %p7094_p6, %p7088_p0 }
  0xb0   : > { %1060 = vmatpush1.bf16.msra.mxu0 %v6284_v19  ;;  %6179 = vmatpush1.bf16.msra.mxu1 %v6284_v19 }
  0xb1   : > { %1061 = vmatprep.subr.bf16.mxu0 %v6285_v22  ;;  %6172 = vmatprep.subr.bf16.mxu1 %v6285_v22 }
  0xb2   : > { %469 = vadd.xlane.f32.xlu0 %v7387_v40 }
  0xb3   : > { %471 = vadd.xlane.f32.xlu1 %v7389_v41 }
  0xb4   : > { %1062 = vmatpush1.bf16.msra.mxu0 %v6287_v26  ;;  %6180 = vmatpush1.bf16.msra.mxu1 %v6287_v26  ;;  %v7532_v26 = vld [vmem:[#allocation11 + $0xf0] sm:$0xff] }
  0xb5   : > { %1063 = vmatprep.subr.bf16.mxu0 %v6288_v29  ;;  %6173 = vmatprep.subr.bf16.mxu1 %v6288_v29 }
  0xb6   : > { %473 = vadd.xlane.f32.xlu0 %v7393_v42 }
  0xb7   : > { %475 = vadd.xlane.f32.xlu1 %v7395_v43 }
  0xba   : > { %477 = vadd.xlane.f32.xlu0 %v7399_v44 }
  0xbb   : > { %479 = vadd.xlane.f32.xlu1 %v7401_v45 }
  0xbe   : > { %481 = vadd.xlane.f32.xlu0 %v7405_v46 }
  0xbf   : > { %483 = vadd.xlane.f32.xlu1 %v7407_v47 }
  0xc2   : > { %485 = vadd.xlane.f32.xlu0 %v7411_v48 }
  0xc3   : > { %487 = vadd.xlane.f32.xlu1 %v7413_v49 }
  0xc6   : > { %489 = vadd.xlane.f32.xlu0 %v7417_v50 }
  0xc7   : > { %491 = vadd.xlane.f32.xlu1 %v7419_v51 }
 0x12f   : > { %v454_v55 = vpop.xlane.xlu0 %453 }
 0x130   : > { %v458_v56 = vpop.xlane.xlu1 %457  ;;  %v518_v57 = vmul.f32 0.0078125, %v454_v55 }
 0x131   : > { %v520_v59 = vmul.f32 0.0078125, %v458_v56 }
 0x132   : > { %v7429_v58 = vsub.f32 %v415_v32, %v518_v57  ;;  %v6294_v57 = vld [vmem:[%s7424_s8 + $0x7c] ss:$12 sps:$4 sm:$0xff]  }
 0x133   : > { %v456_v60 = vpop.xlane.xlu0 %455  ;;  %v7435_v2 = vsub.f32 %v417_v33, %v520_v59  ;;  %v6290_v33 = vld [vmem:[%s7424_s8 + $0x48] ss:$12 sps:$4 sm:$0xff]  }
 0x134   : > { %v460_v61 = vpop.xlane.xlu1 %459  ;;  %v519_v62 = vmul.f32 0.0078125, %v456_v60  ;;  %v582_v63 = vmul.f32 %v7429_v58, %v7429_v58  ;;  %1064 = vmatpush1.bf16.msra.mxu0 %v6290_v33  ;;  %6181 = vmatpush1.bf16.msra.mxu1 %v6290_v33 }
 0x135   : > { %v521_v1 = vmul.f32 0.0078125, %v460_v61  ;;  %v584_v6 = vmul.f32 %v7435_v2, %v7435_v2  ;;  %v6296_v61 = vld [vmem:[%s7424_s8 + $0x78] ss:$12 sps:$4 sm:$0xff]  }
 0x136   : > { %614 = vadd.xlane.f32.xlu0 %v582_v63  ;;  %v7433_v0 = vsub.f32 %v416_v34, %v519_v62  ;;  %v7484_v34 = vld [vmem:[#allocation11 + $0xc8] sm:$0xff]  ;;  %v7504_v62 = vld [vmem:[#allocation11 + $0xd8] sm:$0xff] }
 0x137   : > { %v462_v4 = vpop.xlane.xlu0 %461  ;;  %v7445_v8 = vsub.f32 %v7372_v35, %v521_v1  ;;  %v6297_v1 = vld [vmem:[%s7424_s8 + $0x94] ss:$12 sps:$4 sm:$0xff]  }
 0x138   : > { %v583_v5 = vmul.f32 %v7433_v0, %v7433_v0  ;;  %v522_v7 = vmul.f32 0.0078125, %v462_v4  ;;  %v464_v10 = vpop.xlane.xlu1 %463 }
 0x139   : > { %v585_v11 = vmul.f32 %v7445_v8, %v7445_v8  ;;  %v523_v12 = vmul.f32 0.0078125, %v464_v10 }
 0x13a   : > { %493 = vadd.xlane.f32.xlu0 %v7437_v3  ;;  %616 = vadd.xlane.f32.xlu1 %v583_v5  ;;  %v7453_v13 = vsub.f32 %v7375_v36, %v522_v7  ;;  %v7514_v7 = vld [vmem:[#allocation11 + $0xe0] sm:$0xff] }
 0x13b   : > { %v466_v15 = vpop.xlane.xlu0 %465  ;;  %v7461_v18 = vsub.f32 %v7377_v37, %v523_v12  ;;  %v6291_v37 = vld [vmem:[%s7424_s8 + $0x64] ss:$12 sps:$4 sm:$0xff]  }
 0x13c   : > { %v586_v16 = vmul.f32 %v7453_v13, %v7453_v13  ;;  %v524_v17 = vmul.f32 0.0078125, %v466_v15  ;;  %v468_v21 = vpop.xlane.xlu1 %467  ;;  %1065 = vmatprep.subr.bf16.mxu0 %v6291_v37  ;;  %6174 = vmatprep.subr.bf16.mxu1 %v6291_v37 }
 0x13d   : > { %v587_v23 = vmul.f32 %v7461_v18, %v7461_v18  ;;  %v525_v24 = vmul.f32 0.0078125, %v468_v21  ;;  %1066 = vmatpush1.bf16.msra.mxu0 %v6293_v53  ;;  %6182 = vmatpush1.bf16.msra.mxu1 %v6293_v53 }
 0x13e   : > { %618 = vadd.xlane.f32.xlu0 %v584_v6  ;;  %495 = vadd.xlane.f32.xlu1 %v7447_v9  ;;  %v7471_v25 = vsub.f32 %v7381_v38, %v524_v17  ;;  %v6299_v6 = vld [vmem:[%s7424_s8 + $0x90] ss:$12 sps:$4 sm:$0xff]   ;;  %v7524_v17 = vld [vmem:[#allocation11 + $0xe8] sm:$0xff] }
 0x13f   : > { %v470_v28 = vpop.xlane.xlu0 %469  ;;  %v7481_v32 = vsub.f32 %v7383_v39, %v525_v24  ;;  %1067 = vmatprep.subr.bf16.mxu0 %v6294_v57  ;;  %6175 = vmatprep.subr.bf16.mxu1 %v6294_v57 }
 0x140   : > { %v588_v30 = vmul.f32 %v7471_v25, %v7471_v25  ;;  %v526_v31 = vmul.f32 0.0078125, %v470_v28  ;;  %v472_v35 = vpop.xlane.xlu1 %471  ;;  %v10589_v28 = vmov 0  }
 0x141   : > { %v589_v38 = vmul.f32 %v7481_v32, %v7481_v32  ;;  %v527_v52 = vmul.f32 0.0078125, %v472_v35  ;;  %1068 = vmatpush1.bf16.msra.mxu0 %v6296_v61  ;;  %6183 = vmatpush1.bf16.msra.mxu1 %v6296_v61 }
 0x142   : > { %497 = vadd.xlane.f32.xlu0 %v7455_v14  ;;  %620 = vadd.xlane.f32.xlu1 %v585_v11  ;;  %v7491_v39 = vsub.f32 %v7387_v40, %v526_v31  ;;  %v6300_v11 = vld [vmem:[%s7424_s8 + $0xac] ss:$12 sps:$4 sm:$0xff]  }
 0x143   : > { %v474_v36 = vpop.xlane.xlu0 %473  ;;  %v7501_v60 = vsub.f32 %v7389_v41, %v527_v52  ;;  %1069 = vmatprep.subr.bf16.mxu0 %v6297_v1  ;;  %6176 = vmatprep.subr.bf16.mxu1 %v6297_v1 }
 0x144   : > { %v476_v55 = vpop.xlane.xlu1 %475  ;;  %v590_v59 = vmul.f32 %v7491_v39, %v7491_v39  ;;  %v528_v40 = vmul.f32 0.0078125, %v474_v36  ;;  %1089 = vmatprep.mubr.bf16.mxu0 %v10589_v28  ;;  %1209 = vmatprep.mubr.bf16.mxu1 %v10589_v28  ;;  %v7545_v36 = vld [vmem:[#allocation11 + $0xf8] sm:$0xff] }
 0x145   : > { %v591_v4 = vmul.f32 %v7501_v60, %v7501_v60  ;;  %v529_v5 = vmul.f32 0.0078125, %v476_v55  ;;  %1070 = vmatpush1.bf16.msra.mxu0 %v6299_v6  ;;  %6184 = vmatpush1.bf16.msra.mxu1 %v6299_v6 }
 0x146   : > { %499 = vadd.xlane.f32.xlu1 %v7464_v20  ;;  %622 = vadd.xlane.f32.xlu0 %v586_v16  ;;  %v7511_v41 = vsub.f32 %v7393_v42, %v528_v40  ;;  %v6302_v42 = vld [vmem:[%s7424_s8 + $0xa8] ss:$12 sps:$4 sm:$0xff]  }
 0x147   : > { %v478_v56 = vpop.xlane.xlu0 %477  ;;  %v7521_v16 = vsub.f32 %v7395_v43, %v529_v5  ;;  %1071 = vmatprep.subr.bf16.mxu0 %v6300_v11  ;;  %6177 = vmatprep.subr.bf16.mxu1 %v6300_v11  ;;  %v806_v11 = vlaneseq }
 0x148   : > { %v480_v63 = vpop.xlane.xlu1 %479  ;;  %v592_v12 = vmul.f32 %v7511_v41, %v7511_v41  ;;  %v530_v15 = vmul.f32 0.0078125, %v478_v56 }
 0x149   : > { %1072 = vmatpush1.bf16.msra.mxu0 %v6302_v42  ;;  %6185 = vmatpush1.bf16.msra.mxu1 %v6302_v42  ;;  %v531_v21 = vmul.f32 0.0078125, %v480_v63 }
 0x14a   : > { %624 = vadd.xlane.f32.xlu1 %v587_v23  ;;  %501 = vadd.xlane.f32.xlu0 %v7474_v27  ;;  %v593_v23 = vmul.f32 %v7521_v16, %v7521_v16  ;;  %v7530_v43 = vsub.f32 %v7399_v44, %v530_v15 }
 0x14b   : > { %v482_v10 = vpop.xlane.xlu0 %481 }
 0x14c   : > { %v484_v19 = vpop.xlane.xlu1 %483  ;;  %v532_v24 = vmul.f32 0.0078125, %v482_v10  ;;  %v594_v33 = vmul.f32 %v7530_v43, %v7530_v43 }
 0x14d   : > { %v533_v29 = vmul.f32 0.0078125, %v484_v19 }
 0x14e   : > { %503 = vadd.xlane.f32.xlu1 %v7484_v34  ;;  %626 = vadd.xlane.f32.xlu0 %v588_v30  ;;  %v7537_v30 = vsub.f32 %v7401_v45, %v531_v21  ;;  %v7543_v35 = vsub.f32 %v7405_v46, %v532_v24 }
 0x14f   : > { %v486_v22 = vpop.xlane.xlu0 %485  ;;  %v7550_v45 = vsub.f32 %v7407_v47, %v533_v29 }
 0x150   : > { %v488_v31 = vpop.xlane.xlu1 %487  ;;  %v534_v44 = vmul.f32 0.0078125, %v486_v22  ;;  %v596_v52 = vmul.f32 %v7543_v35, %v7543_v35  ;;  %v7581_v22 = vshrl.u32 %v806_v11, 7 }
 0x151   : > { %v535_v53 = vmul.f32 0.0078125, %v488_v31  ;;  %v597_v57 = vmul.f32 %v7550_v45, %v7550_v45 }
 0x152   : > { %628 = vadd.xlane.f32.xlu1 %v589_v38  ;;  %505 = vadd.xlane.f32.xlu0 %v7494_v54  ;;  %v595_v38 = vmul.f32 %v7537_v30, %v7537_v30  ;;  %v7556_v46 = vsub.f32 %v7411_v48, %v534_v44  ;;  %10720 = vst [vmem:[#allocation16_spill] sm:$0xff] %v7581_v22 }
 0x153   : > { %v490_v37 = vpop.xlane.xlu0 %489  ;;  %v7563_v40 = vsub.f32 %v7413_v49, %v535_v53 }
 0x154   : > { %v536_v55 = vmul.f32 0.0078125, %v490_v37  ;;  %v492_v56 = vpop.xlane.xlu1 %491  ;;  %v598_v47 = vmul.f32 %v7556_v46, %v7556_v46  ;;  %v10588_v37 = vsub.s32 0, %v7581_v22 }
 0x155   : > { %v599_v48 = vmul.f32 %v7563_v40, %v7563_v40 }
 0x156   : > { %507 = vadd.xlane.f32.xlu1 %v7504_v62  ;;  %630 = vadd.xlane.f32.xlu0 %v590_v59  ;;  %v537_v59 = vmul.f32 0.0078125, %v492_v56  ;;  %v7566_v61 = vsub.f32 %v7417_v50, %v536_v55  ;;  %v449_v55 = vld [vmem:[%s7588_s20] sm:$0x3f] }
 0x158   : > { %v600_v63 = vmul.f32 %v7566_v61, %v7566_v61  ;;  %v7573_v1 = vsub.f32 %v7419_v51, %v537_v59 }
 0x15a   : > { %632 = vadd.xlane.f32.xlu1 %v591_v4  ;;  %509 = vadd.xlane.f32.xlu0 %v7514_v7  ;;  %v601_v49 = vmul.f32 %v7573_v1, %v7573_v1 }
 0x15e   : > { %511 = vadd.xlane.f32.xlu1 %v7524_v17  ;;  %634 = vadd.xlane.f32.xlu0 %v592_v12 }
 0x162   : > { %636 = vadd.xlane.f32.xlu1 %v593_v23  ;;  %513 = vadd.xlane.f32.xlu0 %v7532_v26 }
 0x166   : > { %515 = vadd.xlane.f32.xlu1 %v7545_v36  ;;  %638 = vadd.xlane.f32.xlu0 %v594_v33 }
 0x16a   : > { %640 = vadd.xlane.f32.xlu1 %v595_v38  ;;  %642 = vadd.xlane.f32.xlu0 %v596_v52 }
 0x16e   : > { %644 = vadd.xlane.f32.xlu1 %v597_v57  ;;  %646 = vadd.xlane.f32.xlu0 %v598_v47 }
 0x172   : > { %648 = vadd.xlane.f32.xlu1 %v599_v48  ;;  %650 = vadd.xlane.f32.xlu0 %v600_v63  ;;  %v7603_v63 = vrot.slane %v449_v55, %v10588_v37 }
 0x176   : > { %652 = vadd.xlane.f32.xlu1 %v601_v49  ;;  %v10586_v49 = vsub.s32 1, %v7581_v22 }
 0x1c3   : > { %v615_v50 = vpop.xlane.xlu0 %614 }
 0x1c4   : > { %v678_v4 = vmul.f32 0.0078125, %v615_v50 }
 0x1c6   : > { %v710_v5 = vadd.f32 1e-05, %v678_v4 }
 0x1c7   : > { %v617_v6 = vpop.xlane.xlu1 %616  ;;  %v494_v10 = vpop.xlane.xlu0 %493 }
 0x1c8   : > { %6399 = vrsqrt.f32 %v710_v5  ;;  %v679_v12 = vmul.f32 0.0078125, %v617_v6  ;;  %v538_v15 = vmul.f32 0.0078125, %v494_v10 }
 0x1ca   : > { %v711_v42 = vadd.f32 1e-05, %v679_v12  ;;  %v7578_v51 = vsub.f32 %v7437_v3, %v538_v15 }
 0x1cb   : > { %v496_v19 = vpop.xlane.xlu1 %495  ;;  %v619_v21 = vpop.xlane.xlu0 %618 }
 0x1cc   : > { %6401 = vrsqrt.f32 %v711_v42  ;;  %v539_v23 = vmul.f32 0.0078125, %v496_v19  ;;  %v680_v24 = vmul.f32 0.0078125, %v619_v21  ;;  %v602_v29 = vmul.f32 %v7578_v51, %v7578_v51 }
 0x1cd   : > { %v7615_v42 = vrot.slane %v449_v55, %v10586_v49 }
 0x1ce   : > { %v712_v31 = vadd.f32 1e-05, %v680_v24  ;;  %654 = vadd.xlane.f32.xlu0 %v602_v29  ;;  %v7591_v3 = vsub.f32 %v7447_v9, %v539_v23 }
 0x1cf   : > { %v621_v33 = vpop.xlane.xlu1 %620  ;;  %v498_v44 = vpop.xlane.xlu0 %497 }
 0x1d0   : > { %6403 = vrsqrt.f32 %v712_v31  ;;  %v681_v38 = vmul.f32 0.0078125, %v621_v33  ;;  %v540_v52 = vmul.f32 0.0078125, %v498_v44  ;;  %v603_v53 = vmul.f32 %v7591_v3, %v7591_v3 }
 0x1d2   : > { %v6400_v56 = vpop.eup %6399  ;;  %v713_v57 = vadd.f32 1e-05, %v681_v38  ;;  %656 = vadd.xlane.f32.xlu1 %v603_v53  ;;  %v7598_v47 = vsub.f32 %v7455_v14, %v540_v52 }
 0x1d3   : > { %v500_v59 = vpop.xlane.xlu1 %499  ;;  %v623_v9 = vpop.xlane.xlu0 %622  ;;  %v774_v48 = vmul.f32 %v6400_v56, %v7429_v58 }
 0x1d4   : > { %6405 = vrsqrt.f32 %v713_v57  ;;  %v541_v50 = vmul.f32 0.0078125, %v500_v59  ;;  %v682_v4 = vmul.f32 0.0078125, %v623_v9  ;;  %v604_v5 = vmul.f32 %v7598_v47, %v7598_v47 }
 0x1d5   : > { %v810_v15 = vmul.f32 %v7603_v63, %v774_v48 }
 0x1d6   : > { %v6402_v6 = vpop.eup %6401  ;;  %v714_v10 = vadd.f32 1e-05, %v682_v4  ;;  %658 = vadd.xlane.f32.xlu0 %v604_v5  ;;  %v7609_v14 = vsub.f32 %v7464_v20, %v541_v50 }
 0x1d7   : > { %v625_v11 = vpop.xlane.xlu1 %624  ;;  %v502_v58 = vpop.xlane.xlu0 %501  ;;  %v775_v12 = vmul.f32 %v6402_v6, %v7433_v0  ;;  %v846_v44 = vadd.f32 %v7615_v42, %v810_v15 }
 0x1d8   : > { %6407 = vrsqrt.f32 %v714_v10  ;;  %v683_v19 = vmul.f32 0.0078125, %v625_v11  ;;  %v542_v21 = vmul.f32 0.0078125, %v502_v58  ;;  %v605_v23 = vmul.f32 %v7609_v14, %v7609_v14 }
 0x1d9   : > { %v811_v24 = vmul.f32 %v7603_v63, %v775_v12 }
 0x1da   : > { %v6404_v20 = vpop.eup %6403  ;;  %v715_v29 = vadd.f32 1e-05, %v683_v19  ;;  %660 = vadd.xlane.f32.xlu1 %v605_v23  ;;  %v7621_v31 = vsub.f32 %v7474_v27, %v542_v21 }
 0x1db   : > { %v504_v0 = vpop.xlane.xlu1 %503  ;;  %v627_v33 = vpop.xlane.xlu0 %626  ;;  %v847_v38 = vadd.f32 %v7615_v42, %v811_v24  ;;  %v776_v52 = vmul.f32 %v6404_v20, %v7435_v2 }
 0x1dc   : > { %6409 = vrsqrt.f32 %v715_v29  ;;  %v543_v53 = vmul.f32 0.0078125, %v504_v0  ;;  %v684_v55 = vmul.f32 0.0078125, %v627_v33  ;;  %v606_v56 = vmul.f32 %v7621_v31, %v7621_v31 }
 0x1dd   : > { %v7628_v57 = vpack.c.bf16 %v847_v38, %v846_v44  ;;  %v812_v4 = vmul.f32 %v7603_v63, %v776_v52 }
 0x1de   : > { %v6406_v59 = vpop.eup %6405  ;;  %v716_v9 = vadd.f32 1e-05, %v684_v55  ;;  %662 = vadd.xlane.f32.xlu0 %v606_v56  ;;  %v7631_v27 = vsub.f32 %v7484_v34, %v543_v53 }
 0x1df   : > { %v629_v48 = vpop.xlane.xlu1 %628  ;;  %1090 = vmatmul.mubr.bf16.vlgmr.msra.gmra.mrb[0].mxu0 %v7628_v57  ;;  %v506_v50 = vpop.xlane.xlu0 %505  ;;  %v777_v2 = vmul.f32 %v6406_v59, %v7445_v8  ;;  %v848_v19 = vadd.f32 %v7615_v42, %v812_v4 }
 0x1e0   : > { %6411 = vrsqrt.f32 %v716_v9  ;;  %v685_v5 = vmul.f32 0.0078125, %v629_v48  ;;  %v544_v6 = vmul.f32 0.0078125, %v506_v50  ;;  %v607_v10 = vmul.f32 %v7631_v27, %v7631_v27  ;;  %1099 = vmatprep.mubr.bf16.mxu0 %v10589_v28 }
 0x1e1   : > { %v813_v11 = vmul.f32 %v7603_v63, %v777_v2 }
 0x1e2   : > { %v6408_v34 = vpop.eup %6407  ;;  %v717_v58 = vadd.f32 1e-05, %v685_v5  ;;  %664 = vadd.xlane.f32.xlu1 %v607_v10  ;;  %v7641_v12 = vsub.f32 %v7494_v54, %v544_v6 }
 0x1e3   : > { %v508_v15 = vpop.xlane.xlu1 %507  ;;  %v631_v8 = vpop.xlane.xlu0 %630  ;;  %v849_v21 = vadd.f32 %v7615_v42, %v813_v11  ;;  %v778_v23 = vmul.f32 %v6408_v34, %v7453_v13 }
 0x1e4   : > { %6413 = vrsqrt.f32 %v717_v58  ;;  %v545_v24 = vmul.f32 0.0078125, %v508_v15  ;;  %v686_v20 = vmul.f32 0.0078125, %v631_v8  ;;  %v608_v29 = vmul.f32 %v7641_v12, %v7641_v12 }
 0x1e5   : > { %v7648_v0 = vpack.c.bf16 %v849_v21, %v848_v19  ;;  %v814_v53 = vmul.f32 %v7603_v63, %v778_v23 }
 0x1e6   : > { %v6410_v33 = vpop.eup %6409  ;;  %v718_v44 = vadd.f32 1e-05, %v686_v20  ;;  %666 = vadd.xlane.f32.xlu0 %v608_v29  ;;  %v7651_v54 = vsub.f32 %v7504_v62, %v545_v24 }
 0x1e7   : > { %v633_v38 = vpop.xlane.xlu1 %632  ;;  %1100 = vmatmul.mubr.bf16.gmra.mrb[4].mxu0 %v7648_v0  ;;  %v510_v52 = vpop.xlane.xlu0 %509  ;;  %v779_v13 = vmul.f32 %v6410_v33, %v7461_v18  ;;  %v850_v4 = vadd.f32 %v7615_v42, %v814_v53 }
 0x1e8   : > { %6415 = vrsqrt.f32 %v718_v44  ;;  %v687_v55 = vmul.f32 0.0078125, %v633_v38  ;;  %v546_v56 = vmul.f32 0.0078125, %v510_v52  ;;  %v609_v59 = vmul.f32 %v7651_v54, %v7651_v54  ;;  %1109 = vmatprep.mubr.bf16.mxu0 %v10589_v28 }
 0x1e9   : > { %v815_v9 = vmul.f32 %v7603_v63, %v779_v13 }
 0x1ea   : > { %v6412_v62 = vpop.eup %6411  ;;  %v719_v48 = vadd.f32 1e-05, %v687_v55  ;;  %668 = vadd.xlane.f32.xlu1 %v609_v59  ;;  %v7661_v50 = vsub.f32 %v7514_v7, %v546_v56 }
 0x1eb   : > { %v512_v2 = vpop.xlane.xlu1 %511  ;;  %v635_v18 = vpop.xlane.xlu0 %634  ;;  %v851_v5 = vadd.f32 %v7615_v42, %v815_v9  ;;  %v780_v6 = vmul.f32 %v6412_v62, %v7471_v25 }
 0x1ec   : > { %6417 = vrsqrt.f32 %v719_v48  ;;  %v547_v10 = vmul.f32 0.0078125, %v512_v2  ;;  %v688_v11 = vmul.f32 0.0078125, %v635_v18  ;;  %v610_v34 = vmul.f32 %v7661_v50, %v7661_v50 }
 0x1ed   : > { %v7668_v58 = vpack.c.bf16 %v851_v5, %v850_v4  ;;  %v816_v23 = vmul.f32 %v7603_v63, %v780_v6 }
 0x1ee   : > { %v6414_v15 = vpop.eup %6413  ;;  %v720_v8 = vadd.f32 1e-05, %v688_v11  ;;  %670 = vadd.xlane.f32.xlu0 %v610_v34  ;;  %v7671_v7 = vsub.f32 %v7524_v17, %v547_v10 }
 0x1ef   : > { %v637_v19 = vpop.xlane.xlu1 %636  ;;  %1110 = vmatmul.mubr.bf16.gmra.mrb[8].mxu0 %v7668_v58  ;;  %v514_v21 = vpop.xlane.xlu0 %513  ;;  %v781_v25 = vmul.f32 %v6414_v15, %v7481_v32  ;;  %v852_v13 = vadd.f32 %v7615_v42, %v816_v23 }
 0x1f0   : > { %6419 = vrsqrt.f32 %v720_v8  ;;  %v689_v24 = vmul.f32 0.0078125, %v637_v19  ;;  %v548_v20 = vmul.f32 0.0078125, %v514_v21  ;;  %v611_v29 = vmul.f32 %v7671_v7, %v7671_v7  ;;  %1119 = vmatprep.mubr.bf16.mxu0 %v10589_v28 }
 0x1f1   : > { %v817_v33 = vmul.f32 %v7603_v63, %v781_v25 }
 0x1f2   : > { %v6416_v17 = vpop.eup %6415  ;;  %v721_v44 = vadd.f32 1e-05, %v689_v24  ;;  %672 = vadd.xlane.f32.xlu1 %v611_v29  ;;  %v7681_v38 = vsub.f32 %v7532_v26, %v548_v20 }
 0x1f3   : > { %v516_v52 = vpop.xlane.xlu1 %515  ;;  %v639_v32 = vpop.xlane.xlu0 %638  ;;  %v853_v53 = vadd.f32 %v7615_v42, %v817_v33  ;;  %v782_v55 = vmul.f32 %v6416_v17, %v7491_v39 }
 0x1f4   : > { %6421 = vrsqrt.f32 %v721_v44  ;;  %v549_v56 = vmul.f32 0.0078125, %v516_v52  ;;  %v690_v59 = vmul.f32 0.0078125, %v639_v32  ;;  %v612_v9 = vmul.f32 %v7681_v38, %v7681_v38 }
 0x1f5   : > { %v7688_v62 = vpack.c.bf16 %v853_v53, %v852_v13  ;;  %v818_v5 = vmul.f32 %v7603_v63, %v782_v55 }
 0x1f6   : > { %v6418_v48 = vpop.eup %6417  ;;  %v722_v2 = vadd.f32 1e-05, %v690_v59  ;;  %674 = vadd.xlane.f32.xlu0 %v612_v9  ;;  %v7691_v26 = vsub.f32 %v7545_v36, %v549_v56 }
 0x1f7   : > { %v641_v18 = vpop.xlane.xlu1 %640  ;;  %1120 = vmatmul.mubr.bf16.gmra.mrb[12].mxu0 %v7688_v62  ;;  %v643_v4 = vpop.xlane.xlu0 %642  ;;  %v783_v39 = vmul.f32 %v6418_v48, %v7501_v60  ;;  %v854_v60 = vadd.f32 %v7615_v42, %v818_v5 }
 0x1f8   : > { %6423 = vrsqrt.f32 %v722_v2  ;;  %v691_v6 = vmul.f32 0.0078125, %v641_v18  ;;  %v692_v10 = vmul.f32 0.0078125, %v643_v4  ;;  %v613_v11 = vmul.f32 %v7691_v26, %v7691_v26  ;;  %1129 = vmatprep.mubr.bf16.mxu0 %v10589_v28 }
 0x1f9   : > { %v819_v34 = vmul.f32 %v7603_v63, %v783_v39 }
 0x1fa   : > { %v6420_v36 = vpop.eup %6419  ;;  %v723_v15 = vadd.f32 1e-05, %v691_v6  ;;  %v724_v8 = vadd.f32 1e-05, %v692_v10  ;;  %676 = vadd.xlane.f32.xlu1 %v613_v11  ;;  %v7716_v6 = vld [vmem:[%s7424_s8 + $0x8] ss:$12 sps:$4 sm:$0xff]  }
 0x1fb   : > { %v645_v19 = vpop.xlane.xlu1 %644  ;;  %v647_v21 = vpop.xlane.xlu0 %646  ;;  %v855_v25 = vadd.f32 %v7615_v42, %v819_v34  ;;  %v784_v23 = vmul.f32 %v6420_v36, %v7511_v41  ;;  %5946 = vmatprep.subr.bf16.mxu1 %v7716_v6 }
 0x1fc   : > { %6425 = vrsqrt.f32 %v723_v15  ;;  %v693_v24 = vmul.f32 0.0078125, %v645_v19  ;;  %v694_v17 = vmul.f32 0.0078125, %v647_v21 }
 0x1fd   : > { %v7703_v20 = vpack.c.bf16 %v855_v25, %v854_v60  ;;  %6427 = vrsqrt.f32 %v724_v8  ;;  %v820_v32 = vmul.f32 %v7603_v63, %v784_v23 }
 0x1fe   : > { %v6422_v29 = vpop.eup %6421  ;;  %v725_v33 = vadd.f32 1e-05, %v693_v24  ;;  %v726_v55 = vadd.f32 1e-05, %v694_v17 }
 0x1ff   : > { %v649_v44 = vpop.xlane.xlu1 %648  ;;  %1130 = vmatmul.mubr.bf16.gmra.mrb[16].mxu0 %v7703_v20  ;;  %v785_v52 = vmul.f32 %v6422_v29, %v7521_v16  ;;  %v651_v59 = vpop.xlane.xlu0 %650  ;;  %v856_v48 = vadd.f32 %v7615_v42, %v820_v32 }
 0x200   : > { %6429 = vrsqrt.f32 %v725_v33  ;;  %v695_v13 = vmul.f32 0.0078125, %v649_v44  ;;  %1139 = vmatprep.mubr.bf16.mxu0 %v10589_v28  ;;  %v696_v5 = vmul.f32 0.0078125, %v651_v59 }
 0x201   : > { %v821_v41 = vmul.f32 %v7603_v63, %v785_v52 }
 0x202   : > { %v6424_v53 = vpop.eup %6423  ;;  %v727_v56 = vadd.f32 1e-05, %v695_v13  ;;  %v728_v8 = vadd.f32 1e-05, %v696_v5 }
 0x203   : > { %v653_v9 = vpop.xlane.xlu1 %652  ;;  %v857_v2 = vadd.f32 %v7615_v42, %v821_v41  ;;  %v786_v16 = vmul.f32 %v6424_v53, %v7530_v43 }
 0x204   : > { %6431 = vrsqrt.f32 %v727_v56  ;;  %v697_v18 = vmul.f32 0.0078125, %v653_v9 }
 0x205   : > { %v7713_v4 = vpack.c.bf16 %v857_v2, %v856_v48  ;;  %6433 = vrsqrt.f32 %v726_v55  ;;  %v822_v11 = vmul.f32 %v7603_v63, %v786_v16 }
 0x206   : > { %v6426_v39 = vpop.eup %6425  ;;  %v729_v36 = vadd.f32 1e-05, %v697_v18 }
 0x207   : > { %1140 = vmatmul.mubr.bf16.gmra.mrb[20].mxu0 %v7713_v4  ;;  %v787_v10 = vmul.f32 %v6426_v39, %v7537_v30  ;;  %v6428_v34 = vpop.eup %6427  ;;  %v858_v19 = vadd.f32 %v7615_v42, %v822_v11 }
 0x208   : > { %1149 = vmatprep.mubr.bf16.mxu0 %v10589_v28  ;;  %v788_v60 = vmul.f32 %v6428_v34, %v7543_v35  ;;  %6435 = vrsqrt.f32 %v729_v36 }
 0x209   : > { %v823_v43 = vmul.f32 %v7603_v63, %v787_v10  ;;  %6437 = vrsqrt.f32 %v728_v8 }
 0x20a   : > { %v6430_v15 = vpop.eup %6429  ;;  %v824_v29 = vmul.f32 %v7603_v63, %v788_v60 }
 0x20b   : > { %v859_v21 = vadd.f32 %v7615_v42, %v823_v43  ;;  %v789_v30 = vmul.f32 %v6430_v15, %v7550_v45 }
 0x20c   : > { %v860_v45 = vadd.f32 %v7615_v42, %v824_v29 }
 0x20d   : > { %v7728_v25 = vpack.c.bf16 %v859_v21, %v858_v19  ;;  %v825_v23 = vmul.f32 %v7603_v63, %v789_v30 }
 0x20e   : > { %v6432_v24 = vpop.eup %6431 }
 0x20f   : > { %1150 = vmatmul.mubr.bf16.gmra.mrb[24].mxu0 %v7728_v25  ;;  %v6434_v33 = vpop.eup %6433  ;;  %v861_v17 = vadd.f32 %v7615_v42, %v825_v23  ;;  %v791_v35 = vmul.f32 %v6432_v24, %v7563_v40 }
 0x210   : > { %1159 = vmatprep.mubr.bf16.mxu0 %v10589_v28  ;;  %v790_v44 = vmul.f32 %v6434_v33, %v7556_v46 }
 0x211   : > { %v7738_v52 = vpack.c.bf16 %v861_v17, %v860_v45  ;;  %v827_v32 = vmul.f32 %v7603_v63, %v791_v35 }
 0x212   : > { %v6436_v13 = vpop.eup %6435  ;;  %v826_v41 = vmul.f32 %v7603_v63, %v790_v44 }
 0x213   : > { %v6438_v53 = vpop.eup %6437  ;;  %v863_v55 = vadd.f32 %v7615_v42, %v827_v32  ;;  %v793_v40 = vmul.f32 %v6436_v13, %v7573_v1 }
 0x214   : > { %v862_v56 = vadd.f32 %v7615_v42, %v826_v41  ;;  %v792_v46 = vmul.f32 %v6438_v53, %v7566_v61 }
 0x215   : > { %v829_v9 = vmul.f32 %v7603_v63, %v793_v40 }
 0x216   : > { %v7748_v59 = vpack.c.bf16 %v863_v55, %v862_v56  ;;  %v828_v48 = vmul.f32 %v7603_v63, %v792_v46 }
 0x217   : > { %1160 = vmatmul.mubr.bf16.gmra.mrb[28].mxu0 %v7738_v52  ;;  %v865_v2 = vadd.f32 %v7615_v42, %v829_v9 }
 0x218   : > { %1169 = vmatprep.mubr.bf16.mxu0 %v10589_v28  ;;  %v864_v16 = vadd.f32 %v7615_v42, %v828_v48 }
 0x21a   : > { %v7756_v18 = vpack.c.bf16 %v865_v2, %v864_v16 }
 0x21f   : > { %1170 = vmatmul.mubr.bf16.gmra.mrb[32].mxu0 %v7748_v59 }
 0x220   : > { %1179 = vmatprep.mubr.bf16.mxu0 %v10589_v28 }
 0x227   : > { %1180 = vmatmul.mubr.bf16.gmra.mrb[36].mxu0 %v7756_v18 }
 0x228   : > { %1189 = vmatprep.mubr.bf16.mxu0 %v10589_v28 }
 0x25b   : > { %v655_v61 = vpop.xlane.xlu0 %654 }
 0x25c   : > { %v698_v1 = vmul.f32 0.0078125, %v655_v61 }
 0x25e   : > { %v730_v39 = vadd.f32 1e-05, %v698_v1 }
 0x25f   : > { %v657_v5 = vpop.xlane.xlu1 %656 }
 0x260   : > { %6439 = vrsqrt.f32 %v730_v39  ;;  %v699_v10 = vmul.f32 0.0078125, %v657_v5 }
 0x262   : > { %v731_v11 = vadd.f32 1e-05, %v699_v10 }
 0x263   : > { %v659_v34 = vpop.xlane.xlu0 %658 }
 0x264   : > { %6441 = vrsqrt.f32 %v731_v11  ;;  %v700_v36 = vmul.f32 0.0078125, %v659_v34 }
 0x266   : > { %v732_v43 = vadd.f32 1e-05, %v700_v36 }
 0x267   : > { %v661_v15 = vpop.xlane.xlu1 %660 }
 0x268   : > { %6443 = vrsqrt.f32 %v732_v43  ;;  %v701_v8 = vmul.f32 0.0078125, %v661_v15 }
 0x26a   : > { %v6440_v19 = vpop.eup %6439  ;;  %v733_v21 = vadd.f32 1e-05, %v701_v8 }
 0x26b   : > { %v663_v60 = vpop.xlane.xlu0 %662  ;;  %v794_v30 = vmul.f32 %v6440_v19, %v7578_v51 }
 0x26c   : > { %6445 = vrsqrt.f32 %v733_v21  ;;  %v702_v23 = vmul.f32 0.0078125, %v663_v60 }
 0x26d   : > { %v830_v35 = vmul.f32 %v7603_v63, %v794_v30 }
 0x26e   : > { %v6442_v24 = vpop.eup %6441  ;;  %v734_v29 = vadd.f32 1e-05, %v702_v23 }
 0x26f   : > { %v665_v33 = vpop.xlane.xlu1 %664  ;;  %v795_v17 = vmul.f32 %v6442_v24, %v7591_v3  ;;  %v866_v53 = vadd.f32 %v7615_v42, %v830_v35 }
 0x270   : > { %6447 = vrsqrt.f32 %v734_v29  ;;  %v703_v45 = vmul.f32 0.0078125, %v665_v33 }
 0x271   : > { %v831_v44 = vmul.f32 %v7603_v63, %v795_v17 }
 0x272   : > { %v6444_v32 = vpop.eup %6443  ;;  %v735_v13 = vadd.f32 1e-05, %v703_v45 }
 0x273   : > { %v667_v41 = vpop.xlane.xlu0 %666  ;;  %v867_v51 = vadd.f32 %v7615_v42, %v831_v44  ;;  %v796_v55 = vmul.f32 %v6444_v32, %v7598_v47 }
 0x274   : > { %6449 = vrsqrt.f32 %v735_v13  ;;  %v704_v40 = vmul.f32 0.0078125, %v667_v41 }
 0x275   : > { %v7767_v56 = vpack.c.bf16 %v867_v51, %v866_v53  ;;  %v832_v2 = vmul.f32 %v7603_v63, %v796_v55  ;;  %v6305_v51 = vld [vmem:[%s7424_s8 + $0x38] ss:$12 sps:$4 sm:$0xff]  }
 0x276   : > { %v6446_v3 = vpop.eup %6445  ;;  %v736_v46 = vadd.f32 1e-05, %v704_v40 }
 0x277   : > { %v669_v9 = vpop.xlane.xlu1 %668  ;;  %1190 = vmatmul.mubr.bf16.gmra.mrb[40].mxu0 %v7767_v56  ;;  %v797_v48 = vmul.f32 %v6446_v3, %v7609_v14  ;;  %v868_v5 = vadd.f32 %v7615_v42, %v832_v2 }
 0x278   : > { %6451 = vrsqrt.f32 %v736_v46  ;;  %v705_v16 = vmul.f32 0.0078125, %v669_v9  ;;  %1199 = vmatprep.mubr.bf16.mxu0 %v10589_v28 }
 0x279   : > { %v833_v61 = vmul.f32 %v7603_v63, %v797_v48 }
 0x27a   : > { %v6448_v47 = vpop.eup %6447  ;;  %v737_v1 = vadd.f32 1e-05, %v705_v16 }
 0x27b   : > { %v671_v39 = vpop.xlane.xlu0 %670  ;;  %v869_v10 = vadd.f32 %v7615_v42, %v833_v61  ;;  %v798_v11 = vmul.f32 %v6448_v47, %v7621_v31  ;;  %v6307_v61 = vld [vmem:[%s7424_s8 + $0x68] ss:$12 sps:$4 sm:$0xff]  }
 0x27c   : > { %6453 = vrsqrt.f32 %v737_v1  ;;  %v706_v34 = vmul.f32 0.0078125, %v671_v39 }
 0x27d   : > { %v7777_v14 = vpack.c.bf16 %v869_v10, %v868_v5  ;;  %v834_v19 = vmul.f32 %v7603_v63, %v798_v11 }
 0x27e   : > { %v6450_v36 = vpop.eup %6449  ;;  %v738_v43 = vadd.f32 1e-05, %v706_v34 }
 0x27f   : > { %v673_v15 = vpop.xlane.xlu1 %672  ;;  %1200 = vmatmul.mubr.bf16.gmra.mrb[44].mxu0 %v7777_v14  ;;  %v799_v8 = vmul.f32 %v6450_v36, %v7631_v27  ;;  %v870_v24 = vadd.f32 %v7615_v42, %v834_v19  ;;  %v6304_v27 = vld [vmem:[%s7424_s8 + $0x20] ss:$12 sps:$4 sm:$0xff]  }
 0x280   : > { %6455 = vrsqrt.f32 %v738_v43  ;;  %v707_v21 = vmul.f32 0.0078125, %v673_v15 }
 0x281   : > { %v835_v60 = vmul.f32 %v7603_v63, %v799_v8 }
 0x282   : > { %v6452_v30 = vpop.eup %6451  ;;  %v739_v31 = vadd.f32 1e-05, %v707_v21  ;;  %v6310_v21 = vld [vmem:[%s7424_s8 + $0xb0] ss:$12 sps:$4 sm:$0xff]  }
 0x283   : > { %v675_v23 = vpop.xlane.xlu0 %674  ;;  %v871_v29 = vadd.f32 %v7615_v42, %v835_v60  ;;  %v800_v33 = vmul.f32 %v6452_v30, %v7641_v12 }
 0x284   : > { %6457 = vrsqrt.f32 %v739_v31  ;;  %v708_v17 = vmul.f32 0.0078125, %v675_v23 }
 0x285   : > { %v7786_v35 = vpack.c.bf16 %v871_v29, %v870_v24  ;;  %v836_v41 = vmul.f32 %v7603_v63, %v800_v33 }
 0x286   : > { %v6454_v45 = vpop.eup %6453  ;;  %v740_v44 = vadd.f32 1e-05, %v708_v17 }
 0x287   : > { %v677_v32 = vpop.xlane.xlu1 %676  ;;  %1210 = vmatmul.mubr.bf16.vlgmr.msra.gmra.mrb[0].mxu1 %v7786_v35  ;;  %v801_v13 = vmul.f32 %v6454_v45, %v7651_v54  ;;  %v872_v3 = vadd.f32 %v7615_v42, %v836_v41 }
 0x288   : > { %6459 = vrsqrt.f32 %v740_v44  ;;  %v709_v53 = vmul.f32 0.0078125, %v677_v32  ;;  %5947 = vmatpush3.bf16.msra.mxu1 %v7716_v6  ;;  %1219 = vmatprep.mubr.bf16.mxu1 %v10589_v28  ;;  %v6306_v6 = vld [vmem:[%s7424_s8 + $0x50] ss:$12 sps:$4 sm:$0xff]  }
 0x289   : > { %5948 = vmatprep.subr.bf16.mxu1 %v6304_v27  ;;  %v837_v12 = vmul.f32 %v7603_v63, %v801_v13 }
 0x28a   : > { %v6456_v55 = vpop.eup %6455  ;;  %v741_v40 = vadd.f32 1e-05, %v709_v53 }
 0x28b   : > { %v873_v54 = vadd.f32 %v7615_v42, %v837_v12  ;;  %v802_v46 = vmul.f32 %v6456_v55, %v7661_v50 }
 0x28c   : > { %6461 = vrsqrt.f32 %v741_v40  ;;  %5949 = vmatpush3.bf16.msra.mxu1 %v6304_v27 }
 0x28d   : > { %v7799_v9 = vpack.c.bf16 %v873_v54, %v872_v3  ;;  %5950 = vmatprep.subr.bf16.mxu1 %v6305_v51  ;;  %v838_v16 = vmul.f32 %v7603_v63, %v802_v46 }
 0x28e   : > { %v6458_v48 = vpop.eup %6457 }
 0x28f   : > { %1220 = vmatmul.mubr.bf16.gmra.mrb[4].mxu1 %v7799_v9  ;;  %v803_v2 = vmul.f32 %v6458_v48, %v7671_v7  ;;  %v874_v1 = vadd.f32 %v7615_v42, %v838_v16  ;;  %v6308_v7 = vld [vmem:[%s7424_s8 + $0x80] ss:$12 sps:$4 sm:$0xff]  }
 0x290   : > { %5951 = vmatpush3.bf16.msra.mxu1 %v6305_v51  ;;  %1229 = vmatprep.mubr.bf16.mxu1 %v10589_v28 }
 0x291   : > { %5952 = vmatprep.subr.bf16.mxu1 %v6306_v6  ;;  %v839_v50 = vmul.f32 %v7603_v63, %v803_v2 }
 0x292   : > { %v6460_v47 = vpop.eup %6459 }
 0x293   : > { %v875_v39 = vadd.f32 %v7615_v42, %v839_v50  ;;  %v804_v5 = vmul.f32 %v6460_v47, %v7681_v38  ;;  %v6309_v38 = vld [vmem:[%s7424_s8 + $0x98] ss:$12 sps:$4 sm:$0xff]  }
 0x294   : > { %5953 = vmatpush3.bf16.msra.mxu1 %v6306_v6 }
 0x295   : > { %v7811_v10 = vpack.c.bf16 %v875_v39, %v874_v1  ;;  %5954 = vmatprep.subr.bf16.mxu1 %v6307_v61  ;;  %v840_v36 = vmul.f32 %v7603_v63, %v804_v5 }
 0x296   : > { %v6462_v11 = vpop.eup %6461 }
 0x297   : > { %1230 = vmatmul.mubr.bf16.gmra.mrb[8].mxu1 %v7811_v10  ;;  %v805_v34 = vmul.f32 %v6462_v11, %v7691_v26  ;;  %v876_v15 = vadd.f32 %v7615_v42, %v840_v36 }
 0x298   : > { %5955 = vmatpush3.bf16.msra.mxu1 %v6307_v61  ;;  %1239 = vmatprep.mubr.bf16.mxu1 %v10589_v28 }
 0x299   : > { %5956 = vmatprep.subr.bf16.mxu1 %v6308_v7  ;;  %v841_v43 = vmul.f32 %v7603_v63, %v805_v34 }
 0x29b   : > { %v877_v8 = vadd.f32 %v7615_v42, %v841_v43 }
 0x29c   : > { %5957 = vmatpush3.bf16.msra.mxu1 %v6308_v7 }
 0x29d   : > { %v7822_v19 = vpack.c.bf16 %v877_v8, %v876_v15  ;;  %5958 = vmatprep.subr.bf16.mxu1 %v6309_v38 }
 0x29f   : > { %1240 = vmatmul.mubr.bf16.gmra.mrb[12].mxu1 %v7822_v19 }
 0x2a0   : > { %5959 = vmatpush3.bf16.msra.mxu1 %v6309_v38  ;;  %5962 = vmatprep.mubr.bf16.mxu1 %v7628_v57 }
 0x2a1   : > { %5960 = vmatprep.subr.bf16.mxu1 %v6310_v21 }
 0x2a4   : > { %5961 = vmatpush3.bf16.msra.mxu1 %v6310_v21 }
 0x2a7   : > { %5963 = vmatmul.mubr.bf16.vlgmr.msra.gmra.mrb[16].mxu1 %v7648_v0 }
 0x2a8   : > { %5966 = vmatprep.mubr.bf16.mxu1 %v7668_v58 }
 0x2af   : > { %5967 = vmatmul.mubr.bf16.gmra.mrb[20].mxu1 %v7688_v62 }
 0x2b0   : > { %5970 = vmatprep.mubr.bf16.mxu1 %v7703_v20 }
 0x2b2   : > { %v1091_v63 = vpop.f32.mrb[0].mxu0 }
 0x2b3   : > { %v1093_v42 = vpop.f32.mrb[1].mxu0 }
 0x2b4   : > { %v1095_v26 = vpop.f32.mrb[2].mxu0 }
 0x2b5   : > { %v1411_v60 = vpack.c.bf16 %v1095_v26, %v1091_v63  ;;  %v1097_v30 = vpop.f32.mrb[3].mxu0 }
 0x2b6   : > { %v1427_v31 = vpack.c.bf16 %v1097_v30, %v1093_v42 }
 0x2b7   : > { %5971 = vmatmul.mubr.bf16.gmra.mrb[24].mxu1 %v7713_v4 }
 0x2b8   : > { %5974 = vmatprep.mubr.bf16.mxu1 %v7728_v25  ;;  %5994 = vmatprep.subr.bf16.mxu1 %v1427_v31 }
 0x2b9   : > { %5995 = vmatpush3.bf16.xpose.msra.mxu1 %v1427_v31 }
 0x2ba   : > { %v7833_v57 = vpop.f32.mrb[4].mxu0 }
 0x2bb   : > { %v1103_v0 = vpop.f32.mrb[5].mxu0 }
 0x2bc   : > { %v7835_v58 = vpop.f32.mrb[6].mxu0 }
 0x2bd   : > { %v1412_v62 = vpack.c.bf16 %v7835_v58, %v7833_v57  ;;  %v1107_v20 = vpop.f32.mrb[7].mxu0 }
 0x2be   : > { %v1428_v23 = vpack.c.bf16 %v1107_v20, %v1103_v0 }
 0x2bf   : > { %5975 = vmatmul.mubr.bf16.gmra.mrb[28].mxu1 %v7738_v52 }
 0x2c0   : > { %5978 = vmatprep.mubr.bf16.mxu1 %v7748_v59  ;;  %5996 = vmatprep.subr.bf16.mxu1 %v1428_v23 }
 0x2c1   : > { %5997 = vmatpush3.bf16.xpose.msra.mxu1 %v1428_v23 }
 0x2c2   : > { %v7841_v4 = vpop.f32.mrb[8].mxu0 }
 0x2c3   : > { %v1113_v25 = vpop.f32.mrb[9].mxu0 }
 0x2c4   : > { %v7843_v24 = vpop.f32.mrb[10].mxu0 }
 0x2c5   : > { %v1413_v29 = vpack.c.bf16 %v7843_v24, %v7841_v4  ;;  %v1117_v33 = vpop.f32.mrb[11].mxu0 }
 0x2c6   : > { %v1429_v17 = vpack.c.bf16 %v1117_v33, %v1113_v25 }
 0x2c7   : > { %5979 = vmatmul.mubr.bf16.gmra.mrb[32].mxu1 %v7756_v18 }
 0x2c8   : > { %5982 = vmatprep.mubr.bf16.mxu1 %v7767_v56  ;;  %5998 = vmatprep.subr.bf16.mxu1 %v1429_v17 }
 0x2c9   : > { %5999 = vmatpush3.bf16.xpose.msra.mxu1 %v1429_v17 }
 0x2ca   : > { %v7849_v52 = vpop.f32.mrb[12].mxu0 }
 0x2cb   : > { %v1123_v59 = vpop.f32.mrb[13].mxu0 }
 0x2cc   : > { %v1125_v27 = vpop.f32.mrb[14].mxu0 }
 0x2cd   : > { %v1414_v45 = vpack.c.bf16 %v1125_v27, %v7849_v52  ;;  %v1127_v44 = vpop.f32.mrb[15].mxu0 }
 0x2ce   : > { %v1430_v32 = vpack.c.bf16 %v1127_v44, %v1123_v59 }
 0x2cf   : > { %5983 = vmatmul.mubr.bf16.gmra.mrb[36].mxu1 %v7777_v14 }
 0x2d0   : > { %5986 = vmatprep.mubr.bf16.mxu1 %v7786_v35  ;;  %6000 = vmatprep.subr.bf16.mxu1 %v1430_v32 }
 0x2d1   : > { %6001 = vmatpush3.bf16.xpose.msra.mxu1 %v1430_v32 }
 0x2d2   : > { %v1131_v13 = vpop.f32.mrb[16].mxu0 }
 0x2d3   : > { %v1133_v18 = vpop.f32.mrb[17].mxu0 }
 0x2d4   : > { %v1135_v41 = vpop.f32.mrb[18].mxu0 }
 0x2d5   : > { %v1415_v56 = vpack.c.bf16 %v1135_v41, %v1131_v13  ;;  %v1137_v53 = vpop.f32.mrb[19].mxu0 }
 0x2d6   : > { %v1431_v12 = vpack.c.bf16 %v1137_v53, %v1133_v18 }
 0x2d7   : > { %5987 = vmatmul.mubr.bf16.gmra.mrb[40].mxu1 %v7799_v9 }
 0x2d8   : > { %5990 = vmatprep.mubr.bf16.mxu1 %v7811_v10  ;;  %6002 = vmatprep.subr.bf16.mxu1 %v1431_v12 }
 0x2d9   : > { %6003 = vmatpush3.bf16.xpose.msra.mxu1 %v1431_v12 }
 0x2da   : > { %v1141_v51 = vpop.f32.mrb[20].mxu0 }
 0x2db   : > { %v1143_v55 = vpop.f32.mrb[21].mxu0 }
 0x2dc   : > { %v1145_v40 = vpop.f32.mrb[22].mxu0 }
 0x2dd   : > { %v1416_v14 = vpack.c.bf16 %v1145_v40, %v1141_v51  ;;  %v1147_v3 = vpop.f32.mrb[23].mxu0 }
 0x2de   : > { %v1432_v35 = vpack.c.bf16 %v1147_v3, %v1143_v55 }
 0x2df   : > { %5991 = vmatmul.mubr.bf16.gmra.mrb[44].mxu1 %v7822_v19 }
 0x2e0   : > { %6004 = vmatprep.subr.bf16.mxu1 %v1432_v35  ;;  %6010 = vmatprep.mubr.bf16.mxu1 %v1411_v60 }
 0x2e1   : > { %6005 = vmatpush3.bf16.xpose.msra.mxu1 %v1432_v35 }
 0x2e2   : > { %v1151_v54 = vpop.f32.mrb[24].mxu0 }
 0x2e3   : > { %v1153_v46 = vpop.f32.mrb[25].mxu0 }
 0x2e4   : > { %v1155_v6 = vpop.f32.mrb[26].mxu0 }
 0x2e5   : > { %v1417_v48 = vpack.c.bf16 %v1155_v6, %v1151_v54  ;;  %v1157_v9 = vpop.f32.mrb[27].mxu0 }
 0x2e6   : > { %v1433_v2 = vpack.c.bf16 %v1157_v9, %v1153_v46 }
 0x2e8   : > { %6006 = vmatprep.subr.bf16.mxu1 %v1433_v2 }
 0x2e9   : > { %6007 = vmatpush3.bf16.xpose.msra.mxu1 %v1433_v2 }
 0x2ea   : > { %v1161_v16 = vpop.f32.mrb[28].mxu0 }
 0x2eb   : > { %v1163_v50 = vpop.f32.mrb[29].mxu0 }
 0x2ec   : > { %v1165_v61 = vpop.f32.mrb[30].mxu0 }
 0x2ed   : > { %v1418_v47 = vpack.c.bf16 %v1165_v61, %v1161_v16  ;;  %v1167_v1 = vpop.f32.mrb[31].mxu0 }
 0x2ee   : > { %v1434_v39 = vpack.c.bf16 %v1167_v1, %v1163_v50 }
 0x2f0   : > { %6008 = vmatprep.subr.bf16.mxu1 %v1434_v39 }
 0x2f1   : > { %6009 = vmatpush3.bf16.xpose.msra.mxu1 %v1434_v39 }
 0x2f2   : > { %v1171_v5 = vpop.f32.mrb[32].mxu0 }
 0x2f3   : > { %v1173_v10 = vpop.f32.mrb[33].mxu0 }
 0x2f4   : > { %v1175_v7 = vpop.f32.mrb[34].mxu0 }
 0x2f5   : > { %v1419_v11 = vpack.c.bf16 %v1175_v7, %v1171_v5  ;;  %v1177_v34 = vpop.f32.mrb[35].mxu0 }
 0x2f6   : > { %v1435_v36 = vpack.c.bf16 %v1177_v34, %v1173_v10 }
 0x2f7   : > { %6042 = vmatprep.mubr.bf16.mxu0 %v1419_v11 }
 0x2f8   : > { %6011 = vmatmul.mubr.bf16.vlgmr.msra.gmra.mrb[48].mxu1 %v1412_v62  ;;  %6026 = vmatprep.subr.bf16.mxu0 %v1435_v36 }
 0x2f9   : > { %6014 = vmatprep.mubr.bf16.mxu1 %v1413_v29  ;;  %6027 = vmatpush3.bf16.xpose.msra.mxu0 %v1435_v36 }
 0x2fa   : > { %v7860_v43 = vpop.f32.mrb[36].mxu0 }
 0x2fb   : > { %v1183_v38 = vpop.f32.mrb[37].mxu0 }
 0x2fc   : > { %v7862_v15 = vpop.f32.mrb[38].mxu0 }
 0x2fd   : > { %v1420_v8 = vpack.c.bf16 %v7862_v15, %v7860_v43  ;;  %v1187_v19 = vpop.f32.mrb[39].mxu0 }
 0x2fe   : > { %v1436_v21 = vpack.c.bf16 %v1187_v19, %v1183_v38 }
 0x300   : > { %6015 = vmatmul.mubr.bf16.gmra.mrb[52].mxu1 %v1414_v45  ;;  %6028 = vmatprep.subr.bf16.mxu0 %v1436_v21 }
 0x301   : > { %6018 = vmatprep.mubr.bf16.mxu1 %v1415_v56  ;;  %6029 = vmatpush3.bf16.xpose.msra.mxu0 %v1436_v21 }
 0x308   : > { %6019 = vmatmul.mubr.bf16.gmra.mrb[56].mxu1 %v1416_v14 }
 0x309   : > { %6022 = vmatprep.mubr.bf16.mxu1 %v1417_v48 }
 0x310   : > { %6023 = vmatmul.mubr.bf16.gmra.mrb[60].mxu1 %v1418_v47 }
 0x34a   : > { %v1191_v63 = vpop.f32.mrb[40].mxu0 }
 0x34b   : > { %v1193_v42 = vpop.f32.mrb[41].mxu0 }
 0x34c   : > { %v1195_v26 = vpop.f32.mrb[42].mxu0 }
 0x34d   : > { %v1421_v60 = vpack.c.bf16 %v1195_v26, %v1191_v63  ;;  %v1197_v30 = vpop.f32.mrb[43].mxu0 }
 0x34e   : > { %v1437_v31 = vpack.c.bf16 %v1197_v30, %v1193_v42 }
 0x350   : > { %6030 = vmatprep.subr.bf16.mxu0 %v1437_v31 }
 0x351   : > { %6031 = vmatpush3.bf16.xpose.msra.mxu0 %v1437_v31 }
 0x352   : > { %v1201_v57 = vpop.f32.mrb[44].mxu0 }
 0x353   : > { %v1203_v0 = vpop.f32.mrb[45].mxu0 }
 0x354   : > { %v1205_v58 = vpop.f32.mrb[46].mxu0 }
 0x355   : > { %v1422_v62 = vpack.c.bf16 %v1205_v58, %v1201_v57  ;;  %v1207_v20 = vpop.f32.mrb[47].mxu0 }
 0x356   : > { %v1438_v23 = vpack.c.bf16 %v1207_v20, %v1203_v0 }
 0x358   : > { %6032 = vmatprep.subr.bf16.mxu0 %v1438_v23 }
 0x359   : > { %6033 = vmatpush3.bf16.xpose.msra.mxu0 %v1438_v23 }
 0x35a   : > { %v1211_v4 = vpop.f32.mrb[0].mxu1 }
 0x35b   : > { %v1213_v25 = vpop.f32.mrb[1].mxu1 }
 0x35c   : > { %v1215_v24 = vpop.f32.mrb[2].mxu1 }
 0x35d   : > { %v1423_v29 = vpack.c.bf16 %v1215_v24, %v1211_v4  ;;  %v1217_v33 = vpop.f32.mrb[3].mxu1 }
 0x35e   : > { %v1439_v17 = vpack.c.bf16 %v1217_v33, %v1213_v25 }
 0x360   : > { %6034 = vmatprep.subr.bf16.mxu0 %v1439_v17 }
 0x361   : > { %6035 = vmatpush3.bf16.xpose.msra.mxu0 %v1439_v17 }
 0x362   : > { %v1221_v52 = vpop.f32.mrb[4].mxu1 }
 0x363   : > { %v1223_v59 = vpop.f32.mrb[5].mxu1 }
 0x364   : > { %v1225_v27 = vpop.f32.mrb[6].mxu1 }
 0x365   : > { %v1424_v45 = vpack.c.bf16 %v1225_v27, %v1221_v52  ;;  %v1227_v44 = vpop.f32.mrb[7].mxu1 }
 0x366   : > { %v1440_v32 = vpack.c.bf16 %v1227_v44, %v1223_v59 }
 0x368   : > { %6036 = vmatprep.subr.bf16.mxu0 %v1440_v32 }
 0x369   : > { %6037 = vmatpush3.bf16.xpose.msra.mxu0 %v1440_v32 }
 0x36a   : > { %v1231_v13 = vpop.f32.mrb[8].mxu1 }
 0x36b   : > { %v1233_v18 = vpop.f32.mrb[9].mxu1 }
 0x36c   : > { %v1235_v41 = vpop.f32.mrb[10].mxu1 }
 0x36d   : > { %v1425_v56 = vpack.c.bf16 %v1235_v41, %v1231_v13  ;;  %v1237_v53 = vpop.f32.mrb[11].mxu1 }
 0x36e   : > { %v1441_v12 = vpack.c.bf16 %v1237_v53, %v1233_v18 }
 0x370   : > { %6038 = vmatprep.subr.bf16.mxu0 %v1441_v12 }
 0x371   : > { %6039 = vmatpush3.bf16.xpose.msra.mxu0 %v1441_v12 }
 0x372   : > { %v1241_v51 = vpop.f32.mrb[12].mxu1 }
 0x373   : > { %v1243_v55 = vpop.f32.mrb[13].mxu1 }
 0x374   : > { %v1245_v40 = vpop.f32.mrb[14].mxu1 }
 0x375   : > { %v1426_v14 = vpack.c.bf16 %v1245_v40, %v1241_v51  ;;  %v1247_v3 = vpop.f32.mrb[15].mxu1 }
 0x376   : > { %v1442_v35 = vpack.c.bf16 %v1247_v3, %v1243_v55 }
 0x378   : > { %6040 = vmatprep.subr.bf16.mxu0 %v1442_v35 }
 0x379   : > { %6041 = vmatpush3.bf16.xpose.msra.mxu0 %v1442_v35 }
 0x37a   : > { %v5964_v54 = vpop.f32.mrb[16].mxu1 }
 0x37b   : > { %v1284_v46 = vpop.f32.mrb[17].mxu1 }
 0x37c   : > { %v5965_v6 = vpop.f32.mrb[18].mxu1 }
 0x37d   : > { %v1444_v48 = vpack.c.bf16 %v5965_v6, %v5964_v54  ;;  %v1287_v9 = vpop.f32.mrb[19].mxu1 }
 0x37e   : > { %v1443_v2 = vpack.c.bf16 %v1287_v9, %v1284_v46 }
 0x380   : > { %6043 = vmatmul.mubr.bf16.vlgmr.msra.gmra.mrb[48].mxu0 %v1420_v8  ;;  %6058 = vmatprep.subr.bf16.mxu1 %v1443_v2 }
 0x381   : > { %6046 = vmatprep.mubr.bf16.mxu0 %v1421_v60  ;;  %6059 = vmatpush3.bf16.msra.mxu1 %v1443_v2 }
 0x382   : > { %v5968_v16 = vpop.f32.mrb[20].mxu1  ;;  %6060 = vmatprep.subr.bf16.mxu1 %v1444_v48 }
 0x383   : > { %v1300_v50 = vpop.f32.mrb[21].mxu1 }
 0x384   : > { %v5969_v61 = vpop.f32.mrb[22].mxu1 }
 0x385   : > { %v1446_v47 = vpack.c.bf16 %v5969_v61, %v5968_v16  ;;  %v1303_v1 = vpop.f32.mrb[23].mxu1  ;;  %6061 = vmatpush3.bf16.msra.mxu1 %v1444_v48 }
 0x386   : > { %v1445_v39 = vpack.c.bf16 %v1303_v1, %v1300_v50 }
 0x388   : > { %6047 = vmatmul.mubr.bf16.gmra.mrb[52].mxu0 %v1422_v62  ;;  %6062 = vmatprep.subr.bf16.mxu1 %v1445_v39 }
 0x389   : > { %6050 = vmatprep.mubr.bf16.mxu0 %v1423_v29  ;;  %6063 = vmatpush3.bf16.msra.mxu1 %v1445_v39 }
 0x38a   : > { %v5972_v5 = vpop.f32.mrb[24].mxu1  ;;  %6064 = vmatprep.subr.bf16.mxu1 %v1446_v47 }
 0x38b   : > { %v1316_v10 = vpop.f32.mrb[25].mxu1 }
 0x38c   : > { %v5973_v7 = vpop.f32.mrb[26].mxu1 }
 0x38d   : > { %v1448_v11 = vpack.c.bf16 %v5973_v7, %v5972_v5  ;;  %v1319_v34 = vpop.f32.mrb[27].mxu1  ;;  %6065 = vmatpush3.bf16.msra.mxu1 %v1446_v47 }
 0x38e   : > { %v1447_v36 = vpack.c.bf16 %v1319_v34, %v1316_v10 }
 0x390   : > { %6051 = vmatmul.mubr.bf16.gmra.mrb[56].mxu0 %v1424_v45  ;;  %6066 = vmatprep.subr.bf16.mxu1 %v1447_v36 }
 0x391   : > { %6054 = vmatprep.mubr.bf16.mxu0 %v1425_v56  ;;  %6067 = vmatpush3.bf16.msra.mxu1 %v1447_v36 }
 0x392   : > { %v5976_v43 = vpop.f32.mrb[28].mxu1  ;;  %6068 = vmatprep.subr.bf16.mxu1 %v1448_v11 }
 0x393   : > { %v1332_v38 = vpop.f32.mrb[29].mxu1 }
 0x394   : > { %v5977_v15 = vpop.f32.mrb[30].mxu1 }
 0x395   : > { %v1450_v8 = vpack.c.bf16 %v5977_v15, %v5976_v43  ;;  %v1335_v19 = vpop.f32.mrb[31].mxu1  ;;  %6069 = vmatpush3.bf16.msra.mxu1 %v1448_v11 }
 0x396   : > { %v1449_v21 = vpack.c.bf16 %v1335_v19, %v1332_v38 }
 0x398   : > { %6055 = vmatmul.mubr.bf16.gmra.mrb[60].mxu0 %v1426_v14  ;;  %6070 = vmatprep.subr.bf16.mxu1 %v1449_v21 }
 0x399   : > { %6071 = vmatpush3.bf16.msra.mxu1 %v1449_v21 }
 0x39a   : > { %v5980_v63 = vpop.f32.mrb[32].mxu1  ;;  %6072 = vmatprep.subr.bf16.mxu1 %v1450_v8 }
 0x39b   : > { %v1348_v42 = vpop.f32.mrb[33].mxu1 }
 0x39c   : > { %v5981_v26 = vpop.f32.mrb[34].mxu1 }
 0x39d   : > { %v7869_v60 = vpack.c.bf16 %v5981_v26, %v5980_v63  ;;  %v1351_v30 = vpop.f32.mrb[35].mxu1  ;;  %6073 = vmatpush3.bf16.msra.mxu1 %v1450_v8 }
 0x39e   : > { %v7871_v31 = vpack.c.bf16 %v1351_v30, %v1348_v42 }
 0x3a0   : > { %6090 = vmatprep.subr.bf16.mxu1 %v7871_v31 }
 0x3a2   : > { %v5984_v57 = vpop.f32.mrb[36].mxu1 }
 0x3a3   : > { %v1364_v0 = vpop.f32.mrb[37].mxu1 }
 0x3a4   : > { %v5985_v58 = vpop.f32.mrb[38].mxu1 }
 0x3a5   : > { %v7874_v62 = vpack.c.bf16 %v5985_v58, %v5984_v57  ;;  %v1367_v20 = vpop.f32.mrb[39].mxu1 }
 0x3a6   : > { %v7876_v23 = vpack.c.bf16 %v1367_v20, %v1364_v0 }
 0x3aa   : > { %v5988_v4 = vpop.f32.mrb[40].mxu1 }
 0x3ab   : > { %v1380_v25 = vpop.f32.mrb[41].mxu1 }
 0x3ac   : > { %v5989_v24 = vpop.f32.mrb[42].mxu1 }
 0x3ad   : > { %v7878_v29 = vpack.c.bf16 %v5989_v24, %v5988_v4  ;;  %v1383_v33 = vpop.f32.mrb[43].mxu1 }
 0x3ae   : > { %v7880_v17 = vpack.c.bf16 %v1383_v33, %v1380_v25 }
 0x3b2   : > { %v5992_v52 = vpop.f32.mrb[44].mxu1 }
 0x3b3   : > { %v1396_v59 = vpop.f32.mrb[45].mxu1 }
 0x3b4   : > { %v5993_v27 = vpop.f32.mrb[46].mxu1 }
 0x3b5   : > { %v7882_v45 = vpack.c.bf16 %v5993_v27, %v5992_v52  ;;  %v1399_v44 = vpop.f32.mrb[47].mxu1 }
 0x3b6   : > { %v7884_v32 = vpack.c.bf16 %v1399_v44, %v1396_v59 }
 0x3cb   : > { %v6012_v13 = vpop.f32.mrb[48].mxu1 }
 0x3cc   : > { %v1493_v18 = vpop.f32.mrb[49].mxu1 }
 0x3cd   : > { %1653 = vmax.xlane.f32.xlu0 %v1493_v18  ;;  %v6013_v41 = vpop.f32.mrb[50].mxu1 }
 0x3ce   : > { %v1496_v56 = vpop.f32.mrb[51].mxu1 }
 0x3cf   : > { %1655 = vmax.xlane.f32.xlu1 %v1496_v56 }
 0x3d1   : > { %1657 = vmax.xlane.f32.xlu0 %v6012_v13 }
 0x3d3   : > { %1659 = vmax.xlane.f32.xlu1 %v6013_v41  ;;  %v7886_v53 = vpop.f32.mrb[52].mxu1 }
 0x3d4   : > { %v7888_v12 = vpop.f32.mrb[53].mxu1 }
 0x3d5   : > { %1661 = vmax.xlane.f32.xlu0 %v7888_v12  ;;  %v7891_v51 = vpop.f32.mrb[54].mxu1 }
 0x3d6   : > { %v7893_v55 = vpop.f32.mrb[55].mxu1 }
 0x3d7   : > { %1663 = vmax.xlane.f32.xlu1 %v7893_v55 }
 0x3d9   : > { %1665 = vmax.xlane.f32.xlu0 %v7886_v53 }
 0x3db   : > { %1667 = vmax.xlane.f32.xlu1 %v7891_v51  ;;  %v7898_v40 = vpop.f32.mrb[56].mxu1 }
 0x3dc   : > { %v7900_v14 = vpop.f32.mrb[57].mxu1 }
 0x3dd   : > { %1669 = vmax.xlane.f32.xlu0 %v7900_v14  ;;  %v7903_v3 = vpop.f32.mrb[58].mxu1 }
 0x3de   : > { %v7905_v35 = vpop.f32.mrb[59].mxu1 }
 0x3df   : > { %1671 = vmax.xlane.f32.xlu1 %v7905_v35 }
 0x3e1   : > { %1673 = vmax.xlane.f32.xlu0 %v7898_v40 }
 0x3e3   : > { %1675 = vmax.xlane.f32.xlu1 %v7903_v3  ;;  %v7910_v54 = vpop.f32.mrb[60].mxu1 }
 0x3e4   : > { %v7912_v46 = vpop.f32.mrb[61].mxu1 }
 0x3e5   : > { %1677 = vmax.xlane.f32.xlu0 %v7912_v46  ;;  %v7915_v6 = vpop.f32.mrb[62].mxu1 }
 0x3e6   : > { %v7917_v48 = vpop.f32.mrb[63].mxu1 }
 0x3e7   : > { %1679 = vmax.xlane.f32.xlu1 %v7917_v48 }
 0x3e9   : > { %1681 = vmax.xlane.f32.xlu0 %v7910_v54 }
 0x3eb   : > { %1683 = vmax.xlane.f32.xlu1 %v7915_v6 }
 0x453   : > { %v7922_v9 = vpop.f32.mrb[48].mxu0 }
 0x454   : > { %v7924_v2 = vpop.f32.mrb[49].mxu0 }
 0x455   : > { %v7926_v16 = vpop.f32.mrb[50].mxu0  ;;  %1685 = vmax.xlane.f32.xlu0 %v7924_v2 }
 0x456   : > { %v7929_v50 = vpop.f32.mrb[51].mxu0 }
 0x457   : > { %1687 = vmax.xlane.f32.xlu1 %v7929_v50 }
 0x459   : > { %1689 = vmax.xlane.f32.xlu0 %v7922_v9 }
 0x45a   : > { %v1654_v61 = vpop.xlane.xlu0 %1653 }
 0x45b   : > { %v1717_v47 = vsub.f32 %v1493_v18, %v1654_v61  ;;  %v7933_v1 = vpop.f32.mrb[52].mxu0  ;;  %1691 = vmax.xlane.f32.xlu1 %v7926_v16 }
 0x45c   : > { %v7936_v39 = vpop.f32.mrb[53].mxu0  ;;  %v1656_v5 = vpop.xlane.xlu1 %1655 }
 0x45d   : > { %v1749_v10 = vmul.f32 1.442695, %v1717_v47  ;;  %v1718_v7 = vsub.f32 %v1496_v56, %v1656_v5  ;;  %v7938_v11 = vpop.f32.mrb[54].mxu0  ;;  %1697 = vmax.xlane.f32.xlu0 %v7933_v1 }
 0x45e   : > { %v7941_v34 = vpop.f32.mrb[55].mxu0  ;;  %v1658_v36 = vpop.xlane.xlu0 %1657 }
 0x45f   : > { %6463 = vpow2.f32 %v1749_v10  ;;  %v1751_v43 = vmul.f32 1.442695, %v1718_v7  ;;  %v1719_v38 = vsub.f32 %v6012_v13, %v1658_v36  ;;  %1699 = vmax.xlane.f32.xlu1 %v7938_v11 }
 0x460   : > { %v1660_v15 = vpop.xlane.xlu1 %1659 }
 0x461   : > { %6465 = vpow2.f32 %v1751_v43  ;;  %v1753_v8 = vmul.f32 1.442695, %v1719_v38  ;;  %v1720_v19 = vsub.f32 %v6013_v41, %v1660_v15  ;;  %1693 = vmax.xlane.f32.xlu0 %v7936_v39 }
 0x462   : > { %v1662_v21 = vpop.xlane.xlu0 %1661 }
 0x463   : > { %6467 = vpow2.f32 %v1753_v8  ;;  %v1755_v63 = vmul.f32 1.442695, %v1720_v19  ;;  %v7945_v42 = vpop.f32.mrb[56].mxu0  ;;  %1695 = vmax.xlane.f32.xlu1 %v7941_v34  ;;  %v1721_v58 = vsub.f32 %v7888_v12, %v1662_v21 }
 0x464   : > { %v7948_v26 = vpop.f32.mrb[57].mxu0  ;;  %v1664_v30 = vpop.xlane.xlu1 %1663 }
 0x465   : > { %6469 = vpow2.f32 %v1755_v63  ;;  %v7950_v57 = vpop.f32.mrb[58].mxu0  ;;  %v1722_v25 = vsub.f32 %v7893_v55, %v1664_v30  ;;  %v1757_v52 = vmul.f32 1.442695, %v1721_v58 }
 0x466   : > { %v7952_v0 = vpop.f32.mrb[59].mxu0  ;;  %v1666_v20 = vpop.xlane.xlu0 %1665 }
 0x467   : > { %v1723_v59 = vsub.f32 %v7886_v53, %v1666_v20  ;;  %v1759_v18 = vmul.f32 1.442695, %v1722_v25  ;;  %6471 = vpow2.f32 %v1757_v52 }
 0x468   : > { %v1668_v24 = vpop.xlane.xlu1 %1667 }
 0x469   : > { %v7955_v4 = vpop.eup %6463  ;;  %v1724_v41 = vsub.f32 %v7891_v51, %v1668_v24  ;;  %v1761_v53 = vmul.f32 1.442695, %v1723_v59  ;;  %6473 = vpow2.f32 %v1759_v18 }
 0x46a   : > { %1813 = vadd.xlane.f32.xlu0 %v7955_v4  ;;  %v1670_v12 = vpop.xlane.xlu0 %1669 }
 0x46b   : > { %v7959_v33 = vpop.eup %6465  ;;  %v7962_v27 = vpop.f32.mrb[60].mxu0  ;;  %v1763_v5 = vmul.f32 1.442695, %v1724_v41  ;;  %6475 = vpow2.f32 %v1761_v53  ;;  %v1725_v7 = vsub.f32 %v7900_v14, %v1670_v12 }
 0x46c   : > { %v7964_v44 = vpop.f32.mrb[61].mxu0  ;;  %1815 = vadd.xlane.f32.xlu1 %v7959_v33  ;;  %v1672_v47 = vpop.xlane.xlu1 %1671 }
 0x46d   : > { %v7967_v13 = vpop.eup %6467  ;;  %v7970_v56 = vpop.f32.mrb[62].mxu0  ;;  %6477 = vpow2.f32 %v1763_v5  ;;  %v1726_v43 = vsub.f32 %v7905_v35, %v1672_v47  ;;  %v1765_v8 = vmul.f32 1.442695, %v1725_v7 }
 0x46e   : > { %v7972_v55 = vpop.f32.mrb[63].mxu0  ;;  %1817 = vadd.xlane.f32.xlu0 %v7967_v13  ;;  %v1674_v51 = vpop.xlane.xlu0 %1673 }
 0x46f   : > { %v7975_v61 = vpop.eup %6469  ;;  %v1727_v19 = vsub.f32 %v7898_v40, %v1674_v51  ;;  %v1767_v14 = vmul.f32 1.442695, %v1726_v43  ;;  %6479 = vpow2.f32 %v1765_v8 }
 0x470   : > { %1819 = vadd.xlane.f32.xlu1 %v7975_v61  ;;  %v1676_v10 = vpop.xlane.xlu1 %1675 }
 0x471   : > { %v7983_v36 = vpop.eup %6471  ;;  %v1728_v30 = vsub.f32 %v7903_v3, %v1676_v10  ;;  %v1769_v35 = vmul.f32 1.442695, %v1727_v19  ;;  %6481 = vpow2.f32 %v1767_v14 }
 0x472   : > { %1701 = vmax.xlane.f32.xlu0 %v7948_v26  ;;  %v1678_v38 = vpop.xlane.xlu0 %1677 }
 0x473   : > { %v7987_v15 = vpop.eup %6473  ;;  %v1729_v20 = vsub.f32 %v7912_v46, %v1678_v38  ;;  %v1771_v40 = vmul.f32 1.442695, %v1728_v30  ;;  %6483 = vpow2.f32 %v1769_v35 }
 0x474   : > { %1703 = vmax.xlane.f32.xlu1 %v7952_v0  ;;  %v1680_v21 = vpop.xlane.xlu1 %1679 }
 0x475   : > { %v7991_v63 = vpop.eup %6475  ;;  %v1730_v24 = vsub.f32 %v7917_v48, %v1680_v21  ;;  %v1773_v3 = vmul.f32 1.442695, %v1729_v20  ;;  %6485 = vpow2.f32 %v1771_v40 }
 0x476   : > { %1705 = vmax.xlane.f32.xlu0 %v7945_v42  ;;  %v1682_v25 = vpop.xlane.xlu0 %1681 }
 0x477   : > { %v7995_v58 = vpop.eup %6477  ;;  %v1731_v59 = vsub.f32 %v7910_v54, %v1682_v25  ;;  %v1775_v18 = vmul.f32 1.442695, %v1730_v24  ;;  %6487 = vpow2.f32 %v1773_v3 }
 0x478   : > { %1707 = vmax.xlane.f32.xlu1 %v7950_v57  ;;  %v1684_v52 = vpop.xlane.xlu1 %1683 }
 0x479   : > { %v1732_v46 = vsub.f32 %v7915_v6, %v1684_v52  ;;  %v1777_v41 = vmul.f32 1.442695, %v1731_v59  ;;  %v8006_v48 = vpop.eup %6479  ;;  %6489 = vpow2.f32 %v1775_v18 }
 0x47a   : > { %1821 = vadd.xlane.f32.xlu0 %v7983_v36 }
 0x47b   : > { %v1779_v12 = vmul.f32 1.442695, %v1732_v46  ;;  %v8009_v53 = vpop.eup %6481  ;;  %6491 = vpow2.f32 %v1777_v41 }
 0x47c   : > { %1823 = vadd.xlane.f32.xlu1 %v7987_v15 }
 0x47d   : > { %v8012_v54 = vpop.eup %6483  ;;  %6493 = vpow2.f32 %v1779_v12 }
 0x47e   : > { %1825 = vadd.xlane.f32.xlu0 %v7991_v63 }
 0x47f   : > { %v8015_v6 = vpop.eup %6485 }
 0x480   : > { %1827 = vadd.xlane.f32.xlu1 %v7995_v58 }
 0x481   : > { %v8018_v47 = vpop.eup %6487 }
 0x482   : > { %1709 = vmax.xlane.f32.xlu0 %v7964_v44 }
 0x483   : > { %v8021_v5 = vpop.eup %6489 }
 0x484   : > { %1711 = vmax.xlane.f32.xlu1 %v7972_v55 }
 0x485   : > { %v8024_v51 = vpop.eup %6491 }
 0x486   : > { %1713 = vmax.xlane.f32.xlu0 %v7962_v27 }
 0x487   : > { %v8027_v10 = vpop.eup %6493 }
 0x488   : > { %1715 = vmax.xlane.f32.xlu1 %v7970_v56 }
 0x48a   : > { %1829 = vadd.xlane.f32.xlu0 %v8006_v48 }
 0x48c   : > { %1831 = vadd.xlane.f32.xlu1 %v8009_v53 }
 0x48e   : > { %1833 = vadd.xlane.f32.xlu0 %v8012_v54 }
 0x490   : > { %1835 = vadd.xlane.f32.xlu1 %v8015_v6 }
 0x492   : > { %1837 = vadd.xlane.f32.xlu0 %v8018_v47 }
 0x494   : > { %1839 = vadd.xlane.f32.xlu1 %v8021_v5 }
 0x496   : > { %1841 = vadd.xlane.f32.xlu0 %v8024_v51 }
 0x498   : > { %1843 = vadd.xlane.f32.xlu1 %v8027_v10 }
 0x4e2   : > { %v1686_v7 = vpop.xlane.xlu0 %1685 }
 0x4e3   : > { %v1733_v43 = vsub.f32 %v7924_v2, %v1686_v7 }
 0x4e4   : > { %v1688_v38 = vpop.xlane.xlu1 %1687 }
 0x4e5   : > { %v1781_v8 = vmul.f32 1.442695, %v1733_v43  ;;  %v1734_v19 = vsub.f32 %v7929_v50, %v1688_v38 }
 0x4e6   : > { %v1690_v21 = vpop.xlane.xlu0 %1689 }
 0x4e7   : > { %6495 = vpow2.f32 %v1781_v8  ;;  %v1783_v14 = vmul.f32 1.442695, %v1734_v19  ;;  %v1735_v30 = vsub.f32 %v7922_v9, %v1690_v21 }
 0x4e8   : > { %v1692_v35 = vpop.xlane.xlu1 %1691 }
 0x4e9   : > { %6497 = vpow2.f32 %v1783_v14  ;;  %v1785_v20 = vmul.f32 1.442695, %v1735_v30  ;;  %v1736_v25 = vsub.f32 %v7926_v16, %v1692_v35 }
 0x4ea   : > { %v1698_v40 = vpop.xlane.xlu0 %1697 }
 0x4eb   : > { %6499 = vpow2.f32 %v1785_v20  ;;  %v1787_v24 = vmul.f32 1.442695, %v1736_v25  ;;  %v1739_v3 = vsub.f32 %v7933_v1, %v1698_v40 }
 0x4ec   : > { %v1700_v52 = vpop.xlane.xlu1 %1699 }
 0x4ed   : > { %6501 = vpow2.f32 %v1787_v24  ;;  %v1740_v9 = vsub.f32 %v7938_v11, %v1700_v52  ;;  %v1793_v12 = vmul.f32 1.442695, %v1739_v3 }
 0x4ee   : > { %v1694_v2 = vpop.xlane.xlu0 %1693 }
 0x4ef   : > { %v1737_v50 = vsub.f32 %v7936_v39, %v1694_v2  ;;  %v1795_v39 = vmul.f32 1.442695, %v1740_v9 }
 0x4f0   : > { %v1696_v59 = vpop.xlane.xlu1 %1695 }
 0x4f1   : > { %v8036_v18 = vpop.eup %6495  ;;  %v1789_v46 = vmul.f32 1.442695, %v1737_v50  ;;  %v1738_v41 = vsub.f32 %v7941_v34, %v1696_v59 }
 0x4f2   : > { %1845 = vadd.xlane.f32.xlu0 %v8036_v18 }
 0x4f3   : > { %v8041_v16 = vpop.eup %6497  ;;  %6503 = vpow2.f32 %v1789_v46  ;;  %v1791_v7 = vmul.f32 1.442695, %v1738_v41 }
 0x4f4   : > { %1847 = vadd.xlane.f32.xlu1 %v8041_v16 }
 0x4f5   : > { %v8044_v1 = vpop.eup %6499  ;;  %6505 = vpow2.f32 %v1791_v7 }
 0x4f6   : > { %1849 = vadd.xlane.f32.xlu0 %v8044_v1  ;;  %6507 = vpow2.f32 %v1793_v12 }
 0x4f7   : > { %v8047_v43 = vpop.eup %6501  ;;  %v1814_v11 = vpop.xlane.xlu0 %1813 }
 0x4f8   : > { %6509 = vrcp.f32 %v1814_v11  ;;  %1851 = vadd.xlane.f32.xlu1 %v8047_v43 }
 0x4f9   : > { %6511 = vpow2.f32 %v1795_v39  ;;  %v1816_v34 = vpop.xlane.xlu1 %1815 }
 0x4fa   : > { %6513 = vrcp.f32 %v1816_v34 }
 0x4fb   : > { %v1818_v38 = vpop.xlane.xlu0 %1817 }
 0x4fc   : > { %6515 = vrcp.f32 %v1818_v38 }
 0x4fd   : > { %v8050_v8 = vpop.eup %6503  ;;  %v1820_v19 = vpop.xlane.xlu1 %1819 }
 0x4fe   : > { %6517 = vrcp.f32 %v1820_v19  ;;  %1853 = vadd.xlane.f32.xlu0 %v8050_v8 }
 0x4ff   : > { %v8053_v21 = vpop.eup %6505  ;;  %v1702_v14 = vpop.xlane.xlu0 %1701 }
 0x500   : > { %v1741_v30 = vsub.f32 %v7948_v26, %v1702_v14  ;;  %1855 = vadd.xlane.f32.xlu1 %v8053_v21  ;;  %v8057_v35 = vpop.eup %6507 }
 0x501   : > { %v1704_v20 = vpop.xlane.xlu1 %1703 }
 0x502   : > { %v6510_v25 = vpop.eup %6509  ;;  %v1797_v40 = vmul.f32 1.442695, %v1741_v30  ;;  %v1742_v24 = vsub.f32 %v7952_v0, %v1704_v20  ;;  %1857 = vadd.xlane.f32.xlu0 %v8057_v35 }
 0x503   : > { %v8061_v52 = vpop.eup %6511  ;;  %v1706_v2 = vpop.xlane.xlu0 %1705  ;;  %v1909_v9 = vmul.f32 %v6510_v25, %v7955_v4 }
 0x504   : > { %v6514_v3 = vpop.eup %6513  ;;  %6519 = vpow2.f32 %v1797_v40  ;;  %v1799_v50 = vmul.f32 1.442695, %v1742_v24  ;;  %v1743_v59 = vsub.f32 %v7945_v42, %v1706_v2  ;;  %1859 = vadd.xlane.f32.xlu1 %v8061_v52 }
 0x505   : > { %v1708_v26 = vpop.xlane.xlu1 %1707  ;;  %v1910_v46 = vmul.f32 %v6514_v3, %v7959_v33 }
 0x506   : > { %v6516_v41 = vpop.eup %6515  ;;  %6521 = vpow2.f32 %v1799_v50  ;;  %v1801_v0 = vmul.f32 1.442695, %v1743_v59  ;;  %v1744_v12 = vsub.f32 %v7950_v57, %v1708_v26 }
 0x507   : > { %v1822_v7 = vpop.xlane.xlu0 %1821  ;;  %v1941_v39 = vpack.c.bf16 %v1910_v46, %v1909_v9  ;;  %v1911_v38 = vmul.f32 %v6516_v41, %v7967_v13 }
 0x508   : > { %v6518_v11 = vpop.eup %6517  ;;  %6523 = vpow2.f32 %v1801_v0  ;;  %v1803_v34 = vmul.f32 1.442695, %v1744_v12 }
 0x509   : > { %v1912_v42 = vmul.f32 %v6518_v11, %v7975_v61  ;;  %6525 = vrcp.f32 %v1822_v7  ;;  %6074 = vmatprep.mubr.bf16.mxu1 %v1941_v39  ;;  %v1824_v19 = vpop.xlane.xlu1 %1823 }
 0x50a   : > { %6527 = vpow2.f32 %v1803_v34 }
 0x50b   : > { %6529 = vrcp.f32 %v1824_v19  ;;  %v1826_v4 = vpop.xlane.xlu0 %1825  ;;  %v1942_v33 = vpack.c.bf16 %v1912_v42, %v1911_v38 }
 0x50c   : > { %6531 = vrcp.f32 %v1826_v4 }
 0x50d   : > { %6075 = vmatmul.mubr.bf16.vlgmr.msra.gmra.mrb[64].mxu1 %v1942_v33  ;;  %v1828_v14 = vpop.xlane.xlu1 %1827 }
 0x50e   : > { %v8070_v57 = vpop.eup %6519  ;;  %6091 = vmatpush3.bf16.msra.mxu1 %v7871_v31  ;;  %6533 = vrcp.f32 %v1828_v14 }
 0x50f   : > { %6092 = vmatprep.subr.bf16.mxu1 %v7869_v60  ;;  %1861 = vadd.xlane.f32.xlu0 %v8070_v57  ;;  %v1710_v13 = vpop.xlane.xlu0 %1709 }
 0x510   : > { %v8075_v61 = vpop.eup %6521  ;;  %v1745_v30 = vsub.f32 %v7964_v44, %v1710_v13 }
 0x511   : > { %1863 = vadd.xlane.f32.xlu1 %v8075_v61  ;;  %v1712_v20 = vpop.xlane.xlu1 %1711 }
 0x512   : > { %v8079_v25 = vpop.eup %6523  ;;  %v1805_v40 = vmul.f32 1.442695, %v1745_v30  ;;  %6093 = vmatpush3.bf16.msra.mxu1 %v7869_v60  ;;  %v1746_v31 = vsub.f32 %v7972_v55, %v1712_v20 }
 0x513   : > { %v6526_v24 = vpop.eup %6525  ;;  %6094 = vmatprep.subr.bf16.mxu1 %v7876_v23  ;;  %1865 = vadd.xlane.f32.xlu0 %v8079_v25  ;;  %v1714_v2 = vpop.xlane.xlu0 %1713 }
 0x514   : > { %v8085_v3 = vpop.eup %6527  ;;  %6535 = vpow2.f32 %v1805_v40  ;;  %v1807_v44 = vmul.f32 1.442695, %v1746_v31  ;;  %v1747_v50 = vsub.f32 %v7962_v27, %v1714_v2  ;;  %v1913_v60 = vmul.f32 %v6526_v24, %v7983_v36 }
 0x515   : > { %v6530_v59 = vpop.eup %6529  ;;  %1867 = vadd.xlane.f32.xlu1 %v8085_v3  ;;  %v1716_v26 = vpop.xlane.xlu1 %1715 }
 0x516   : > { %v6532_v9 = vpop.eup %6531  ;;  %6537 = vpow2.f32 %v1807_v44  ;;  %v1809_v55 = vmul.f32 1.442695, %v1747_v50  ;;  %6095 = vmatpush3.bf16.msra.mxu1 %v7876_v23  ;;  %v1748_v46 = vsub.f32 %v7970_v56, %v1716_v26  ;;  %v1914_v41 = vmul.f32 %v6530_v59, %v7987_v15 }
 0x517   : > { %6096 = vmatprep.subr.bf16.mxu1 %v7874_v62  ;;  %v1830_v0 = vpop.xlane.xlu0 %1829  ;;  %v1915_v36 = vmul.f32 %v6532_v9, %v7991_v63  ;;  %v6315_v9 = vld [vmem:[%s2169_s13 + $0x20] sm:$0xff]  }
 0x518   : > { %v6534_v12 = vpop.eup %6533  ;;  %6539 = vpow2.f32 %v1809_v55  ;;  %v1811_v27 = vmul.f32 1.442695, %v1748_v46  ;;  %v1943_v7 = vpack.c.bf16 %v1914_v41, %v1913_v60  ;;  %v6312_v60 = vld [vmem:[%s2169_s13 + $0x8] sm:$0xff]   ;;  %v6318_v55 = vld [vmem:[%s2169_s13 + $0x38] sm:$0xff]  }
 0x519   : > { %6541 = vrcp.f32 %v1830_v0  ;;  %v1832_v39 = vpop.xlane.xlu1 %1831  ;;  %v1916_v11 = vmul.f32 %v6534_v12, %v7995_v58 }
 0x51a   : > { %6543 = vpow2.f32 %v1811_v27  ;;  %6078 = vmatprep.mubr.bf16.mxu1 %v1943_v7  ;;  %6097 = vmatpush3.bf16.msra.mxu1 %v7874_v62 }
 0x51b   : > { %6545 = vrcp.f32 %v1832_v39  ;;  %6098 = vmatprep.subr.bf16.mxu1 %v7880_v17  ;;  %v1834_v23 = vpop.xlane.xlu0 %1833  ;;  %v1944_v56 = vpack.c.bf16 %v1916_v11, %v1915_v36 }
 0x51c   : > { %6547 = vrcp.f32 %v1834_v23 }
 0x51d   : > { %6079 = vmatmul.mubr.bf16.gmra.mrb[68].mxu1 %v1944_v56  ;;  %v1836_v15 = vpop.xlane.xlu1 %1835 }
 0x51e   : > { %v8098_v34 = vpop.eup %6535  ;;  %6099 = vmatpush3.bf16.msra.mxu1 %v7880_v17  ;;  %6549 = vrcp.f32 %v1836_v15 }
 0x51f   : > { %6100 = vmatprep.subr.bf16.mxu1 %v7878_v29  ;;  %1869 = vadd.xlane.f32.xlu0 %v8098_v34  ;;  %v1838_v63 = vpop.xlane.xlu0 %1837 }
 0x520   : > { %v8103_v58 = vpop.eup %6537  ;;  %6551 = vrcp.f32 %v1838_v63 }
 0x521   : > { %1871 = vadd.xlane.f32.xlu1 %v8103_v58  ;;  %v1840_v62 = vpop.xlane.xlu1 %1839 }
 0x522   : > { %v8106_v38 = vpop.eup %6539  ;;  %6101 = vmatpush3.bf16.msra.mxu1 %v7878_v29  ;;  %6553 = vrcp.f32 %v1840_v62 }
 0x523   : > { %v6542_v42 = vpop.eup %6541  ;;  %6102 = vmatprep.subr.bf16.mxu1 %v7884_v32  ;;  %1873 = vadd.xlane.f32.xlu0 %v8106_v38  ;;  %v1842_v17 = vpop.xlane.xlu0 %1841 }
 0x524   : > { %v8111_v19 = vpop.eup %6543  ;;  %6555 = vrcp.f32 %v1842_v17  ;;  %v1917_v29 = vmul.f32 %v6542_v42, %v8006_v48 }
 0x525   : > { %v6546_v4 = vpop.eup %6545  ;;  %1875 = vadd.xlane.f32.xlu1 %v8111_v19  ;;  %v1844_v33 = vpop.xlane.xlu1 %1843 }
 0x526   : > { %v6548_v14 = vpop.eup %6547  ;;  %6557 = vrcp.f32 %v1844_v33  ;;  %6103 = vmatpush3.bf16.msra.mxu1 %v7884_v32  ;;  %v1918_v13 = vmul.f32 %v6546_v4, %v8009_v53 }
 0x527   : > { %6104 = vmatprep.subr.bf16.mxu1 %v7882_v45  ;;  %v1919_v40 = vmul.f32 %v6548_v14, %v8012_v54 }
 0x528   : > { %v6550_v30 = vpop.eup %6549  ;;  %v1945_v20 = vpack.c.bf16 %v1918_v13, %v1917_v29 }
 0x529   : > { %v1920_v31 = vmul.f32 %v6550_v30, %v8015_v6 }
 0x52a   : > { %v6552_v24 = vpop.eup %6551  ;;  %6082 = vmatprep.mubr.bf16.mxu1 %v1945_v20  ;;  %6105 = vmatpush3.bf16.msra.mxu1 %v7882_v45  ;;  %v6311_v45 = vld [vmem:[%s2169_s13] sm:$0xff]  }
 0x52b   : > { %v1946_v2 = vpack.c.bf16 %v1920_v31, %v1919_v40  ;;  %v1921_v32 = vmul.f32 %v6552_v24, %v8018_v47  ;;  %6122 = vmatprep.subr.bf16.mxu0 %v6311_v45  ;;  %v6313_v47 = vld [vmem:[%s2169_s13 + $0x10] sm:$0xff]  }
 0x52c   : > { %v6554_v44 = vpop.eup %6553  ;;  %6123 = vmatpush3.bf16.msra.mxu0 %v6311_v45 }
 0x52d   : > { %6083 = vmatmul.mubr.bf16.gmra.mrb[72].mxu1 %v1946_v2  ;;  %v1922_v48 = vmul.f32 %v6554_v44, %v8021_v5  ;;  %6124 = vmatprep.subr.bf16.mxu0 %v6312_v60  ;;  %v6314_v5 = vld [vmem:[%s2169_s13 + $0x18] sm:$0xff]  }
 0x52e   : > { %v6556_v53 = vpop.eup %6555 }
 0x52f   : > { %v1947_v50 = vpack.c.bf16 %v1922_v48, %v1921_v32  ;;  %v1923_v54 = vmul.f32 %v6556_v53, %v8024_v51  ;;  %v6316_v51 = vld [vmem:[%s2169_s13 + $0x28] sm:$0xff]  }
 0x530   : > { %v6558_v59 = vpop.eup %6557  ;;  %6125 = vmatpush3.bf16.msra.mxu0 %v6312_v60 }
 0x531   : > { %6086 = vmatprep.mubr.bf16.mxu1 %v1947_v50  ;;  %v1924_v6 = vmul.f32 %v6558_v59, %v8027_v10  ;;  %6126 = vmatprep.subr.bf16.mxu0 %v6313_v47  ;;  %v6317_v10 = vld [vmem:[%s2169_s13 + $0x30] sm:$0xff]  }
 0x533   : > { %v1948_v26 = vpack.c.bf16 %v1924_v6, %v1923_v54 }
 0x534   : > { %6127 = vmatpush3.bf16.msra.mxu0 %v6313_v47 }
 0x535   : > { %6087 = vmatmul.mubr.bf16.gmra.mrb[76].mxu1 %v1948_v26  ;;  %6128 = vmatprep.subr.bf16.mxu0 %v6314_v5 }
 0x538   : > { %6129 = vmatpush3.bf16.msra.mxu0 %v6314_v5 }
 0x539   : > { %6130 = vmatprep.subr.bf16.mxu0 %v6315_v9 }
 0x53c   : > { %6131 = vmatpush3.bf16.msra.mxu0 %v6315_v9 }
 0x53d   : > { %6132 = vmatprep.subr.bf16.mxu0 %v6316_v51 }
 0x540   : > { %6133 = vmatpush3.bf16.msra.mxu0 %v6316_v51 }
 0x541   : > { %6134 = vmatprep.subr.bf16.mxu0 %v6317_v10 }
 0x544   : > { %6135 = vmatpush3.bf16.msra.mxu0 %v6317_v10 }
 0x545   : > { %6136 = vmatprep.subr.bf16.mxu0 %v6318_v55 }
 0x548   : > { %6137 = vmatpush3.bf16.msra.mxu0 %v6318_v55 }
 0x57f   : > { %v1846_v46 = vpop.xlane.xlu0 %1845 }
 0x580   : > { %6559 = vrcp.f32 %v1846_v46 }
 0x581   : > { %v1848_v41 = vpop.xlane.xlu1 %1847 }
 0x582   : > { %6561 = vrcp.f32 %v1848_v41 }
 0x583   : > { %v1850_v0 = vpop.xlane.xlu0 %1849 }
 0x584   : > { %6563 = vrcp.f32 %v1850_v0 }
 0x585   : > { %v1852_v12 = vpop.xlane.xlu1 %1851 }
 0x586   : > { %6565 = vrcp.f32 %v1852_v12 }
 0x58a   : > { %v6560_v27 = vpop.eup %6559 }
 0x58b   : > { %v1854_v7 = vpop.xlane.xlu0 %1853  ;;  %v1925_v11 = vmul.f32 %v6560_v27, %v8036_v18 }
 0x58c   : > { %v6562_v39 = vpop.eup %6561  ;;  %6567 = vrcp.f32 %v1854_v7 }
 0x58d   : > { %v1856_v36 = vpop.xlane.xlu1 %1855  ;;  %v1926_v23 = vmul.f32 %v6562_v39, %v8041_v16 }
 0x58e   : > { %v6564_v56 = vpop.eup %6563  ;;  %6569 = vrcp.f32 %v1856_v36 }
 0x58f   : > { %v1858_v15 = vpop.xlane.xlu0 %1857  ;;  %v1949_v63 = vpack.c.bf16 %v1926_v23, %v1925_v11  ;;  %v1927_v42 = vmul.f32 %v6564_v56, %v8044_v1 }
 0x590   : > { %v6566_v62 = vpop.eup %6565  ;;  %6571 = vrcp.f32 %v1858_v15 }
 0x591   : > { %v1928_v17 = vmul.f32 %v6566_v62, %v8047_v43  ;;  %6106 = vmatprep.mubr.bf16.mxu1 %v1949_v63  ;;  %v1860_v4 = vpop.xlane.xlu1 %1859 }
 0x592   : > { %6573 = vrcp.f32 %v1860_v4 }
 0x593   : > { %v1950_v33 = vpack.c.bf16 %v1928_v17, %v1927_v42 }
 0x595   : > { %6107 = vmatmul.mubr.bf16.vlgmr.msra.gmra.mrb[80].mxu1 %v1950_v33 }
 0x596   : > { %v6568_v14 = vpop.eup %6567 }
 0x597   : > { %v1929_v18 = vmul.f32 %v6568_v14, %v8050_v8 }
 0x598   : > { %v6570_v29 = vpop.eup %6569 }
 0x599   : > { %v1930_v16 = vmul.f32 %v6570_v29, %v8053_v21 }
 0x59a   : > { %v6572_v13 = vpop.eup %6571 }
 0x59b   : > { %v1951_v30 = vpack.c.bf16 %v1930_v16, %v1929_v18  ;;  %v1931_v1 = vmul.f32 %v6572_v13, %v8057_v35 }
 0x59c   : > { %v6574_v20 = vpop.eup %6573  ;;  %v1862_v40 = vpop.xlane.xlu0 %1861 }
 0x59d   : > { %6575 = vrcp.f32 %v1862_v40  ;;  %6110 = vmatprep.mubr.bf16.mxu1 %v1951_v30  ;;  %v1932_v43 = vmul.f32 %v6574_v20, %v8061_v52 }
 0x59e   : > { %v1864_v31 = vpop.xlane.xlu1 %1863 }
 0x59f   : > { %6577 = vrcp.f32 %v1864_v31  ;;  %v1952_v24 = vpack.c.bf16 %v1932_v43, %v1931_v1 }
 0x5a0   : > { %v1866_v2 = vpop.xlane.xlu0 %1865 }
 0x5a1   : > { %6579 = vrcp.f32 %v1866_v2  ;;  %6111 = vmatmul.mubr.bf16.gmra.mrb[84].mxu1 %v1952_v24 }
 0x5a2   : > { %v1868_v44 = vpop.xlane.xlu1 %1867 }
 0x5a3   : > { %6581 = vrcp.f32 %v1868_v44 }
 0x5a7   : > { %v6576_v8 = vpop.eup %6575 }
 0x5a8   : > { %v1933_v32 = vmul.f32 %v6576_v8, %v8070_v57 }
 0x5a9   : > { %v6578_v21 = vpop.eup %6577 }
 0x5aa   : > { %v1934_v48 = vmul.f32 %v6578_v21, %v8075_v61 }
 0x5ab   : > { %v6580_v53 = vpop.eup %6579 }
 0x5ac   : > { %v1870_v50 = vpop.xlane.xlu0 %1869  ;;  %v1953_v59 = vpack.c.bf16 %v1934_v48, %v1933_v32  ;;  %v1935_v54 = vmul.f32 %v6580_v53, %v8079_v25 }
 0x5ad   : > { %v6582_v35 = vpop.eup %6581  ;;  %6583 = vrcp.f32 %v1870_v50 }
 0x5ae   : > { %v1872_v52 = vpop.xlane.xlu1 %1871  ;;  %6114 = vmatprep.mubr.bf16.mxu1 %v1953_v59  ;;  %v1936_v6 = vmul.f32 %v6582_v35, %v8085_v3 }
 0x5af   : > { %6585 = vrcp.f32 %v1872_v52 }
 0x5b0   : > { %v1874_v26 = vpop.xlane.xlu0 %1873  ;;  %v1954_v45 = vpack.c.bf16 %v1936_v6, %v1935_v54 }
 0x5b1   : > { %6587 = vrcp.f32 %v1874_v26 }
 0x5b2   : > { %v1876_v60 = vpop.xlane.xlu1 %1875  ;;  %6115 = vmatmul.mubr.bf16.gmra.mrb[88].mxu1 %v1954_v45  ;;  %v10587_v45 = vsub.s32 2, %v7581_v22 }
 0x5b3   : > { %6589 = vrcp.f32 %v1876_v60 }
 0x5b7   : > { %v6584_v57 = vpop.eup %6583 }
 0x5b8   : > { %v1937_v47 = vmul.f32 %v6584_v57, %v8098_v34  ;;  %v8146_v57 = vld [vmem:[%s7588_s20] sm:$0x3f] }
 0x5b9   : > { %v6586_v61 = vpop.eup %6585 }
 0x5ba   : > { %v1938_v5 = vmul.f32 %v6586_v61, %v8103_v58  ;;  %v8151_v61 = vrot.slane %v8146_v57, %v10587_v45 }
 0x5bb   : > { %v6588_v9 = vpop.eup %6587 }
 0x5bc   : > { %v1955_v51 = vpack.c.bf16 %v1938_v5, %v1937_v47  ;;  %v1939_v25 = vmul.f32 %v6588_v9, %v8106_v38  ;;  %v6912_v5 = vld [vmem:[#allocation11] sm:$0xff] }
 0x5bd   : > { %v6590_v10 = vpop.eup %6589 }
 0x5be   : > { %6118 = vmatprep.mubr.bf16.mxu1 %v1955_v51  ;;  %v1940_v3 = vmul.f32 %v6590_v10, %v8111_v19 }
 0x5c0   : > { %v1956_v55 = vpack.c.bf16 %v1940_v3, %v1939_v25  ;;  %v6913_v25 = vld [vmem:[#allocation11 + $0x10] sm:$0xff] }
 0x5c2   : > { %6119 = vmatmul.mubr.bf16.gmra.mrb[92].mxu1 %v1956_v55 }
 0x5c3   : > { %3151 = vmatprep.mubr.bf16.mxu1 %v10589_v28 }
 0x5e0   : > { %v6076_v46 = vpop.f32.mrb[64].mxu1 }
 0x5e1   : > { %v1991_v41 = vpop.f32.mrb[65].mxu1 }
 0x5e2   : > { %v6077_v0 = vpop.f32.mrb[66].mxu1 }
 0x5e3   : > { %v2152_v12 = vpack.c.bf16 %v6077_v0, %v6076_v46  ;;  %v1994_v27 = vpop.f32.mrb[67].mxu1  ;;  %v6914_v46 = vld [vmem:[#allocation11 + $0x8] sm:$0xff]  ;;  %v6915_v0 = vld [vmem:[#allocation11 + $0x18] sm:$0xff] }
 0x5e4   : > { %v2151_v34 = vpack.c.bf16 %v1994_v27, %v1991_v41 }
 0x5e6   : > { %6138 = vmatprep.mubr.bf16.mxu0 %v2151_v34 }
 0x5e7   : > { %6139 = vmatmul.mubr.bf16.vlgmr.msra.gmra.mrb[64].mxu0 %v2152_v12 }
 0x5f0   : > { %v6080_v58 = vpop.f32.mrb[68].mxu1 }
 0x5f1   : > { %v2007_v7 = vpop.f32.mrb[69].mxu1 }
 0x5f2   : > { %v6081_v39 = vpop.f32.mrb[70].mxu1 }
 0x5f3   : > { %v2154_v36 = vpack.c.bf16 %v6081_v39, %v6080_v58  ;;  %v2010_v11 = vpop.f32.mrb[71].mxu1 }
 0x5f4   : > { %v2153_v38 = vpack.c.bf16 %v2010_v11, %v2007_v7 }
 0x5f6   : > { %6142 = vmatprep.mubr.bf16.mxu0 %v2153_v38 }
 0x5f7   : > { %6143 = vmatmul.mubr.bf16.gmra.mrb[68].mxu0 %v2154_v36  ;;  %v6916_v36 = vld [vmem:[#allocation11 + $0x20] sm:$0xff] }
 0x600   : > { %v6084_v19 = vpop.f32.mrb[72].mxu1 }
 0x601   : > { %v2023_v23 = vpop.f32.mrb[73].mxu1 }
 0x602   : > { %v6085_v56 = vpop.f32.mrb[74].mxu1 }
 0x603   : > { %v2156_v15 = vpack.c.bf16 %v6085_v56, %v6084_v19  ;;  %v2026_v63 = vpop.f32.mrb[75].mxu1 }
 0x604   : > { %v2155_v62 = vpack.c.bf16 %v2026_v63, %v2023_v23  ;;  %v6917_v23 = vld [vmem:[#allocation11 + $0x30] sm:$0xff]  ;;  %v6918_v63 = vld [vmem:[#allocation11 + $0x28] sm:$0xff] }
 0x606   : > { %6146 = vmatprep.mubr.bf16.mxu0 %v2155_v62 }
 0x607   : > { %6147 = vmatmul.mubr.bf16.gmra.mrb[72].mxu0 %v2156_v15 }
 0x608   : > { %v6088_v42 = vpop.f32.mrb[76].mxu1 }
 0x609   : > { %v2039_v17 = vpop.f32.mrb[77].mxu1 }
 0x60a   : > { %v6089_v4 = vpop.f32.mrb[78].mxu1 }
 0x60b   : > { %v2158_v33 = vpack.c.bf16 %v6089_v4, %v6088_v42  ;;  %v2042_v14 = vpop.f32.mrb[79].mxu1  ;;  %v6919_v42 = vld [vmem:[#allocation11 + $0x38] sm:$0xff] }
 0x60c   : > { %v2157_v29 = vpack.c.bf16 %v2042_v14, %v2039_v17 }
 0x60e   : > { %6150 = vmatprep.mubr.bf16.mxu0 %v2157_v29 }
 0x60f   : > { %6151 = vmatmul.mubr.bf16.gmra.mrb[76].mxu0 %v2158_v33 }
 0x668   : > { %v6108_v18 = vpop.f32.mrb[80].mxu1 }
 0x669   : > { %v2088_v16 = vpop.f32.mrb[81].mxu1 }
 0x66a   : > { %v6109_v13 = vpop.f32.mrb[82].mxu1 }
 0x66b   : > { %v2160_v30 = vpack.c.bf16 %v6109_v13, %v6108_v18  ;;  %v2091_v20 = vpop.f32.mrb[83].mxu1 }
 0x66c   : > { %v2159_v40 = vpack.c.bf16 %v2091_v20, %v2088_v16  ;;  %v6920_v16 = vld [vmem:[#allocation11 + $0x40] sm:$0xff] }
 0x66e   : > { %6154 = vmatprep.mubr.bf16.mxu0 %v2159_v40  ;;  %v6921_v40 = vld [vmem:[#allocation11 + $0x50] sm:$0xff] }
 0x66f   : > { %6155 = vmatmul.mubr.bf16.gmra.mrb[80].mxu0 %v2160_v30 }
 0x674   : > { %v6112_v1 = vpop.f32.mrb[84].mxu1 }
 0x675   : > { %v2104_v43 = vpop.f32.mrb[85].mxu1 }
 0x676   : > { %v6113_v31 = vpop.f32.mrb[86].mxu1 }
 0x677   : > { %v2162_v24 = vpack.c.bf16 %v6113_v31, %v6112_v1  ;;  %v2107_v2 = vpop.f32.mrb[87].mxu1  ;;  %v6922_v31 = vld [vmem:[#allocation11 + $0x48] sm:$0xff] }
 0x678   : > { %v2161_v44 = vpack.c.bf16 %v2107_v2, %v2104_v43  ;;  %v6923_v2 = vld [vmem:[#allocation11 + $0x58] sm:$0xff] }
 0x67a   : > { %6158 = vmatprep.mubr.bf16.mxu0 %v2161_v44 }
 0x67b   : > { %6159 = vmatmul.mubr.bf16.gmra.mrb[84].mxu0 %v2162_v24 }
 0x685   : > { %v6116_v8 = vpop.f32.mrb[88].mxu1 }
 0x686   : > { %v2120_v21 = vpop.f32.mrb[89].mxu1 }
 0x687   : > { %v6117_v32 = vpop.f32.mrb[90].mxu1 }
 0x688   : > { %v2164_v48 = vpack.c.bf16 %v6117_v32, %v6116_v8  ;;  %v2123_v53 = vpop.f32.mrb[91].mxu1 }
 0x689   : > { %v2163_v50 = vpack.c.bf16 %v2123_v53, %v2120_v21 }
 0x68b   : > { %6162 = vmatprep.mubr.bf16.mxu0 %v2163_v50  ;;  %v6924_v50 = vld [vmem:[#allocation11 + $0x60] sm:$0xff] }
 0x68c   : > { %6163 = vmatmul.mubr.bf16.gmra.mrb[88].mxu0 %v2164_v48 }
 0x695   : > { %v6120_v59 = vpop.f32.mrb[92].mxu1 }
 0x696   : > { %v2136_v35 = vpop.f32.mrb[93].mxu1 }
 0x697   : > { %v6121_v52 = vpop.f32.mrb[94].mxu1 }
 0x698   : > { %v2166_v54 = vpack.c.bf16 %v6121_v52, %v6120_v59  ;;  %v2139_v6 = vpop.f32.mrb[95].mxu1 }
 0x699   : > { %v2165_v26 = vpack.c.bf16 %v2139_v6, %v2136_v35 }
 0x69b   : > { %6166 = vmatprep.mubr.bf16.mxu0 %v2165_v26 }
 0x69c   : > { %6167 = vmatmul.mubr.bf16.gmra.mrb[92].mxu0 %v2166_v54  ;;  %v6925_v54 = vld [vmem:[#allocation11 + $0x70] sm:$0xff] }
 0x69d   : > { %3344 = vmatprep.mubr.bf16.mxu0 %v10589_v28 }
 0x6ba   : > { %v6140_v60 = vpop.f32.mrb[64].mxu0 }
 0x6bb   : > { %v2268_v47 = vpop.f32.mrb[65].mxu0  ;;  %v2397_v3 = vadd.f32 %v6913_v25, %v6140_v60  ;;  %v6926_v60 = vld [vmem:[#allocation11 + $0x68] sm:$0xff] }
 0x6bc   : > { %v2395_v9 = vadd.f32 %v6912_v5, %v2268_v47  ;;  %v6141_v51 = vpop.f32.mrb[66].mxu0  ;;  %v6927_v5 = vld [vmem:[#allocation11 + $0x78] sm:$0xff] }
 0x6bd   : > { %v2271_v10 = vpop.f32.mrb[67].mxu0  ;;  %v2398_v12 = vadd.f32 %v6915_v0, %v6141_v51  ;;  %v8161_v34 = vadd.f32 %v8151_v61, %v2397_v3 }
 0x6be   : > { %v8154_v55 = vadd.f32 %v8151_v61, %v2395_v9  ;;  %v2396_v41 = vadd.f32 %v6914_v46, %v2271_v10 }
 0x6bf   : > { %10723 = vst [vmem:[#allocation19_spill] sm:$0xff] %v8161_v34  ;;  %v8165_v58 = vadd.f32 %v8151_v61, %v2398_v12 }
 0x6c0   : > { %10721 = vst [vmem:[#allocation17_spill] sm:$0xff] %v8154_v55  ;;  %v8157_v27 = vadd.f32 %v8151_v61, %v2396_v41  ;;  %2463 = vadd.xlane.f32.xlu0 %v8154_v55  ;;  %v6928_v41 = vld [vmem:[#allocation11 + $0x80] sm:$0xff] }
 0x6c1   : > { %10724 = vst [vmem:[#allocation20_spill] sm:$0xff] %v8165_v58 }
 0x6c2   : > { %10722 = vst [vmem:[#allocation18_spill] sm:$0xff] %v8157_v27  ;;  %2465 = vadd.xlane.f32.xlu1 %v8157_v27 }
 0x6c4   : > { %2467 = vadd.xlane.f32.xlu0 %v8161_v34 }
 0x6c6   : > { %2469 = vadd.xlane.f32.xlu1 %v8165_v58 }
 0x6ca   : > { %v6144_v7 = vpop.f32.mrb[68].mxu0 }
 0x6cb   : > { %v2284_v39 = vpop.f32.mrb[69].mxu0  ;;  %v2401_v56 = vadd.f32 %v6917_v23, %v6144_v7  ;;  %v6931_v23 = vld [vmem:[#allocation11 + $0x98] sm:$0xff] }
 0x6cc   : > { %v2399_v11 = vadd.f32 %v6916_v36, %v2284_v39  ;;  %v6145_v38 = vpop.f32.mrb[70].mxu0  ;;  %v6929_v39 = vld [vmem:[#allocation11 + $0x90] sm:$0xff] }
 0x6cd   : > { %v2287_v19 = vpop.f32.mrb[71].mxu0  ;;  %v2402_v17 = vadd.f32 %v6919_v42, %v6145_v38  ;;  %v8177_v33 = vadd.f32 %v8151_v61, %v2401_v56  ;;  %v6930_v38 = vld [vmem:[#allocation11 + $0x88] sm:$0xff] }
 0x6ce   : > { %v8170_v15 = vadd.f32 %v8151_v61, %v2399_v11  ;;  %v2400_v62 = vadd.f32 %v6918_v63, %v2287_v19 }
 0x6cf   : > { %10727 = vst [vmem:[#allocation23_spill] sm:$0xff] %v8177_v33  ;;  %v8181_v14 = vadd.f32 %v8151_v61, %v2402_v17 }
 0x6d0   : > { %10725 = vst [vmem:[#allocation21_spill] sm:$0xff] %v8170_v15  ;;  %v8173_v4 = vadd.f32 %v8151_v61, %v2400_v62  ;;  %2471 = vadd.xlane.f32.xlu0 %v8170_v15 }
 0x6d1   : > { %10728 = vst [vmem:[#allocation24_spill] sm:$0xff] %v8181_v14 }
 0x6d2   : > { %10726 = vst [vmem:[#allocation22_spill] sm:$0xff] %v8173_v4  ;;  %2473 = vadd.xlane.f32.xlu1 %v8173_v4 }
 0x6d4   : > { %2475 = vadd.xlane.f32.xlu0 %v8177_v33 }
 0x6d6   : > { %2477 = vadd.xlane.f32.xlu1 %v8181_v14 }
 0x6da   : > { %v6148_v29 = vpop.f32.mrb[72].mxu0 }
 0x6db   : > { %v2300_v18 = vpop.f32.mrb[73].mxu0  ;;  %v2405_v1 = vadd.f32 %v6921_v40, %v6148_v29 }
 0x6dc   : > { %v2403_v13 = vadd.f32 %v6920_v16, %v2300_v18  ;;  %v6149_v30 = vpop.f32.mrb[74].mxu0 }
 0x6dd   : > { %v2303_v20 = vpop.f32.mrb[75].mxu0  ;;  %v2406_v44 = vadd.f32 %v6923_v2, %v6149_v30  ;;  %v8193_v21 = vadd.f32 %v8151_v61, %v2405_v1  ;;  %v6932_v2 = vld [vmem:[#allocation11 + $0xa0] sm:$0xff] }
 0x6de   : > { %v8186_v43 = vadd.f32 %v8151_v61, %v2403_v13  ;;  %v2404_v24 = vadd.f32 %v6922_v31, %v2303_v20 }
 0x6df   : > { %10731 = vst [vmem:[#allocation27_spill] sm:$0xff] %v8193_v21  ;;  %v8197_v53 = vadd.f32 %v8151_v61, %v2406_v44 }
 0x6e0   : > { %10729 = vst [vmem:[#allocation25_spill] sm:$0xff] %v8186_v43  ;;  %v8189_v8 = vadd.f32 %v8151_v61, %v2404_v24  ;;  %2479 = vadd.xlane.f32.xlu0 %v8186_v43 }
 0x6e1   : > { %10732 = vst [vmem:[#allocation28_spill] sm:$0xff] %v8197_v53 }
 0x6e2   : > { %10730 = vst [vmem:[#allocation26_spill] sm:$0xff] %v8189_v8  ;;  %2481 = vadd.xlane.f32.xlu1 %v8189_v8  ;;  %v6152_v32 = vpop.f32.mrb[76].mxu0 }
 0x6e3   : > { %v2316_v48 = vpop.f32.mrb[77].mxu0  ;;  %v2409_v6 = vadd.f32 %v6925_v54, %v6152_v32 }
 0x6e4   : > { %v2407_v59 = vadd.f32 %v6924_v50, %v2316_v48  ;;  %2483 = vadd.xlane.f32.xlu0 %v8193_v21  ;;  %v6153_v35 = vpop.f32.mrb[78].mxu0 }
 0x6e5   : > { %v2319_v52 = vpop.f32.mrb[79].mxu0  ;;  %v2410_v9 = vadd.f32 %v6927_v5, %v6153_v35  ;;  %v8209_v10 = vadd.f32 %v8151_v61, %v2409_v6 }
 0x6e6   : > { %v8201_v26 = vadd.f32 %v8151_v61, %v2407_v59  ;;  %v2408_v47 = vadd.f32 %v6926_v60, %v2319_v52  ;;  %2485 = vadd.xlane.f32.xlu1 %v8197_v53  ;;  %v6933_v59 = vld [vmem:[#allocation11 + $0xa8] sm:$0xff] }
 0x6e7   : > { %10735 = vst [vmem:[#allocation31_spill] sm:$0xff] %v8209_v10  ;;  %v8213_v25 = vadd.f32 %v8151_v61, %v2410_v9  ;;  %v6321_v9 = vld [vmem:[%s8260_s15 + $0x4] ss:$16 sps:$4 sm:$0xff]  }
 0x6e8   : > { %10733 = vst [vmem:[#allocation29_spill] sm:$0xff] %v8201_v26  ;;  %v8205_v51 = vadd.f32 %v8151_v61, %v2408_v47  ;;  %2487 = vadd.xlane.f32.xlu0 %v8201_v26  ;;  %3119 = vmatprep.subr.bf16.mxu1 %v6321_v9 }
 0x6e9   : > { %10736 = vst [vmem:[#allocation32_spill] sm:$0xff] %v8213_v25 }
 0x6ea   : > { %10734 = vst [vmem:[#allocation30_spill] sm:$0xff] %v8205_v51  ;;  %2489 = vadd.xlane.f32.xlu1 %v8205_v51 }
 0x6ec   : > { %2491 = vadd.xlane.f32.xlu0 %v8209_v10 }
 0x6ee   : > { %2493 = vadd.xlane.f32.xlu1 %v8213_v25 }
 0x742   : > { %v6156_v3 = vpop.f32.mrb[80].mxu0 }
 0x743   : > { %v2332_v46 = vpop.f32.mrb[81].mxu0  ;;  %v2413_v36 = vadd.f32 %v6929_v39, %v6156_v3  ;;  %v6934_v3 = vld [vmem:[#allocation11 + $0xb0] sm:$0xff] }
 0x744   : > { %v2411_v0 = vadd.f32 %v6928_v41, %v2332_v46  ;;  %v6157_v12 = vpop.f32.mrb[82].mxu0 }
 0x745   : > { %v2335_v7 = vpop.f32.mrb[83].mxu0  ;;  %v2414_v56 = vadd.f32 %v6931_v23, %v6157_v12  ;;  %v8225_v62 = vadd.f32 %v8151_v61, %v2413_v36  ;;  %v6935_v12 = vld [vmem:[#allocation11 + $0xb8] sm:$0xff] }
 0x746   : > { %v8218_v11 = vadd.f32 %v8151_v61, %v2411_v0  ;;  %v2412_v19 = vadd.f32 %v6930_v38, %v2335_v7  ;;  %v6319_v0 = vld [vmem:[%s8260_s15] ss:$16 sps:$4 sm:$0xff]   ;;  %v6322_v36 = vld [vmem:[%s8260_s15 + $0x8] ss:$16 sps:$4 sm:$0xff]   ;;  %v6324_v38 = vld [vmem:[%s8260_s15 + $0xc] ss:$16 sps:$4 sm:$0xff]  }
 0x747   : > { %10739 = vst [vmem:[#allocation35_spill] sm:$0xff] %v8225_v62  ;;  %v8229_v42 = vadd.f32 %v8151_v61, %v2414_v56  ;;  %3120 = vmatpush1.bf16.msra.mxu1 %v6319_v0  ;;  %3312 = vmatprep.subr.bf16.mxu0 %v6324_v38  ;;  %v6325_v56 = vld [vmem:[%s8260_s15 + $0x20] ss:$16 sps:$4 sm:$0xff]   ;;  %v6334_v0 = vld [vmem:[%s8260_s15 + $0x48] ss:$16 sps:$4 sm:$0xff]  }
 0x748   : > { %10737 = vst [vmem:[#allocation33_spill] sm:$0xff] %v8218_v11  ;;  %v8221_v63 = vadd.f32 %v8151_v61, %v2412_v19  ;;  %2495 = vadd.xlane.f32.xlu0 %v8218_v11  ;;  %3313 = vmatpush1.bf16.msra.mxu0 %v6322_v36  ;;  %v6339_v38 = vld [vmem:[%s8260_s15 + $0x64] ss:$16 sps:$4 sm:$0xff]  }
 0x749   : > { %10740 = vst [vmem:[#allocation36_spill] sm:$0xff] %v8229_v42 }
 0x74a   : > { %10738 = vst [vmem:[#allocation34_spill] sm:$0xff] %v8221_v63  ;;  %2497 = vadd.xlane.f32.xlu1 %v8221_v63 }
 0x74c   : > { %2499 = vadd.xlane.f32.xlu0 %v8225_v62 }
 0x74d   : > { %v2464_v17 = vpop.xlane.xlu0 %2463 }
 0x74e   : > { %v2527_v29 = vmul.f32 0.0078125, %v2464_v17  ;;  %2501 = vadd.xlane.f32.xlu1 %v8229_v42  ;;  %v6160_v18 = vpop.f32.mrb[84].mxu0  ;;  %v6327_v17 = vld [vmem:[%s8260_s15 + $0x24] ss:$16 sps:$4 sm:$0xff]  }
 0x74f   : > { %v2466_v16 = vpop.xlane.xlu1 %2465  ;;  %v2348_v13 = vpop.f32.mrb[85].mxu0  ;;  %v2417_v46 = vadd.f32 %v6934_v3, %v6160_v18  ;;  %3121 = vmatprep.subr.bf16.mxu1 %v6327_v17  ;;  %v6337_v17 = vld [vmem:[%s8260_s15 + $0x60] ss:$16 sps:$4 sm:$0xff]  }
 0x750   : > { %v8234_v30 = vsub.f32 %v8154_v55, %v2527_v29  ;;  %v2528_v20 = vmul.f32 0.0078125, %v2466_v16  ;;  %v6161_v40 = vpop.f32.mrb[86].mxu0  ;;  %v2415_v44 = vadd.f32 %v6932_v2, %v2348_v13  ;;  %v6328_v13 = vld [vmem:[%s8260_s15 + $0x28] ss:$16 sps:$4 sm:$0xff]   ;;  %3122 = vmatpush1.bf16.msra.mxu1 %v6325_v56 }
 0x751   : > { %v2468_v1 = vpop.xlane.xlu0 %2467  ;;  %v2351_v31 = vpop.f32.mrb[87].mxu0  ;;  %v2418_v7 = vadd.f32 %v6935_v12, %v6161_v40  ;;  %v8273_v29 = vadd.f32 %v8151_v61, %v2417_v46  ;;  %v6937_v12 = vld [vmem:[#allocation11 + $0xc8] sm:$0xff] }
 0x752   : > { %v8237_v24 = vsub.f32 %v8157_v27, %v2528_v20  ;;  %v2529_v32 = vmul.f32 0.0078125, %v2468_v1  ;;  %v2591_v50 = vmul.f32 %v8234_v30, %v8234_v30  ;;  %v2416_v35 = vadd.f32 %v6933_v59, %v2351_v31  ;;  %v6330_v20 = vld [vmem:[%s8260_s15 + $0x2c] ss:$16 sps:$4 sm:$0xff]   ;;  %v6333_v59 = vld [vmem:[%s8260_s15 + $0x44] ss:$16 sps:$4 sm:$0xff]  }
 0x753   : > { %v2470_v48 = vpop.xlane.xlu1 %2469  ;;  %v8244_v6 = vadd.f32 %v8151_v61, %v2415_v44  ;;  %10743 = vst [vmem:[#allocation39_spill] sm:$0xff] %v8273_v29  ;;  %v8278_v40 = vadd.f32 %v8151_v61, %v2418_v7  ;;  %3314 = vmatprep.subr.bf16.mxu0 %v6330_v20  ;;  %3123 = vmatprep.subr.bf16.mxu1 %v6333_v59 }
 0x754   : > { %v2530_v52 = vmul.f32 0.0078125, %v2470_v48  ;;  %v2592_v54 = vmul.f32 %v8237_v24, %v8237_v24  ;;  %2623 = vadd.xlane.f32.xlu0 %v2591_v50  ;;  %v8247_v60 = vsub.f32 %v8161_v34, %v2529_v32  ;;  %v8250_v47 = vadd.f32 %v8151_v61, %v2416_v35  ;;  %v6336_v35 = vld [vmem:[%s8260_s15 + $0x4c] ss:$16 sps:$4 sm:$0xff]   ;;  %3315 = vmatpush1.bf16.msra.mxu0 %v6328_v13 }
 0x755   : > { %10741 = vst [vmem:[#allocation37_spill] sm:$0xff] %v8244_v6  ;;  %10744 = vst [vmem:[#allocation40_spill] sm:$0xff] %v8278_v40  ;;  %3316 = vmatprep.subr.bf16.mxu0 %v6336_v35  ;;  %v6343_v35 = vld [vmem:[%s8260_s15 + $0x80] ss:$16 sps:$4 sm:$0xff]  }
 0x756   : > { %2625 = vadd.xlane.f32.xlu1 %v2592_v54  ;;  %10742 = vst [vmem:[#allocation38_spill] sm:$0xff] %v8250_v47  ;;  %v8253_v5 = vsub.f32 %v8165_v58, %v2530_v52  ;;  %v2593_v41 = vmul.f32 %v8247_v60, %v8247_v60  ;;  %v6936_v52 = vld [vmem:[#allocation11 + $0xc0] sm:$0xff] }
 0x758   : > { %2503 = vadd.xlane.f32.xlu0 %v8244_v6  ;;  %v2594_v39 = vmul.f32 %v8253_v5, %v8253_v5  ;;  %3317 = vmatpush1.bf16.msra.mxu0 %v6334_v0  ;;  %v6354_v0 = vld [vmem:[%s8260_s15 + $0xac] ss:$16 sps:$4 sm:$0xff]  }
 0x75a   : > { %2505 = vadd.xlane.f32.xlu1 %v8250_v47 }
 0x75c   : > { %2627 = vadd.xlane.f32.xlu0 %v2593_v41  ;;  %v6331_v41 = vld [vmem:[%s8260_s15 + $0x40] ss:$16 sps:$4 sm:$0xff]  }
 0x75d   : > { %v2472_v19 = vpop.xlane.xlu0 %2471  ;;  %3124 = vmatpush1.bf16.msra.mxu1 %v6331_v41  ;;  %v6351_v41 = vld [vmem:[%s8260_s15 + $0xa4] ss:$16 sps:$4 sm:$0xff]  }
 0x75e   : > { %v2531_v23 = vmul.f32 0.0078125, %v2472_v19  ;;  %2629 = vadd.xlane.f32.xlu1 %v2594_v39  ;;  %v6342_v19 = vld [vmem:[%s8260_s15 + $0x6c] ss:$16 sps:$4 sm:$0xff]   ;;  %3125 = vmatprep.subr.bf16.mxu1 %v6339_v38 }
 0x75f   : > { %v2474_v18 = vpop.xlane.xlu1 %2473  ;;  %v6164_v16 = vpop.f32.mrb[88].mxu0  ;;  %3318 = vmatprep.subr.bf16.mxu0 %v6342_v19 }
 0x760   : > { %v8281_v1 = vsub.f32 %v8170_v15, %v2531_v23  ;;  %v2532_v31 = vmul.f32 0.0078125, %v2474_v18  ;;  %v2364_v2 = vpop.f32.mrb[89].mxu0  ;;  %2507 = vadd.xlane.f32.xlu0 %v8273_v29  ;;  %v6340_v18 = vld [vmem:[%s8260_s15 + $0x68] ss:$16 sps:$4 sm:$0xff]  }
 0x761   : > { %v2476_v44 = vpop.xlane.xlu0 %2475  ;;  %v6165_v32 = vpop.f32.mrb[90].mxu0  ;;  %v2419_v54 = vadd.f32 %v6936_v52, %v2364_v2  ;;  %3126 = vmatpush1.bf16.msra.mxu1 %v6337_v17  ;;  %v6348_v2 = vld [vmem:[%s8260_s15 + $0x8c] ss:$16 sps:$4 sm:$0xff]   ;;  %3319 = vmatpush1.bf16.msra.mxu0 %v6340_v18  ;;  %v6346_v52 = vld [vmem:[%s8260_s15 + $0x88] ss:$16 sps:$4 sm:$0xff]  }
 0x762   : > { %v8285_v48 = vsub.f32 %v8173_v4, %v2532_v31  ;;  %2509 = vadd.xlane.f32.xlu1 %v8278_v40  ;;  %v2367_v50 = vpop.f32.mrb[91].mxu0  ;;  %v2533_v9 = vmul.f32 0.0078125, %v2476_v44  ;;  %v2595_v46 = vmul.f32 %v8281_v1, %v8281_v1  ;;  %v6345_v31 = vld [vmem:[%s8260_s15 + $0x84] ss:$16 sps:$4 sm:$0xff]   ;;  %3320 = vmatprep.subr.bf16.mxu0 %v6348_v2 }
 0x763   : > { %v2478_v3 = vpop.xlane.xlu1 %2477  ;;  %v2420_v7 = vadd.f32 %v6937_v12, %v2367_v50  ;;  %v8299_v23 = vadd.f32 %v8151_v61, %v2419_v54  ;;  %v6938_v44 = vld [vmem:[#allocation11 + $0xd0] sm:$0xff]  ;;  %v6939_v54 = vld [vmem:[#allocation11 + $0xd8] sm:$0xff]  ;;  %3127 = vmatprep.subr.bf16.mxu1 %v6345_v31 }
 0x764   : > { %v2534_v39 = vmul.f32 0.0078125, %v2478_v3  ;;  %v2596_v36 = vmul.f32 %v8285_v48, %v8285_v48  ;;  %2631 = vadd.xlane.f32.xlu0 %v2595_v46  ;;  %v8302_v56 = vsub.f32 %v8177_v33, %v2533_v9  ;;  %v2421_v50 = vadd.f32 %v6938_v44, %v6164_v16 }
 0x765   : > { %10745 = vst [vmem:[#allocation41_spill] sm:$0xff] %v8299_v23  ;;  %v8307_v13 = vadd.f32 %v8151_v61, %v2420_v7  ;;  %v2422_v9 = vadd.f32 %v6939_v54, %v6165_v32  ;;  %3128 = vmatpush1.bf16.msra.mxu1 %v6343_v35  ;;  %3321 = vmatpush1.bf16.msra.mxu0 %v6346_v52  ;;  %v6349_v32 = vld [vmem:[%s8260_s15 + $0xa0] ss:$16 sps:$4 sm:$0xff]   ;;  %v6360_v35 = vld [vmem:[%s8260_s15 + $0xcc] ss:$16 sps:$4 sm:$0xff]  }
 0x766   : > { %2633 = vadd.xlane.f32.xlu1 %v2596_v36  ;;  %v8310_v20 = vsub.f32 %v8181_v14, %v2534_v39  ;;  %v2597_v59 = vmul.f32 %v8302_v56, %v8302_v56  ;;  %v8329_v12 = vadd.f32 %v8151_v61, %v2421_v50  ;;  %v6352_v36 = vld [vmem:[%s8260_s15 + $0xa8] ss:$16 sps:$4 sm:$0xff]   ;;  %3129 = vmatprep.subr.bf16.mxu1 %v6351_v41  ;;  %v6940_v52 = vld [vmem:[#allocation11 + $0xe0] sm:$0xff] }
 0x767   : > { %10746 = vst [vmem:[#allocation42_spill] sm:$0xff] %v8307_v13  ;;  %v8334_v38 = vadd.f32 %v8151_v61, %v2422_v9  ;;  %3322 = vmatprep.subr.bf16.mxu0 %v6354_v0  ;;  %v6358_v41 = vld [vmem:[%s8260_s15 + $0xc8] ss:$16 sps:$4 sm:$0xff]  }
 0x768   : > { %2511 = vadd.xlane.f32.xlu0 %v8299_v23  ;;  %v2598_v3 = vmul.f32 %v8310_v20, %v8310_v20  ;;  %10747 = vst [vmem:[#allocation43_spill] sm:$0xff] %v8329_v12  ;;  %v6941_v0 = vld [vmem:[#allocation11 + $0xe8] sm:$0xff] }
 0x769   : > { %10748 = vst [vmem:[#allocation44_spill] sm:$0xff] %v8334_v38  ;;  %3130 = vmatpush1.bf16.msra.mxu1 %v6349_v32  ;;  %3323 = vmatpush1.bf16.msra.mxu0 %v6352_v36 }
 0x76a   : > { %2513 = vadd.xlane.f32.xlu1 %v8307_v13  ;;  %3324 = vmatprep.subr.bf16.mxu0 %v6360_v35 }
 0x76c   : > { %2635 = vadd.xlane.f32.xlu0 %v2597_v59  ;;  %v6357_v59 = vld [vmem:[%s8260_s15 + $0xc4] ss:$16 sps:$4 sm:$0xff]  }
 0x76d   : > { %v2480_v16 = vpop.xlane.xlu0 %2479  ;;  %3131 = vmatprep.subr.bf16.mxu1 %v6357_v59  ;;  %3325 = vmatpush1.bf16.msra.mxu0 %v6358_v41 }
 0x76e   : > { %v2535_v46 = vmul.f32 0.0078125, %v2480_v16  ;;  %2637 = vadd.xlane.f32.xlu1 %v2598_v3 }
 0x76f   : > { %v2482_v7 = vpop.xlane.xlu1 %2481  ;;  %v6168_v39 = vpop.f32.mrb[92].mxu0 }
 0x770   : > { %v8337_v19 = vsub.f32 %v8186_v43, %v2535_v46  ;;  %v2536_v17 = vmul.f32 0.0078125, %v2482_v7  ;;  %v2380_v18 = vpop.f32.mrb[93].mxu0  ;;  %2515 = vadd.xlane.f32.xlu0 %v8329_v12  ;;  %v6355_v46 = vld [vmem:[%s8260_s15 + $0xc0] ss:$16 sps:$4 sm:$0xff]  }
 0x771   : > { %v2484_v31 = vpop.xlane.xlu0 %2483  ;;  %v6169_v2 = vpop.f32.mrb[94].mxu0  ;;  %v2423_v54 = vadd.f32 %v6940_v52, %v2380_v18  ;;  %3132 = vmatpush1.bf16.msra.mxu1 %v6355_v46  ;;  %v6366_v52 = vld [vmem:[%s8260_s15 + $0xec] ss:$16 sps:$4 sm:$0xff]  }
 0x772   : > { %v8341_v44 = vsub.f32 %v8189_v8, %v2536_v17  ;;  %2517 = vadd.xlane.f32.xlu1 %v8334_v38  ;;  %v2383_v50 = vpop.f32.mrb[95].mxu0  ;;  %v2537_v9 = vmul.f32 0.0078125, %v2484_v31  ;;  %v2599_v16 = vmul.f32 %v8337_v19, %v8337_v19  ;;  %v6363_v31 = vld [vmem:[%s8260_s15 + $0xe4] ss:$16 sps:$4 sm:$0xff]   ;;  %3326 = vmatprep.subr.bf16.mxu0 %v6366_v52 }
 0x773   : > { %v2486_v3 = vpop.xlane.xlu1 %2485  ;;  %v2424_v7 = vadd.f32 %v6941_v0, %v2383_v50  ;;  %v8355_v36 = vadd.f32 %v8151_v61, %v2423_v54  ;;  %v6364_v0 = vld [vmem:[%s8260_s15 + $0xe8] ss:$16 sps:$4 sm:$0xff]   ;;  %3133 = vmatprep.subr.bf16.mxu1 %v6363_v31 }
 0x774   : > { %v2538_v17 = vmul.f32 0.0078125, %v2486_v3  ;;  %v2600_v32 = vmul.f32 %v8341_v44, %v8341_v44  ;;  %2639 = vadd.xlane.f32.xlu0 %v2599_v16  ;;  %v8358_v49 = vsub.f32 %v8193_v21, %v2537_v9  ;;  %v6361_v3 = vld [vmem:[%s8260_s15 + $0xe0] ss:$16 sps:$4 sm:$0xff]   ;;  %3327 = vmatpush1.bf16.msra.mxu0 %v6364_v0 }
 0x775   : > { %v2488_v18 = vpop.xlane.xlu0 %2487  ;;  %10749 = vst [vmem:[#allocation45_spill] sm:$0xff] %v8355_v36  ;;  %v8363_v45 = vadd.f32 %v8151_v61, %v2424_v7  ;;  %3134 = vmatpush1.bf16.msra.mxu1 %v6361_v3  ;;  %v6942_v9 = vld [vmem:[#allocation11 + $0xf0] sm:$0xff] }
 0x776   : > { %2641 = vadd.xlane.f32.xlu1 %v2600_v32  ;;  %v8366_v59 = vsub.f32 %v8197_v53, %v2538_v17  ;;  %v2539_v54 = vmul.f32 0.0078125, %v2488_v18  ;;  %v2425_v46 = vadd.f32 %v6942_v9, %v6168_v39  ;;  %v2601_v7 = vmul.f32 %v8358_v49, %v8358_v49  ;;  %v6943_v32 = vld [vmem:[#allocation11 + $0xf8] sm:$0xff] }
 0x777   : > { %v2490_v50 = vpop.xlane.xlu1 %2489  ;;  %10750 = vst [vmem:[#allocation46_spill] sm:$0xff] %v8363_v45  ;;  %v2426_v17 = vadd.f32 %v6943_v32, %v6169_v2 }
 0x778   : > { %2519 = vadd.xlane.f32.xlu0 %v8355_v36  ;;  %v2540_v16 = vmul.f32 0.0078125, %v2490_v50  ;;  %v2602_v52 = vmul.f32 %v8366_v59, %v8366_v59  ;;  %v8375_v18 = vadd.f32 %v8151_v61, %v2425_v46  ;;  %v8378_v50 = vsub.f32 %v8201_v26, %v2539_v54 }
 0x779   : > { %v2492_v35 = vpop.xlane.xlu0 %2491  ;;  %v8381_v39 = vadd.f32 %v8151_v61, %v2426_v17 }
 0x77a   : > { %2521 = vadd.xlane.f32.xlu1 %v8363_v45  ;;  %v2541_v37 = vmul.f32 0.0078125, %v2492_v35  ;;  %10751 = vst [vmem:[#allocation47_spill] sm:$0xff] %v8375_v18  ;;  %v8384_v3 = vsub.f32 %v8205_v51, %v2540_v16  ;;  %v2603_v0 = vmul.f32 %v8378_v50, %v8378_v50 }
 0x77b   : > { %v2494_v41 = vpop.xlane.xlu1 %2493  ;;  %10752 = vst [vmem:[#allocation48_spill] sm:$0xff] %v8381_v39 }
 0x77c   : > { %v2542_v31 = vmul.f32 0.0078125, %v2494_v41  ;;  %2643 = vadd.xlane.f32.xlu0 %v2601_v7  ;;  %v8389_v2 = vsub.f32 %v8209_v10, %v2541_v37  ;;  %v2604_v61 = vmul.f32 %v8384_v3, %v8384_v3 }
 0x77e   : > { %2645 = vadd.xlane.f32.xlu1 %v2602_v52  ;;  %v8394_v35 = vsub.f32 %v8213_v25, %v2542_v31  ;;  %v2605_v54 = vmul.f32 %v8389_v2, %v8389_v2 }
 0x780   : > { %2523 = vadd.xlane.f32.xlu0 %v8375_v18  ;;  %v2606_v16 = vmul.f32 %v8394_v35, %v8394_v35 }
 0x782   : > { %2525 = vadd.xlane.f32.xlu1 %v8381_v39 }
 0x784   : > { %2647 = vadd.xlane.f32.xlu0 %v2603_v0 }
 0x786   : > { %2649 = vadd.xlane.f32.xlu1 %v2604_v61 }
 0x788   : > { %2651 = vadd.xlane.f32.xlu0 %v2605_v54 }
 0x78a   : > { %2653 = vadd.xlane.f32.xlu1 %v2606_v16 }
 0x7d5   : > { %v2496_v37 = vpop.xlane.xlu0 %2495 }
 0x7d6   : > { %v2543_v9 = vmul.f32 0.0078125, %v2496_v37 }
 0x7d7   : > { %v2498_v46 = vpop.xlane.xlu1 %2497 }
 0x7d8   : > { %v8403_v41 = vsub.f32 %v8218_v11, %v2543_v9  ;;  %v2544_v7 = vmul.f32 0.0078125, %v2498_v46 }
 0x7d9   : > { %v2500_v32 = vpop.xlane.xlu0 %2499 }
 0x7da   : > { %v8406_v17 = vsub.f32 %v8221_v63, %v2544_v7  ;;  %v2545_v31 = vmul.f32 0.0078125, %v2500_v32  ;;  %v2607_v52 = vmul.f32 %v8403_v41, %v8403_v41 }
 0x7db   : > { %v2502_v0 = vpop.xlane.xlu1 %2501 }
 0x7dc   : > { %v8411_v61 = vsub.f32 %v8225_v62, %v2545_v31  ;;  %v2546_v54 = vmul.f32 0.0078125, %v2502_v0  ;;  %2655 = vadd.xlane.f32.xlu0 %v2607_v52  ;;  %v2608_v16 = vmul.f32 %v8406_v17, %v8406_v17 }
 0x7de   : > { %v8416_v37 = vsub.f32 %v8229_v42, %v2546_v54  ;;  %2657 = vadd.xlane.f32.xlu1 %v2608_v16  ;;  %v2609_v9 = vmul.f32 %v8411_v61, %v8411_v61 }
 0x7e0   : > { %2659 = vadd.xlane.f32.xlu0 %v2609_v9  ;;  %v2610_v46 = vmul.f32 %v8416_v37, %v8416_v37 }
 0x7e1   : > { %v2624_v7 = vpop.xlane.xlu0 %2623 }
 0x7e2   : > { %2661 = vadd.xlane.f32.xlu1 %v2610_v46  ;;  %v2687_v32 = vmul.f32 0.0078125, %v2624_v7 }
 0x7e3   : > { %v2626_v31 = vpop.xlane.xlu1 %2625 }
 0x7e4   : > { %v2688_v0 = vmul.f32 0.0078125, %v2626_v31  ;;  %v2719_v52 = vadd.f32 1e-05, %v2687_v32  ;;  %v10599_v32 = vsub.s32 3, %v7581_v22 }
 0x7e5   : > { %v2504_v62 = vpop.xlane.xlu0 %2503 }
 0x7e6   : > { %v2720_v28 = vadd.f32 1e-05, %v2688_v0  ;;  %6591 = vrsqrt.f32 %v2719_v52  ;;  %v2547_v63 = vmul.f32 0.0078125, %v2504_v62 }
 0x7e7   : > { %v2506_v54 = vpop.xlane.xlu1 %2505 }
 0x7e8   : > { %6593 = vrsqrt.f32 %v2720_v28  ;;  %v2548_v16 = vmul.f32 0.0078125, %v2506_v54  ;;  %v8423_v42 = vsub.f32 %v8244_v6, %v2547_v63 }
 0x7e9   : > { %v2628_v11 = vpop.xlane.xlu0 %2627 }
 0x7ea   : > { %v8426_v9 = vsub.f32 %v8250_v47, %v2548_v16  ;;  %v2689_v25 = vmul.f32 0.0078125, %v2628_v11  ;;  %v2611_v7 = vmul.f32 %v8423_v42, %v8423_v42  ;;  %v2853_v11 = vsub.s32 4, %v7581_v22 }
 0x7eb   : > { %v2630_v46 = vpop.xlane.xlu1 %2629  ;;  %v8437_v16 = vrot.slane %v8146_v57, %v10599_v32 }
 0x7ec   : > { %v2690_v31 = vmul.f32 0.0078125, %v2630_v46  ;;  %v2612_v62 = vmul.f32 %v8426_v9, %v8426_v9  ;;  %v2721_v28 = vadd.f32 1e-05, %v2689_v25  ;;  %2663 = vadd.xlane.f32.xlu0 %v2611_v7 }
 0x7ed   : > { %v2508_v63 = vpop.xlane.xlu0 %2507 }
 0x7ee   : > { %v2722_v0 = vadd.f32 1e-05, %v2690_v31  ;;  %2665 = vadd.xlane.f32.xlu1 %v2612_v62  ;;  %6595 = vrsqrt.f32 %v2721_v28  ;;  %v2549_v52 = vmul.f32 0.0078125, %v2508_v63 }
 0x7ef   : > { %v2510_v54 = vpop.xlane.xlu1 %2509 }
 0x7f0   : > { %6597 = vrsqrt.f32 %v2722_v0  ;;  %v2550_v46 = vmul.f32 0.0078125, %v2510_v54  ;;  %v6592_v47 = vpop.eup %6591  ;;  %v8440_v6 = vsub.f32 %v8273_v29, %v2549_v52  ;;  %v8450_v0 = vrot.slane %v8146_v57, %v2853_v11 }
 0x7f1   : > { %v2783_v7 = vmul.f32 %v6592_v47, %v8234_v30  ;;  %v2632_v62 = vpop.xlane.xlu0 %2631 }
 0x7f2   : > { %v6594_v25 = vpop.eup %6593  ;;  %v8444_v31 = vsub.f32 %v8278_v40, %v2550_v46  ;;  %v2691_v63 = vmul.f32 0.0078125, %v2632_v62  ;;  %v2613_v32 = vmul.f32 %v8440_v6, %v8440_v6 }
 0x7f3   : > { %v2784_v28 = vmul.f32 %v6594_v25, %v8237_v24  ;;  %v2634_v10 = vpop.xlane.xlu1 %2633  ;;  %v2819_v52 = vmul.f32 %v8437_v16, %v2783_v7 }
 0x7f4   : > { %v2692_v54 = vmul.f32 0.0078125, %v2634_v10  ;;  %v2614_v30 = vmul.f32 %v8444_v31, %v8444_v31  ;;  %v2723_v46 = vadd.f32 1e-05, %v2691_v63  ;;  %2667 = vadd.xlane.f32.xlu0 %v2613_v32 }
 0x7f5   : > { %v2820_v47 = vmul.f32 %v8437_v16, %v2784_v28  ;;  %v2512_v24 = vpop.xlane.xlu0 %2511  ;;  %v2855_v29 = vadd.f32 %v8450_v0, %v2819_v52 }
 0x7f6   : > { %v2724_v40 = vadd.f32 1e-05, %v2692_v54  ;;  %2669 = vadd.xlane.f32.xlu1 %v2614_v30  ;;  %6599 = vrsqrt.f32 %v2723_v46  ;;  %v2551_v25 = vmul.f32 0.0078125, %v2512_v24  ;;  %v10753_v24 = vmov 0  }
 0x7f7   : > { %v2514_v62 = vpop.xlane.xlu1 %2513  ;;  %v2856_v57 = vadd.f32 %v8450_v0, %v2820_v47 }
 0x7f8   : > { %6601 = vrsqrt.f32 %v2724_v40  ;;  %v2552_v11 = vmul.f32 0.0078125, %v2514_v62  ;;  %v6596_v10 = vpop.eup %6595  ;;  %v8459_v7 = vsub.f32 %v8299_v23, %v2551_v25 }
 0x7f9   : > { %v2887_v51 = vpack.c.bf16 %v2856_v57, %v2855_v29  ;;  %v2636_v63 = vpop.xlane.xlu0 %2635  ;;  %v2785_v54 = vmul.f32 %v6596_v10, %v8247_v60 }
 0x7fa   : > { %v6598_v28 = vpop.eup %6597  ;;  %v8462_v32 = vsub.f32 %v8307_v13, %v2552_v11  ;;  %v2693_v30 = vmul.f32 0.0078125, %v2636_v63  ;;  %v2615_v40 = vmul.f32 %v8459_v7, %v8459_v7 }
 0x7fb   : > { %3152 = vmatmul.mubr.bf16.vlgmr.msra.gmra.mrb[96].mxu1 %v2887_v51  ;;  %v2638_v46 = vpop.xlane.xlu1 %2637  ;;  %3345 = vmatmul.mubr.bf16.vlgmr.msra.gmra.mrb[96].mxu0 %v2887_v51  ;;  %v2786_v52 = vmul.f32 %v6598_v28, %v8253_v5  ;;  %v2821_v25 = vmul.f32 %v8437_v16, %v2785_v54 }
 0x7fc   : > { %v2694_v47 = vmul.f32 0.0078125, %v2638_v46  ;;  %v2616_v29 = vmul.f32 %v8462_v32, %v8462_v32  ;;  %3161 = vmatprep.mubr.bf16.mxu1 %v10753_v24  ;;  %3354 = vmatprep.mubr.bf16.mxu0 %v10753_v24  ;;  %v2725_v60 = vadd.f32 1e-05, %v2693_v30 }
 0x7fd   : > { %2671 = vadd.xlane.f32.xlu0 %v2615_v40  ;;  %v2822_v62 = vmul.f32 %v8437_v16, %v2786_v52  ;;  %v2516_v57 = vpop.xlane.xlu0 %2515  ;;  %v2857_v10 = vadd.f32 %v8450_v0, %v2821_v25 }
 0x7fe   : > { %v2726_v51 = vadd.f32 1e-05, %v2694_v47  ;;  %2673 = vadd.xlane.f32.xlu1 %v2616_v29  ;;  %6603 = vrsqrt.f32 %v2725_v60  ;;  %v2553_v11 = vmul.f32 0.0078125, %v2516_v57 }
 0x7ff   : > { %v2518_v5 = vpop.xlane.xlu1 %2517  ;;  %v2858_v28 = vadd.f32 %v8450_v0, %v2822_v62 }
 0x800   : > { %6605 = vrsqrt.f32 %v2726_v51  ;;  %v2554_v63 = vmul.f32 0.0078125, %v2518_v5  ;;  %v6600_v46 = vpop.eup %6599  ;;  %v8477_v13 = vsub.f32 %v8329_v12, %v2553_v11 }
 0x801   : > { %v2888_v54 = vpack.c.bf16 %v2858_v28, %v2857_v10  ;;  %v2640_v52 = vpop.xlane.xlu0 %2639  ;;  %v2787_v47 = vmul.f32 %v6600_v46, %v8281_v1 }
 0x802   : > { %v6602_v30 = vpop.eup %6601  ;;  %v8480_v40 = vsub.f32 %v8334_v38, %v2554_v63  ;;  %v2695_v29 = vmul.f32 0.0078125, %v2640_v52  ;;  %v2617_v25 = vmul.f32 %v8477_v13, %v8477_v13 }
 0x803   : > { %3162 = vmatmul.mubr.bf16.gmra.mrb[100].mxu1 %v2888_v54  ;;  %v2642_v60 = vpop.xlane.xlu1 %2641  ;;  %3355 = vmatmul.mubr.bf16.gmra.mrb[100].mxu0 %v2888_v54  ;;  %v2788_v62 = vmul.f32 %v6602_v30, %v8285_v48  ;;  %v2823_v11 = vmul.f32 %v8437_v16, %v2787_v47 }
 0x804   : > { %v2696_v51 = vmul.f32 0.0078125, %v2642_v60  ;;  %v2618_v57 = vmul.f32 %v8480_v40, %v8480_v40  ;;  %3171 = vmatprep.mubr.bf16.mxu1 %v10753_v24  ;;  %3364 = vmatprep.mubr.bf16.mxu0 %v10753_v24  ;;  %v2727_v1 = vadd.f32 1e-05, %v2695_v29 }
 0x805   : > { %2675 = vadd.xlane.f32.xlu0 %v2617_v25  ;;  %v2824_v5 = vmul.f32 %v8437_v16, %v2788_v62  ;;  %v2520_v28 = vpop.xlane.xlu0 %2519  ;;  %v2859_v46 = vadd.f32 %v8450_v0, %v2823_v11 }
 0x806   : > { %v2728_v10 = vadd.f32 1e-05, %v2696_v51  ;;  %2677 = vadd.xlane.f32.xlu1 %v2618_v57  ;;  %6607 = vrsqrt.f32 %v2727_v1  ;;  %v2555_v63 = vmul.f32 0.0078125, %v2520_v28 }
 0x807   : > { %v2522_v48 = vpop.xlane.xlu1 %2521  ;;  %v2860_v54 = vadd.f32 %v8450_v0, %v2824_v5 }
 0x808   : > { %6609 = vrsqrt.f32 %v2728_v10  ;;  %v2556_v30 = vmul.f32 0.0078125, %v2522_v48  ;;  %v6604_v52 = vpop.eup %6603  ;;  %v8495_v60 = vsub.f32 %v8355_v36, %v2555_v63 }
 0x809   : > { %v2889_v47 = vpack.c.bf16 %v2860_v54, %v2859_v46  ;;  %v2644_v62 = vpop.xlane.xlu0 %2643  ;;  %v2789_v51 = vmul.f32 %v6604_v52, %v8302_v56 }
 0x80a   : > { %v6606_v29 = vpop.eup %6605  ;;  %v8498_v25 = vsub.f32 %v8363_v45, %v2556_v30  ;;  %v2697_v57 = vmul.f32 0.0078125, %v2644_v62  ;;  %v2619_v1 = vmul.f32 %v8495_v60, %v8495_v60 }
 0x80b   : > { %3172 = vmatmul.mubr.bf16.gmra.mrb[104].mxu1 %v2889_v47  ;;  %3365 = vmatmul.mubr.bf16.gmra.mrb[104].mxu0 %v2889_v47  ;;  %v2646_v11 = vpop.xlane.xlu1 %2645  ;;  %v2790_v5 = vmul.f32 %v6606_v29, %v8310_v20  ;;  %v2825_v63 = vmul.f32 %v8437_v16, %v2789_v51 }
 0x80c   : > { %v2698_v10 = vmul.f32 0.0078125, %v2646_v11  ;;  %v2620_v28 = vmul.f32 %v8498_v25, %v8498_v25  ;;  %3181 = vmatprep.mubr.bf16.mxu1 %v10753_v24  ;;  %3374 = vmatprep.mubr.bf16.mxu0 %v10753_v24  ;;  %v2729_v56 = vadd.f32 1e-05, %v2697_v57 }
 0x80d   : > { %2679 = vadd.xlane.f32.xlu0 %v2619_v1  ;;  %v2826_v48 = vmul.f32 %v8437_v16, %v2790_v5  ;;  %v2524_v54 = vpop.xlane.xlu0 %2523  ;;  %v2861_v52 = vadd.f32 %v8450_v0, %v2825_v63 }
 0x80e   : > { %v2730_v46 = vadd.f32 1e-05, %v2698_v10  ;;  %2681 = vadd.xlane.f32.xlu1 %v2620_v28  ;;  %6611 = vrsqrt.f32 %v2729_v56  ;;  %v2557_v30 = vmul.f32 0.0078125, %v2524_v54 }
 0x80f   : > { %v2526_v20 = vpop.xlane.xlu1 %2525  ;;  %v2862_v47 = vadd.f32 %v8450_v0, %v2826_v48 }
 0x810   : > { %6613 = vrsqrt.f32 %v2730_v46  ;;  %v2558_v29 = vmul.f32 0.0078125, %v2526_v20  ;;  %v6608_v62 = vpop.eup %6607  ;;  %v8513_v11 = vsub.f32 %v8375_v18, %v2557_v30 }
 0x811   : > { %v2890_v51 = vpack.c.bf16 %v2862_v47, %v2861_v52  ;;  %v2648_v5 = vpop.xlane.xlu0 %2647  ;;  %v2791_v10 = vmul.f32 %v6608_v62, %v8337_v19 }
 0x812   : > { %v6610_v57 = vpop.eup %6609  ;;  %v8516_v1 = vsub.f32 %v8381_v39, %v2558_v29  ;;  %v2699_v28 = vmul.f32 0.0078125, %v2648_v5  ;;  %v2621_v56 = vmul.f32 %v8513_v11, %v8513_v11 }
 0x813   : > { %3182 = vmatmul.mubr.bf16.gmra.mrb[108].mxu1 %v2890_v51  ;;  %3375 = vmatmul.mubr.bf16.gmra.mrb[108].mxu0 %v2890_v51  ;;  %v2650_v63 = vpop.xlane.xlu1 %2649  ;;  %v2792_v48 = vmul.f32 %v6610_v57, %v8341_v44  ;;  %v2827_v30 = vmul.f32 %v8437_v16, %v2791_v10 }
 0x814   : > { %v2700_v46 = vmul.f32 0.0078125, %v2650_v63  ;;  %v2622_v54 = vmul.f32 %v8516_v1, %v8516_v1  ;;  %3191 = vmatprep.mubr.bf16.mxu1 %v10753_v24  ;;  %3384 = vmatprep.mubr.bf16.mxu0 %v10753_v24  ;;  %v2731_v19 = vadd.f32 1e-05, %v2699_v28 }
 0x815   : > { %2683 = vadd.xlane.f32.xlu0 %v2621_v56  ;;  %v2828_v20 = vmul.f32 %v8437_v16, %v2792_v48  ;;  %v2652_v47 = vpop.xlane.xlu0 %2651  ;;  %v2863_v62 = vadd.f32 %v8450_v0, %v2827_v30 }
 0x816   : > { %v2732_v52 = vadd.f32 1e-05, %v2700_v46  ;;  %2685 = vadd.xlane.f32.xlu1 %v2622_v54  ;;  %6615 = vrsqrt.f32 %v2731_v19  ;;  %v2701_v29 = vmul.f32 0.0078125, %v2652_v47 }
 0x817   : > { %v2654_v44 = vpop.xlane.xlu1 %2653  ;;  %v2864_v51 = vadd.f32 %v8450_v0, %v2828_v20 }
 0x818   : > { %6617 = vrsqrt.f32 %v2732_v52  ;;  %v2702_v57 = vmul.f32 0.0078125, %v2654_v44  ;;  %v6612_v5 = vpop.eup %6611  ;;  %v2733_v63 = vadd.f32 1e-05, %v2701_v29 }
 0x819   : > { %v2891_v39 = vpack.c.bf16 %v2864_v51, %v2863_v62  ;;  %v2793_v56 = vmul.f32 %v6612_v5, %v8358_v49 }
 0x81a   : > { %v6614_v10 = vpop.eup %6613  ;;  %v2734_v28 = vadd.f32 1e-05, %v2702_v57  ;;  %6619 = vrsqrt.f32 %v2733_v63 }
 0x81b   : > { %3192 = vmatmul.mubr.bf16.gmra.mrb[112].mxu1 %v2891_v39  ;;  %3385 = vmatmul.mubr.bf16.gmra.mrb[112].mxu0 %v2891_v39  ;;  %v2794_v48 = vmul.f32 %v6614_v10, %v8366_v59  ;;  %v2829_v46 = vmul.f32 %v8437_v16, %v2793_v56  ;;  %v6367_v56 = vld [vmem:[%s8322_s16 + $0x40] sm:$0xff]  }
 0x81c   : > { %6621 = vrsqrt.f32 %v2734_v28  ;;  %3201 = vmatprep.mubr.bf16.mxu1 %v10753_v24  ;;  %3394 = vmatprep.mubr.bf16.mxu0 %v10753_v24 }
 0x81d   : > { %v2830_v54 = vmul.f32 %v8437_v16, %v2794_v48  ;;  %v2865_v30 = vadd.f32 %v8450_v0, %v2829_v46  ;;  %v6368_v48 = vld [vmem:[%s8322_s16 + $0xc0] sm:$0xff]   ;;  %5722 = vmatprep.subr.bf16.mxu1 %v6367_v56 }
 0x81e   : > { %v6369_v46 = vld [vmem:[%s8322_s16] sm:$0xff]   ;;  %5834 = vmatprep.subr.bf16.mxu0 %v6368_v48 }
 0x81f   : > { %v2866_v19 = vadd.f32 %v8450_v0, %v2830_v54  ;;  %v6370_v54 = vld [vmem:[%s8322_s16 + $0x80] sm:$0xff]   ;;  %5723 = vmatpush3.bf16.msra.mxu1 %v6369_v46 }
 0x820   : > { %v6616_v20 = vpop.eup %6615  ;;  %5835 = vmatpush3.bf16.msra.mxu0 %v6370_v54  ;;  %v6383_v54 = vld [vmem:[%s8322_s16 + $0x60] sm:$0xff]  }
 0x821   : > { %v2892_v49 = vpack.c.bf16 %v2866_v19, %v2865_v30  ;;  %v2795_v39 = vmul.f32 %v6616_v20, %v8378_v50  ;;  %v6371_v30 = vld [vmem:[%s8322_s16 + $0x48] sm:$0xff]  }
 0x822   : > { %v6618_v52 = vpop.eup %6617  ;;  %v6372_v19 = vld [vmem:[%s8322_s16 + $0xc8] sm:$0xff]   ;;  %5724 = vmatprep.subr.bf16.mxu1 %v6371_v30  ;;  %v6384_v30 = vld [vmem:[%s8322_s16 + $0xe0] sm:$0xff]  }
 0x823   : > { %3202 = vmatmul.mubr.bf16.gmra.mrb[116].mxu1 %v2892_v49  ;;  %3395 = vmatmul.mubr.bf16.gmra.mrb[116].mxu0 %v2892_v49  ;;  %v2796_v59 = vmul.f32 %v6618_v52, %v8384_v3  ;;  %v2831_v47 = vmul.f32 %v8437_v16, %v2795_v39  ;;  %v6373_v20 = vld [vmem:[%s8322_s16 + $0x8] sm:$0xff]   ;;  %v6375_v52 = vld [vmem:[%s8322_s16 + $0x50] sm:$0xff]  }
 0x824   : > { %3211 = vmatprep.mubr.bf16.mxu1 %v10753_v24  ;;  %3404 = vmatprep.mubr.bf16.mxu0 %v10753_v24  ;;  %v6620_v29 = vpop.eup %6619  ;;  %v6374_v49 = vld [vmem:[%s8322_s16 + $0x88] sm:$0xff]   ;;  %v6376_v39 = vld [vmem:[%s8322_s16 + $0xd0] sm:$0xff]  }
 0x825   : > { %v2832_v44 = vmul.f32 %v8437_v16, %v2796_v59  ;;  %v2867_v51 = vadd.f32 %v8450_v0, %v2831_v47  ;;  %v2797_v50 = vmul.f32 %v6620_v29, %v8389_v2  ;;  %5836 = vmatprep.subr.bf16.mxu0 %v6372_v19  ;;  %5725 = vmatpush3.bf16.msra.mxu1 %v6373_v20  ;;  %v6377_v59 = vld [vmem:[%s8322_s16 + $0x10] sm:$0xff]   ;;  %v6385_v19 = vld [vmem:[%s8322_s16 + $0x20] sm:$0xff]  }
 0x826   : > { %v6622_v62 = vpop.eup %6621  ;;  %5837 = vmatpush3.bf16.msra.mxu0 %v6374_v49  ;;  %v6378_v47 = vld [vmem:[%s8322_s16 + $0x90] sm:$0xff]   ;;  %5726 = vmatprep.subr.bf16.mxu1 %v6375_v52  ;;  %v6386_v20 = vld [vmem:[%s8322_s16 + $0xa0] sm:$0xff]   ;;  %v6387_v52 = vld [vmem:[%s8322_s16 + $0x68] sm:$0xff]  }
 0x827   : > { %v2868_v57 = vadd.f32 %v8450_v0, %v2832_v44  ;;  %v2798_v5 = vmul.f32 %v6622_v62, %v8394_v35  ;;  %v2833_v10 = vmul.f32 %v8437_v16, %v2797_v50  ;;  %5838 = vmatprep.subr.bf16.mxu0 %v6376_v39  ;;  %v6379_v62 = vld [vmem:[%s8322_s16 + $0x58] sm:$0xff]   ;;  %v6388_v39 = vld [vmem:[%s8322_s16 + $0xe8] sm:$0xff]  }
 0x829   : > { %v2893_v3 = vpack.c.bf16 %v2868_v57, %v2867_v51  ;;  %v2834_v63 = vmul.f32 %v8437_v16, %v2798_v5  ;;  %v2869_v35 = vadd.f32 %v8450_v0, %v2833_v10  ;;  %5727 = vmatpush3.bf16.msra.mxu1 %v6377_v59  ;;  %v6380_v51 = vld [vmem:[%s8322_s16 + $0xd8] sm:$0xff]  }
 0x82a   : > { %5839 = vmatpush3.bf16.msra.mxu0 %v6378_v47  ;;  %5728 = vmatprep.subr.bf16.mxu1 %v6379_v62  ;;  %v6390_v62 = vld [vmem:[%s8322_s16 + $0xa8] sm:$0xff]  }
 0x82b   : > { %3212 = vmatmul.mubr.bf16.gmra.mrb[120].mxu1 %v2893_v3  ;;  %3405 = vmatmul.mubr.bf16.gmra.mrb[120].mxu0 %v2893_v3  ;;  %v2870_v2 = vadd.f32 %v8450_v0, %v2834_v63  ;;  %v6381_v3 = vld [vmem:[%s8322_s16 + $0x18] sm:$0xff]  }
 0x82c   : > { %3221 = vmatprep.mubr.bf16.mxu1 %v10753_v24  ;;  %3414 = vmatprep.mubr.bf16.mxu0 %v10753_v24  ;;  %v6382_v63 = vld [vmem:[%s8322_s16 + $0x98] sm:$0xff]  }
 0x82d   : > { %v2894_v28 = vpack.c.bf16 %v2870_v2, %v2869_v35  ;;  %5840 = vmatprep.subr.bf16.mxu0 %v6380_v51  ;;  %5729 = vmatpush3.bf16.msra.mxu1 %v6381_v3 }
 0x82e   : > { %5841 = vmatpush3.bf16.msra.mxu0 %v6382_v63  ;;  %5730 = vmatprep.subr.bf16.mxu1 %v6383_v54 }
 0x82f   : > { %5842 = vmatprep.subr.bf16.mxu0 %v6384_v30 }
 0x831   : > { %5731 = vmatpush3.bf16.msra.mxu1 %v6385_v19  ;;  %v6391_v19 = vld [vmem:[%s8322_s16 + $0x70] sm:$0xff]  }
 0x832   : > { %5843 = vmatpush3.bf16.msra.mxu0 %v6386_v20  ;;  %5732 = vmatprep.subr.bf16.mxu1 %v6387_v52  ;;  %v6392_v20 = vld [vmem:[%s8322_s16 + $0xf0] sm:$0xff]  }
 0x833   : > { %3222 = vmatmul.mubr.bf16.gmra.mrb[124].mxu1 %v2894_v28  ;;  %3415 = vmatmul.mubr.bf16.gmra.mrb[124].mxu0 %v2894_v28 }
 0x834   : > { %3231 = vmatprep.mubr.bf16.mxu1 %v10753_v24  ;;  %3424 = vmatprep.mubr.bf16.mxu0 %v10753_v24 }
 0x835   : > { %5844 = vmatprep.subr.bf16.mxu0 %v6388_v39 }
 0x836   : > { %5845 = vmatpush3.bf16.msra.mxu0 %v6390_v62  ;;  %v6395_v62 = vld [vmem:[%s8322_s16 + $0x78] sm:$0xff]  }
 0x837   : > { %5846 = vmatprep.subr.bf16.mxu0 %v6392_v20 }
 0x869   : > { %v2656_v29 = vpop.xlane.xlu0 %2655 }
 0x86a   : > { %v2703_v44 = vmul.f32 0.0078125, %v2656_v29 }
 0x86b   : > { %v2658_v57 = vpop.xlane.xlu1 %2657 }
 0x86c   : > { %v2735_v50 = vadd.f32 1e-05, %v2703_v44  ;;  %v2704_v5 = vmul.f32 0.0078125, %v2658_v57  ;;  %v6389_v44 = vld [vmem:[%s8322_s16 + $0x28] sm:$0xff]  }
 0x86d   : > { %v2660_v10 = vpop.xlane.xlu0 %2659  ;;  %5733 = vmatpush3.bf16.msra.mxu1 %v6389_v44 }
 0x86e   : > { %6623 = vrsqrt.f32 %v2735_v50  ;;  %v2736_v2 = vadd.f32 1e-05, %v2704_v5  ;;  %v2705_v35 = vmul.f32 0.0078125, %v2660_v10  ;;  %5734 = vmatprep.subr.bf16.mxu1 %v6391_v19 }
 0x86f   : > { %v2662_v28 = vpop.xlane.xlu1 %2661 }
 0x870   : > { %6625 = vrsqrt.f32 %v2736_v2  ;;  %v2737_v56 = vadd.f32 1e-05, %v2705_v35  ;;  %v2706_v48 = vmul.f32 0.0078125, %v2662_v28 }
 0x872   : > { %6627 = vrsqrt.f32 %v2737_v56  ;;  %v2738_v46 = vadd.f32 1e-05, %v2706_v48 }
 0x874   : > { %6629 = vrsqrt.f32 %v2738_v46 }
 0x878   : > { %v6624_v49 = vpop.eup %6623 }
 0x879   : > { %v2799_v59 = vmul.f32 %v6624_v49, %v8403_v41  ;;  %v2664_v29 = vpop.xlane.xlu0 %2663 }
 0x87a   : > { %v6626_v47 = vpop.eup %6625  ;;  %v2707_v51 = vmul.f32 0.0078125, %v2664_v29 }
 0x87b   : > { %v2666_v57 = vpop.xlane.xlu1 %2665  ;;  %v2800_v50 = vmul.f32 %v6626_v47, %v8406_v17  ;;  %v2835_v5 = vmul.f32 %v8437_v16, %v2799_v59  ;;  %v6393_v59 = vld [vmem:[%s8322_s16 + $0x30] sm:$0xff]  }
 0x87c   : > { %v6628_v3 = vpop.eup %6627  ;;  %v2708_v63 = vmul.f32 0.0078125, %v2666_v57  ;;  %v2739_v10 = vadd.f32 1e-05, %v2707_v51  ;;  %v6394_v47 = vld [vmem:[%s8322_s16 + $0xb0] sm:$0xff]   ;;  %5735 = vmatpush3.bf16.msra.mxu1 %v6393_v59  ;;  %v6396_v51 = vld [vmem:[%s8322_s16 + $0xf8] sm:$0xff]  }
 0x87d   : > { %v2836_v41 = vmul.f32 %v8437_v16, %v2800_v50  ;;  %v2871_v28 = vadd.f32 %v8450_v0, %v2835_v5  ;;  %v2801_v56 = vmul.f32 %v6628_v3, %v8411_v61  ;;  %5847 = vmatpush3.bf16.msra.mxu0 %v6394_v47  ;;  %5736 = vmatprep.subr.bf16.mxu1 %v6395_v62  ;;  %v6397_v50 = vld [vmem:[%s8322_s16 + $0x38] sm:$0xff]  }
 0x87e   : > { %v6630_v2 = vpop.eup %6629  ;;  %v2740_v35 = vadd.f32 1e-05, %v2708_v63  ;;  %6631 = vrsqrt.f32 %v2739_v10  ;;  %5848 = vmatprep.subr.bf16.mxu0 %v6396_v51  ;;  %v6398_v5 = vld [vmem:[%s8322_s16 + $0xb8] sm:$0xff]  }
 0x87f   : > { %v2872_v17 = vadd.f32 %v8450_v0, %v2836_v41  ;;  %v2802_v48 = vmul.f32 %v6630_v2, %v8416_v37  ;;  %v2837_v39 = vmul.f32 %v8437_v16, %v2801_v56 }
 0x880   : > { %6633 = vrsqrt.f32 %v2740_v35  ;;  %5737 = vmatpush3.bf16.msra.mxu1 %v6397_v50 }
 0x881   : > { %v2895_v46 = vpack.c.bf16 %v2872_v17, %v2871_v28  ;;  %v2838_v54 = vmul.f32 %v8437_v16, %v2802_v48  ;;  %v2668_v30 = vpop.xlane.xlu0 %2667  ;;  %v2873_v57 = vadd.f32 %v8450_v0, %v2837_v39  ;;  %5849 = vmatpush3.bf16.msra.mxu0 %v6398_v5 }
 0x882   : > { %v2709_v49 = vmul.f32 0.0078125, %v2668_v30 }
 0x883   : > { %3232 = vmatmul.mubr.bf16.gmra.mrb[128].mxu1 %v2895_v46  ;;  %3425 = vmatmul.mubr.bf16.gmra.mrb[128].mxu0 %v2895_v46  ;;  %v2670_v52 = vpop.xlane.xlu1 %2669  ;;  %v2874_v29 = vadd.f32 %v8450_v0, %v2838_v54 }
 0x884   : > { %v2710_v61 = vmul.f32 0.0078125, %v2670_v52  ;;  %3241 = vmatprep.mubr.bf16.mxu1 %v10753_v24  ;;  %3434 = vmatprep.mubr.bf16.mxu0 %v10753_v24  ;;  %v2741_v37 = vadd.f32 1e-05, %v2709_v49 }
 0x885   : > { %v2896_v63 = vpack.c.bf16 %v2874_v29, %v2873_v57 }
 0x886   : > { %v2742_v44 = vadd.f32 1e-05, %v2710_v61  ;;  %6635 = vrsqrt.f32 %v2741_v37 }
 0x888   : > { %6637 = vrsqrt.f32 %v2742_v44  ;;  %v6632_v3 = vpop.eup %6631 }
 0x889   : > { %v2803_v2 = vmul.f32 %v6632_v3, %v8423_v42 }
 0x88a   : > { %v6634_v10 = vpop.eup %6633  ;;  %v2672_v41 = vpop.xlane.xlu0 %2671 }
 0x88b   : > { %v2711_v35 = vmul.f32 0.0078125, %v2672_v41  ;;  %3242 = vmatmul.mubr.bf16.gmra.mrb[132].mxu1 %v2896_v63  ;;  %3435 = vmatmul.mubr.bf16.gmra.mrb[132].mxu0 %v2896_v63  ;;  %v2674_v28 = vpop.xlane.xlu1 %2673  ;;  %v2804_v17 = vmul.f32 %v6634_v10, %v8426_v9  ;;  %v2839_v48 = vmul.f32 %v8437_v16, %v2803_v2 }
 0x88c   : > { %v2712_v56 = vmul.f32 0.0078125, %v2674_v28  ;;  %3251 = vmatprep.mubr.bf16.mxu1 %v10753_v24  ;;  %3444 = vmatprep.mubr.bf16.mxu0 %v10753_v24 }
 0x88d   : > { %v2743_v46 = vadd.f32 1e-05, %v2711_v35  ;;  %v2840_v54 = vmul.f32 %v8437_v16, %v2804_v17  ;;  %v2875_v42 = vadd.f32 %v8450_v0, %v2839_v48 }
 0x88e   : > { %v2744_v30 = vadd.f32 1e-05, %v2712_v56 }
 0x88f   : > { %6639 = vrsqrt.f32 %v2743_v46  ;;  %v2876_v19 = vadd.f32 %v8450_v0, %v2840_v54 }
 0x890   : > { %6641 = vrsqrt.f32 %v2744_v30  ;;  %v6636_v20 = vpop.eup %6635 }
 0x891   : > { %v2897_v49 = vpack.c.bf16 %v2876_v19, %v2875_v42  ;;  %v2805_v39 = vmul.f32 %v6636_v20, %v8440_v6 }
 0x892   : > { %v6638_v9 = vpop.eup %6637  ;;  %v2676_v52 = vpop.xlane.xlu0 %2675 }
 0x893   : > { %v2713_v59 = vmul.f32 0.0078125, %v2676_v52  ;;  %3252 = vmatmul.mubr.bf16.gmra.mrb[136].mxu1 %v2897_v49  ;;  %3445 = vmatmul.mubr.bf16.gmra.mrb[136].mxu0 %v2897_v49  ;;  %v2678_v47 = vpop.xlane.xlu1 %2677  ;;  %v2806_v61 = vmul.f32 %v6638_v9, %v8444_v31  ;;  %v2841_v29 = vmul.f32 %v8437_v16, %v2805_v39 }
 0x894   : > { %v2714_v37 = vmul.f32 0.0078125, %v2678_v47  ;;  %3261 = vmatprep.mubr.bf16.mxu1 %v10753_v24  ;;  %3454 = vmatprep.mubr.bf16.mxu0 %v10753_v24 }
 0x895   : > { %v2745_v44 = vadd.f32 1e-05, %v2713_v59  ;;  %v2842_v62 = vmul.f32 %v8437_v16, %v2806_v61  ;;  %v2877_v6 = vadd.f32 %v8450_v0, %v2841_v29 }
 0x896   : > { %v2746_v51 = vadd.f32 1e-05, %v2714_v37 }
 0x897   : > { %6643 = vrsqrt.f32 %v2745_v44  ;;  %v2878_v57 = vadd.f32 %v8450_v0, %v2842_v62 }
 0x898   : > { %6645 = vrsqrt.f32 %v2746_v51 }
 0x899   : > { %v6640_v50 = vpop.eup %6639  ;;  %v2898_v5 = vpack.c.bf16 %v2878_v57, %v2877_v6 }
 0x89a   : > { %v6642_v31 = vpop.eup %6641  ;;  %v2680_v3 = vpop.xlane.xlu0 %2679  ;;  %v2807_v63 = vmul.f32 %v6640_v50, %v8459_v7 }
 0x89b   : > { %v2715_v10 = vmul.f32 0.0078125, %v2680_v3  ;;  %3262 = vmatmul.mubr.bf16.gmra.mrb[140].mxu1 %v2898_v5  ;;  %3455 = vmatmul.mubr.bf16.gmra.mrb[140].mxu0 %v2898_v5  ;;  %v2682_v41 = vpop.xlane.xlu1 %2681  ;;  %v2808_v2 = vmul.f32 %v6642_v31, %v8462_v32 }
 0x89c   : > { %v2716_v35 = vmul.f32 0.0078125, %v2682_v41  ;;  %3271 = vmatprep.mubr.bf16.mxu1 %v10753_v24  ;;  %3464 = vmatprep.mubr.bf16.mxu0 %v10753_v24  ;;  %v2843_v28 = vmul.f32 %v8437_v16, %v2807_v63 }
 0x89d   : > { %v2747_v17 = vadd.f32 1e-05, %v2715_v10  ;;  %v2844_v56 = vmul.f32 %v8437_v16, %v2808_v2 }
 0x89e   : > { %v2748_v48 = vadd.f32 1e-05, %v2716_v35  ;;  %v2879_v7 = vadd.f32 %v8450_v0, %v2843_v28 }
 0x89f   : > { %6647 = vrsqrt.f32 %v2747_v17  ;;  %v2880_v46 = vadd.f32 %v8450_v0, %v2844_v56  ;;  %v10756_v17 = vsub.s32 2, %v7581_v22  ;;  %v10758_v56 = vsub.s32 1, %v7581_v22 }
 0x8a0   : > { %6649 = vrsqrt.f32 %v2748_v48  ;;  %v10760_v48 = vsub.s32 3, %v7581_v22 }
 0x8a1   : > { %v6644_v54 = vpop.eup %6643  ;;  %v2899_v30 = vpack.c.bf16 %v2880_v46, %v2879_v7 }
 0x8a2   : > { %v6646_v32 = vpop.eup %6645  ;;  %v2684_v42 = vpop.xlane.xlu0 %2683  ;;  %v2809_v19 = vmul.f32 %v6644_v54, %v8477_v13 }
 0x8a3   : > { %v2717_v20 = vmul.f32 0.0078125, %v2684_v42  ;;  %3272 = vmatmul.mubr.bf16.gmra.mrb[144].mxu1 %v2899_v30  ;;  %3465 = vmatmul.mubr.bf16.gmra.mrb[144].mxu0 %v2899_v30  ;;  %v2686_v49 = vpop.xlane.xlu1 %2685  ;;  %v2810_v9 = vmul.f32 %v6646_v32, %v8480_v40 }
 0x8a4   : > { %v2718_v52 = vmul.f32 0.0078125, %v2686_v49  ;;  %3281 = vmatprep.mubr.bf16.mxu1 %v10753_v24  ;;  %3474 = vmatprep.mubr.bf16.mxu0 %v10753_v24  ;;  %v2845_v39 = vmul.f32 %v8437_v16, %v2809_v19 }
 0x8a5   : > { %v2749_v59 = vadd.f32 1e-05, %v2717_v20  ;;  %v2846_v47 = vmul.f32 %v8437_v16, %v2810_v9 }
 0x8a6   : > { %v2750_v61 = vadd.f32 1e-05, %v2718_v52  ;;  %v2881_v13 = vadd.f32 %v8450_v0, %v2845_v39 }
 0x8a7   : > { %6651 = vrsqrt.f32 %v2749_v59  ;;  %v2882_v37 = vadd.f32 %v8450_v0, %v2846_v47 }
 0x8a8   : > { %6653 = vrsqrt.f32 %v2750_v61 }
 0x8a9   : > { %v6648_v29 = vpop.eup %6647  ;;  %v2900_v44 = vpack.c.bf16 %v2882_v37, %v2881_v13 }
 0x8aa   : > { %v6650_v40 = vpop.eup %6649  ;;  %v2811_v62 = vmul.f32 %v6648_v29, %v8495_v60 }
 0x8ab   : > { %3282 = vmatmul.mubr.bf16.gmra.mrb[148].mxu1 %v2900_v44  ;;  %3475 = vmatmul.mubr.bf16.gmra.mrb[148].mxu0 %v2900_v44  ;;  %v2812_v51 = vmul.f32 %v6650_v40, %v8498_v25 }
 0x8ac   : > { %3291 = vmatprep.mubr.bf16.mxu1 %v10753_v24  ;;  %3484 = vmatprep.mubr.bf16.mxu0 %v10753_v24  ;;  %v2847_v6 = vmul.f32 %v8437_v16, %v2811_v62 }
 0x8ad   : > { %v2848_v57 = vmul.f32 %v8437_v16, %v2812_v51 }
 0x8ae   : > { %v2883_v50 = vadd.f32 %v8450_v0, %v2847_v6 }
 0x8af   : > { %v2884_v5 = vadd.f32 %v8450_v0, %v2848_v57 }
 0x8b1   : > { %v6652_v31 = vpop.eup %6651  ;;  %v2901_v3 = vpack.c.bf16 %v2884_v5, %v2883_v50 }
 0x8b2   : > { %v6654_v60 = vpop.eup %6653  ;;  %v2813_v63 = vmul.f32 %v6652_v31, %v8513_v11  ;;  %v452_v11 = vld [vmem:[%s451_s9] sm:$0xf] }
 0x8b3   : > { %3292 = vmatmul.mubr.bf16.gmra.mrb[152].mxu1 %v2901_v3  ;;  %3485 = vmatmul.mubr.bf16.gmra.mrb[152].mxu0 %v2901_v3  ;;  %v2814_v25 = vmul.f32 %v6654_v60, %v8516_v1  ;;  %v10754_v1 = vsub.s32 0, %v7581_v22  ;;  %v8668_v7 = vrot.slane %v452_v11, %v10760_v48 }
 0x8b4   : > { %3301 = vmatprep.mubr.bf16.mxu1 %v10753_v24  ;;  %3494 = vmatprep.mubr.bf16.mxu0 %v10753_v24  ;;  %v2849_v10 = vmul.f32 %v8437_v16, %v2813_v63 }
 0x8b5   : > { %v2850_v41 = vmul.f32 %v8437_v16, %v2814_v25  ;;  %v8656_v24 = vrot.slane %v452_v11, %v10754_v1  ;;  %v8660_v16 = vrot.slane %v452_v11, %v10756_v17  ;;  %10761 = vst [vmem:[#allocation52_spill] sm:$0xff] %v8668_v7 }
 0x8b6   : > { %v2885_v2 = vadd.f32 %v8450_v0, %v2849_v10 }
 0x8b7   : > { %v2886_v35 = vadd.f32 %v8450_v0, %v2850_v41  ;;  %10755 = vst [vmem:[#allocation49_spill] sm:$0xff] %v8656_v24  ;;  %10757 = vst [vmem:[#allocation50_spill] sm:$0xff] %v8660_v16  ;;  %v8664_v0 = vrot.slane %v452_v11, %v10758_v56 }
 0x8b9   : > { %v2902_v28 = vpack.c.bf16 %v2886_v35, %v2885_v2  ;;  %10759 = vst [vmem:[#allocation51_spill] sm:$0xff] %v8664_v0 }
 0x8bb   : > { %3302 = vmatmul.mubr.bf16.gmra.mrb[156].mxu1 %v2902_v28  ;;  %3495 = vmatmul.mubr.bf16.gmra.mrb[156].mxu0 %v2902_v28 }
 0x8ce   : > { %v3153_v46 = vpop.f32.mrb[96].mxu1  ;;  %v3346_v54 = vpop.f32.mrb[96].mxu0 }
 0x8cf   : > { %v8671_v30 = vadd.f32 %v3153_v46, %v8656_v24  ;;  %v8674_v32 = vadd.f32 %v3346_v54, %v8660_v16  ;;  %v3155_v42 = vpop.f32.mrb[97].mxu1  ;;  %v3348_v19 = vpop.f32.mrb[97].mxu0 }
 0x8d0   : > { %v8677_v20 = vadd.f32 %v3155_v42, %v8664_v0  ;;  %v8680_v49 = vadd.f32 %v3348_v19, %v8668_v7  ;;  %v3157_v9 = vpop.f32.mrb[98].mxu1  ;;  %v3350_v52 = vpop.f32.mrb[98].mxu0 }
 0x8d1   : > { %v3505_v39 = vmul.f32 %v8671_v30, %v8671_v30  ;;  %v3507_v59 = vmul.f32 %v8674_v32, %v8674_v32  ;;  %v8687_v47 = vadd.f32 %v3157_v9, %v8656_v24  ;;  %v8690_v61 = vadd.f32 %v3350_v52, %v8660_v16  ;;  %v3159_v13 = vpop.f32.mrb[99].mxu1  ;;  %v3352_v37 = vpop.f32.mrb[99].mxu0 }
 0x8d2   : > { %v3506_v29 = vmul.f32 %v8677_v20, %v8677_v20  ;;  %v3508_v44 = vmul.f32 %v8680_v49, %v8680_v49  ;;  %v8697_v40 = vadd.f32 %v3159_v13, %v8664_v0  ;;  %v8700_v62 = vadd.f32 %v3352_v37, %v8668_v7 }
 0x8d3   : > { %v3633_v51 = vmul.f32 %v3505_v39, %v8671_v30  ;;  %v3635_v6 = vmul.f32 %v3507_v59, %v8674_v32  ;;  %v3509_v57 = vmul.f32 %v8687_v47, %v8687_v47  ;;  %v3511_v50 = vmul.f32 %v8690_v61, %v8690_v61 }
 0x8d4   : > { %v3634_v5 = vmul.f32 %v3506_v29, %v8677_v20  ;;  %v3636_v31 = vmul.f32 %v3508_v44, %v8680_v49  ;;  %v3510_v3 = vmul.f32 %v8697_v40, %v8697_v40  ;;  %v3512_v60 = vmul.f32 %v8700_v62, %v8700_v62 }
 0x8d5   : > { %v3761_v63 = vmul.f32 0.044715, %v3633_v51  ;;  %v3763_v25 = vmul.f32 0.044715, %v3635_v6  ;;  %v3637_v10 = vmul.f32 %v3509_v57, %v8687_v47  ;;  %v3639_v41 = vmul.f32 %v3511_v50, %v8690_v61 }
 0x8d6   : > { %v3762_v2 = vmul.f32 0.044715, %v3634_v5  ;;  %v3764_v35 = vmul.f32 0.044715, %v3636_v31  ;;  %v3638_v28 = vmul.f32 %v3510_v3, %v8697_v40  ;;  %v3640_v11 = vmul.f32 %v3512_v60, %v8700_v62  ;;  %v3163_v1 = vpop.f32.mrb[100].mxu1  ;;  %v3356_v17 = vpop.f32.mrb[100].mxu0 }
 0x8d7   : > { %v3889_v56 = vadd.f32 %v3761_v63, %v8671_v30  ;;  %v3891_v48 = vadd.f32 %v3763_v25, %v8674_v32  ;;  %v3765_v46 = vmul.f32 0.044715, %v3637_v10  ;;  %v3767_v54 = vmul.f32 0.044715, %v3639_v41  ;;  %v3165_v42 = vpop.f32.mrb[101].mxu1  ;;  %v3358_v19 = vpop.f32.mrb[101].mxu0 }
 0x8d8   : > { %v3890_v9 = vadd.f32 %v3762_v2, %v8677_v20  ;;  %v3892_v52 = vadd.f32 %v3764_v35, %v8680_v49  ;;  %v3766_v39 = vmul.f32 0.044715, %v3638_v28  ;;  %v3768_v59 = vmul.f32 0.044715, %v3640_v11  ;;  %v3167_v13 = vpop.f32.mrb[102].mxu1  ;;  %v3360_v37 = vpop.f32.mrb[102].mxu0 }
 0x8d9   : > { %v4017_v29 = vmul.f32 0.7978846, %v3889_v56  ;;  %v4019_v44 = vmul.f32 0.7978846, %v3891_v48  ;;  %v3893_v51 = vadd.f32 %v3765_v46, %v8687_v47  ;;  %v3895_v6 = vadd.f32 %v3767_v54, %v8690_v61  ;;  %v3169_v57 = vpop.f32.mrb[103].mxu1  ;;  %v3362_v50 = vpop.f32.mrb[103].mxu0 }
 0x8da   : > { %v4018_v5 = vmul.f32 0.7978846, %v3890_v9  ;;  %v4020_v31 = vmul.f32 0.7978846, %v3892_v52  ;;  %v3894_v3 = vadd.f32 %v3766_v39, %v8697_v40  ;;  %v3896_v60 = vadd.f32 %v3768_v59, %v8700_v62 }
 0x8db   : > { %6655 = vtanh.f32 %v4017_v29  ;;  %v4021_v63 = vmul.f32 0.7978846, %v3893_v51  ;;  %v4023_v25 = vmul.f32 0.7978846, %v3895_v6  ;;  %v8727_v10 = vadd.f32 %v3163_v1, %v8656_v24 }
 0x8dc   : > { %6657 = vtanh.f32 %v4019_v44  ;;  %v4022_v41 = vmul.f32 0.7978846, %v3894_v3  ;;  %v4024_v2 = vmul.f32 0.7978846, %v3896_v60  ;;  %v8730_v35 = vadd.f32 %v3356_v17, %v8660_v16 }
 0x8dd   : > { %10762 = vst [vmem:[#allocation53_spill] sm:$0xff] %v8727_v10  ;;  %6659 = vtanh.f32 %v4018_v5  ;;  %v3513_v28 = vmul.f32 %v8727_v10, %v8727_v10  ;;  %v8735_v11 = vadd.f32 %v3165_v42, %v8664_v0  ;;  %v8738_v56 = vadd.f32 %v3358_v19, %v8668_v7 }
 0x8de   : > { %10763 = vst [vmem:[#allocation54_spill] sm:$0xff] %v8730_v35  ;;  %6661 = vtanh.f32 %v4020_v31  ;;  %v3515_v1 = vmul.f32 %v8730_v35, %v8730_v35  ;;  %v8743_v48 = vadd.f32 %v3167_v13, %v8656_v24  ;;  %v8746_v17 = vadd.f32 %v3360_v37, %v8660_v16  ;;  %v8748_v46 = vpop.f32.mrb[104].mxu1  ;;  %v8750_v54 = vpop.f32.mrb[104].mxu0 }
 0x8df   : > { %10764 = vst [vmem:[#allocation55_spill] sm:$0xff] %v8738_v56  ;;  %6663 = vtanh.f32 %v4021_v63  ;;  %v3641_v42 = vmul.f32 %v3513_v28, %v8727_v10  ;;  %v3514_v19 = vmul.f32 %v8735_v11, %v8735_v11  ;;  %v3516_v9 = vmul.f32 %v8738_v56, %v8738_v56  ;;  %v8757_v52 = vpop.f32.mrb[105].mxu1  ;;  %v8759_v39 = vpop.f32.mrb[105].mxu0 }
 0x8e0   : > { %10765 = vst [vmem:[#allocation56_spill] sm:$0xff] %v8743_v48  ;;  %10766 = vst [vmem:[#allocation57_spill] sm:$0xff] %v8746_v17  ;;  %6665 = vtanh.f32 %v4023_v25  ;;  %v3643_v59 = vmul.f32 %v3515_v1, %v8730_v35  ;;  %v3517_v13 = vmul.f32 %v8743_v48, %v8743_v48  ;;  %v3519_v37 = vmul.f32 %v8746_v17, %v8746_v17  ;;  %v8766_v29 = vpop.f32.mrb[106].mxu1  ;;  %v8768_v44 = vpop.f32.mrb[106].mxu0 }
 0x8e1   : > { %6667 = vtanh.f32 %v4022_v41  ;;  %v3769_v51 = vmul.f32 0.044715, %v3641_v42  ;;  %v3642_v6 = vmul.f32 %v3514_v19, %v8735_v11  ;;  %v3644_v5 = vmul.f32 %v3516_v9, %v8738_v56  ;;  %v8772_v31 = vpop.f32.mrb[107].mxu1  ;;  %v8774_v3 = vpop.f32.mrb[107].mxu0 }
 0x8e2   : > { %6669 = vtanh.f32 %v4024_v2  ;;  %v3771_v60 = vmul.f32 0.044715, %v3643_v59  ;;  %v3645_v63 = vmul.f32 %v3517_v13, %v8743_v48  ;;  %v3647_v25 = vmul.f32 %v3519_v37, %v8746_v17 }
 0x8e3   : > { %v3897_v28 = vadd.f32 %v3769_v51, %v8727_v10  ;;  %v3770_v1 = vmul.f32 0.044715, %v3642_v6  ;;  %v3772_v18 = vmul.f32 0.044715, %v3644_v5  ;;  %v8780_v41 = vadd.f32 %v3169_v57, %v8664_v0 }
 0x8e4   : > { %v3899_v42 = vadd.f32 %v3771_v60, %v8730_v35  ;;  %v3773_v19 = vmul.f32 0.044715, %v3645_v63  ;;  %v3775_v9 = vmul.f32 0.044715, %v3647_v25  ;;  %v8784_v45 = vadd.f32 %v3362_v50, %v8668_v7 }
 0x8e5   : > { %10767 = vst [vmem:[#allocation58_spill] sm:$0xff] %v8780_v41  ;;  %v6656_v2 = vpop.eup %6655  ;;  %v4025_v59 = vmul.f32 0.7978846, %v3897_v28  ;;  %v3898_v13 = vadd.f32 %v3770_v1, %v8735_v11  ;;  %v3900_v37 = vadd.f32 %v3772_v18, %v8738_v56  ;;  %v3518_v51 = vmul.f32 %v8780_v41, %v8780_v41 }
 0x8e6   : > { %10768 = vst [vmem:[#allocation59_spill] sm:$0xff] %v8784_v45  ;;  %v6658_v6 = vpop.eup %6657  ;;  %v4273_v5 = vadd.f32 1.0, %v6656_v2  ;;  %v4027_v57 = vmul.f32 0.7978846, %v3899_v42  ;;  %v3901_v36 = vadd.f32 %v3773_v19, %v8743_v48  ;;  %v3903_v60 = vadd.f32 %v3775_v9, %v8746_v17  ;;  %v8792_v63 = vpop.f32.mrb[108].mxu1 }
 0x8e7   : > { %v8794_v50 = vpop.f32.mrb[108].mxu0  ;;  %v8796_v25 = vpop.eup %6659  ;;  %v4275_v28 = vadd.f32 1.0, %v6658_v6  ;;  %6671 = vtanh.f32 %v4025_v59  ;;  %v4026_v1 = vmul.f32 0.7978846, %v3898_v13  ;;  %v4028_v18 = vmul.f32 0.7978846, %v3900_v37 }
 0x8e8   : > { %v8798_v38 = vpop.f32.mrb[109].mxu1  ;;  %v8800_v12 = vpop.eup %6661  ;;  %v4401_v2 = vmul.f32 0.5, %v4273_v5  ;;  %6673 = vtanh.f32 %v4027_v57  ;;  %v4029_v42 = vmul.f32 0.7978846, %v3901_v36  ;;  %v4031_v19 = vmul.f32 0.7978846, %v3903_v60 }
 0x8e9   : > { %v8802_v23 = vpop.f32.mrb[109].mxu0  ;;  %v6664_v9 = vpop.eup %6663  ;;  %v4403_v26 = vmul.f32 0.5, %v4275_v28  ;;  %6675 = vtanh.f32 %v4026_v1  ;;  %v3646_v53 = vmul.f32 %v3518_v51, %v8780_v41  ;;  %v3520_v59 = vmul.f32 %v8784_v45, %v8784_v45 }
 0x8ea   : > { %v8807_v13 = vpop.f32.mrb[110].mxu1  ;;  %v8809_v37 = vpop.f32.mrb[110].mxu0  ;;  %v8812_v5 = vmul.f32 %v4401_v2, %v8671_v30  ;;  %v4277_v36 = vadd.f32 1.0, %v6664_v9  ;;  %6677 = vtanh.f32 %v4028_v18  ;;  %v8816_v57 = vadd.f32 %v8748_v46, %v8656_v24 }
 0x8eb   : > { %v6666_v6 = vpop.eup %6665  ;;  %v8818_v60 = vpop.f32.mrb[111].mxu1  ;;  %v8825_v1 = vmul.f32 %v4403_v26, %v8674_v32  ;;  %6679 = vtanh.f32 %v4029_v42  ;;  %v3774_v8 = vmul.f32 0.044715, %v3646_v53  ;;  %v3648_v18 = vmul.f32 %v3520_v59, %v8784_v45 }
 0x8ec   : > { %10769 = vst [vmem:[#allocation60_spill] sm:$0xff] %v8816_v57  ;;  %v8820_v51 = vpop.f32.mrb[111].mxu0  ;;  %v8822_v28 = vpop.eup %6667  ;;  %v4279_v21 = vadd.f32 1.0, %v6666_v6  ;;  %v4405_v2 = vmul.f32 0.5, %v4277_v36  ;;  %6681 = vtanh.f32 %v4031_v19  ;;  %v3521_v46 = vmul.f32 %v8816_v57, %v8816_v57 }
 0x8ed   : > { %v8827_v30 = vpop.eup %6669  ;;  %v3902_v43 = vadd.f32 %v3774_v8, %v8780_v41  ;;  %v8835_v14 = vadd.f32 %v8750_v54, %v8660_v16  ;;  %v8839_v26 = vadd.f32 %v8757_v52, %v8664_v0  ;;  %v3776_v32 = vmul.f32 0.044715, %v3648_v18 }
 0x8ee   : > { %v4407_v9 = vmul.f32 0.5, %v4279_v21  ;;  %v8842_v53 = vmul.f32 %v4405_v2, %v8687_v47  ;;  %v3649_v42 = vmul.f32 %v3521_v46, %v8816_v57  ;;  %v8847_v19 = vadd.f32 %v8759_v39, %v8668_v7  ;;  %v8849_v21 = vpop.f32.mrb[112].mxu1  ;;  %v8851_v8 = vpop.f32.mrb[112].mxu0 }
 0x8ef   : > { %10770 = vst [vmem:[#allocation61_spill] sm:$0xff] %v8835_v14  ;;  %10771 = vst [vmem:[#allocation62_spill] sm:$0xff] %v8839_v26  ;;  %v4030_v59 = vmul.f32 0.7978846, %v3902_v43  ;;  %v3523_v52 = vmul.f32 %v8835_v14, %v8835_v14  ;;  %v3522_v47 = vmul.f32 %v8839_v26, %v8839_v26  ;;  %v8860_v6 = vpop.f32.mrb[113].mxu1  ;;  %v8862_v36 = vpop.f32.mrb[113].mxu0  ;;  %v3904_v2 = vadd.f32 %v3776_v32, %v8784_v45 }
 0x8f0   : > { %10772 = vst [vmem:[#allocation63_spill] sm:$0xff] %v8847_v19  ;;  %v8854_v54 = vmul.f32 %v4407_v9, %v8690_v61  ;;  %v3777_v18 = vmul.f32 0.044715, %v3649_v42  ;;  %v3524_v61 = vmul.f32 %v8847_v19, %v8847_v19  ;;  %v8869_v43 = vpop.f32.mrb[114].mxu1  ;;  %v8871_v46 = vpop.f32.mrb[114].mxu0  ;;  %v8889_v55 = vadd.f32 %v8766_v29, %v8656_v24 }
 0x8f1   : > { %v8873_v9 = vpop.eup %6671  ;;  %6683 = vtanh.f32 %v4030_v59  ;;  %v3651_v4 = vmul.f32 %v3523_v52, %v8835_v14  ;;  %v3650_v39 = vmul.f32 %v3522_v47, %v8839_v26  ;;  %v8879_v15 = vpop.f32.mrb[115].mxu1  ;;  %v4032_v58 = vmul.f32 0.7978846, %v3904_v2 }
 0x8f2   : > { %v8881_v32 = vpop.f32.mrb[115].mxu0  ;;  %v8883_v42 = vpop.eup %6673  ;;  %v3905_v34 = vadd.f32 %v3777_v18, %v8816_v57  ;;  %v3652_v27 = vmul.f32 %v3524_v61, %v8847_v19  ;;  %10774 = vst [vmem:[#allocation65_spill] sm:$0xff] %v8889_v55  ;;  %v8895_v47 = vadd.f32 %v8768_v44, %v8660_v16  ;;  %v8899_v22 = vadd.f32 %v8772_v31, %v8664_v0 }
 0x8f3   : > { %10773 = vst [vmem:[#allocation64_spill] sm:$0xff] %v8883_v42  ;;  %v8891_v59 = vpop.eup %6675  ;;  %v3779_v52 = vmul.f32 0.044715, %v3651_v4  ;;  %v3778_v33 = vmul.f32 0.044715, %v3650_v39  ;;  %6685 = vtanh.f32 %v4032_v58  ;;  %v3525_v29 = vmul.f32 %v8889_v55, %v8889_v55 }
 0x8f4   : > { %10775 = vst [vmem:[#allocation66_spill] sm:$0xff] %v8895_v47  ;;  %10776 = vst [vmem:[#allocation67_spill] sm:$0xff] %v8899_v22  ;;  %v8901_v2 = vpop.eup %6677  ;;  %v4033_v18 = vmul.f32 0.7978846, %v3905_v34  ;;  %v3780_v61 = vmul.f32 0.044715, %v3652_v27  ;;  %v3527_v44 = vmul.f32 %v8895_v47, %v8895_v47  ;;  %v3526_v31 = vmul.f32 %v8899_v22, %v8899_v22 }
 0x8f5   : > { %v8905_v57 = vpop.eup %6679  ;;  %v3907_v4 = vadd.f32 %v3779_v52, %v8835_v14  ;;  %v3906_v39 = vadd.f32 %v3778_v33, %v8839_v26  ;;  %v3653_v34 = vmul.f32 %v3525_v29, %v8889_v55  ;;  %v8919_v58 = vadd.f32 %v8774_v3, %v8668_v7 }
 0x8f6   : > { %10777 = vst [vmem:[#allocation68_spill] sm:$0xff] %v8905_v57  ;;  %v8913_v17 = vpop.eup %6681  ;;  %6687 = vtanh.f32 %v4033_v18  ;;  %v3908_v27 = vadd.f32 %v3780_v61, %v8847_v19  ;;  %v8921_v52 = vpop.f32.mrb[116].mxu1  ;;  %v3655_v35 = vmul.f32 %v3527_v44, %v8895_v47  ;;  %v3654_v48 = vmul.f32 %v3526_v31, %v8899_v22 }
 0x8f7   : > { %10778 = vst [vmem:[#allocation69_spill] sm:$0xff] %v8913_v17  ;;  %10779 = vst [vmem:[#allocation70_spill] sm:$0xff] %v8919_v58  ;;  %v8923_v33 = vpop.f32.mrb[116].mxu0  ;;  %v4035_v14 = vmul.f32 0.7978846, %v3907_v4  ;;  %v8927_v10 = vpop.f32.mrb[117].mxu1  ;;  %v3528_v3 = vmul.f32 %v8919_v58, %v8919_v58  ;;  %v8935_v19 = vadd.f32 %v8792_v63, %v8656_v24  ;;  %v8943_v31 = vadd.f32 %v8794_v50, %v8660_v16 }
 0x8f8   : > { %v4034_v26 = vmul.f32 0.7978846, %v3906_v39  ;;  %v8929_v18 = vpop.f32.mrb[117].mxu0  ;;  %v4036_v61 = vmul.f32 0.7978846, %v3908_v27  ;;  %v8937_v17 = vpop.f32.mrb[118].mxu1 }
 0x8f9   : > { %v3781_v29 = vmul.f32 0.044715, %v3653_v34  ;;  %10780 = vst [vmem:[#allocation71_spill] sm:$0xff] %v8935_v19  ;;  %v8939_v4 = vpop.f32.mrb[118].mxu0  ;;  %6689 = vtanh.f32 %v4035_v14  ;;  %v3783_v39 = vmul.f32 0.044715, %v3655_v35  ;;  %v3656_v63 = vmul.f32 %v3528_v3, %v8919_v58 }
 0x8fa   : > { %v3782_v44 = vmul.f32 0.044715, %v3654_v48  ;;  %10781 = vst [vmem:[#allocation72_spill] sm:$0xff] %v8943_v31  ;;  %v8945_v27 = vpop.f32.mrb[119].mxu1  ;;  %v8947_v34 = vpop.f32.mrb[119].mxu0  ;;  %6691 = vtanh.f32 %v4034_v26  ;;  %v3529_v45 = vmul.f32 %v8935_v19, %v8935_v19  ;;  %v3531_v48 = vmul.f32 %v8943_v31, %v8943_v31 }
 0x8fb   : > { %v3909_v42 = vadd.f32 %v3781_v29, %v8889_v55  ;;  %v8953_v57 = vpop.eup %6683  ;;  %6693 = vtanh.f32 %v4036_v61  ;;  %v3911_v14 = vadd.f32 %v3783_v39, %v8895_v47  ;;  %v3784_v56 = vmul.f32 0.044715, %v3656_v63 }
 0x8fc   : > { %v3910_v35 = vadd.f32 %v3782_v44, %v8899_v22  ;;  %v3657_v26 = vmul.f32 %v3529_v45, %v8935_v19  ;;  %v8962_v29 = vadd.f32 %v8798_v38, %v8664_v0  ;;  %v3659_v41 = vmul.f32 %v3531_v48, %v8943_v31 }
 0x8fd   : > { %v4037_v50 = vmul.f32 0.7978846, %v3909_v42  ;;  %v4039_v3 = vmul.f32 0.7978846, %v3911_v14  ;;  %v8967_v61 = vadd.f32 %v8802_v23, %v8668_v7  ;;  %v8969_v39 = vpop.eup %6685  ;;  %v3912_v42 = vadd.f32 %v3784_v56, %v8919_v58 }
 0x8fe   : > { %10782 = vst [vmem:[#allocation73_spill] sm:$0xff] %v8962_v29  ;;  %v4038_v55 = vmul.f32 0.7978846, %v3910_v35  ;;  %v3785_v44 = vmul.f32 0.044715, %v3657_v26  ;;  %v3530_v45 = vmul.f32 %v8962_v29, %v8962_v29  ;;  %v8974_v63 = vpop.f32.mrb[120].mxu1  ;;  %v8982_v23 = vadd.f32 %v8807_v13, %v8656_v24 }
 0x8ff   : > { %10783 = vst [vmem:[#allocation74_spill] sm:$0xff] %v8967_v61  ;;  %6695 = vtanh.f32 %v4037_v50  ;;  %v8976_v38 = vpop.f32.mrb[120].mxu0  ;;  %v3787_v14 = vmul.f32 0.044715, %v3659_v41  ;;  %v3532_v35 = vmul.f32 %v8967_v61, %v8967_v61  ;;  %v8984_v48 = vpop.f32.mrb[121].mxu1 }
 0x900   : > { %6697 = vtanh.f32 %v4039_v3  ;;  %10784 = vst [vmem:[#allocation75_spill] sm:$0xff] %v8982_v23  ;;  %10785 = vst [vmem:[#allocation76_spill] sm:$0xff] %v8984_v48  ;;  %v8986_v56 = vpop.f32.mrb[121].mxu0  ;;  %v8988_v50 = vpop.eup %6687  ;;  %v4040_v26 = vmul.f32 0.7978846, %v3912_v42  ;;  %v3913_v47 = vadd.f32 %v3785_v44, %v8935_v19  ;;  %v3658_v3 = vmul.f32 %v3530_v45, %v8962_v29 }
 0x901   : > { %10786 = vst [vmem:[#allocation77_spill] sm:$0xff] %v8988_v50  ;;  %6699 = vtanh.f32 %v4038_v55  ;;  %v8992_v41 = vpop.f32.mrb[122].mxu1  ;;  %v8994_v58 = vpop.f32.mrb[122].mxu0  ;;  %v3915_v22 = vadd.f32 %v3787_v14, %v8943_v31  ;;  %v3660_v13 = vmul.f32 %v3532_v35, %v8967_v61  ;;  %v3533_v48 = vmul.f32 %v8982_v23, %v8982_v23 }
 0x902   : > { %10787 = vst [vmem:[#allocation78_spill] sm:$0xff] %v8992_v41  ;;  %10788 = vst [vmem:[#allocation79_spill] sm:$0xff] %v8994_v58  ;;  %v9002_v50 = vadd.f32 %v8809_v37, %v8660_v16  ;;  %v9004_v55 = vpop.f32.mrb[123].mxu1  ;;  %v9006_v42 = vpop.f32.mrb[123].mxu0  ;;  %6701 = vtanh.f32 %v4040_v26  ;;  %v4041_v44 = vmul.f32 0.7978846, %v3913_v47  ;;  %v9010_v19 = vadd.f32 %v8818_v60, %v8664_v0 }
 0x903   : > { %v3786_v45 = vmul.f32 0.044715, %v3658_v3  ;;  %v9012_v14 = vpop.eup %6689  ;;  %v4043_v35 = vmul.f32 0.7978846, %v3915_v22  ;;  %v3788_v31 = vmul.f32 0.044715, %v3660_v13  ;;  %v3661_v58 = vmul.f32 %v3533_v48, %v8982_v23 }
 0x904   : > { %10789 = vst [vmem:[#allocation80_spill] sm:$0xff] %v9002_v50  ;;  %10790 = vst [vmem:[#allocation81_spill] sm:$0xff] %v9010_v19  ;;  %v3535_v37 = vmul.f32 %v9002_v50, %v9002_v50  ;;  %v9017_v41 = vpop.eup %6691  ;;  %6703 = vtanh.f32 %v4041_v44  ;;  %v3534_v47 = vmul.f32 %v9010_v19, %v9010_v19  ;;  %v9024_v60 = vadd.f32 %v8820_v51, %v8668_v7 }
 0x905   : > { %10791 = vst [vmem:[#allocation82_spill] sm:$0xff] %v9012_v14  ;;  %10792 = vst [vmem:[#allocation83_spill] sm:$0xff] %v9017_v41  ;;  %v3914_v26 = vadd.f32 %v3786_v45, %v8962_v29  ;;  %v9026_v3 = vpop.eup %6693  ;;  %6705 = vtanh.f32 %v4043_v35  ;;  %v3916_v22 = vadd.f32 %v3788_v31, %v8967_v61  ;;  %v3789_v48 = vmul.f32 0.044715, %v3661_v58 }
 0x906   : > { %10793 = vst [vmem:[#allocation84_spill] sm:$0xff] %v9024_v60  ;;  %v3663_v13 = vmul.f32 %v3535_v37, %v9002_v50  ;;  %v3662_v44 = vmul.f32 %v3534_v47, %v9010_v19  ;;  %v3536_v45 = vmul.f32 %v9024_v60, %v9024_v60  ;;  %v9035_v29 = vadd.f32 %v8849_v21, %v8656_v24  ;;  %v9037_v51 = vpop.f32.mrb[124].mxu1  ;;  %v9039_v41 = vpop.f32.mrb[124].mxu0 }
 0x907   : > { %v4042_v14 = vmul.f32 0.7978846, %v3914_v26  ;;  %10795 = vst [vmem:[#allocation86_spill] sm:$0xff] %v9037_v51  ;;  %10796 = vst [vmem:[#allocation87_spill] sm:$0xff] %v9039_v41  ;;  %v4044_v35 = vmul.f32 0.7978846, %v3916_v22  ;;  %v3917_v31 = vadd.f32 %v3789_v48, %v8982_v23  ;;  %v9044_v37 = vadd.f32 %v8851_v8, %v8660_v16 }
 0x908   : > { %10794 = vst [vmem:[#allocation85_spill] sm:$0xff] %v9035_v29  ;;  %v3791_v58 = vmul.f32 0.044715, %v3663_v13  ;;  %v9046_v26 = vpop.f32.mrb[125].mxu1  ;;  %v9048_v47 = vpop.f32.mrb[125].mxu0  ;;  %v3664_v51 = vmul.f32 %v3536_v45, %v9024_v60  ;;  %v3537_v22 = vmul.f32 %v9035_v29, %v9035_v29 }
 0x909   : > { %10797 = vst [vmem:[#allocation88_spill] sm:$0xff] %v9044_v37  ;;  %10798 = vst [vmem:[#allocation89_spill] sm:$0xff] %v9046_v26  ;;  %v9050_v61 = vpop.eup %6695  ;;  %6707 = vtanh.f32 %v4042_v14  ;;  %v3790_v21 = vmul.f32 0.044715, %v3662_v44  ;;  %v9055_v41 = vpop.f32.mrb[126].mxu1 }
 0x90a   : > { %10799 = vst [vmem:[#allocation90_spill] sm:$0xff] %v9048_v47  ;;  %10800 = vst [vmem:[#allocation91_spill] sm:$0xff] %v9055_v41  ;;  %v9057_v48 = vpop.f32.mrb[126].mxu0  ;;  %v9059_v13 = vpop.eup %6697  ;;  %6709 = vtanh.f32 %v4044_v35  ;;  %v4045_v8 = vmul.f32 0.7978846, %v3917_v31  ;;  %v3919_v23 = vadd.f32 %v3791_v58, %v9002_v50  ;;  %v3539_v47 = vmul.f32 %v9044_v37, %v9044_v37 }
 0x90b   : > { %10801 = vst [vmem:[#allocation92_spill] sm:$0xff] %v9057_v48  ;;  %v9064_v14 = vpop.f32.mrb[127].mxu1  ;;  %v9066_v44 = vpop.f32.mrb[127].mxu0  ;;  %v3918_v26 = vadd.f32 %v3790_v21, %v9010_v19  ;;  %v3792_v41 = vmul.f32 0.044715, %v3664_v51  ;;  %v3665_v48 = vmul.f32 %v3537_v22, %v9035_v29  ;;  %v9074_v35 = vadd.f32 %v8860_v6, %v8664_v0 }
 0x90c   : > { %10802 = vst [vmem:[#allocation93_spill] sm:$0xff] %v9064_v14  ;;  %10803 = vst [vmem:[#allocation94_spill] sm:$0xff] %v9066_v44  ;;  %v9068_v45 = vpop.eup %6699  ;;  %6711 = vtanh.f32 %v4045_v8  ;;  %v4047_v31 = vmul.f32 0.7978846, %v3919_v23  ;;  %v3667_v58 = vmul.f32 %v3539_v47, %v9044_v37  ;;  %v9079_v50 = vadd.f32 %v8862_v36, %v8668_v7 }
 0x90d   : > { %10804 = vst [vmem:[#allocation95_spill] sm:$0xff] %v9074_v35  ;;  %v9081_v44 = vpop.eup %6701  ;;  %v4046_v14 = vmul.f32 0.7978846, %v3918_v26  ;;  %v3920_v21 = vadd.f32 %v3792_v41, %v9024_v60  ;;  %v3793_v51 = vmul.f32 0.044715, %v3665_v48  ;;  %v3538_v22 = vmul.f32 %v9074_v35, %v9074_v35 }
 0x90e   : > { %10805 = vst [vmem:[#allocation96_spill] sm:$0xff] %v9079_v50  ;;  %6713 = vtanh.f32 %v4047_v31  ;;  %v3795_v6 = vmul.f32 0.044715, %v3667_v58  ;;  %v3540_v23 = vmul.f32 %v9079_v50, %v9079_v50  ;;  %v9090_v47 = vadd.f32 %v8869_v43, %v8656_v24  ;;  %v9092_v36 = vpop.eup %6703 }
 0x90f   : > { %10806 = vst [vmem:[#allocation97_spill] sm:$0xff] %v9092_v36  ;;  %6715 = vtanh.f32 %v4046_v14  ;;  %v4048_v8 = vmul.f32 0.7978846, %v3920_v21  ;;  %v3921_v26 = vadd.f32 %v3793_v51, %v9035_v29  ;;  %v3666_v41 = vmul.f32 %v3538_v22, %v9074_v35  ;;  %v9096_v48 = vpop.eup %6705 }
 0x910   : > { %10807 = vst [vmem:[#allocation98_spill] sm:$0xff] %v9096_v48  ;;  %v3923_v31 = vadd.f32 %v3795_v6, %v9044_v37  ;;  %v3668_v58 = vmul.f32 %v3540_v23, %v9079_v50  ;;  %v3541_v60 = vmul.f32 %v9090_v47, %v9090_v47  ;;  %v9104_v43 = vadd.f32 %v8871_v46, %v8660_v16 }
 0x911   : > { %6717 = vtanh.f32 %v4048_v8  ;;  %v4049_v14 = vmul.f32 0.7978846, %v3921_v26  ;;  %v3794_v21 = vmul.f32 0.044715, %v3666_v41  ;;  %v9108_v51 = vadd.f32 %v8879_v15, %v8664_v0 }
 0x912   : > { %v4051_v22 = vmul.f32 0.7978846, %v3923_v31  ;;  %v3796_v29 = vmul.f32 0.044715, %v3668_v58  ;;  %v3669_v6 = vmul.f32 %v3541_v60, %v9090_v47  ;;  %v3543_v23 = vmul.f32 %v9104_v43, %v9104_v43 }
 0x913   : > { %v9113_v37 = vpop.eup %6707  ;;  %6719 = vtanh.f32 %v4049_v14  ;;  %v3922_v46 = vadd.f32 %v3794_v21, %v9074_v35  ;;  %v3542_v8 = vmul.f32 %v9108_v51, %v9108_v51  ;;  %v9120_v26 = vadd.f32 %v8881_v32, %v8668_v7 }
 0x914   : > { %v9122_v15 = vpop.eup %6709  ;;  %6721 = vtanh.f32 %v4051_v22  ;;  %v3924_v60 = vadd.f32 %v3796_v29, %v9079_v50  ;;  %v3797_v41 = vmul.f32 0.044715, %v3669_v6  ;;  %v3671_v31 = vmul.f32 %v3543_v23, %v9104_v43 }
 0x915   : > { %10808 = vst [vmem:[#allocation99_spill] sm:$0xff] %v9122_v15  ;;  %v4050_v58 = vmul.f32 0.7978846, %v3922_v46  ;;  %v3670_v14 = vmul.f32 %v3542_v8, %v9108_v51  ;;  %v3544_v21 = vmul.f32 %v9120_v26, %v9120_v26  ;;  %v4274_v35 = vadd.f32 1.0, %v8796_v25 }
 0x916   : > { %v9130_v48 = vpop.eup %6711  ;;  %v4052_v32 = vmul.f32 0.7978846, %v3924_v60  ;;  %v3925_v19 = vadd.f32 %v3797_v41, %v9090_v47  ;;  %v3799_v36 = vmul.f32 0.044715, %v3671_v31  ;;  %v4278_v22 = vadd.f32 1.0, %v8822_v28 }
 0x917   : > { %6723 = vtanh.f32 %v4050_v58  ;;  %v3798_v29 = vmul.f32 0.044715, %v3670_v14  ;;  %v3672_v6 = vmul.f32 %v3544_v21, %v9120_v26  ;;  %v4402_v23 = vmul.f32 0.5, %v4274_v35 }
 0x918   : > { %v9135_v46 = vpop.eup %6713  ;;  %6725 = vtanh.f32 %v4052_v32  ;;  %v4053_v8 = vmul.f32 0.7978846, %v3925_v19  ;;  %v3927_v50 = vadd.f32 %v3799_v36, %v9104_v43  ;;  %v4406_v25 = vmul.f32 0.5, %v4278_v22 }
 0x919   : > { %v9138_v15 = vpop.eup %6715  ;;  %v3926_v60 = vadd.f32 %v3798_v29, %v9108_v51  ;;  %v3800_v41 = vmul.f32 0.044715, %v3672_v6  ;;  %v4530_v31 = vmul.f32 %v4402_v23, %v8677_v20  ;;  %v4276_v28 = vadd.f32 1.0, %v8800_v12 }
 0x91a   : > { %6727 = vtanh.f32 %v4053_v8  ;;  %v4055_v58 = vmul.f32 0.7978846, %v3927_v50  ;;  %v4534_v35 = vmul.f32 %v4406_v25, %v8697_v40  ;;  %v4280_v14 = vadd.f32 1.0, %v8827_v30 }
 0x91b   : > { %v9145_v21 = vpop.eup %6717  ;;  %v4054_v19 = vmul.f32 0.7978846, %v3926_v60  ;;  %v3928_v36 = vadd.f32 %v3800_v41, %v9120_v26  ;;  %v4404_v32 = vmul.f32 0.5, %v4276_v28  ;;  %v9150_v22 = vadd.f32 %v8921_v52, %v8656_v24 }
 0x91c   : > { %6729 = vtanh.f32 %v4055_v58  ;;  %v4658_v20 = vpack.c.bf16 %v4534_v35, %v4530_v31  ;;  %v4408_v29 = vmul.f32 0.5, %v4280_v14  ;;  %v9154_v12 = vadd.f32 %v8923_v33, %v8660_v16 }
 0x91d   : > { %10809 = vst [vmem:[#allocation100_spill] sm:$0xff] %v9150_v22  ;;  %v9156_v40 = vpop.eup %6719  ;;  %6731 = vtanh.f32 %v4054_v19  ;;  %v4056_v30 = vmul.f32 0.7978846, %v3928_v36  ;;  %v4532_v50 = vmul.f32 %v4404_v32, %v8680_v49  ;;  %v3545_v6 = vmul.f32 %v9150_v22, %v9150_v22 }
 0x91e   : > { %10810 = vst [vmem:[#allocation101_spill] sm:$0xff] %v9154_v12  ;;  %v9161_v23 = vpop.eup %6721  ;;  %5015 = vmatprep.mubr.bf16.mxu1 %v4658_v20  ;;  %v4536_v52 = vmul.f32 %v4408_v29, %v8700_v62  ;;  %v3547_v8 = vmul.f32 %v9154_v12, %v9154_v12  ;;  %v9168_v33 = vadd.f32 %v8927_v10, %v8664_v0 }
 0x91f   : > { %v9172_v25 = vadd.f32 %v8929_v18, %v8668_v7  ;;  %6733 = vtanh.f32 %v4056_v30  ;;  %v10811_v49 = vpack.c.bf16 %v8842_v53, %v8812_v5  ;;  %v3673_v60 = vmul.f32 %v3545_v6, %v9150_v22 }
 0x920   : > { %v9180_v62 = vadd.f32 %v8937_v17, %v8656_v24  ;;  %v9184_v41 = vadd.f32 %v8939_v4, %v8660_v16  ;;  %v4660_v10 = vpack.c.bf16 %v4536_v52, %v4532_v50  ;;  %v3675_v31 = vmul.f32 %v3547_v8, %v9154_v12 }
 0x921   : > { %5016 = vmatmul.mubr.bf16.vlgmr.msra.gmra.mrb[160].mxu1 %v10811_v49  ;;  %v3546_v18 = vmul.f32 %v9168_v33, %v9168_v33  ;;  %v3548_v5 = vmul.f32 %v9172_v25, %v9172_v25  ;;  %v9191_v53 = vpop.eup %6723  ;;  %v3801_v28 = vmul.f32 0.044715, %v3673_v60  ;;  %v9199_v4 = vadd.f32 %v8945_v27, %v8664_v0 }
 0x922   : > { %10812 = vst [vmem:[#allocation102_spill] sm:$0xff] %v9180_v62  ;;  %10813 = vst [vmem:[#allocation103_spill] sm:$0xff] %v9184_v41  ;;  %v3549_v17 = vmul.f32 %v9180_v62, %v9180_v62  ;;  %v3551_v58 = vmul.f32 %v9184_v41, %v9184_v41  ;;  %v9201_v35 = vpop.eup %6725  ;;  %5176 = vmatprep.mubr.bf16.mxu0 %v4660_v10  ;;  %v3803_v14 = vmul.f32 0.044715, %v3675_v31 }
 0x923   : > { %v3674_v19 = vmul.f32 %v3546_v18, %v9168_v33  ;;  %v3676_v36 = vmul.f32 %v3548_v5, %v9172_v25  ;;  %v9207_v32 = vadd.f32 %v8947_v34, %v8668_v7  ;;  %v10814_v20 = vpack.c.bf16 %v8854_v54, %v8825_v1 }
 0x924   : > { %v3929_v29 = vadd.f32 %v3801_v28, %v9150_v22  ;;  %v3677_v27 = vmul.f32 %v3549_v17, %v9180_v62  ;;  %v3679_v30 = vmul.f32 %v3551_v58, %v9184_v41  ;;  %v3550_v50 = vmul.f32 %v9199_v4, %v9199_v4  ;;  %v9217_v6 = vpop.eup %6727 }
 0x925   : > { %5177 = vmatmul.mubr.bf16.vlgmr.msra.gmra.mrb[160].mxu0 %v10814_v20  ;;  %v3931_v52 = vadd.f32 %v3803_v14, %v9154_v12  ;;  %v3802_v8 = vmul.f32 0.044715, %v3674_v19  ;;  %v3804_v34 = vmul.f32 0.044715, %v3676_v36  ;;  %v3552_v49 = vmul.f32 %v9207_v32, %v9207_v32 }
 0x926   : > { %v4057_v1 = vmul.f32 0.7978846, %v3929_v29  ;;  %v3805_v54 = vmul.f32 0.044715, %v3677_v27  ;;  %v3807_v60 = vmul.f32 0.044715, %v3679_v30  ;;  %v3678_v10 = vmul.f32 %v3550_v50, %v9199_v4  ;;  %v9223_v31 = vpop.eup %6729 }
 0x927   : > { %v4059_v18 = vmul.f32 0.7978846, %v3931_v52  ;;  %v3930_v5 = vadd.f32 %v3802_v8, %v9168_v33  ;;  %v3932_v28 = vadd.f32 %v3804_v34, %v9172_v25  ;;  %v3680_v17 = vmul.f32 %v3552_v49, %v9207_v32  ;;  %v9228_v58 = vpop.eup %6731 }
 0x928   : > { %6735 = vtanh.f32 %v4057_v1  ;;  %v3933_v14 = vadd.f32 %v3805_v54, %v9180_v62  ;;  %v3935_v19 = vadd.f32 %v3807_v60, %v9184_v41  ;;  %v3806_v36 = vmul.f32 0.044715, %v3678_v10 }
 0x929   : > { %6737 = vtanh.f32 %v4059_v18  ;;  %v4058_v20 = vmul.f32 0.7978846, %v3930_v5  ;;  %v4060_v29 = vmul.f32 0.7978846, %v3932_v28  ;;  %v3808_v27 = vmul.f32 0.044715, %v3680_v17  ;;  %v9232_v30 = vpop.eup %6733 }
 0x92a   : > { %v4061_v50 = vmul.f32 0.7978846, %v3933_v14  ;;  %v4063_v52 = vmul.f32 0.7978846, %v3935_v19  ;;  %v3934_v8 = vadd.f32 %v3806_v36, %v9199_v4  ;;  %v4282_v34 = vadd.f32 1.0, %v8891_v59  ;;  %v10815_v36 = vld [vmem:[#allocation58_spill] sm:$0xff] }
 0x92b   : > { %6739 = vtanh.f32 %v4058_v20  ;;  %v3936_v49 = vadd.f32 %v3808_v27, %v9207_v32  ;;  %v4286_v1 = vadd.f32 1.0, %v8953_v57  ;;  %v4284_v54 = vadd.f32 1.0, %v8901_v2  ;;  %v10816_v20 = vld [vmem:[#allocation55_spill] sm:$0xff] }
 0x92c   : > { %6741 = vtanh.f32 %v4060_v29  ;;  %v4062_v60 = vmul.f32 0.7978846, %v3934_v8  ;;  %v4410_v10 = vmul.f32 0.5, %v4282_v34  ;;  %v4288_v18 = vadd.f32 1.0, %v8969_v39  ;;  %v10817_v29 = vld [vmem:[#allocation68_spill] sm:$0xff]  ;;  %v10818_v8 = vld [vmem:[#allocation59_spill] sm:$0xff] }
 0x92d   : > { %6743 = vtanh.f32 %v4061_v50  ;;  %v4064_v5 = vmul.f32 0.7978846, %v3936_v49  ;;  %v4414_v28 = vmul.f32 0.5, %v4286_v1  ;;  %v4412_v17 = vmul.f32 0.5, %v4284_v54  ;;  %v10819_v34 = vld [vmem:[#allocation64_spill] sm:$0xff]  ;;  %v10820_v54 = vld [vmem:[#allocation69_spill] sm:$0xff] }
 0x92e   : > { %6745 = vtanh.f32 %v4063_v52  ;;  %v4538_v14 = vmul.f32 %v4410_v10, %v8735_v11  ;;  %v4416_v59 = vmul.f32 0.5, %v4288_v18  ;;  %v4281_v19 = vadd.f32 1.0, %v8873_v9  ;;  %v10822_v18 = vld [vmem:[#allocation53_spill] sm:$0xff] }
 0x92f   : > { %6747 = vtanh.f32 %v4062_v60  ;;  %v4542_v57 = vmul.f32 %v4414_v28, %v10815_v36  ;;  %v4540_v2 = vmul.f32 %v4412_v17, %v10816_v20  ;;  %v4285_v27 = vadd.f32 1.0, %v10817_v29 }
 0x930   : > { %6749 = vtanh.f32 %v4064_v5  ;;  %v4544_v39 = vmul.f32 %v4416_v59, %v10818_v8  ;;  %v4409_v50 = vmul.f32 0.5, %v4281_v19  ;;  %v4283_v49 = vadd.f32 1.0, %v10819_v34  ;;  %v10828_v8 = vld [vmem:[#allocation78_spill] sm:$0xff] }
 0x931   : > { %v4662_v1 = vpack.c.bf16 %v4542_v57, %v4538_v14  ;;  %v4413_v52 = vmul.f32 0.5, %v4285_v27  ;;  %v4287_v11 = vadd.f32 1.0, %v10820_v54  ;;  %v9250_v9 = vadd.f32 %v8974_v63, %v8656_v24  ;;  %v10824_v14 = vld [vmem:[#allocation56_spill] sm:$0xff] }
 0x932   : > { %v9252_v60 = vpop.eup %6735  ;;  %v4664_v10 = vpack.c.bf16 %v4544_v39, %v4540_v2  ;;  %v4537_v28 = vmul.f32 %v4409_v50, %v10822_v18  ;;  %v4411_v17 = vmul.f32 0.5, %v4283_v49  ;;  %v9257_v5 = vadd.f32 %v8976_v38, %v8660_v16  ;;  %v10825_v57 = vld [vmem:[#allocation76_spill] sm:$0xff]  ;;  %v10827_v2 = vld [vmem:[#allocation54_spill] sm:$0xff]  ;;  %v10830_v49 = vld [vmem:[#allocation57_spill] sm:$0xff] }
 0x933   : > { %10821 = vst [vmem:[#allocation58_spill] sm:$0xff] %v9250_v9  ;;  %v9259_v59 = vpop.eup %6737  ;;  %5023 = vmatprep.mubr.bf16.mxu1 %v4662_v1  ;;  %v4541_v19 = vmul.f32 %v4413_v52, %v10824_v14  ;;  %v4415_v36 = vmul.f32 0.5, %v4287_v11  ;;  %v3553_v63 = vmul.f32 %v9250_v9, %v9250_v9  ;;  %v9266_v20 = vadd.f32 %v10825_v57, %v8664_v0 }
 0x934   : > { %10823 = vst [vmem:[#allocation55_spill] sm:$0xff] %v9257_v5  ;;  %5184 = vmatprep.mubr.bf16.mxu0 %v4664_v10  ;;  %v4539_v29 = vmul.f32 %v4411_v17, %v10827_v2  ;;  %v3555_v38 = vmul.f32 %v9257_v5, %v9257_v5  ;;  %v9273_v27 = vadd.f32 %v8986_v56, %v8668_v7  ;;  %v10831_v17 = vld [vmem:[#allocation79_spill] sm:$0xff] }
 0x935   : > { %10826 = vst [vmem:[#allocation68_spill] sm:$0xff] %v9266_v20  ;;  %v9277_v39 = vadd.f32 %v10828_v8, %v8656_v24  ;;  %v9279_v50 = vpop.eup %6739  ;;  %v4661_v34 = vpack.c.bf16 %v4541_v19, %v4537_v28  ;;  %v4543_v1 = vmul.f32 %v4415_v36, %v10830_v49  ;;  %v3681_v52 = vmul.f32 %v3553_v63, %v9250_v9 }
 0x936   : > { %v3554_v54 = vmul.f32 %v9266_v20, %v9266_v20  ;;  %v9285_v11 = vpop.eup %6741  ;;  %v3683_v10 = vmul.f32 %v3555_v38, %v9257_v5  ;;  %v3556_v56 = vmul.f32 %v9273_v27, %v9273_v27  ;;  %v9294_v28 = vadd.f32 %v10831_v17, %v8660_v16 }
 0x937   : > { %10829 = vst [vmem:[#allocation59_spill] sm:$0xff] %v9277_v39  ;;  %v3557_v18 = vmul.f32 %v9277_v39, %v9277_v39  ;;  %v9296_v14 = vpop.eup %6743  ;;  %5024 = vmatmul.mubr.bf16.gmra.mrb[164].mxu1 %v4661_v34  ;;  %v4663_v19 = vpack.c.bf16 %v4543_v1, %v4539_v29  ;;  %v3809_v36 = vmul.f32 0.044715, %v3681_v52  ;;  %v9301_v57 = vadd.f32 %v9004_v55, %v8664_v0 }
 0x938   : > { %10832 = vst [vmem:[#allocation64_spill] sm:$0xff] %v9294_v28  ;;  %v3682_v63 = vmul.f32 %v3554_v54, %v9266_v20  ;;  %v9303_v2 = vpop.eup %6745  ;;  %v3811_v38 = vmul.f32 0.044715, %v3683_v10  ;;  %v3684_v8 = vmul.f32 %v3556_v56, %v9273_v27  ;;  %v3559_v17 = vmul.f32 %v9294_v28, %v9294_v28 }
 0x939   : > { %v3685_v49 = vmul.f32 %v3557_v18, %v9277_v39  ;;  %v9309_v41 = vpop.eup %6747  ;;  %5185 = vmatmul.mubr.bf16.gmra.mrb[164].mxu0 %v4663_v19  ;;  %v3937_v29 = vadd.f32 %v3809_v36, %v9250_v9  ;;  %v3558_v55 = vmul.f32 %v9301_v57, %v9301_v57  ;;  %v9316_v1 = vadd.f32 %v9006_v42, %v8668_v7 }
 0x93a   : > { %v3810_v34 = vmul.f32 0.044715, %v3682_v63  ;;  %v9318_v52 = vpop.eup %6749  ;;  %v3939_v54 = vadd.f32 %v3811_v38, %v9257_v5  ;;  %v3812_v10 = vmul.f32 0.044715, %v3684_v8  ;;  %v3687_v18 = vmul.f32 %v3559_v17, %v9294_v28 }
 0x93b   : > { %10833 = vst [vmem:[#allocation69_spill] sm:$0xff] %v9316_v1  ;;  %v3813_v56 = vmul.f32 0.044715, %v3685_v49  ;;  %v4065_v12 = vmul.f32 0.7978846, %v3937_v29  ;;  %v3686_v36 = vmul.f32 %v3558_v55, %v9301_v57  ;;  %v3560_v63 = vmul.f32 %v9316_v1, %v9316_v1 }
 0x93c   : > { %v3938_v19 = vadd.f32 %v3810_v34, %v9266_v20  ;;  %v4067_v9 = vmul.f32 0.7978846, %v3939_v54  ;;  %v3940_v42 = vadd.f32 %v3812_v10, %v9273_v27  ;;  %v3815_v22 = vmul.f32 0.044715, %v3687_v18  ;;  %v10834_v54 = vld [vmem:[#allocation83_spill] sm:$0xff] }
 0x93d   : > { %v3941_v62 = vadd.f32 %v3813_v56, %v9277_v39  ;;  %6751 = vtanh.f32 %v4065_v12  ;;  %v3814_v8 = vmul.f32 0.044715, %v3686_v36  ;;  %v3688_v49 = vmul.f32 %v3560_v63, %v9316_v1 }
 0x93e   : > { %v4066_v38 = vmul.f32 0.7978846, %v3938_v19  ;;  %6753 = vtanh.f32 %v4067_v9  ;;  %v4068_v17 = vmul.f32 0.7978846, %v3940_v42  ;;  %v3943_v34 = vadd.f32 %v3815_v22, %v9294_v28  ;;  %v10835_v42 = vld [vmem:[#allocation62_spill] sm:$0xff] }
 0x93f   : > { %v4069_v29 = vmul.f32 0.7978846, %v3941_v62  ;;  %v3942_v55 = vadd.f32 %v3814_v8, %v9301_v57  ;;  %v3816_v5 = vmul.f32 0.044715, %v3688_v49  ;;  %v4290_v20 = vadd.f32 1.0, %v10834_v54  ;;  %v10836_v8 = vld [vmem:[#allocation77_spill] sm:$0xff] }
 0x940   : > { %6755 = vtanh.f32 %v4066_v38  ;;  %v4071_v10 = vmul.f32 0.7978846, %v3943_v34  ;;  %v4294_v56 = vadd.f32 1.0, %v9068_v45  ;;  %v4292_v12 = vadd.f32 1.0, %v9026_v3  ;;  %v10838_v3 = vld [vmem:[#allocation63_spill] sm:$0xff] }
 0x941   : > { %6757 = vtanh.f32 %v4068_v17  ;;  %v4070_v18 = vmul.f32 0.7978846, %v3942_v55  ;;  %v3944_v9 = vadd.f32 %v3816_v5, %v9316_v1  ;;  %v4418_v19 = vmul.f32 0.5, %v4290_v20  ;;  %v10837_v17 = vld [vmem:[#allocation67_spill] sm:$0xff]  ;;  %v10839_v20 = vld [vmem:[#allocation82_spill] sm:$0xff] }
 0x942   : > { %6759 = vtanh.f32 %v4069_v29  ;;  %v4422_v62 = vmul.f32 0.5, %v4294_v56  ;;  %v4296_v22 = vadd.f32 1.0, %v9081_v44  ;;  %v4420_v36 = vmul.f32 0.5, %v4292_v12  ;;  %v10840_v56 = vld [vmem:[#allocation70_spill] sm:$0xff] }
 0x943   : > { %6761 = vtanh.f32 %v4071_v10  ;;  %v4072_v63 = vmul.f32 0.7978846, %v3944_v9  ;;  %v4546_v38 = vmul.f32 %v4418_v19, %v10835_v42  ;;  %v4289_v49 = vadd.f32 1.0, %v10836_v8  ;;  %v10841_v9 = vld [vmem:[#allocation86_spill] sm:$0xff] }
 0x944   : > { %6763 = vtanh.f32 %v4070_v18  ;;  %v4550_v45 = vmul.f32 %v4422_v62, %v10837_v17  ;;  %v4424_v34 = vmul.f32 0.5, %v4296_v22  ;;  %v4548_v29 = vmul.f32 %v4420_v36, %v10838_v3  ;;  %v10843_v22 = vld [vmem:[#allocation60_spill] sm:$0xff] }
 0x945   : > { %v4293_v55 = vadd.f32 1.0, %v9050_v61  ;;  %6765 = vtanh.f32 %v4072_v63  ;;  %v4417_v5 = vmul.f32 0.5, %v4289_v49  ;;  %v4291_v54 = vadd.f32 1.0, %v10839_v20  ;;  %v10844_v63 = vld [vmem:[#allocation87_spill] sm:$0xff] }
 0x946   : > { %v4295_v44 = vadd.f32 1.0, %v9059_v13  ;;  %v4666_v10 = vpack.c.bf16 %v4550_v45, %v4546_v38  ;;  %v4552_v12 = vmul.f32 %v4424_v34, %v10840_v56  ;;  %v9346_v19 = vadd.f32 %v10841_v9, %v8656_v24  ;;  %v10847_v38 = vld [vmem:[#allocation65_spill] sm:$0xff] }
 0x947   : > { %v4421_v18 = vmul.f32 0.5, %v4293_v55  ;;  %v9348_v62 = vpop.eup %6751  ;;  %v4545_v36 = vmul.f32 %v4417_v5, %v10843_v22  ;;  %v4419_v42 = vmul.f32 0.5, %v4291_v54  ;;  %v9353_v8 = vadd.f32 %v10844_v63, %v8660_v16  ;;  %v10848_v34 = vld [vmem:[#allocation89_spill] sm:$0xff]  ;;  %v10850_v54 = vld [vmem:[#allocation66_spill] sm:$0xff] }
 0x948   : > { %10842 = vst [vmem:[#allocation53_spill] sm:$0xff] %v9346_v19  ;;  %v4423_v61 = vmul.f32 0.5, %v4295_v44  ;;  %v9355_v49 = vpop.eup %6753  ;;  %5031 = vmatprep.mubr.bf16.mxu1 %v4666_v10  ;;  %v4668_v13 = vpack.c.bf16 %v4552_v12, %v4548_v29  ;;  %v3561_v45 = vmul.f32 %v9346_v19, %v9346_v19  ;;  %v9362_v3 = vadd.f32 %v10848_v34, %v8664_v0  ;;  %v10849_v5 = vld [vmem:[#allocation61_spill] sm:$0xff]  ;;  %v10851_v29 = vld [vmem:[#allocation90_spill] sm:$0xff] }
 0x949   : > { %10845 = vst [vmem:[#allocation56_spill] sm:$0xff] %v9353_v8  ;;  %10846 = vst [vmem:[#allocation76_spill] sm:$0xff] %v9355_v49  ;;  %v4549_v17 = vmul.f32 %v4421_v18, %v10847_v38  ;;  %v4547_v20 = vmul.f32 %v4419_v42, %v10849_v5  ;;  %v3563_v56 = vmul.f32 %v9353_v8, %v9353_v8  ;;  %v10852_v42 = vld [vmem:[#allocation91_spill] sm:$0xff] }
 0x94a   : > { %v9364_v55 = vpop.eup %6755  ;;  %v4551_v44 = vmul.f32 %v4423_v61, %v10850_v54  ;;  %v9372_v10 = vadd.f32 %v10851_v29, %v8668_v7  ;;  %5192 = vmatprep.mubr.bf16.mxu0 %v4668_v13  ;;  %v3689_v9 = vmul.f32 %v3561_v45, %v9346_v19  ;;  %v3562_v22 = vmul.f32 %v9362_v3, %v9362_v3  ;;  %v10853_v13 = vld [vmem:[#allocation92_spill] sm:$0xff] }
 0x94b   : > { %v9374_v12 = vpop.eup %6757  ;;  %v4665_v18 = vpack.c.bf16 %v4549_v17, %v4545_v36  ;;  %v9381_v63 = vadd.f32 %v10852_v42, %v8656_v24  ;;  %v3691_v34 = vmul.f32 %v3563_v56, %v9353_v8  ;;  %v9390_v36 = vadd.f32 %v10853_v13, %v8660_v16 }
 0x94c   : > { %v9383_v61 = vpop.eup %6759  ;;  %v4667_v38 = vpack.c.bf16 %v4551_v44, %v4547_v20  ;;  %v3564_v5 = vmul.f32 %v9372_v10, %v9372_v10  ;;  %v3817_v45 = vmul.f32 0.044715, %v3689_v9  ;;  %v3690_v54 = vmul.f32 %v3562_v22, %v9362_v3  ;;  %v10856_v20 = vld [vmem:[#allocation93_spill] sm:$0xff] }
 0x94d   : > { %10854 = vst [vmem:[#allocation54_spill] sm:$0xff] %v9390_v36  ;;  %v9392_v17 = vpop.eup %6761  ;;  %5032 = vmatmul.mubr.bf16.gmra.mrb[168].mxu1 %v4665_v18  ;;  %v3565_v29 = vmul.f32 %v9381_v63, %v9381_v63  ;;  %v9399_v44 = vadd.f32 %v10856_v20, %v8664_v0  ;;  %v3819_v42 = vmul.f32 0.044715, %v3691_v34  ;;  %v3567_v16 = vmul.f32 %v9390_v36, %v9390_v36  ;;  %v10857_v18 = vld [vmem:[#allocation94_spill] sm:$0xff] }
 0x94e   : > { %10855 = vst [vmem:[#allocation78_spill] sm:$0xff] %v9392_v17  ;;  %v9401_v56 = vpop.eup %6763  ;;  %5193 = vmatmul.mubr.bf16.gmra.mrb[168].mxu0 %v4667_v38  ;;  %v3692_v13 = vmul.f32 %v3564_v5, %v9372_v10  ;;  %v9408_v9 = vadd.f32 %v10857_v18, %v8668_v7  ;;  %v3945_v22 = vadd.f32 %v3817_v45, %v9346_v19  ;;  %v3818_v24 = vmul.f32 0.044715, %v3690_v54 }
 0x94f   : > { %v3693_v28 = vmul.f32 %v3565_v29, %v9381_v63  ;;  %v3566_v20 = vmul.f32 %v9399_v44, %v9399_v44  ;;  %v9414_v0 = vpop.eup %6765  ;;  %v3947_v38 = vadd.f32 %v3819_v42, %v9353_v8  ;;  %v3695_v5 = vmul.f32 %v3567_v16, %v9390_v36 }
 0x950   : > { %v3820_v34 = vmul.f32 0.044715, %v3692_v13  ;;  %v3568_v39 = vmul.f32 %v9408_v9, %v9408_v9  ;;  %v4073_v18 = vmul.f32 0.7978846, %v3945_v22  ;;  %v3946_v7 = vadd.f32 %v3818_v24, %v9362_v3 }
 0x951   : > { %v3821_v45 = vmul.f32 0.044715, %v3693_v28  ;;  %v3694_v54 = vmul.f32 %v3566_v20, %v9399_v44  ;;  %v4075_v29 = vmul.f32 0.7978846, %v3947_v38  ;;  %v3823_v1 = vmul.f32 0.044715, %v3695_v5 }
 0x952   : > { %v3948_v19 = vadd.f32 %v3820_v34, %v9372_v10  ;;  %v3696_v17 = vmul.f32 %v3568_v39, %v9408_v9  ;;  %6767 = vtanh.f32 %v4073_v18  ;;  %v4074_v42 = vmul.f32 0.7978846, %v3946_v7  ;;  %v10858_v18 = vld [vmem:[#allocation99_spill] sm:$0xff] }
 0x953   : > { %v3949_v13 = vadd.f32 %v3821_v45, %v9381_v63  ;;  %v3822_v16 = vmul.f32 0.044715, %v3694_v54  ;;  %6769 = vtanh.f32 %v4075_v29  ;;  %v3951_v22 = vadd.f32 %v3823_v1, %v9390_v36  ;;  %v10859_v54 = vld [vmem:[#allocation73_spill] sm:$0xff] }
 0x954   : > { %v4076_v8 = vmul.f32 0.7978846, %v3948_v19  ;;  %v3824_v49 = vmul.f32 0.044715, %v3696_v17  ;;  %6771 = vtanh.f32 %v4074_v42  ;;  %v4298_v20 = vadd.f32 1.0, %v9113_v37 }
 0x955   : > { %v4077_v24 = vmul.f32 0.7978846, %v3949_v13  ;;  %v3950_v28 = vadd.f32 %v3822_v16, %v9399_v44  ;;  %v4079_v38 = vmul.f32 0.7978846, %v3951_v22  ;;  %v4302_v7 = vadd.f32 1.0, %v9138_v15  ;;  %v10861_v15 = vld [vmem:[#allocation81_spill] sm:$0xff] }
 0x956   : > { %6773 = vtanh.f32 %v4076_v8  ;;  %v3952_v39 = vadd.f32 %v3824_v49, %v9408_v9  ;;  %v4426_v5 = vmul.f32 0.5, %v4298_v20  ;;  %v4300_v19 = vadd.f32 1.0, %v10858_v18  ;;  %v10860_v8 = vld [vmem:[#allocation97_spill] sm:$0xff]  ;;  %v9434_v13 = vpop.f32.mrb[128].mxu1  ;;  %v9436_v49 = vpop.f32.mrb[128].mxu0 }
 0x957   : > { %6775 = vtanh.f32 %v4077_v24  ;;  %v4078_v34 = vmul.f32 0.7978846, %v3950_v28  ;;  %v4430_v17 = vmul.f32 0.5, %v4302_v7  ;;  %v4304_v45 = vadd.f32 1.0, %v9145_v21  ;;  %v9440_v28 = vpop.f32.mrb[129].mxu1  ;;  %v9442_v20 = vpop.f32.mrb[129].mxu0 }
 0x958   : > { %6777 = vtanh.f32 %v4079_v38  ;;  %v4080_v1 = vmul.f32 0.7978846, %v3952_v39  ;;  %v4554_v29 = vmul.f32 %v4426_v5, %v10859_v54  ;;  %v4428_v37 = vmul.f32 0.5, %v4300_v19  ;;  %10862 = vst [vmem:[#allocation57_spill] sm:$0xff] %v9442_v20  ;;  %v10863_v21 = vld [vmem:[#allocation74_spill] sm:$0xff]  ;;  %v9447_v18 = vpop.f32.mrb[130].mxu1 }
 0x959   : > { %6779 = vtanh.f32 %v4078_v34  ;;  %v4297_v42 = vadd.f32 1.0, %v10860_v8  ;;  %v4558_v16 = vmul.f32 %v4430_v17, %v10861_v15  ;;  %v4432_v22 = vmul.f32 0.5, %v4304_v45  ;;  %v10864_v7 = vld [vmem:[#allocation98_spill] sm:$0xff]  ;;  %10865 = vst [vmem:[#allocation79_spill] sm:$0xff] %v9447_v18  ;;  %v9449_v19 = vpop.f32.mrb[130].mxu0  ;;  %v10867_v17 = vld [vmem:[#allocation84_spill] sm:$0xff] }
 0x95a   : > { %6781 = vtanh.f32 %v4080_v1  ;;  %v4301_v24 = vadd.f32 1.0, %v9130_v48  ;;  %v4556_v38 = vmul.f32 %v4428_v37, %v10863_v21  ;;  %v4299_v34 = vadd.f32 1.0, %v10864_v7  ;;  %10866 = vst [vmem:[#allocation83_spill] sm:$0xff] %v9449_v19  ;;  %v9453_v8 = vpop.f32.mrb[131].mxu1  ;;  %v9455_v15 = vpop.f32.mrb[131].mxu0  ;;  %v10873_v19 = vld [vmem:[#allocation80_spill] sm:$0xff] }
 0x95b   : > { %v4425_v39 = vmul.f32 0.5, %v4297_v42  ;;  %v4303_v5 = vadd.f32 1.0, %v9135_v46  ;;  %v4670_v1 = vpack.c.bf16 %v4558_v16, %v4554_v29  ;;  %v4560_v45 = vmul.f32 %v4432_v22, %v10867_v17  ;;  %10868 = vst [vmem:[#allocation62_spill] sm:$0xff] %v9453_v8  ;;  %10869 = vst [vmem:[#allocation77_spill] sm:$0xff] %v9455_v15  ;;  %v10870_v42 = vld [vmem:[#allocation71_spill] sm:$0xff]  ;;  %v10872_v15 = vld [vmem:[#allocation72_spill] sm:$0xff] }
 0x95c   : > { %v4429_v54 = vmul.f32 0.5, %v4301_v24  ;;  %v4306_v48 = vadd.f32 1.0, %v9191_v53  ;;  %v9457_v37 = vpop.eup %6767  ;;  %v4427_v7 = vmul.f32 0.5, %v4299_v34  ;;  %v4310_v18 = vadd.f32 1.0, %v9228_v58  ;;  %v10871_v16 = vld [vmem:[#allocation75_spill] sm:$0xff] }
 0x95d   : > { %v4553_v21 = vmul.f32 %v4425_v39, %v10870_v42  ;;  %v4431_v46 = vmul.f32 0.5, %v4303_v5  ;;  %v9461_v20 = vpop.eup %6769  ;;  %5039 = vmatprep.mubr.bf16.mxu1 %v4670_v1  ;;  %v4672_v29 = vpack.c.bf16 %v4560_v45, %v4556_v38  ;;  %v4308_v53 = vadd.f32 1.0, %v9201_v35  ;;  %v10874_v1 = vld [vmem:[#allocation95_spill] sm:$0xff] }
 0x95e   : > { %v4557_v22 = vmul.f32 %v4429_v54, %v10871_v16  ;;  %v4434_v24 = vmul.f32 0.5, %v4306_v48  ;;  %v9465_v17 = vpop.eup %6771  ;;  %v4555_v8 = vmul.f32 %v4427_v7, %v10872_v15  ;;  %v4438_v39 = vmul.f32 0.5, %v4310_v18  ;;  %v9478_v18 = vpop.f32.mrb[132].mxu1 }
 0x95f   : > { %v4559_v36 = vmul.f32 %v4431_v46, %v10873_v19  ;;  %v4312_v34 = vadd.f32 1.0, %v9232_v30  ;;  %5200 = vmatprep.mubr.bf16.mxu0 %v4672_v29  ;;  %v4436_v45 = vmul.f32 0.5, %v4308_v53  ;;  %v4305_v54 = vadd.f32 1.0, %v9156_v40  ;;  %v9480_v30 = vpop.f32.mrb[132].mxu0 }
 0x960   : > { %v9470_v5 = vpop.eup %6773  ;;  %v4669_v58 = vpack.c.bf16 %v4557_v22, %v4553_v21  ;;  %v4562_v38 = vmul.f32 %v4434_v24, %v10874_v1  ;;  %v4566_v42 = vmul.f32 %v4438_v39, %v9108_v51  ;;  %v4309_v19 = vadd.f32 1.0, %v9217_v6  ;;  %v10875_v21 = vld [vmem:[#allocation96_spill] sm:$0xff]  ;;  %v9489_v51 = vpop.f32.mrb[133].mxu0 }
 0x961   : > { %v9474_v48 = vpop.eup %6775  ;;  %v4671_v35 = vpack.c.bf16 %v4559_v36, %v4555_v8  ;;  %v4440_v15 = vmul.f32 0.5, %v4312_v34  ;;  %v4564_v46 = vmul.f32 %v4436_v45, %v10875_v21  ;;  %v4433_v29 = vmul.f32 0.5, %v4305_v54  ;;  %v9487_v36 = vpop.f32.mrb[133].mxu1 }
 0x962   : > { %v9482_v7 = vpop.eup %6777  ;;  %5040 = vmatmul.mubr.bf16.gmra.mrb[172].mxu1 %v4669_v58  ;;  %v4307_v40 = vadd.f32 1.0, %v9161_v23  ;;  %v4311_v16 = vadd.f32 1.0, %v9223_v31  ;;  %v4674_v6 = vpack.c.bf16 %v4566_v42, %v4562_v38  ;;  %v4437_v24 = vmul.f32 0.5, %v4309_v19  ;;  %v9495_v39 = vpop.f32.mrb[134].mxu1  ;;  %v10877_v31 = vld [vmem:[#allocation85_spill] sm:$0xff] }
 0x963   : > { %v9491_v8 = vpop.eup %6779  ;;  %5201 = vmatmul.mubr.bf16.gmra.mrb[172].mxu0 %v4671_v35  ;;  %v4568_v22 = vmul.f32 %v4440_v15, %v9120_v26  ;;  %v4314_v53 = vadd.f32 1.0, %v9279_v50  ;;  %v9497_v34 = vpop.f32.mrb[134].mxu0  ;;  %v4561_v58 = vmul.f32 %v4433_v29, %v10877_v31  ;;  %v4318_v54 = vadd.f32 1.0, %v9309_v41  ;;  %v10878_v15 = vld [vmem:[#allocation88_spill] sm:$0xff] }
 0x964   : > { %10876 = vst [vmem:[#allocation67_spill] sm:$0xff] %v9497_v34  ;;  %v9499_v23 = vpop.eup %6781  ;;  %v4435_v1 = vmul.f32 0.5, %v4307_v40  ;;  %v4439_v45 = vmul.f32 0.5, %v4311_v16  ;;  %v9503_v21 = vpop.f32.mrb[135].mxu1  ;;  %5047 = vmatprep.mubr.bf16.mxu1 %v4674_v6  ;;  %v4565_v50 = vmul.f32 %v4437_v24, %v9090_v47  ;;  %v4316_v42 = vadd.f32 1.0, %v9285_v11 }
 0x965   : > { %v9505_v38 = vpop.f32.mrb[135].mxu0  ;;  %v4676_v26 = vpack.c.bf16 %v4568_v22, %v4564_v46  ;;  %v4442_v35 = vmul.f32 0.5, %v4314_v53  ;;  %v4446_v29 = vmul.f32 0.5, %v4318_v54  ;;  %v4320_v40 = vadd.f32 1.0, %v9318_v52 }
 0x966   : > { %v4563_v19 = vmul.f32 %v4435_v1, %v10878_v15  ;;  %v4567_v34 = vmul.f32 %v4439_v45, %v9104_v43  ;;  %v4673_v41 = vpack.c.bf16 %v4565_v50, %v4561_v58  ;;  %v4444_v31 = vmul.f32 0.5, %v4316_v42  ;;  %v9519_v1 = vpop.f32.mrb[136].mxu1  ;;  %v9521_v58 = vpop.f32.mrb[136].mxu0  ;;  %v10880_v42 = vld [vmem:[#allocation102_spill] sm:$0xff] }
 0x967   : > { %5208 = vmatprep.mubr.bf16.mxu0 %v4676_v26  ;;  %v4570_v16 = vmul.f32 %v4442_v35, %v9168_v33  ;;  %v4313_v6 = vadd.f32 1.0, %v9252_v60  ;;  %v4574_v47 = vmul.f32 %v4446_v29, %v9199_v4  ;;  %v4448_v22 = vmul.f32 0.5, %v4320_v40  ;;  %v9525_v45 = vpop.f32.mrb[137].mxu1 }
 0x968   : > { %v4675_v46 = vpack.c.bf16 %v4567_v34, %v4563_v19  ;;  %v4317_v11 = vadd.f32 1.0, %v9296_v14  ;;  %v4572_v24 = vmul.f32 %v4444_v31, %v9172_v25  ;;  %v4315_v43 = vadd.f32 1.0, %v9259_v59  ;;  %v9527_v14 = vpop.f32.mrb[137].mxu0  ;;  %v10879_v25 = vld [vmem:[#allocation100_spill] sm:$0xff]  ;;  %v9531_v50 = vpop.f32.mrb[138].mxu1  ;;  %v10882_v31 = vld [vmem:[#allocation103_spill] sm:$0xff] }
 0x969   : > { %v4441_v53 = vmul.f32 0.5, %v4313_v6  ;;  %v4319_v52 = vadd.f32 1.0, %v9303_v2  ;;  %v4678_v33 = vpack.c.bf16 %v4574_v47, %v4570_v16  ;;  %v4576_v60 = vmul.f32 %v4448_v22, %v9207_v32  ;;  %v9533_v35 = vpop.f32.mrb[138].mxu0  ;;  %v9537_v29 = vpop.f32.mrb[139].mxu1  ;;  %v10883_v22 = vld [vmem:[#allocation68_spill] sm:$0xff] }
 0x96a   : > { %5048 = vmatmul.mubr.bf16.gmra.mrb[176].mxu1 %v4673_v41  ;;  %v4445_v34 = vmul.f32 0.5, %v4317_v11  ;;  %v4322_v4 = vadd.f32 1.0, %v9364_v55  ;;  %v4443_v54 = vmul.f32 0.5, %v4315_v43  ;;  %v4326_v26 = vadd.f32 1.0, %v9401_v56  ;;  %v9539_v40 = vpop.f32.mrb[139].mxu0  ;;  %v10881_v41 = vld [vmem:[#allocation101_spill] sm:$0xff] }
 0x96b   : > { %5209 = vmatmul.mubr.bf16.gmra.mrb[176].mxu0 %v4675_v46  ;;  %v4569_v59 = vmul.f32 %v4441_v53, %v10879_v25  ;;  %v4447_v2 = vmul.f32 0.5, %v4319_v52  ;;  %5055 = vmatprep.mubr.bf16.mxu1 %v4678_v33  ;;  %v4680_v32 = vpack.c.bf16 %v4576_v60, %v4572_v24  ;;  %v4324_v19 = vadd.f32 1.0, %v9374_v12 }
 0x96c   : > { %v4573_v15 = vmul.f32 %v4445_v34, %v10880_v42  ;;  %v4450_v55 = vmul.f32 0.5, %v4322_v4  ;;  %v4571_v16 = vmul.f32 %v4443_v54, %v10881_v41  ;;  %v4454_v56 = vmul.f32 0.5, %v4326_v26  ;;  %v10884_v4 = vld [vmem:[#allocation76_spill] sm:$0xff]  ;;  %v10885_v54 = vld [vmem:[#allocation78_spill] sm:$0xff] }
 0x96d   : > { %v4575_v6 = vmul.f32 %v4447_v2, %v10882_v31  ;;  %v4328_v46 = vadd.f32 1.0, %v9414_v0  ;;  %5216 = vmatprep.mubr.bf16.mxu0 %v4680_v32  ;;  %v4452_v24 = vmul.f32 0.5, %v4324_v19  ;;  %v4321_v53 = vadd.f32 1.0, %v9348_v62 }
 0x96e   : > { %v4677_v47 = vpack.c.bf16 %v4573_v15, %v4569_v59  ;;  %v4578_v11 = vmul.f32 %v4450_v55, %v10883_v22  ;;  %v4582_v12 = vmul.f32 %v4454_v56, %v9301_v57  ;;  %v4325_v33 = vadd.f32 1.0, %v9383_v61  ;;  %v10886_v59 = vld [vmem:[#allocation69_spill] sm:$0xff]  ;;  %v9553_v62 = vpop.f32.mrb[140].mxu1  ;;  %v9555_v15 = vpop.f32.mrb[140].mxu0  ;;  %v10887_v57 = vld [vmem:[#allocation58_spill] sm:$0xff] }
 0x96f   : > { %v4679_v43 = vpack.c.bf16 %v4575_v6, %v4571_v16  ;;  %v4456_v52 = vmul.f32 0.5, %v4328_v46  ;;  %v4580_v60 = vmul.f32 %v4452_v24, %v9273_v27  ;;  %v4449_v34 = vmul.f32 0.5, %v4321_v53  ;;  %v9559_v41 = vpop.f32.mrb[141].mxu1  ;;  %v9561_v16 = vpop.f32.mrb[141].mxu0  ;;  %v10888_v6 = vld [vmem:[#allocation59_spill] sm:$0xff]  ;;  %v10890_v53 = vld [vmem:[#allocation64_spill] sm:$0xff] }
 0x970   : > { %v4323_v25 = vadd.f32 1.0, %v10884_v4  ;;  %v4327_v0 = vadd.f32 1.0, %v10885_v54  ;;  %v4682_v2 = vpack.c.bf16 %v4582_v12, %v4578_v11  ;;  %v4453_v32 = vmul.f32 0.5, %v4325_v33  ;;  %v9565_v22 = vpop.f32.mrb[142].mxu1  ;;  %v10889_v11 = vld [vmem:[#allocation55_spill] sm:$0xff] }
 0x971   : > { %v4584_v26 = vmul.f32 %v4456_v52, %v10886_v59  ;;  %v4330_v42 = vadd.f32 1.0, %v9465_v17  ;;  %v4577_v61 = vmul.f32 %v4449_v34, %v10887_v57  ;;  %v4334_v19 = vadd.f32 1.0, %v9491_v8  ;;  %v9572_v33 = vpop.f32.mrb[143].mxu1 }
 0x972   : > { %5056 = vmatmul.mubr.bf16.gmra.mrb[180].mxu1 %v4677_v47  ;;  %v4451_v55 = vmul.f32 0.5, %v4323_v25  ;;  %v4455_v27 = vmul.f32 0.5, %v4327_v0  ;;  %v4581_v17 = vmul.f32 %v4453_v32, %v10888_v6  ;;  %v4332_v46 = vadd.f32 1.0, %v9470_v5  ;;  %v9567_v47 = vpop.f32.mrb[142].mxu0  ;;  %v10895_v6 = vld [vmem:[#allocation51_spill] sm:$0xff] }
 0x973   : > { %5217 = vmatmul.mubr.bf16.gmra.mrb[180].mxu0 %v4679_v43  ;;  %5063 = vmatprep.mubr.bf16.mxu1 %v4682_v2  ;;  %v4684_v31 = vpack.c.bf16 %v4584_v26, %v4580_v60  ;;  %v4458_v56 = vmul.f32 0.5, %v4330_v42  ;;  %v4462_v12 = vmul.f32 0.5, %v4334_v19  ;;  %v4336_v52 = vadd.f32 1.0, %v9499_v23  ;;  %v9574_v43 = vpop.f32.mrb[143].mxu0 }
 0x974   : > { %v4579_v24 = vmul.f32 %v4451_v55, %v10889_v11  ;;  %v4583_v8 = vmul.f32 %v4455_v27, %v10890_v53  ;;  %v4681_v60 = vpack.c.bf16 %v4581_v17, %v4577_v61  ;;  %v4460_v5 = vmul.f32 0.5, %v4332_v46  ;;  %v10891_v61 = vld [vmem:[#allocation49_spill] sm:$0xff] }
 0x975   : > { %5224 = vmatprep.mubr.bf16.mxu0 %v4684_v31  ;;  %v4586_v34 = vmul.f32 %v4458_v56, %v9362_v3  ;;  %v4329_v4 = vadd.f32 1.0, %v9457_v37  ;;  %v4590_v54 = vmul.f32 %v4462_v12, %v9399_v44  ;;  %v4464_v0 = vmul.f32 0.5, %v4336_v52  ;;  %v10892_v55 = vld [vmem:[#allocation53_spill] sm:$0xff] }
 0x976   : > { %v4683_v25 = vpack.c.bf16 %v4583_v8, %v4579_v24  ;;  %v4333_v2 = vadd.f32 1.0, %v9474_v48  ;;  %v4588_v59 = vmul.f32 %v4460_v5, %v9372_v10  ;;  %v4331_v26 = vadd.f32 1.0, %v9461_v20  ;;  %v10893_v48 = vld [vmem:[#allocation50_spill] sm:$0xff]  ;;  %v9593_v31 = vpop.f32.mrb[144].mxu1  ;;  %v9595_v20 = vpop.f32.mrb[144].mxu0  ;;  %v10897_v24 = vld [vmem:[#allocation56_spill] sm:$0xff] }
 0x977   : > { %v4457_v23 = vmul.f32 0.5, %v4329_v4  ;;  %v4335_v32 = vadd.f32 1.0, %v9482_v7  ;;  %v4686_v42 = vpack.c.bf16 %v4590_v54, %v4586_v34  ;;  %v4592_v57 = vmul.f32 %v4464_v0, %v9408_v9  ;;  %v9604_v56 = vpop.f32.mrb[145].mxu1  ;;  %v9606_v46 = vpop.f32.mrb[145].mxu0  ;;  %v10898_v8 = vld [vmem:[#allocation54_spill] sm:$0xff]  ;;  %v10899_v4 = vld [vmem:[#allocation52_spill] sm:$0xff] }
 0x978   : > { %v4461_v3 = vmul.f32 0.5, %v4333_v2  ;;  %v9586_v37 = vadd.f32 %v9434_v13, %v10891_v61  ;;  %v4459_v27 = vmul.f32 0.5, %v4331_v26  ;;  %v9591_v10 = vadd.f32 %v9436_v49, %v10893_v48  ;;  %v9613_v52 = vpop.f32.mrb[146].mxu1  ;;  %v10901_v26 = vld [vmem:[#allocation79_spill] sm:$0xff] }
 0x979   : > { %v4585_v44 = vmul.f32 %v4457_v23, %v10892_v55  ;;  %v4463_v19 = vmul.f32 0.5, %v4335_v32  ;;  %v4688_v7 = vpack.c.bf16 %v4592_v57, %v4588_v59  ;;  %v9602_v17 = vadd.f32 %v9440_v28, %v10895_v6  ;;  %v9624_v0 = vpop.f32.mrb[147].mxu1 }
 0x97a   : > { %10894 = vst [vmem:[#allocation63_spill] sm:$0xff] %v9591_v10  ;;  %5064 = vmatmul.mubr.bf16.gmra.mrb[184].mxu1 %v4681_v60  ;;  %v4589_v9 = vmul.f32 %v4461_v3, %v9381_v63  ;;  %v3569_v13 = vmul.f32 %v9586_v37, %v9586_v37  ;;  %v4587_v53 = vmul.f32 %v4459_v27, %v10897_v24  ;;  %v9615_v60 = vpop.f32.mrb[146].mxu0  ;;  %v10903_v27 = vld [vmem:[#allocation62_spill] sm:$0xff]  ;;  %v10904_v24 = vld [vmem:[#allocation77_spill] sm:$0xff] }
 0x97b   : > { %5225 = vmatmul.mubr.bf16.gmra.mrb[184].mxu0 %v4683_v25  ;;  %5071 = vmatprep.mubr.bf16.mxu1 %v4686_v42  ;;  %v4591_v12 = vmul.f32 %v4463_v19, %v10898_v8  ;;  %v3571_v63 = vmul.f32 %v9591_v10, %v9591_v10  ;;  %v3570_v5 = vmul.f32 %v9602_v17, %v9602_v17  ;;  %v10900_v25 = vld [vmem:[#allocation57_spill] sm:$0xff]  ;;  %v9626_v2 = vpop.f32.mrb[147].mxu0  ;;  %v10902_v42 = vld [vmem:[#allocation83_spill] sm:$0xff] }
 0x97c   : > { %5232 = vmatprep.mubr.bf16.mxu0 %v4688_v7  ;;  %v4685_v28 = vpack.c.bf16 %v4589_v9, %v4585_v44  ;;  %v3697_v34 = vmul.f32 %v3569_v13, %v9586_v37  ;;  %v9622_v54 = vadd.f32 %v10900_v25, %v10899_v4  ;;  %v9631_v32 = vadd.f32 %v10901_v26, %v10891_v61 }
 0x97d   : > { %v4687_v59 = vpack.c.bf16 %v4591_v12, %v4587_v53  ;;  %v3699_v23 = vmul.f32 %v3571_v63, %v9591_v10  ;;  %v9635_v57 = vadd.f32 %v10902_v42, %v10893_v48  ;;  %v3698_v55 = vmul.f32 %v3570_v5, %v9602_v17 }
 0x97e   : > { %v3825_v3 = vmul.f32 0.044715, %v3697_v34  ;;  %v3572_v44 = vmul.f32 %v9622_v54, %v9622_v54  ;;  %v9642_v19 = vadd.f32 %v10903_v27, %v10895_v6  ;;  %v3573_v9 = vmul.f32 %v9631_v32, %v9631_v32  ;;  %v9661_v42 = vpop.f32.mrb[148].mxu1  ;;  %v9663_v27 = vpop.f32.mrb[148].mxu0 }
 0x97f   : > { %v3827_v7 = vmul.f32 0.044715, %v3699_v23  ;;  %v3575_v13 = vmul.f32 %v9635_v57, %v9635_v57  ;;  %v9650_v53 = vadd.f32 %v10904_v24, %v10899_v4  ;;  %v3826_v12 = vmul.f32 0.044715, %v3698_v55  ;;  %10905 = vst [vmem:[#allocation82_spill] sm:$0xff] %v9661_v42  ;;  %10906 = vst [vmem:[#allocation70_spill] sm:$0xff] %v9663_v27 }
 0x980   : > { %v3953_v8 = vadd.f32 %v3825_v3, %v9586_v37  ;;  %v3700_v63 = vmul.f32 %v3572_v44, %v9622_v54  ;;  %v3574_v34 = vmul.f32 %v9642_v19, %v9642_v19  ;;  %v3701_v25 = vmul.f32 %v3573_v9, %v9631_v32  ;;  %v9667_v11 = vpop.f32.mrb[149].mxu1 }
 0x981   : > { %v3955_v5 = vadd.f32 %v3827_v7, %v9591_v10  ;;  %v3703_v23 = vmul.f32 %v3575_v13, %v9635_v57  ;;  %v3576_v26 = vmul.f32 %v9650_v53, %v9650_v53  ;;  %v3954_v55 = vadd.f32 %v3826_v12, %v9602_v17  ;;  %v9669_v7 = vpop.f32.mrb[149].mxu0  ;;  %v9673_v27 = vpop.f32.mrb[150].mxu1 }
 0x982   : > { %5072 = vmatmul.mubr.bf16.gmra.mrb[188].mxu1 %v4685_v28  ;;  %v4081_v3 = vmul.f32 0.7978846, %v3953_v8  ;;  %v3828_v44 = vmul.f32 0.044715, %v3700_v63  ;;  %v3702_v24 = vmul.f32 %v3574_v34, %v9642_v19  ;;  %v3829_v13 = vmul.f32 0.044715, %v3701_v25 }
 0x983   : > { %5233 = vmatmul.mubr.bf16.gmra.mrb[188].mxu0 %v4687_v59  ;;  %v4083_v9 = vmul.f32 0.7978846, %v3955_v5  ;;  %v3831_v49 = vmul.f32 0.044715, %v3703_v23  ;;  %v3704_v10 = vmul.f32 %v3576_v26, %v9650_v53  ;;  %v4082_v42 = vmul.f32 0.7978846, %v3954_v55 }
 0x984   : > { %6783 = vtanh.f32 %v4081_v3  ;;  %v3956_v28 = vadd.f32 %v3828_v44, %v9622_v54  ;;  %v3830_v8 = vmul.f32 0.044715, %v3702_v24  ;;  %10907 = vst [vmem:[#allocation86_spill] sm:$0xff] %v9673_v27  ;;  %v9675_v12 = vpop.f32.mrb[150].mxu0  ;;  %v3957_v63 = vadd.f32 %v3829_v13, %v9631_v32  ;;  %v9679_v5 = vpop.f32.mrb[151].mxu1 }
 0x985   : > { %10908 = vst [vmem:[#allocation60_spill] sm:$0xff] %v9675_v12  ;;  %6785 = vtanh.f32 %v4083_v9  ;;  %v3959_v34 = vadd.f32 %v3831_v49, %v9635_v57  ;;  %v3832_v59 = vmul.f32 0.044715, %v3704_v10  ;;  %10909 = vst [vmem:[#allocation87_spill] sm:$0xff] %v9679_v5  ;;  %v9681_v25 = vpop.f32.mrb[151].mxu0  ;;  %v9686_v3 = vadd.f32 %v9478_v18, %v10891_v61 }
 0x986   : > { %10910 = vst [vmem:[#allocation65_spill] sm:$0xff] %v9681_v25  ;;  %6787 = vtanh.f32 %v4082_v42  ;;  %v4084_v23 = vmul.f32 0.7978846, %v3956_v28  ;;  %v3958_v26 = vadd.f32 %v3830_v8, %v9642_v19  ;;  %v4085_v55 = vmul.f32 0.7978846, %v3957_v63  ;;  %v9707_v8 = vpop.f32.mrb[152].mxu0 }
 0x987   : > { %10911 = vst [vmem:[#allocation89_spill] sm:$0xff] %v9686_v3  ;;  %v4087_v44 = vmul.f32 0.7978846, %v3959_v34  ;;  %v3960_v24 = vadd.f32 %v3832_v59, %v9650_v53  ;;  %v9691_v49 = vadd.f32 %v9480_v30, %v10893_v48  ;;  %v3577_v42 = vmul.f32 %v9686_v3, %v9686_v3  ;;  %v9705_v30 = vpop.f32.mrb[152].mxu1  ;;  %10916 = vst [vmem:[#allocation92_spill] sm:$0xff] %v9707_v8 }
 0x988   : > { %6789 = vtanh.f32 %v4084_v23  ;;  %v4086_v10 = vmul.f32 0.7978846, %v3958_v26  ;;  %v9697_v9 = vadd.f32 %v9487_v36, %v10895_v6  ;;  %v9703_v28 = vadd.f32 %v9489_v51, %v10899_v4  ;;  %10915 = vst [vmem:[#allocation91_spill] sm:$0xff] %v9705_v30  ;;  %v9716_v59 = vpop.f32.mrb[153].mxu1  ;;  %v9718_v23 = vpop.f32.mrb[153].mxu0 }
 0x989   : > { %10912 = vst [vmem:[#allocation61_spill] sm:$0xff] %v9691_v49  ;;  %6791 = vtanh.f32 %v4085_v55  ;;  %v4088_v18 = vmul.f32 0.7978846, %v3960_v24  ;;  %v3579_v13 = vmul.f32 %v9691_v49, %v9691_v49  ;;  %v3705_v63 = vmul.f32 %v3577_v42, %v9686_v3  ;;  %10918 = vst [vmem:[#allocation94_spill] sm:$0xff] %v9716_v59  ;;  %v10920_v55 = vld [vmem:[#allocation67_spill] sm:$0xff]  ;;  %v9727_v24 = vpop.f32.mrb[154].mxu1 }
 0x98a   : > { %10913 = vst [vmem:[#allocation66_spill] sm:$0xff] %v9697_v9  ;;  %10914 = vst [vmem:[#allocation90_spill] sm:$0xff] %v9703_v28  ;;  %6793 = vtanh.f32 %v4087_v44  ;;  %v3578_v36 = vmul.f32 %v9697_v9, %v9697_v9  ;;  %v9714_v34 = vadd.f32 %v9495_v39, %v10891_v61  ;;  %v3580_v26 = vmul.f32 %v9703_v28, %v9703_v28  ;;  %v9729_v42 = vpop.f32.mrb[154].mxu0 }
 0x98b   : > { %10919 = vst [vmem:[#allocation99_spill] sm:$0xff] %v9718_v23  ;;  %6795 = vtanh.f32 %v4086_v10  ;;  %v3707_v51 = vmul.f32 %v3579_v13, %v9691_v49  ;;  %v9725_v44 = vadd.f32 %v10920_v55, %v10893_v48  ;;  %10922 = vst [vmem:[#allocation97_spill] sm:$0xff] %v9727_v24  ;;  %v3833_v39 = vmul.f32 0.044715, %v3705_v63  ;;  %v9734_v23 = vpop.f32.mrb[155].mxu1  ;;  %v9736_v13 = vpop.f32.mrb[155].mxu0 }
 0x98c   : > { %10917 = vst [vmem:[#allocation93_spill] sm:$0xff] %v9714_v34  ;;  %10923 = vst [vmem:[#allocation81_spill] sm:$0xff] %v9729_v42  ;;  %6797 = vtanh.f32 %v4088_v18  ;;  %v3706_v59 = vmul.f32 %v3578_v36, %v9697_v9  ;;  %v3581_v10 = vmul.f32 %v9714_v34, %v9714_v34  ;;  %v3708_v30 = vmul.f32 %v3580_v26, %v9703_v28 }
 0x98d   : > { %10921 = vst [vmem:[#allocation73_spill] sm:$0xff] %v9725_v44  ;;  %10924 = vst [vmem:[#allocation74_spill] sm:$0xff] %v9734_v23  ;;  %v3835_v8 = vmul.f32 0.044715, %v3707_v51  ;;  %v3583_v55 = vmul.f32 %v9725_v44, %v9725_v44  ;;  %v9743_v42 = vadd.f32 %v9503_v21, %v10895_v6  ;;  %v3961_v63 = vadd.f32 %v3833_v39, %v9686_v3 }
 0x98e   : > { %10925 = vst [vmem:[#allocation98_spill] sm:$0xff] %v9736_v13  ;;  %v9745_v18 = vpop.eup %6783  ;;  %v3834_v36 = vmul.f32 0.044715, %v3706_v59  ;;  %v3709_v24 = vmul.f32 %v3581_v10, %v9714_v34  ;;  %v9751_v13 = vadd.f32 %v9505_v38, %v10899_v4  ;;  %v3836_v23 = vmul.f32 0.044715, %v3708_v30 }
 0x98f   : > { %10926 = vst [vmem:[#allocation84_spill] sm:$0xff] %v9743_v42  ;;  %v9753_v51 = vpop.eup %6785  ;;  %v3963_v26 = vadd.f32 %v3835_v8, %v9691_v49  ;;  %v3711_v25 = vmul.f32 %v3583_v55, %v9725_v44  ;;  %v3582_v21 = vmul.f32 %v9743_v42, %v9743_v42  ;;  %v4089_v39 = vmul.f32 0.7978846, %v3961_v63  ;;  %v9766_v8 = vpop.f32.mrb[156].mxu1 }
 0x990   : > { %10927 = vst [vmem:[#allocation71_spill] sm:$0xff] %v9751_v13  ;;  %v9759_v5 = vpop.eup %6787  ;;  %v3962_v59 = vadd.f32 %v3834_v36, %v9697_v9  ;;  %v3837_v10 = vmul.f32 0.044715, %v3709_v24  ;;  %v3584_v38 = vmul.f32 %v9751_v13, %v9751_v13  ;;  %v3964_v12 = vadd.f32 %v3836_v23, %v9703_v28  ;;  %10928 = vst [vmem:[#allocation75_spill] sm:$0xff] %v9766_v8  ;;  %v9768_v55 = vpop.f32.mrb[156].mxu0 }
 0x991   : > { %v4091_v3 = vmul.f32 0.7978846, %v3963_v26  ;;  %v3839_v27 = vmul.f32 0.044715, %v3711_v25  ;;  %v3710_v30 = vmul.f32 %v3582_v21, %v9743_v42  ;;  %10929 = vst [vmem:[#allocation72_spill] sm:$0xff] %v9768_v55  ;;  %6799 = vtanh.f32 %v4089_v39  ;;  %v9774_v9 = vpop.f32.mrb[157].mxu1 }
 0x992   : > { %v9770_v49 = vpop.eup %6789  ;;  %v4090_v63 = vmul.f32 0.7978846, %v3962_v59  ;;  %v3965_v36 = vadd.f32 %v3837_v10, %v9714_v34  ;;  %v3712_v24 = vmul.f32 %v3584_v38, %v9751_v13  ;;  %10930 = vst [vmem:[#allocation80_spill] sm:$0xff] %v9774_v9  ;;  %v9776_v26 = vpop.f32.mrb[157].mxu0  ;;  %v4092_v25 = vmul.f32 0.7978846, %v3964_v12 }
 0x993   : > { %10931 = vst [vmem:[#allocation95_spill] sm:$0xff] %v9776_v26  ;;  %v9778_v23 = vpop.eup %6791  ;;  %6801 = vtanh.f32 %v4091_v3  ;;  %v3967_v21 = vadd.f32 %v3839_v27, %v9725_v44  ;;  %v3838_v8 = vmul.f32 0.044715, %v3710_v30  ;;  %v9781_v55 = vpop.f32.mrb[158].mxu1  ;;  %v9789_v38 = vadd.f32 %v9519_v1, %v10891_v61 }
 0x994   : > { %10932 = vst [vmem:[#allocation96_spill] sm:$0xff] %v9781_v55  ;;  %v9783_v28 = vpop.f32.mrb[158].mxu0  ;;  %v9785_v39 = vpop.eup %6793  ;;  %6803 = vtanh.f32 %v4090_v63  ;;  %v4093_v59 = vmul.f32 0.7978846, %v3965_v36  ;;  %v3840_v10 = vmul.f32 0.044715, %v3712_v24  ;;  %v9809_v24 = vadd.f32 %v9525_v45, %v10895_v6 }
 0x995   : > { %10933 = vst [vmem:[#allocation85_spill] sm:$0xff] %v9783_v28  ;;  %10934 = vst [vmem:[#allocation88_spill] sm:$0xff] %v9789_v38  ;;  %v9791_v26 = vpop.f32.mrb[159].mxu1  ;;  %v9793_v3 = vpop.f32.mrb[159].mxu0  ;;  %6805 = vtanh.f32 %v4092_v25  ;;  %v4095_v27 = vmul.f32 0.7978846, %v3967_v21  ;;  %v3966_v30 = vadd.f32 %v3838_v8, %v9743_v42  ;;  %v9800_v28 = vadd.f32 %v9521_v58, %v10893_v48 }
 0x996   : > { %10935 = vst [vmem:[#allocation100_spill] sm:$0xff] %v9791_v26  ;;  %10936 = vst [vmem:[#allocation102_spill] sm:$0xff] %v9793_v3  ;;  %v9795_v12 = vpop.eup %6795  ;;  %6807 = vtanh.f32 %v4093_v59  ;;  %v3968_v1 = vadd.f32 %v3840_v10, %v9751_v13  ;;  %v3585_v36 = vmul.f32 %v9789_v38, %v9789_v38  ;;  %v9815_v58 = vadd.f32 %v9527_v14, %v10899_v4 }
 0x997   : > { %10937 = vst [vmem:[#allocation101_spill] sm:$0xff] %v9800_v28  ;;  %v9802_v63 = vpop.eup %6797  ;;  %10938 = vst [vmem:[#allocation103_spill] sm:$0xff] %v9809_v24  ;;  %6809 = vtanh.f32 %v4095_v27  ;;  %v4094_v25 = vmul.f32 0.7978846, %v3966_v30  ;;  %v3587_v8 = vmul.f32 %v9800_v28, %v9800_v28  ;;  %v3586_v10 = vmul.f32 %v9809_v24, %v9809_v24 }
 0x998   : > { %10939 = vst [vmem:[#allocation68_spill] sm:$0xff] %v9815_v58  ;;  %v4096_v21 = vmul.f32 0.7978846, %v3968_v1  ;;  %v3713_v59 = vmul.f32 %v3585_v36, %v9789_v38  ;;  %v9822_v3 = vadd.f32 %v9531_v50, %v10891_v61  ;;  %v3588_v27 = vmul.f32 %v9815_v58, %v9815_v58 }
 0x999   : > { %6811 = vtanh.f32 %v4094_v25  ;;  %v3715_v45 = vmul.f32 %v3587_v8, %v9800_v28  ;;  %v9829_v14 = vadd.f32 %v9533_v35, %v10893_v48  ;;  %v3714_v1 = vmul.f32 %v3586_v10, %v9809_v24 }
 0x99a   : > { %10940 = vst [vmem:[#allocation76_spill] sm:$0xff] %v9822_v3  ;;  %6813 = vtanh.f32 %v4096_v21  ;;  %v3841_v30 = vmul.f32 0.044715, %v3713_v59  ;;  %v3589_v36 = vmul.f32 %v9822_v3, %v9822_v3  ;;  %v3716_v50 = vmul.f32 %v3588_v27, %v9815_v58 }
 0x99b   : > { %10941 = vst [vmem:[#allocation78_spill] sm:$0xff] %v9829_v14  ;;  %v3843_v26 = vmul.f32 0.044715, %v3715_v45  ;;  %v3591_v25 = vmul.f32 %v9829_v14, %v9829_v14  ;;  %v9839_v8 = vadd.f32 %v9537_v29, %v10895_v6  ;;  %v9841_v55 = vpop.eup %6799  ;;  %v3842_v21 = vmul.f32 0.044715, %v3714_v1 }
 0x99c   : > { %v3969_v35 = vadd.f32 %v3841_v30, %v9789_v38  ;;  %v3717_v59 = vmul.f32 %v3589_v36, %v9822_v3  ;;  %v9847_v10 = vadd.f32 %v9539_v40, %v10899_v4  ;;  %v3844_v9 = vmul.f32 0.044715, %v3716_v50 }
 0x99d   : > { %v9849_v45 = vpop.eup %6801  ;;  %v3971_v27 = vadd.f32 %v3843_v26, %v9800_v28  ;;  %v3719_v44 = vmul.f32 %v3591_v25, %v9829_v14  ;;  %v3590_v29 = vmul.f32 %v9839_v8, %v9839_v8  ;;  %v3970_v1 = vadd.f32 %v3842_v21, %v9809_v24 }
 0x99e   : > { %10942 = vst [vmem:[#allocation69_spill] sm:$0xff] %v9847_v10  ;;  %10943 = vst [vmem:[#allocation58_spill] sm:$0xff] %v9849_v45  ;;  %v9855_v34 = vpop.eup %6803  ;;  %v4097_v30 = vmul.f32 0.7978846, %v3969_v35  ;;  %v3845_v36 = vmul.f32 0.044715, %v3717_v59  ;;  %v3592_v40 = vmul.f32 %v9847_v10, %v9847_v10  ;;  %v3972_v26 = vadd.f32 %v3844_v9, %v9815_v58 }
 0x99f   : > { %v9860_v38 = vpop.eup %6805  ;;  %v4099_v13 = vmul.f32 0.7978846, %v3971_v27  ;;  %v3847_v50 = vmul.f32 0.044715, %v3719_v44  ;;  %v3718_v25 = vmul.f32 %v3590_v29, %v9839_v8  ;;  %v4098_v45 = vmul.f32 0.7978846, %v3970_v1 }
 0x9a0   : > { %v9864_v28 = vpop.eup %6807  ;;  %6815 = vtanh.f32 %v4097_v30  ;;  %v3973_v35 = vadd.f32 %v3845_v36, %v9822_v3  ;;  %v3720_v21 = vmul.f32 %v3592_v40, %v9847_v10  ;;  %v4100_v24 = vmul.f32 0.7978846, %v3972_v26 }
 0x9a1   : > { %v9868_v59 = vpop.eup %6809  ;;  %6817 = vtanh.f32 %v4099_v13  ;;  %v3975_v42 = vadd.f32 %v3847_v50, %v9829_v14  ;;  %v3846_v27 = vmul.f32 0.044715, %v3718_v25  ;;  %v9873_v29 = vadd.f32 %v9553_v62, %v10891_v61 }
 0x9a2   : > { %6819 = vtanh.f32 %v4098_v45  ;;  %v4101_v9 = vmul.f32 0.7978846, %v3973_v35  ;;  %v3848_v44 = vmul.f32 0.044715, %v3720_v21  ;;  %v9880_v13 = vadd.f32 %v9555_v15, %v10893_v48 }
 0x9a3   : > { %10944 = vst [vmem:[#allocation59_spill] sm:$0xff] %v9873_v29  ;;  %v9875_v30 = vpop.eup %6811  ;;  %6821 = vtanh.f32 %v4100_v24  ;;  %v4103_v1 = vmul.f32 0.7978846, %v3975_v42  ;;  %v3974_v36 = vadd.f32 %v3846_v27, %v9839_v8  ;;  %v3593_v26 = vmul.f32 %v9873_v29, %v9873_v29 }
 0x9a4   : > { %10945 = vst [vmem:[#allocation55_spill] sm:$0xff] %v9880_v13  ;;  %v9882_v40 = vpop.eup %6813  ;;  %6823 = vtanh.f32 %v4101_v9  ;;  %v3976_v45 = vadd.f32 %v3848_v44, %v9847_v10  ;;  %v9889_v62 = vadd.f32 %v9559_v41, %v10895_v6  ;;  %v3595_v24 = vmul.f32 %v9880_v13, %v9880_v13 }
 0x9a5   : > { %6825 = vtanh.f32 %v4103_v1  ;;  %v4102_v42 = vmul.f32 0.7978846, %v3974_v36  ;;  %v9895_v15 = vadd.f32 %v9561_v16, %v10899_v4  ;;  %v3721_v25 = vmul.f32 %v3593_v26, %v9873_v29 }
 0x9a6   : > { %10946 = vst [vmem:[#allocation64_spill] sm:$0xff] %v9889_v62  ;;  %v4104_v50 = vmul.f32 0.7978846, %v3976_v45  ;;  %v3594_v35 = vmul.f32 %v9889_v62, %v9889_v62  ;;  %v9902_v21 = vadd.f32 %v9565_v22, %v10891_v61  ;;  %v3723_v41 = vmul.f32 %v3595_v24, %v9880_v13 }
 0x9a7   : > { %10947 = vst [vmem:[#allocation49_spill] sm:$0xff] %v9895_v15  ;;  %6827 = vtanh.f32 %v4102_v42  ;;  %v3596_v27 = vmul.f32 %v9895_v15, %v9895_v15  ;;  %v9909_v16 = vadd.f32 %v9567_v47, %v10893_v48  ;;  %v3849_v9 = vmul.f32 0.044715, %v3721_v25 }
 0x9a8   : > { %10948 = vst [vmem:[#allocation53_spill] sm:$0xff] %v9902_v21  ;;  %6829 = vtanh.f32 %v4104_v50  ;;  %v3722_v44 = vmul.f32 %v3594_v35, %v9889_v62  ;;  %v3597_v1 = vmul.f32 %v9902_v21, %v9902_v21  ;;  %v3851_v36 = vmul.f32 0.044715, %v3723_v41 }
 0x9a9   : > { %10949 = vst [vmem:[#allocation50_spill] sm:$0xff] %v9909_v16  ;;  %v3724_v22 = vmul.f32 %v3596_v27, %v9895_v15  ;;  %v3599_v45 = vmul.f32 %v9909_v16, %v9909_v16  ;;  %v9919_v26 = vadd.f32 %v9572_v33, %v10895_v6  ;;  %v3977_v47 = vadd.f32 %v3849_v9, %v9873_v29 }
 0x9aa   : > { %v9921_v42 = vpop.eup %6815  ;;  %v3850_v24 = vmul.f32 0.044715, %v3722_v44  ;;  %v3725_v50 = vmul.f32 %v3597_v1, %v9902_v21  ;;  %v9927_v25 = vadd.f32 %v9574_v43, %v10899_v4  ;;  %v3979_v41 = vadd.f32 %v3851_v36, %v9880_v13 }
 0x9ab   : > { %v9929_v35 = vpop.eup %6817  ;;  %v3852_v27 = vmul.f32 0.044715, %v3724_v22  ;;  %v3727_v14 = vmul.f32 %v3599_v45, %v9909_v16  ;;  %v3598_v33 = vmul.f32 %v9919_v26, %v9919_v26  ;;  %v4105_v9 = vmul.f32 0.7978846, %v3977_v47 }
 0x9ac   : > { %10950 = vst [vmem:[#allocation51_spill] sm:$0xff] %v9927_v25  ;;  %10951 = vst [vmem:[#allocation56_spill] sm:$0xff] %v9929_v35  ;;  %v9935_v3 = vpop.eup %6819  ;;  %v3978_v44 = vadd.f32 %v3850_v24, %v9889_v62  ;;  %v3853_v1 = vmul.f32 0.044715, %v3725_v50  ;;  %v3600_v43 = vmul.f32 %v9927_v25, %v9927_v25  ;;  %v4107_v10 = vmul.f32 0.7978846, %v3979_v41 }
 0x9ad   : > { %v9940_v29 = vpop.eup %6821  ;;  %v3980_v36 = vadd.f32 %v3852_v27, %v9895_v15  ;;  %v3855_v22 = vmul.f32 0.044715, %v3727_v14  ;;  %v3726_v45 = vmul.f32 %v3598_v33, %v9919_v26  ;;  %6831 = vtanh.f32 %v4105_v9 }
 0x9ae   : > { %v9944_v13 = vpop.eup %6823  ;;  %v4106_v35 = vmul.f32 0.7978846, %v3978_v44  ;;  %v3981_v47 = vadd.f32 %v3853_v1, %v9902_v21  ;;  %v3728_v24 = vmul.f32 %v3600_v43, %v9927_v25  ;;  %6833 = vtanh.f32 %v4107_v10 }
 0x9af   : > { %v9948_v50 = vpop.eup %6825  ;;  %v4108_v62 = vmul.f32 0.7978846, %v3980_v36  ;;  %v3983_v58 = vadd.f32 %v3855_v22, %v9909_v16  ;;  %v3854_v41 = vmul.f32 0.044715, %v3726_v45  ;;  %v9953_v33 = vadd.f32 %v9593_v31, %v10891_v61 }
 0x9b0   : > { %6835 = vtanh.f32 %v4106_v35  ;;  %v4109_v27 = vmul.f32 0.7978846, %v3981_v47  ;;  %v3856_v14 = vmul.f32 0.044715, %v3728_v24  ;;  %v9960_v10 = vadd.f32 %v9595_v20, %v10893_v48 }
 0x9b1   : > { %10952 = vst [vmem:[#allocation54_spill] sm:$0xff] %v9953_v33  ;;  %v9955_v9 = vpop.eup %6827  ;;  %6837 = vtanh.f32 %v4108_v62  ;;  %v4111_v44 = vmul.f32 0.7978846, %v3983_v58  ;;  %v3982_v1 = vadd.f32 %v3854_v41, %v9919_v26  ;;  %v3601_v36 = vmul.f32 %v9953_v33, %v9953_v33 }
 0x9b2   : > { %10953 = vst [vmem:[#allocation52_spill] sm:$0xff] %v9960_v10  ;;  %v9962_v43 = vpop.eup %6829  ;;  %6839 = vtanh.f32 %v4109_v27  ;;  %v3984_v35 = vadd.f32 %v3856_v14, %v9927_v25  ;;  %v9969_v31 = vadd.f32 %v9604_v56, %v10895_v6  ;;  %v3603_v62 = vmul.f32 %v9960_v10, %v9960_v10 }
 0x9b3   : > { %6841 = vtanh.f32 %v4111_v44  ;;  %v4110_v58 = vmul.f32 0.7978846, %v3982_v1  ;;  %v9975_v20 = vadd.f32 %v9606_v46, %v10899_v4  ;;  %v3729_v45 = vmul.f32 %v3601_v36, %v9953_v33 }
 0x9b4   : > { %10954 = vst [vmem:[#allocation57_spill] sm:$0xff] %v9969_v31  ;;  %v4112_v22 = vmul.f32 0.7978846, %v3984_v35  ;;  %v3602_v47 = vmul.f32 %v9969_v31, %v9969_v31  ;;  %v9982_v24 = vadd.f32 %v9613_v52, %v10891_v61  ;;  %v3731_v56 = vmul.f32 %v3603_v62, %v9960_v10 }
 0x9b5   : > { %10955 = vst [vmem:[#allocation79_spill] sm:$0xff] %v9975_v20  ;;  %6843 = vtanh.f32 %v4110_v58  ;;  %v3604_v41 = vmul.f32 %v9975_v20, %v9975_v20  ;;  %v9989_v46 = vadd.f32 %v9615_v60, %v10893_v48  ;;  %v3857_v27 = vmul.f32 0.044715, %v3729_v45 }
 0x9b6   : > { %10956 = vst [vmem:[#allocation83_spill] sm:$0xff] %v9982_v24  ;;  %6845 = vtanh.f32 %v4112_v22  ;;  %v3730_v14 = vmul.f32 %v3602_v47, %v9969_v31  ;;  %v3605_v44 = vmul.f32 %v9982_v24, %v9982_v24  ;;  %v3859_v1 = vmul.f32 0.044715, %v3731_v56 }
 0x9b7   : > { %10957 = vst [vmem:[#allocation62_spill] sm:$0xff] %v9989_v46  ;;  %v3732_v52 = vmul.f32 %v3604_v41, %v9975_v20  ;;  %v3607_v35 = vmul.f32 %v9989_v46, %v9989_v46  ;;  %v9999_v36 = vadd.f32 %v9624_v0, %v10895_v6  ;;  %v10001_v58 = vpop.eup %6831  ;;  %v3985_v60 = vadd.f32 %v3857_v27, %v9953_v33 }
 0x9b8   : > { %v3858_v62 = vmul.f32 0.044715, %v3730_v14  ;;  %v3733_v22 = vmul.f32 %v3605_v44, %v9982_v24  ;;  %v10007_v45 = vadd.f32 %v9626_v2, %v10899_v4  ;;  %v10009_v47 = vpop.eup %6833  ;;  %v3987_v56 = vadd.f32 %v3859_v1, %v9960_v10 }
 0x9b9   : > { %10958 = vst [vmem:[#allocation77_spill] sm:$0xff] %v10009_v47  ;;  %v3860_v41 = vmul.f32 0.044715, %v3732_v52  ;;  %v3735_v16 = vmul.f32 %v3607_v35, %v9989_v46  ;;  %v3606_v0 = vmul.f32 %v9999_v36, %v9999_v36  ;;  %v4113_v27 = vmul.f32 0.7978846, %v3985_v60 }
 0x9ba   : > { %v10015_v21 = vpop.eup %6835  ;;  %v3986_v14 = vadd.f32 %v3858_v62, %v9969_v31  ;;  %v3861_v44 = vmul.f32 0.044715, %v3733_v22  ;;  %v3608_v2 = vmul.f32 %v10007_v45, %v10007_v45  ;;  %v4115_v25 = vmul.f32 0.7978846, %v3987_v56 }
 0x9bb   : > { %v10020_v33 = vpop.eup %6837  ;;  %v3988_v1 = vadd.f32 %v3860_v41, %v9975_v20  ;;  %v3863_v52 = vmul.f32 0.044715, %v3735_v16  ;;  %v3734_v35 = vmul.f32 %v3606_v0, %v9999_v36  ;;  %6847 = vtanh.f32 %v4113_v27 }
 0x9bc   : > { %v10024_v10 = vpop.eup %6839  ;;  %v4114_v47 = vmul.f32 0.7978846, %v3986_v14  ;;  %v3989_v60 = vadd.f32 %v3861_v44, %v9982_v24  ;;  %v3736_v62 = vmul.f32 %v3608_v2, %v10007_v45  ;;  %6849 = vtanh.f32 %v4115_v25 }
 0x9bd   : > { %v10028_v22 = vpop.eup %6841  ;;  %v4116_v31 = vmul.f32 0.7978846, %v3988_v1  ;;  %v3991_v15 = vadd.f32 %v3863_v52, %v9989_v46  ;;  %v3862_v56 = vmul.f32 0.044715, %v3734_v35  ;;  %v4338_v0 = vadd.f32 1.0, %v9759_v5 }
 0x9be   : > { %6851 = vtanh.f32 %v4114_v47  ;;  %v4117_v41 = vmul.f32 0.7978846, %v3989_v60  ;;  %v3864_v16 = vmul.f32 0.044715, %v3736_v62  ;;  %v4342_v44 = vadd.f32 1.0, %v9795_v12 }
 0x9bf   : > { %v10032_v20 = vpop.eup %6843  ;;  %6853 = vtanh.f32 %v4116_v31  ;;  %v4119_v27 = vmul.f32 0.7978846, %v3991_v15  ;;  %v3990_v14 = vadd.f32 %v3862_v56, %v9999_v36  ;;  %v4466_v1 = vmul.f32 0.5, %v4338_v0 }
 0x9c0   : > { %v10036_v2 = vpop.eup %6845  ;;  %6855 = vtanh.f32 %v4117_v41  ;;  %v3992_v25 = vadd.f32 %v3864_v16, %v10007_v45  ;;  %v4340_v47 = vadd.f32 1.0, %v9770_v49  ;;  %v4470_v35 = vmul.f32 0.5, %v4342_v44 }
 0x9c1   : > { %6857 = vtanh.f32 %v4119_v27  ;;  %v4118_v52 = vmul.f32 0.7978846, %v3990_v14  ;;  %v4344_v5 = vadd.f32 1.0, %v9802_v63  ;;  %v4594_v15 = vmul.f32 %v4466_v1, %v9602_v17 }
 0x9c2   : > { %v4120_v60 = vmul.f32 0.7978846, %v3992_v25  ;;  %v4468_v31 = vmul.f32 0.5, %v4340_v47  ;;  %v4337_v62 = vadd.f32 1.0, %v9745_v18  ;;  %v4598_v12 = vmul.f32 %v4470_v35, %v9642_v19  ;;  %v10959_v25 = vld [vmem:[#allocation82_spill] sm:$0xff]  ;;  %v10963_v35 = vld [vmem:[#allocation63_spill] sm:$0xff] }
 0x9c3   : > { %6859 = vtanh.f32 %v4118_v52  ;;  %v4472_v56 = vmul.f32 0.5, %v4344_v5  ;;  %v4341_v41 = vadd.f32 1.0, %v9778_v23  ;;  %v4339_v0 = vadd.f32 1.0, %v9753_v51 }
 0x9c4   : > { %6861 = vtanh.f32 %v4120_v60  ;;  %v4596_v49 = vmul.f32 %v4468_v31, %v9622_v54  ;;  %v4465_v16 = vmul.f32 0.5, %v4337_v62  ;;  %v4690_v27 = vpack.c.bf16 %v4598_v12, %v4594_v15  ;;  %v10961_v54 = vld [vmem:[#allocation70_spill] sm:$0xff] }
 0x9c5   : > { %v4600_v63 = vmul.f32 %v4472_v56, %v9650_v53  ;;  %v4469_v14 = vmul.f32 0.5, %v4341_v41  ;;  %v4343_v17 = vadd.f32 1.0, %v9785_v39  ;;  %v10049_v44 = vpop.eup %6847  ;;  %v4467_v19 = vmul.f32 0.5, %v4339_v0  ;;  %v10965_v56 = vld [vmem:[#allocation86_spill] sm:$0xff] }
 0x9c6   : > { %v4593_v18 = vmul.f32 %v4465_v16, %v9586_v37  ;;  %v10054_v23 = vadd.f32 %v10959_v25, %v10891_v61  ;;  %v10058_v1 = vadd.f32 %v10961_v54, %v10893_v48  ;;  %v10060_v51 = vpop.eup %6849  ;;  %5079 = vmatprep.mubr.bf16.mxu1 %v4690_v27  ;;  %v10065_v52 = vadd.f32 %v9667_v11, %v10895_v6  ;;  %v10967_v27 = vld [vmem:[#allocation60_spill] sm:$0xff] }
 0x9c7   : > { %v4692_v53 = vpack.c.bf16 %v4600_v63, %v4596_v49  ;;  %v4597_v47 = vmul.f32 %v4469_v14, %v9631_v32  ;;  %v4471_v39 = vmul.f32 0.5, %v4343_v17  ;;  %v4595_v5 = vmul.f32 %v4467_v19, %v10963_v35  ;;  %v10970_v19 = vld [vmem:[#allocation87_spill] sm:$0xff] }
 0x9c8   : > { %10960 = vst [vmem:[#allocation67_spill] sm:$0xff] %v10054_v23  ;;  %10962 = vst [vmem:[#allocation82_spill] sm:$0xff] %v10058_v1  ;;  %v10067_v37 = vpop.eup %6851  ;;  %v3609_v60 = vmul.f32 %v10054_v23, %v10054_v23  ;;  %v3611_v15 = vmul.f32 %v10058_v1, %v10058_v1  ;;  %v10076_v31 = vadd.f32 %v9669_v7, %v10899_v4 }
 0x9c9   : > { %v10078_v32 = vpop.eup %6853  ;;  %5240 = vmatprep.mubr.bf16.mxu0 %v4692_v53  ;;  %v4689_v62 = vpack.c.bf16 %v4597_v47, %v4593_v18  ;;  %v4599_v11 = vmul.f32 %v4471_v39, %v9635_v57  ;;  %v3610_v12 = vmul.f32 %v10065_v52, %v10065_v52  ;;  %v10085_v41 = vadd.f32 %v10965_v56, %v10891_v61 }
 0x9ca   : > { %10964 = vst [vmem:[#allocation70_spill] sm:$0xff] %v10076_v31  ;;  %v10087_v49 = vpop.eup %6855  ;;  %v3737_v16 = vmul.f32 %v3609_v60, %v10054_v23  ;;  %v3739_v7 = vmul.f32 %v3611_v15, %v10058_v1  ;;  %v3612_v0 = vmul.f32 %v10076_v31, %v10076_v31  ;;  %v10095_v63 = vadd.f32 %v10967_v27, %v10893_v48 }
 0x9cb   : > { %10966 = vst [vmem:[#allocation63_spill] sm:$0xff] %v10085_v41  ;;  %v10097_v57 = vpop.eup %6857  ;;  %5080 = vmatmul.mubr.bf16.gmra.mrb[192].mxu1 %v4689_v62  ;;  %v4691_v14 = vpack.c.bf16 %v4599_v11, %v4595_v5  ;;  %v3738_v17 = vmul.f32 %v3610_v12, %v10065_v52  ;;  %v3613_v18 = vmul.f32 %v10085_v41, %v10085_v41  ;;  %v10971_v62 = vld [vmem:[#allocation65_spill] sm:$0xff] }
 0x9cc   : > { %10968 = vst [vmem:[#allocation86_spill] sm:$0xff] %v10095_v63  ;;  %10969 = vst [vmem:[#allocation60_spill] sm:$0xff] %v10097_v57  ;;  %v10104_v25 = vadd.f32 %v10970_v19, %v10895_v6  ;;  %v3865_v54 = vmul.f32 0.044715, %v3737_v16  ;;  %v3867_v53 = vmul.f32 0.044715, %v3739_v7  ;;  %v3740_v47 = vmul.f32 %v3612_v0, %v10076_v31 }
 0x9cd   : > { %v3615_v39 = vmul.f32 %v10095_v63, %v10095_v63  ;;  %v10109_v35 = vpop.eup %6859  ;;  %5241 = vmatmul.mubr.bf16.gmra.mrb[192].mxu0 %v4691_v14  ;;  %v3866_v5 = vmul.f32 0.044715, %v3738_v17  ;;  %v3741_v60 = vmul.f32 %v3613_v18, %v10085_v41  ;;  %v10116_v11 = vadd.f32 %v10971_v62, %v10899_v4 }
 0x9ce   : > { %v3614_v15 = vmul.f32 %v10104_v25, %v10104_v25  ;;  %v10118_v12 = vpop.eup %6861  ;;  %v3993_v56 = vadd.f32 %v3865_v54, %v10054_v23  ;;  %v3995_v16 = vadd.f32 %v3867_v53, %v10058_v1  ;;  %v3868_v7 = vmul.f32 0.044715, %v3740_v47 }
 0x9cf   : > { %10972 = vst [vmem:[#allocation87_spill] sm:$0xff] %v10116_v11  ;;  %v3743_v0 = vmul.f32 %v3615_v39, %v10095_v63  ;;  %v3994_v27 = vadd.f32 %v3866_v5, %v10065_v52  ;;  %v3869_v14 = vmul.f32 0.044715, %v3741_v60  ;;  %v3616_v18 = vmul.f32 %v10116_v11, %v10116_v11 }
 0x9d0   : > { %v3742_v17 = vmul.f32 %v3614_v15, %v10104_v25  ;;  %v4121_v19 = vmul.f32 0.7978846, %v3993_v56  ;;  %v4123_v62 = vmul.f32 0.7978846, %v3995_v16  ;;  %v3996_v46 = vadd.f32 %v3868_v7, %v10076_v31 }
 0x9d1   : > { %v3871_v24 = vmul.f32 0.044715, %v3743_v0  ;;  %v4122_v57 = vmul.f32 0.7978846, %v3994_v27  ;;  %v3997_v54 = vadd.f32 %v3869_v14, %v10085_v41  ;;  %v3744_v47 = vmul.f32 %v3616_v18, %v10116_v11  ;;  %v10973_v18 = vld [vmem:[#allocation66_spill] sm:$0xff] }
 0x9d2   : > { %v3870_v53 = vmul.f32 0.044715, %v3742_v17  ;;  %6863 = vtanh.f32 %v4121_v19  ;;  %v4124_v39 = vmul.f32 0.7978846, %v3996_v46  ;;  %v4346_v60 = vadd.f32 1.0, %v9855_v34 }
 0x9d3   : > { %v3999_v5 = vadd.f32 %v3871_v24, %v10095_v63  ;;  %6865 = vtanh.f32 %v4123_v62  ;;  %v4125_v15 = vmul.f32 0.7978846, %v3997_v54  ;;  %v3872_v16 = vmul.f32 0.044715, %v3744_v47 }
 0x9d4   : > { %v3998_v56 = vadd.f32 %v3870_v53, %v10104_v25  ;;  %6867 = vtanh.f32 %v4122_v57  ;;  %v4350_v0 = vadd.f32 1.0, %v9875_v30  ;;  %v4474_v27 = vmul.f32 0.5, %v4346_v60  ;;  %v10974_v30 = vld [vmem:[#allocation84_spill] sm:$0xff] }
 0x9d5   : > { %v4127_v7 = vmul.f32 0.7978846, %v3999_v5  ;;  %6869 = vtanh.f32 %v4124_v39  ;;  %v4000_v17 = vadd.f32 %v3872_v16, %v10116_v11  ;;  %v4348_v46 = vadd.f32 1.0, %v9860_v38  ;;  %v10975_v5 = vld [vmem:[#allocation90_spill] sm:$0xff] }
 0x9d6   : > { %v4126_v14 = vmul.f32 0.7978846, %v3998_v56  ;;  %6871 = vtanh.f32 %v4125_v15  ;;  %v4478_v24 = vmul.f32 0.5, %v4350_v0  ;;  %v4602_v34 = vmul.f32 %v4474_v27, %v10973_v18  ;;  %v10976_v15 = vld [vmem:[#allocation58_spill] sm:$0xff]  ;;  %v10977_v0 = vld [vmem:[#allocation71_spill] sm:$0xff] }
 0x9d7   : > { %v4352_v19 = vadd.f32 1.0, %v9882_v40  ;;  %6873 = vtanh.f32 %v4127_v7  ;;  %v4128_v62 = vmul.f32 0.7978846, %v4000_v17  ;;  %v4476_v54 = vmul.f32 0.5, %v4348_v46  ;;  %v10978_v17 = vld [vmem:[#allocation89_spill] sm:$0xff]  ;;  %v10979_v46 = vld [vmem:[#allocation91_spill] sm:$0xff] }
 0x9d8   : > { %v4345_v57 = vadd.f32 1.0, %v9841_v55  ;;  %6875 = vtanh.f32 %v4126_v14  ;;  %v4606_v53 = vmul.f32 %v4478_v24, %v10974_v30  ;;  %v4349_v39 = vadd.f32 1.0, %v9864_v28  ;;  %v10980_v28 = vld [vmem:[#allocation92_spill] sm:$0xff] }
 0x9d9   : > { %v4480_v47 = vmul.f32 0.5, %v4352_v19  ;;  %6877 = vtanh.f32 %v4128_v62  ;;  %v4604_v38 = vmul.f32 %v4476_v54, %v10975_v5  ;;  %v4347_v56 = vadd.f32 1.0, %v10976_v15  ;;  %v10982_v62 = vld [vmem:[#allocation93_spill] sm:$0xff]  ;;  %v10986_v15 = vld [vmem:[#allocation99_spill] sm:$0xff] }
 0x9da   : > { %v4473_v60 = vmul.f32 0.5, %v4345_v57  ;;  %v4694_v16 = vpack.c.bf16 %v4606_v53, %v4602_v34  ;;  %v4477_v7 = vmul.f32 0.5, %v4349_v39  ;;  %v4351_v27 = vadd.f32 1.0, %v9868_v59  ;;  %v10983_v59 = vld [vmem:[#allocation94_spill] sm:$0xff] }
 0x9db   : > { %v4608_v40 = vmul.f32 %v4480_v47, %v10977_v0  ;;  %v4475_v14 = vmul.f32 0.5, %v4347_v56  ;;  %v10148_v24 = vadd.f32 %v10979_v46, %v10891_v61  ;;  %v10152_v18 = vadd.f32 %v10980_v28, %v10893_v48  ;;  %v10985_v47 = vld [vmem:[#allocation61_spill] sm:$0xff] }
 0x9dc   : > { %v4601_v55 = vmul.f32 %v4473_v60, %v10978_v17  ;;  %v10154_v19 = vpop.eup %6863  ;;  %5087 = vmatprep.mubr.bf16.mxu1 %v4694_v16  ;;  %v4605_v54 = vmul.f32 %v4477_v7, %v10982_v62  ;;  %v4479_v57 = vmul.f32 0.5, %v4351_v27  ;;  %v10159_v30 = vadd.f32 %v10983_v59, %v10895_v6  ;;  %v10987_v0 = vld [vmem:[#allocation73_spill] sm:$0xff] }
 0x9dd   : > { %10981 = vst [vmem:[#allocation65_spill] sm:$0xff] %v10152_v18  ;;  %v4696_v34 = vpack.c.bf16 %v4608_v40, %v4604_v38  ;;  %v10161_v53 = vpop.eup %6865  ;;  %v4603_v39 = vmul.f32 %v4475_v14, %v10985_v47  ;;  %v3617_v5 = vmul.f32 %v10148_v24, %v10148_v24  ;;  %v3619_v60 = vmul.f32 %v10152_v18, %v10152_v18  ;;  %v10988_v27 = vld [vmem:[#allocation97_spill] sm:$0xff] }
 0x9de   : > { %10984 = vst [vmem:[#allocation66_spill] sm:$0xff] %v10161_v53  ;;  %v10170_v38 = vadd.f32 %v10986_v15, %v10899_v4  ;;  %v10172_v56 = vpop.eup %6867  ;;  %v4693_v16 = vpack.c.bf16 %v4605_v54, %v4601_v55  ;;  %v4607_v40 = vmul.f32 %v4479_v57, %v10987_v0  ;;  %v3618_v7 = vmul.f32 %v10159_v30, %v10159_v30  ;;  %v10990_v55 = vld [vmem:[#allocation81_spill] sm:$0xff] }
 0x9df   : > { %5248 = vmatprep.mubr.bf16.mxu0 %v4696_v34  ;;  %v10179_v17 = vadd.f32 %v10988_v27, %v10891_v61  ;;  %v10181_v14 = vpop.eup %6869  ;;  %v3745_v46 = vmul.f32 %v3617_v5, %v10148_v24  ;;  %v3747_v28 = vmul.f32 %v3619_v60, %v10152_v18  ;;  %v10189_v34 = vadd.f32 %v10990_v55, %v10893_v48  ;;  %v10993_v5 = vld [vmem:[#allocation74_spill] sm:$0xff] }
 0x9e0   : > { %v3620_v62 = vmul.f32 %v10170_v38, %v10170_v38  ;;  %v10191_v54 = vpop.eup %6871  ;;  %5088 = vmatmul.mubr.bf16.gmra.mrb[196].mxu1 %v4693_v16  ;;  %v4695_v57 = vpack.c.bf16 %v4607_v40, %v4603_v39  ;;  %v3746_v59 = vmul.f32 %v3618_v7, %v10159_v30  ;;  %v10198_v15 = vadd.f32 %v10993_v5, %v10895_v6  ;;  %v10995_v5 = vld [vmem:[#allocation98_spill] sm:$0xff] }
 0x9e1   : > { %10989 = vst [vmem:[#allocation84_spill] sm:$0xff] %v10179_v17  ;;  %10991 = vst [vmem:[#allocation90_spill] sm:$0xff] %v10189_v34  ;;  %v3621_v47 = vmul.f32 %v10179_v17, %v10179_v17  ;;  %v10200_v60 = vpop.eup %6873  ;;  %v3873_v0 = vmul.f32 0.044715, %v3745_v46  ;;  %v3875_v27 = vmul.f32 0.044715, %v3747_v28  ;;  %v3623_v63 = vmul.f32 %v10189_v34, %v10189_v34 }
 0x9e2   : > { %10992 = vst [vmem:[#allocation58_spill] sm:$0xff] %v10191_v54  ;;  %10994 = vst [vmem:[#allocation71_spill] sm:$0xff] %v10200_v60  ;;  %v3748_v55 = vmul.f32 %v3620_v62, %v10170_v38  ;;  %v10205_v16 = vpop.eup %6875  ;;  %5249 = vmatmul.mubr.bf16.gmra.mrb[196].mxu0 %v4695_v57  ;;  %v3874_v39 = vmul.f32 0.044715, %v3746_v59  ;;  %v3622_v7 = vmul.f32 %v10198_v15, %v10198_v15 }
 0x9e3   : > { %v3749_v40 = vmul.f32 %v3621_v47, %v10179_v17  ;;  %v10212_v1 = vadd.f32 %v10995_v5, %v10899_v4  ;;  %v10214_v46 = vpop.eup %6877  ;;  %v4001_v28 = vadd.f32 %v3873_v0, %v10148_v24  ;;  %v4003_v62 = vadd.f32 %v3875_v27, %v10152_v18 }
 0x9e4   : > { %v3876_v41 = vmul.f32 0.044715, %v3748_v55  ;;  %v3751_v23 = vmul.f32 %v3623_v63, %v10189_v34  ;;  %v4002_v57 = vadd.f32 %v3874_v39, %v10159_v30  ;;  %v3750_v47 = vmul.f32 %v3622_v7, %v10198_v15 }
 0x9e5   : > { %v3877_v59 = vmul.f32 0.044715, %v3749_v40  ;;  %v3624_v60 = vmul.f32 %v10212_v1, %v10212_v1  ;;  %v4129_v11 = vmul.f32 0.7978846, %v4001_v28  ;;  %v4131_v5 = vmul.f32 0.7978846, %v4003_v62 }
 0x9e6   : > { %v4004_v53 = vadd.f32 %v3876_v41, %v10170_v38  ;;  %v3879_v31 = vmul.f32 0.044715, %v3751_v23  ;;  %v4130_v54 = vmul.f32 0.7978846, %v4002_v57  ;;  %v3878_v27 = vmul.f32 0.044715, %v3750_v47 }
 0x9e7   : > { %v4005_v0 = vadd.f32 %v3877_v59, %v10179_v17  ;;  %v3752_v55 = vmul.f32 %v3624_v60, %v10212_v1  ;;  %6879 = vtanh.f32 %v4129_v11  ;;  %v4354_v40 = vadd.f32 1.0, %v9935_v3 }
 0x9e8   : > { %v4132_v63 = vmul.f32 0.7978846, %v4004_v53  ;;  %v4007_v39 = vadd.f32 %v3879_v31, %v10189_v34  ;;  %6881 = vtanh.f32 %v4131_v5  ;;  %v4006_v28 = vadd.f32 %v3878_v27, %v10198_v15  ;;  %v10996_v53 = vld [vmem:[#allocation103_spill] sm:$0xff] }
 0x9e9   : > { %v4133_v7 = vmul.f32 0.7978846, %v4005_v0  ;;  %v3880_v62 = vmul.f32 0.044715, %v3752_v55  ;;  %6883 = vtanh.f32 %v4130_v54  ;;  %v4358_v23 = vadd.f32 1.0, %v9955_v9 }
 0x9ea   : > { %v4135_v41 = vmul.f32 0.7978846, %v4007_v39  ;;  %v4482_v57 = vmul.f32 0.5, %v4354_v40  ;;  %6885 = vtanh.f32 %v4132_v63  ;;  %v4134_v59 = vmul.f32 0.7978846, %v4006_v28  ;;  %v10997_v63 = vld [vmem:[#allocation68_spill] sm:$0xff] }
 0x9eb   : > { %v4008_v60 = vadd.f32 %v3880_v62, %v10212_v1  ;;  %v4356_v11 = vadd.f32 1.0, %v9940_v29  ;;  %6887 = vtanh.f32 %v4133_v7  ;;  %v4486_v31 = vmul.f32 0.5, %v4358_v23  ;;  %v10998_v40 = vld [vmem:[#allocation56_spill] sm:$0xff]  ;;  %v10999_v62 = vld [vmem:[#allocation69_spill] sm:$0xff] }
 0x9ec   : > { %v4610_v3 = vmul.f32 %v4482_v57, %v10996_v53  ;;  %v4360_v47 = vadd.f32 1.0, %v9962_v43  ;;  %6889 = vtanh.f32 %v4135_v41  ;;  %v4353_v54 = vadd.f32 1.0, %v9921_v42  ;;  %v11000_v57 = vld [vmem:[#allocation88_spill] sm:$0xff] }
 0x9ed   : > { %v4136_v5 = vmul.f32 0.7978846, %v4008_v60  ;;  %v4484_v0 = vmul.f32 0.5, %v4356_v11  ;;  %6891 = vtanh.f32 %v4134_v59  ;;  %v4614_v9 = vmul.f32 %v4486_v31, %v9839_v8  ;;  %v11001_v8 = vld [vmem:[#allocation75_spill] sm:$0xff] }
 0x9ee   : > { %v4488_v27 = vmul.f32 0.5, %v4360_v47  ;;  %v4357_v55 = vadd.f32 1.0, %v9944_v13  ;;  %v4481_v39 = vmul.f32 0.5, %v4353_v54  ;;  %v4355_v7 = vadd.f32 1.0, %v10998_v40  ;;  %v11003_v13 = vld [vmem:[#allocation72_spill] sm:$0xff] }
 0x9ef   : > { %6893 = vtanh.f32 %v4136_v5  ;;  %v4612_v29 = vmul.f32 %v4484_v0, %v10997_v63  ;;  %v4698_v28 = vpack.c.bf16 %v4614_v9, %v4610_v3  ;;  %v4359_v23 = vadd.f32 1.0, %v9948_v50  ;;  %v11005_v3 = vld [vmem:[#allocation76_spill] sm:$0xff]  ;;  %v11007_v9 = vld [vmem:[#allocation101_spill] sm:$0xff] }
 0x9f0   : > { %v4616_v43 = vmul.f32 %v4488_v27, %v10999_v62  ;;  %v4485_v41 = vmul.f32 0.5, %v4357_v55  ;;  %v4609_v42 = vmul.f32 %v4481_v39, %v11000_v57  ;;  %v4483_v59 = vmul.f32 0.5, %v4355_v7  ;;  %v11006_v50 = vld [vmem:[#allocation80_spill] sm:$0xff]  ;;  %v11008_v39 = vld [vmem:[#allocation95_spill] sm:$0xff] }
 0x9f1   : > { %v10244_v60 = vadd.f32 %v11001_v8, %v10891_v61  ;;  %v10248_v11 = vadd.f32 %v11003_v13, %v10893_v48  ;;  %v10250_v31 = vpop.eup %6879  ;;  %5095 = vmatprep.mubr.bf16.mxu1 %v4698_v28  ;;  %v4487_v5 = vmul.f32 0.5, %v4359_v23  ;;  %v10255_v0 = vadd.f32 %v11006_v50, %v10895_v6  ;;  %v11009_v28 = vld [vmem:[#allocation78_spill] sm:$0xff] }
 0x9f2   : > { %v4700_v53 = vpack.c.bf16 %v4616_v43, %v4612_v29  ;;  %v4613_v47 = vmul.f32 %v4485_v41, %v11005_v3  ;;  %v10257_v54 = vpop.eup %6881  ;;  %v4611_v27 = vmul.f32 %v4483_v59, %v11007_v9  ;;  %v10266_v29 = vadd.f32 %v11008_v39, %v10899_v4  ;;  %v11010_v41 = vld [vmem:[#allocation96_spill] sm:$0xff] }
 0x9f3   : > { %11002 = vst [vmem:[#allocation89_spill] sm:$0xff] %v10244_v60  ;;  %11004 = vst [vmem:[#allocation91_spill] sm:$0xff] %v10248_v11  ;;  %v3625_v55 = vmul.f32 %v10244_v60, %v10244_v60  ;;  %v3627_v63 = vmul.f32 %v10248_v11, %v10248_v11  ;;  %v10268_v40 = vpop.eup %6883  ;;  %v4615_v62 = vmul.f32 %v4487_v5, %v11009_v28  ;;  %v11013_v9 = vld [vmem:[#allocation100_spill] sm:$0xff] }
 0x9f4   : > { %5256 = vmatprep.mubr.bf16.mxu0 %v4700_v53  ;;  %v4697_v7 = vpack.c.bf16 %v4613_v47, %v4609_v42  ;;  %v3626_v43 = vmul.f32 %v10255_v0, %v10255_v0  ;;  %v10275_v23 = vadd.f32 %v11010_v41, %v10891_v61  ;;  %v10277_v57 = vpop.eup %6885  ;;  %v3628_v13 = vmul.f32 %v10266_v29, %v10266_v29  ;;  %v11011_v42 = vld [vmem:[#allocation85_spill] sm:$0xff]  ;;  %v10287_v3 = vpop.f32.mrb[160].mxu1 }
 0x9f5   : > { %v3753_v59 = vmul.f32 %v3625_v55, %v10244_v60  ;;  %v3755_v8 = vmul.f32 %v3627_v63, %v10248_v11  ;;  %v10285_v53 = vadd.f32 %v11011_v42, %v10893_v48  ;;  %11012 = vst [vmem:[#allocation92_spill] sm:$0xff] %v10287_v3  ;;  %v10289_v47 = vpop.eup %6887  ;;  %v4699_v61 = vpack.c.bf16 %v4615_v62, %v4611_v27  ;;  %v10298_v63 = vpop.f32.mrb[161].mxu1 }
 0x9f6   : > { %5096 = vmatmul.mubr.bf16.gmra.mrb[200].mxu1 %v4697_v7  ;;  %v3754_v5 = vmul.f32 %v3626_v43, %v10255_v0  ;;  %v3629_v50 = vmul.f32 %v10275_v23, %v10275_v23  ;;  %v10296_v55 = vadd.f32 %v11013_v9, %v10895_v6  ;;  %11014 = vst [vmem:[#allocation93_spill] sm:$0xff] %v10298_v63  ;;  %v10300_v39 = vpop.eup %6889  ;;  %v10305_v7 = vpop.f32.mrb[162].mxu1  ;;  %v11016_v9 = vld [vmem:[#allocation102_spill] sm:$0xff] }
 0x9f7   : > { %v3881_v48 = vmul.f32 0.044715, %v3753_v59  ;;  %v3883_v28 = vmul.f32 0.044715, %v3755_v8  ;;  %v3756_v41 = vmul.f32 %v3628_v13, %v10266_v29  ;;  %v3631_v27 = vmul.f32 %v10285_v53, %v10285_v53  ;;  %11015 = vst [vmem:[#allocation94_spill] sm:$0xff] %v10305_v7  ;;  %v10307_v62 = vpop.eup %6891  ;;  %5257 = vmatmul.mubr.bf16.gmra.mrb[200].mxu0 %v4699_v61  ;;  %v10316_v8 = vpop.f32.mrb[163].mxu1 }
 0x9f8   : > { %v3882_v43 = vmul.f32 0.044715, %v3754_v5  ;;  %v3757_v6 = vmul.f32 %v3629_v50, %v10275_v23  ;;  %v3630_v42 = vmul.f32 %v10296_v55, %v10296_v55  ;;  %v10314_v59 = vadd.f32 %v11016_v9, %v10899_v4  ;;  %11017 = vst [vmem:[#allocation61_spill] sm:$0xff] %v10316_v8  ;;  %v10323_v5 = vpop.f32.mrb[160].mxu0 }
 0x9f9   : > { %v10318_v13 = vpop.eup %6893  ;;  %v4009_v63 = vadd.f32 %v3881_v48, %v10244_v60  ;;  %v4011_v7 = vadd.f32 %v3883_v28, %v10248_v11  ;;  %v3884_v3 = vmul.f32 0.044715, %v3756_v41  ;;  %v3759_v61 = vmul.f32 %v3631_v27, %v10285_v53  ;;  %11018 = vst [vmem:[#allocation99_spill] sm:$0xff] %v10323_v5  ;;  %v10329_v9 = vpop.f32.mrb[161].mxu0 }
 0x9fa   : > { %v4010_v50 = vadd.f32 %v3882_v43, %v10255_v0  ;;  %v3885_v34 = vmul.f32 0.044715, %v3757_v6  ;;  %v3758_v18 = vmul.f32 %v3630_v42, %v10296_v55  ;;  %v3632_v4 = vmul.f32 %v10314_v59, %v10314_v59  ;;  %11019 = vst [vmem:[#allocation73_spill] sm:$0xff] %v10329_v9  ;;  %v10334_v43 = vpop.f32.mrb[162].mxu0 }
 0x9fb   : > { %v4137_v8 = vmul.f32 0.7978846, %v4009_v63  ;;  %v4139_v17 = vmul.f32 0.7978846, %v4011_v7  ;;  %v4012_v48 = vadd.f32 %v3884_v3, %v10266_v29  ;;  %v3887_v28 = vmul.f32 0.044715, %v3759_v61 }
 0x9fc   : > { %v4138_v41 = vmul.f32 0.7978846, %v4010_v50  ;;  %v4013_v27 = vadd.f32 %v3885_v34, %v10275_v23  ;;  %v3886_v11 = vmul.f32 0.044715, %v3758_v18  ;;  %v3760_v5 = vmul.f32 %v3632_v4, %v10314_v59  ;;  %v10338_v9 = vpop.f32.mrb[163].mxu0 }
 0x9fd   : > { %6895 = vtanh.f32 %v4137_v8  ;;  %v4140_v6 = vmul.f32 0.7978846, %v4012_v48  ;;  %v4015_v42 = vadd.f32 %v3887_v28, %v10285_v53  ;;  %v4362_v60 = vadd.f32 1.0, %v10015_v21  ;;  %v11020_v48 = vld [vmem:[#allocation64_spill] sm:$0xff] }
 0x9fe   : > { %6897 = vtanh.f32 %v4139_v17  ;;  %v4141_v63 = vmul.f32 0.7978846, %v4013_v27  ;;  %v4014_v3 = vadd.f32 %v3886_v11, %v10296_v55  ;;  %v3888_v7 = vmul.f32 0.044715, %v3760_v5 }
 0x9ff   : > { %6899 = vtanh.f32 %v4138_v41  ;;  %v4143_v34 = vmul.f32 0.7978846, %v4015_v42  ;;  %v4366_v18 = vadd.f32 1.0, %v10032_v20  ;;  %v4490_v61 = vmul.f32 0.5, %v4362_v60 }
 0xa00   : > { %6901 = vtanh.f32 %v4140_v6  ;;  %v4142_v50 = vmul.f32 0.7978846, %v4014_v3  ;;  %v4016_v8 = vadd.f32 %v3888_v7, %v10314_v59  ;;  %v4364_v4 = vadd.f32 1.0, %v10020_v33  ;;  %v11021_v6 = vld [vmem:[#allocation49_spill] sm:$0xff] }
 0xa01   : > { %6903 = vtanh.f32 %v4141_v63  ;;  %v4494_v21 = vmul.f32 0.5, %v4366_v18  ;;  %v4618_v28 = vmul.f32 %v4490_v61, %v11020_v48  ;;  %v4368_v17 = vadd.f32 1.0, %v10036_v2  ;;  %v11022_v63 = vld [vmem:[#allocation77_spill] sm:$0xff]  ;;  %v11023_v18 = vld [vmem:[#allocation51_spill] sm:$0xff] }
 0xa02   : > { %6905 = vtanh.f32 %v4143_v34  ;;  %v4144_v11 = vmul.f32 0.7978846, %v4016_v8  ;;  %v4492_v5 = vmul.f32 0.5, %v4364_v4  ;;  %v4361_v41 = vadd.f32 1.0, %v10001_v58  ;;  %v11024_v8 = vld [vmem:[#allocation59_spill] sm:$0xff]  ;;  %v11025_v48 = vld [vmem:[#allocation53_spill] sm:$0xff] }
 0xa03   : > { %6907 = vtanh.f32 %v4142_v50  ;;  %v4622_v20 = vmul.f32 %v4494_v21, %v9919_v26  ;;  %v4496_v60 = vmul.f32 0.5, %v4368_v17  ;;  %v4365_v27 = vadd.f32 1.0, %v10024_v10 }
 0xa04   : > { %6909 = vtanh.f32 %v4144_v11  ;;  %v4620_v33 = vmul.f32 %v4492_v5, %v11021_v6  ;;  %v4489_v42 = vmul.f32 0.5, %v4361_v41  ;;  %v4363_v3 = vadd.f32 1.0, %v11022_v63  ;;  %v11026_v41 = vld [vmem:[#allocation55_spill] sm:$0xff]  ;;  %v11027_v6 = vld [vmem:[#allocation50_spill] sm:$0xff] }
 0xa05   : > { %v4702_v7 = vpack.c.bf16 %v4622_v20, %v4618_v28  ;;  %v4624_v2 = vmul.f32 %v4496_v60, %v11023_v18  ;;  %v4493_v34 = vmul.f32 0.5, %v4365_v27  ;;  %v4367_v61 = vadd.f32 1.0, %v10028_v22 }
 0xa06   : > { %v4617_v58 = vmul.f32 %v4489_v42, %v11024_v8  ;;  %v4491_v50 = vmul.f32 0.5, %v4363_v3  ;;  %v4370_v26 = vadd.f32 1.0, %v10067_v37  ;;  %v4374_v4 = vadd.f32 1.0, %v10109_v35  ;;  %v11029_v8 = vld [vmem:[#allocation79_spill] sm:$0xff] }
 0xa07   : > { %v10356_v10 = vpop.eup %6895  ;;  %5103 = vmatprep.mubr.bf16.mxu1 %v4702_v7  ;;  %v4704_v21 = vpack.c.bf16 %v4624_v2, %v4620_v33  ;;  %v4621_v17 = vmul.f32 %v4493_v34, %v11025_v48  ;;  %v4495_v11 = vmul.f32 0.5, %v4367_v61  ;;  %v4372_v28 = vadd.f32 1.0, %v10078_v32  ;;  %v11028_v32 = vld [vmem:[#allocation57_spill] sm:$0xff] }
 0xa08   : > { %v10360_v5 = vpop.eup %6897  ;;  %v4619_v22 = vmul.f32 %v4491_v50, %v11026_v41  ;;  %v4498_v20 = vmul.f32 0.5, %v4370_v26  ;;  %v4502_v60 = vmul.f32 0.5, %v4374_v4  ;;  %v4376_v27 = vadd.f32 1.0, %v10118_v12 }
 0xa09   : > { %v10364_v37 = vpop.eup %6899  ;;  %5264 = vmatprep.mubr.bf16.mxu0 %v4704_v21  ;;  %v4701_v35 = vpack.c.bf16 %v4621_v17, %v4617_v58  ;;  %v4623_v42 = vmul.f32 %v4495_v11, %v11027_v6  ;;  %v4500_v33 = vmul.f32 0.5, %v4372_v28  ;;  %v4369_v63 = vadd.f32 1.0, %v10049_v44  ;;  %v11030_v17 = vld [vmem:[#allocation60_spill] sm:$0xff]  ;;  %v11031_v28 = vld [vmem:[#allocation54_spill] sm:$0xff] }
 0xa0a   : > { %v10368_v3 = vpop.eup %6901  ;;  %v4626_v7 = vmul.f32 %v4498_v20, %v11028_v32  ;;  %v4630_v18 = vmul.f32 %v4502_v60, %v9999_v36  ;;  %v4504_v2 = vmul.f32 0.5, %v4376_v27  ;;  %v4373_v34 = vadd.f32 1.0, %v10087_v49  ;;  %v10381_v11 = vpop.f32.mrb[164].mxu1 }
 0xa0b   : > { %v10373_v61 = vpop.eup %6903  ;;  %5104 = vmatmul.mubr.bf16.gmra.mrb[204].mxu1 %v4701_v35  ;;  %v4703_v12 = vpack.c.bf16 %v4623_v42, %v4619_v22  ;;  %v4628_v58 = vmul.f32 %v4500_v33, %v11029_v8  ;;  %v4497_v50 = vmul.f32 0.5, %v4369_v63  ;;  %v4371_v26 = vadd.f32 1.0, %v10060_v51  ;;  %v10388_v60 = vpop.f32.mrb[165].mxu1  ;;  %v11032_v35 = vld [vmem:[#allocation83_spill] sm:$0xff] }
 0xa0c   : > { %v10377_v4 = vpop.eup %6905  ;;  %v4706_v44 = vpack.c.bf16 %v4630_v18, %v4626_v7  ;;  %v4632_v21 = vmul.f32 %v4504_v2, %v10007_v45  ;;  %v4501_v48 = vmul.f32 0.5, %v4373_v34  ;;  %v4375_v36 = vadd.f32 1.0, %v11030_v17  ;;  %v10394_v63 = vpop.f32.mrb[164].mxu0  ;;  %v11033_v7 = vld [vmem:[#allocation52_spill] sm:$0xff] }
 0xa0d   : > { %v10383_v49 = vpop.eup %6907  ;;  %5265 = vmatmul.mubr.bf16.gmra.mrb[204].mxu0 %v4703_v12  ;;  %v4625_v41 = vmul.f32 %v4497_v50, %v11031_v28  ;;  %v4499_v22 = vmul.f32 0.5, %v4371_v26  ;;  %v4378_v20 = vadd.f32 1.0, %v10172_v56  ;;  %v4382_v51 = vadd.f32 1.0, %v10205_v16  ;;  %v10396_v32 = vpop.f32.mrb[166].mxu1 }
 0xa0e   : > { %v10390_v27 = vpop.eup %6909  ;;  %5111 = vmatprep.mubr.bf16.mxu1 %v4706_v44  ;;  %v4708_v45 = vpack.c.bf16 %v4632_v21, %v4628_v58  ;;  %v4629_v6 = vmul.f32 %v4501_v48, %v11032_v35  ;;  %v4503_v42 = vmul.f32 0.5, %v4375_v36  ;;  %v4380_v33 = vadd.f32 1.0, %v10181_v14  ;;  %v10400_v34 = vpop.f32.mrb[165].mxu0  ;;  %v11034_v58 = vld [vmem:[#allocation62_spill] sm:$0xff] }
 0xa0f   : > { %v4627_v18 = vmul.f32 %v4499_v22, %v11033_v7  ;;  %v4506_v56 = vmul.f32 0.5, %v4378_v20  ;;  %v4510_v2 = vmul.f32 0.5, %v4382_v51  ;;  %v4384_v16 = vadd.f32 1.0, %v10214_v46  ;;  %v10402_v12 = vpop.f32.mrb[167].mxu1  ;;  %v10406_v44 = vpop.f32.mrb[166].mxu0  ;;  %v11035_v36 = vld [vmem:[#allocation58_spill] sm:$0xff] }
 0xa10   : > { %5272 = vmatprep.mubr.bf16.mxu0 %v4708_v45  ;;  %v4705_v8 = vpack.c.bf16 %v4629_v6, %v4625_v41  ;;  %v4631_v50 = vmul.f32 %v4503_v42, %v11034_v58  ;;  %v4508_v26 = vmul.f32 0.5, %v4380_v33  ;;  %v4377_v14 = vadd.f32 1.0, %v10154_v19  ;;  %v10411_v28 = vpop.f32.mrb[167].mxu0  ;;  %v11036_v20 = vld [vmem:[#allocation70_spill] sm:$0xff]  ;;  %v11038_v19 = vld [vmem:[#allocation87_spill] sm:$0xff] }
 0xa11   : > { %v4634_v21 = vmul.f32 %v4506_v56, %v10065_v52  ;;  %v4638_v48 = vmul.f32 %v4510_v2, %v10104_v25  ;;  %v4512_v17 = vmul.f32 0.5, %v4384_v16  ;;  %v4381_v46 = vadd.f32 1.0, %v11035_v36  ;;  %v11037_v45 = vld [vmem:[#allocation66_spill] sm:$0xff]  ;;  %v11039_v7 = vld [vmem:[#allocation71_spill] sm:$0xff] }
 0xa12   : > { %v4707_v22 = vpack.c.bf16 %v4631_v50, %v4627_v18  ;;  %v4636_v51 = vmul.f32 %v4508_v26, %v11036_v20  ;;  %v4505_v41 = vmul.f32 0.5, %v4377_v14  ;;  %v4379_v35 = vadd.f32 1.0, %v11037_v45  ;;  %v11040_v56 = vld [vmem:[#allocation67_spill] sm:$0xff] }
 0xa13   : > { %5112 = vmatmul.mubr.bf16.gmra.mrb[208].mxu1 %v4705_v8  ;;  %v4710_v6 = vpack.c.bf16 %v4638_v48, %v4634_v21  ;;  %v4640_v42 = vmul.f32 %v4512_v17, %v11038_v19  ;;  %v4509_v33 = vmul.f32 0.5, %v4381_v46  ;;  %v4383_v52 = vadd.f32 1.0, %v11039_v7  ;;  %v11041_v50 = vld [vmem:[#allocation63_spill] sm:$0xff]  ;;  %v11042_v21 = vld [vmem:[#allocation82_spill] sm:$0xff] }
 0xa14   : > { %v4633_v25 = vmul.f32 %v4505_v41, %v11040_v56  ;;  %v4507_v2 = vmul.f32 0.5, %v4379_v35  ;;  %v4386_v16 = vadd.f32 1.0, %v10268_v40  ;;  %v4390_v58 = vadd.f32 1.0, %v10307_v62  ;;  %v11043_v41 = vld [vmem:[#allocation86_spill] sm:$0xff] }
 0xa15   : > { %5273 = vmatmul.mubr.bf16.gmra.mrb[208].mxu0 %v4707_v22  ;;  %5119 = vmatprep.mubr.bf16.mxu1 %v4710_v6  ;;  %v4712_v18 = vpack.c.bf16 %v4640_v42, %v4636_v51  ;;  %v4637_v26 = vmul.f32 %v4509_v33, %v11041_v50  ;;  %v4511_v14 = vmul.f32 0.5, %v4383_v52  ;;  %v4388_v8 = vadd.f32 1.0, %v10277_v57 }
 0xa16   : > { %v4635_v48 = vmul.f32 %v4507_v2, %v11042_v21  ;;  %v4514_v17 = vmul.f32 0.5, %v4386_v16  ;;  %v4518_v36 = vmul.f32 0.5, %v4390_v58  ;;  %v4392_v46 = vadd.f32 1.0, %v10318_v13 }
 0xa17   : > { %5280 = vmatprep.mubr.bf16.mxu0 %v4712_v18  ;;  %v4709_v20 = vpack.c.bf16 %v4637_v26, %v4633_v25  ;;  %v4639_v40 = vmul.f32 %v4511_v14, %v11043_v41  ;;  %v4516_v45 = vmul.f32 0.5, %v4388_v8  ;;  %v4385_v62 = vadd.f32 1.0, %v10250_v31  ;;  %v11046_v26 = vld [vmem:[#allocation90_spill] sm:$0xff] }
 0xa18   : > { %v4642_v22 = vmul.f32 %v4514_v17, %v10159_v30  ;;  %v4646_v51 = vmul.f32 %v4518_v36, %v10198_v15  ;;  %v4520_v35 = vmul.f32 0.5, %v4392_v46  ;;  %v4389_v57 = vadd.f32 1.0, %v10289_v47 }
 0xa19   : > { %v4711_v6 = vpack.c.bf16 %v4639_v40, %v4635_v48  ;;  %v4644_v19 = vmul.f32 %v4516_v45, %v10170_v38  ;;  %v4513_v42 = vmul.f32 0.5, %v4385_v62  ;;  %v4387_v13 = vadd.f32 1.0, %v10257_v54  ;;  %v11044_v38 = vld [vmem:[#allocation84_spill] sm:$0xff]  ;;  %v11047_v62 = vld [vmem:[#allocation89_spill] sm:$0xff] }
 0xa1a   : > { %v4714_v33 = vpack.c.bf16 %v4646_v51, %v4642_v22  ;;  %v4648_v7 = vmul.f32 %v4520_v35, %v10212_v1  ;;  %v4517_v52 = vmul.f32 0.5, %v4389_v57  ;;  %v4391_v56 = vadd.f32 1.0, %v10300_v39  ;;  %v11045_v1 = vld [vmem:[#allocation65_spill] sm:$0xff]  ;;  %v11048_v51 = vld [vmem:[#allocation16_spill] sm:$0xff] }
 0xa1b   : > { %5120 = vmatmul.mubr.bf16.gmra.mrb[212].mxu1 %v4709_v20  ;;  %v4641_v30 = vmul.f32 %v4513_v42, %v10148_v24  ;;  %v4515_v31 = vmul.f32 0.5, %v4387_v13  ;;  %v4394_v15 = vadd.f32 1.0, %v10364_v37  ;;  %v4398_v47 = vadd.f32 1.0, %v10383_v49  ;;  %v11050_v57 = vld [vmem:[#allocation92_spill] sm:$0xff] }
 0xa1c   : > { %5127 = vmatprep.mubr.bf16.mxu1 %v4714_v33  ;;  %v4716_v25 = vpack.c.bf16 %v4648_v7, %v4644_v19  ;;  %v4645_v2 = vmul.f32 %v4517_v52, %v11044_v38  ;;  %v4519_v16 = vmul.f32 0.5, %v4391_v56  ;;  %v4396_v54 = vadd.f32 1.0, %v10368_v3  ;;  %v11053_v33 = vld [vmem:[#allocation73_spill] sm:$0xff] }
 0xa1d   : > { %5281 = vmatmul.mubr.bf16.gmra.mrb[212].mxu0 %v4711_v6  ;;  %v4643_v58 = vmul.f32 %v4515_v31, %v11045_v1  ;;  %v4522_v18 = vmul.f32 0.5, %v4394_v15  ;;  %v4526_v39 = vmul.f32 0.5, %v4398_v47  ;;  %v4400_v50 = vadd.f32 1.0, %v10390_v27  ;;  %v11055_v47 = vld [vmem:[#allocation94_spill] sm:$0xff] }
 0xa1e   : > { %5288 = vmatprep.mubr.bf16.mxu0 %v4716_v25  ;;  %v4713_v24 = vpack.c.bf16 %v4645_v2, %v4641_v30  ;;  %v4647_v37 = vmul.f32 %v4519_v16, %v11046_v26  ;;  %v4524_v14 = vmul.f32 0.5, %v4396_v54  ;;  %v4393_v49 = vadd.f32 1.0, %v10356_v10  ;;  %v11054_v30 = vld [vmem:[#allocation91_spill] sm:$0xff]  ;;  %v11056_v25 = vld [vmem:[#allocation61_spill] sm:$0xff] }
 0xa1f   : > { %v4650_v8 = vmul.f32 %v4522_v18, %v10255_v0  ;;  %v4654_v21 = vmul.f32 %v4526_v39, %v10296_v55  ;;  %v4528_v3 = vmul.f32 0.5, %v4400_v50  ;;  %v4397_v48 = vadd.f32 1.0, %v10373_v61  ;;  %v6944_v55 = vld [vmem:[%s7588_s20] sm:$0x3f] }
 0xa20   : > { %v4715_v17 = vpack.c.bf16 %v4647_v37, %v4643_v58  ;;  %v4652_v36 = vmul.f32 %v4524_v14, %v10266_v29  ;;  %v4521_v46 = vmul.f32 0.5, %v4393_v49  ;;  %v4395_v27 = vadd.f32 1.0, %v10360_v5  ;;  %v5750_v45 = vpop.f32.mrb[168].mxu1  ;;  %v11051_v29 = vld [vmem:[#allocation93_spill] sm:$0xff] }
 0xa21   : > { %v4718_v20 = vpack.c.bf16 %v4654_v21, %v4650_v8  ;;  %v4656_v41 = vmul.f32 %v4528_v3, %v10314_v59  ;;  %v4525_v40 = vmul.f32 0.5, %v4397_v48  ;;  %v4399_v10 = vadd.f32 1.0, %v10377_v4  ;;  %v5862_v19 = vpop.f32.mrb[168].mxu0  ;;  %v5751_v5 = vpop.f32.mrb[169].mxu1  ;;  %v11052_v4 = vld [vmem:[#allocation99_spill] sm:$0xff] }
 0xa22   : > { %v4649_v0 = vmul.f32 %v4521_v46, %v11047_v62  ;;  %v4523_v22 = vmul.f32 0.5, %v4395_v27  ;;  %v11049_v35 = vsub.s32 5, %v11048_v51  ;;  %v5740_v6 = vadd.f32 %v11051_v29, %v11050_v57  ;;  %v5863_v52 = vpop.f32.mrb[169].mxu0  ;;  %v5753_v56 = vpop.f32.mrb[170].mxu1  ;;  %v11060_v46 = vld [vmem:[#allocation20_spill] sm:$0xff] }
 0xa23   : > { %5128 = vmatmul.mubr.bf16.gmra.mrb[216].mxu1 %v4713_v24  ;;  %v4720_v42 = vpack.c.bf16 %v4656_v41, %v4652_v36  ;;  %v4653_v59 = vmul.f32 %v4525_v40, %v10275_v23  ;;  %v4527_v13 = vmul.f32 0.5, %v4399_v10  ;;  %v5852_v7 = vadd.f32 %v11053_v33, %v11052_v4  ;;  %v5865_v16 = vpop.f32.mrb[170].mxu0  ;;  %v5754_v54 = vpop.f32.mrb[171].mxu1  ;;  %v11061_v41 = vld [vmem:[#allocation21_spill] sm:$0xff]  ;;  %v11062_v10 = vld [vmem:[#allocation22_spill] sm:$0xff]  ;;  %v11063_v33 = vld [vmem:[#allocation23_spill] sm:$0xff] }
 0xa24   : > { %v10453_v61 = vrot.slane %v6944_v55, %v11049_v35  ;;  %5135 = vmatprep.mubr.bf16.mxu1 %v4718_v20  ;;  %v4651_v31 = vmul.f32 %v4523_v22, %v11054_v30  ;;  %v5743_v38 = vadd.f32 %v11056_v25, %v11055_v47  ;;  %v5855_v2 = vadd.f32 %v10338_v9, %v10334_v43  ;;  %v5866_v39 = vpop.f32.mrb[171].mxu0 }
 0xa25   : > { %5289 = vmatmul.mubr.bf16.gmra.mrb[216].mxu0 %v4715_v17  ;;  %v4717_v23 = vpack.c.bf16 %v4653_v59, %v4649_v0  ;;  %v4655_v1 = vmul.f32 %v4527_v13, %v10285_v53  ;;  %v5746_v58 = vadd.f32 %v10388_v60, %v10381_v11  ;;  %v5858_v18 = vadd.f32 %v10400_v34, %v10394_v63  ;;  %v11057_v11 = vld [vmem:[#allocation17_spill] sm:$0xff] }
 0xa26   : > { %v5018_v15 = vadd.f32 %v5740_v6, %v10453_v61  ;;  %5296 = vmatprep.mubr.bf16.mxu0 %v4720_v42  ;;  %v5021_v24 = vadd.f32 %v5743_v38, %v10453_v61  ;;  %v5749_v9 = vadd.f32 %v10402_v12, %v10396_v32  ;;  %v5861_v43 = vadd.f32 %v10411_v28, %v10406_v44  ;;  %v11058_v32 = vld [vmem:[#allocation18_spill] sm:$0xff]  ;;  %v11059_v28 = vld [vmem:[#allocation19_spill] sm:$0xff] }
 0xa27   : > { %v4719_v26 = vpack.c.bf16 %v4655_v1, %v4651_v31  ;;  %v5026_v53 = vadd.f32 %v5746_v58, %v10453_v61  ;;  %v5752_v37 = vadd.f32 %v5751_v5, %v5750_v45  ;;  %v5864_v14 = vadd.f32 %v5863_v52, %v5862_v19 }
 0xa28   : > { %v5179_v50 = vadd.f32 %v5852_v7, %v5018_v15  ;;  %v5182_v49 = vadd.f32 %v5855_v2, %v5021_v24  ;;  %v5029_v63 = vadd.f32 %v5749_v9, %v10453_v61  ;;  %v5755_v34 = vadd.f32 %v5754_v54, %v5753_v56  ;;  %v11064_v15 = vld [vmem:[#allocation24_spill] sm:$0xff]  ;;  %v11065_v9 = vld [vmem:[#allocation25_spill] sm:$0xff] }
 0xa29   : > { %v5187_v8 = vadd.f32 %v5858_v18, %v5026_v53  ;;  %v5034_v21 = vadd.f32 %v5752_v37, %v10453_v61  ;;  %v5867_v3 = vadd.f32 %v5866_v39, %v5865_v16 }
 0xa2a   : > { %v5305_v60 = vadd.f32 %v5179_v50, %v11057_v11  ;;  %v5306_v12 = vadd.f32 %v5182_v49, %v11058_v32  ;;  %v5190_v48 = vadd.f32 %v5861_v43, %v5029_v63  ;;  %v5037_v44 = vadd.f32 %v5755_v34, %v10453_v61  ;;  %v11066_v11 = vld [vmem:[#allocation26_spill] sm:$0xff] }
 0xa2b   : > { %5136 = vmatmul.mubr.bf16.gmra.mrb[220].mxu1 %v4717_v23  ;;  %v5307_v17 = vadd.f32 %v5187_v8, %v11059_v28  ;;  %v5195_v36 = vadd.f32 %v5864_v14, %v5034_v21 }
 0xa2c   : > { %5337 = vst [vmem:[#allocation11] sm:$0xff] %v5305_v60  ;;  %5338 = vst [vmem:[#allocation11 + $0x8] sm:$0xff] %v5306_v12  ;;  %v5308_v27 = vadd.f32 %v5190_v48, %v11060_v46  ;;  %v5198_v20 = vadd.f32 %v5867_v3, %v5037_v44 }
 0xa2d   : > { %5297 = vmatmul.mubr.bf16.gmra.mrb[220].mxu0 %v4719_v26  ;;  %5339 = vst [vmem:[#allocation11 + $0x10] sm:$0xff] %v5307_v17  ;;  %v5309_v40 = vadd.f32 %v5195_v36, %v11061_v41  ;;  %v11067_v36 = vld [vmem:[#allocation27_spill] sm:$0xff] }
 0xa2e   : > { %5340 = vst [vmem:[#allocation11 + $0x18] sm:$0xff] %v5308_v27  ;;  %v5310_v45 = vadd.f32 %v5198_v20, %v11062_v10  ;;  %v11068_v10 = vld [vmem:[#allocation28_spill] sm:$0xff] }
 0xa2f   : > { %5341 = vst [vmem:[#allocation11 + $0x20] sm:$0xff] %v5309_v40 }
 0xa30   : > { %5342 = vst [vmem:[#allocation11 + $0x28] sm:$0xff] %v5310_v45 }
 0xa35   : > { %v5756_v62 = vpop.f32.mrb[172].mxu1 }
 0xa36   : > { %v5868_v0 = vpop.f32.mrb[172].mxu0  ;;  %v5757_v22 = vpop.f32.mrb[173].mxu1 }
 0xa37   : > { %v5758_v55 = vadd.f32 %v5757_v22, %v5756_v62  ;;  %v5869_v51 = vpop.f32.mrb[173].mxu0  ;;  %v5759_v35 = vpop.f32.mrb[174].mxu1 }
 0xa38   : > { %v5870_v57 = vadd.f32 %v5869_v51, %v5868_v0  ;;  %v5871_v29 = vpop.f32.mrb[174].mxu0  ;;  %v5760_v6 = vpop.f32.mrb[175].mxu1 }
 0xa39   : > { %v5042_v19 = vadd.f32 %v5758_v55, %v10453_v61  ;;  %v5761_v5 = vadd.f32 %v5760_v6, %v5759_v35  ;;  %v5872_v42 = vpop.f32.mrb[175].mxu0 }
 0xa3a   : > { %v5873_v59 = vadd.f32 %v5872_v42, %v5871_v29 }
 0xa3b   : > { %v5203_v13 = vadd.f32 %v5870_v57, %v5042_v19  ;;  %v5045_v4 = vadd.f32 %v5761_v5, %v10453_v61 }
 0xa3d   : > { %v5311_v7 = vadd.f32 %v5203_v13, %v11063_v33  ;;  %v5206_v52 = vadd.f32 %v5873_v59, %v5045_v4  ;;  %v5762_v56 = vpop.f32.mrb[176].mxu1  ;;  %v11069_v59 = vld [vmem:[#allocation29_spill] sm:$0xff] }
 0xa3e   : > { %v5874_v30 = vpop.f32.mrb[176].mxu0  ;;  %v5763_v31 = vpop.f32.mrb[177].mxu1 }
 0xa3f   : > { %5343 = vst [vmem:[#allocation11 + $0x30] sm:$0xff] %v5311_v7  ;;  %v5312_v47 = vadd.f32 %v5206_v52, %v11064_v15  ;;  %v5764_v25 = vadd.f32 %v5763_v31, %v5762_v56  ;;  %v5875_v38 = vpop.f32.mrb[177].mxu0  ;;  %v5765_v2 = vpop.f32.mrb[178].mxu1  ;;  %v11070_v56 = vld [vmem:[#allocation30_spill] sm:$0xff] }
 0xa40   : > { %v5876_v16 = vadd.f32 %v5875_v38, %v5874_v30  ;;  %v5877_v54 = vpop.f32.mrb[178].mxu0  ;;  %v5766_v23 = vpop.f32.mrb[179].mxu1 }
 0xa41   : > { %5344 = vst [vmem:[#allocation11 + $0x38] sm:$0xff] %v5312_v47  ;;  %v5050_v1 = vadd.f32 %v5764_v25, %v10453_v61  ;;  %v5767_v58 = vadd.f32 %v5766_v23, %v5765_v2  ;;  %v5878_v18 = vpop.f32.mrb[179].mxu0 }
 0xa42   : > { %v5879_v39 = vadd.f32 %v5878_v18, %v5877_v54 }
 0xa43   : > { %v5211_v50 = vadd.f32 %v5876_v16, %v5050_v1  ;;  %v5053_v24 = vadd.f32 %v5767_v58, %v10453_v61 }
 0xa45   : > { %v5313_v43 = vadd.f32 %v5211_v50, %v11065_v9  ;;  %v5214_v26 = vadd.f32 %v5879_v39, %v5053_v24  ;;  %v5768_v53 = vpop.f32.mrb[180].mxu1  ;;  %v11071_v39 = vld [vmem:[#allocation31_spill] sm:$0xff]  ;;  %v11072_v9 = vld [vmem:[#allocation32_spill] sm:$0xff] }
 0xa46   : > { %v5880_v37 = vpop.f32.mrb[180].mxu0  ;;  %v5769_v14 = vpop.f32.mrb[181].mxu1 }
 0xa47   : > { %5345 = vst [vmem:[#allocation11 + $0x40] sm:$0xff] %v5313_v43  ;;  %v5314_v60 = vadd.f32 %v5214_v26, %v11066_v11  ;;  %v5770_v49 = vadd.f32 %v5769_v14, %v5768_v53  ;;  %v5881_v63 = vpop.f32.mrb[181].mxu0  ;;  %v5771_v34 = vpop.f32.mrb[182].mxu1 }
 0xa48   : > { %v5882_v8 = vadd.f32 %v5881_v63, %v5880_v37  ;;  %v5883_v21 = vpop.f32.mrb[182].mxu0  ;;  %v5772_v3 = vpop.f32.mrb[183].mxu1 }
 0xa49   : > { %5346 = vst [vmem:[#allocation11 + $0x48] sm:$0xff] %v5314_v60  ;;  %v5058_v32 = vadd.f32 %v5770_v49, %v10453_v61  ;;  %v5773_v12 = vadd.f32 %v5772_v3, %v5771_v34  ;;  %v5884_v48 = vpop.f32.mrb[183].mxu0 }
 0xa4a   : > { %v5885_v44 = vadd.f32 %v5884_v48, %v5883_v21 }
 0xa4b   : > { %v5219_v28 = vadd.f32 %v5882_v8, %v5058_v32  ;;  %v5061_v17 = vadd.f32 %v5773_v12, %v10453_v61 }
 0xa4d   : > { %v5315_v46 = vadd.f32 %v5219_v28, %v11067_v36  ;;  %v5222_v27 = vadd.f32 %v5885_v44, %v5061_v17  ;;  %v5774_v20 = vpop.f32.mrb[184].mxu1  ;;  %v11073_v44 = vld [vmem:[#allocation33_spill] sm:$0xff]  ;;  %v11074_v36 = vld [vmem:[#allocation34_spill] sm:$0xff] }
 0xa4e   : > { %v5886_v41 = vpop.f32.mrb[184].mxu0  ;;  %v5775_v40 = vpop.f32.mrb[185].mxu1 }
 0xa4f   : > { %5347 = vst [vmem:[#allocation11 + $0x50] sm:$0xff] %v5315_v46  ;;  %v5316_v45 = vadd.f32 %v5222_v27, %v11068_v10  ;;  %v5776_v62 = vadd.f32 %v5775_v40, %v5774_v20  ;;  %v5887_v0 = vpop.f32.mrb[185].mxu0  ;;  %v5777_v22 = vpop.f32.mrb[186].mxu1 }
 0xa50   : > { %v5888_v55 = vadd.f32 %v5887_v0, %v5886_v41  ;;  %v5889_v51 = vpop.f32.mrb[186].mxu0  ;;  %v5778_v35 = vpop.f32.mrb[187].mxu1 }
 0xa51   : > { %5348 = vst [vmem:[#allocation11 + $0x58] sm:$0xff] %v5316_v45  ;;  %v5066_v57 = vadd.f32 %v5776_v62, %v10453_v61  ;;  %v5779_v29 = vadd.f32 %v5778_v35, %v5777_v22  ;;  %v5890_v6 = vpop.f32.mrb[187].mxu0 }
 0xa52   : > { %v5891_v19 = vadd.f32 %v5890_v6, %v5889_v51 }
 0xa53   : > { %v5227_v5 = vadd.f32 %v5888_v55, %v5066_v57  ;;  %v5069_v42 = vadd.f32 %v5779_v29, %v10453_v61 }
 0xa55   : > { %v5317_v13 = vadd.f32 %v5227_v5, %v11069_v59  ;;  %v5230_v4 = vadd.f32 %v5891_v19, %v5069_v42  ;;  %v5780_v33 = vpop.f32.mrb[188].mxu1  ;;  %v11075_v19 = vld [vmem:[#allocation35_spill] sm:$0xff]  ;;  %v11076_v59 = vld [vmem:[#allocation36_spill] sm:$0xff] }
 0xa56   : > { %v5892_v7 = vpop.f32.mrb[188].mxu0  ;;  %v5781_v52 = vpop.f32.mrb[189].mxu1 }
 0xa57   : > { %5349 = vst [vmem:[#allocation11 + $0x60] sm:$0xff] %v5317_v13  ;;  %v5318_v30 = vadd.f32 %v5230_v4, %v11070_v56  ;;  %v5782_v31 = vadd.f32 %v5781_v52, %v5780_v33  ;;  %v5893_v15 = vpop.f32.mrb[189].mxu0  ;;  %v5783_v47 = vpop.f32.mrb[190].mxu1 }
 0xa58   : > { %v5894_v25 = vadd.f32 %v5893_v15, %v5892_v7  ;;  %v5895_v38 = vpop.f32.mrb[190].mxu0  ;;  %v5784_v2 = vpop.f32.mrb[191].mxu1 }
 0xa59   : > { %5350 = vst [vmem:[#allocation11 + $0x68] sm:$0xff] %v5318_v30  ;;  %v5074_v16 = vadd.f32 %v5782_v31, %v10453_v61  ;;  %v5785_v54 = vadd.f32 %v5784_v2, %v5783_v47  ;;  %v5896_v23 = vpop.f32.mrb[191].mxu0 }
 0xa5a   : > { %v5897_v1 = vadd.f32 %v5896_v23, %v5895_v38 }
 0xa5b   : > { %v5235_v58 = vadd.f32 %v5894_v25, %v5074_v16  ;;  %v5077_v18 = vadd.f32 %v5785_v54, %v10453_v61 }
 0xa5d   : > { %v5319_v50 = vadd.f32 %v5235_v58, %v11071_v39  ;;  %v5238_v24 = vadd.f32 %v5897_v1, %v5077_v18  ;;  %v11077_v1 = vld [vmem:[#allocation37_spill] sm:$0xff]  ;;  %v11078_v39 = vld [vmem:[#allocation38_spill] sm:$0xff] }
 0xa5f   : > { %5351 = vst [vmem:[#allocation11 + $0x70] sm:$0xff] %v5319_v50  ;;  %v5320_v43 = vadd.f32 %v5238_v24, %v11072_v9 }
 0xa61   : > { %5352 = vst [vmem:[#allocation11 + $0x78] sm:$0xff] %v5320_v43 }
 0xa9e   : > { %v5786_v26 = vpop.f32.mrb[192].mxu1 }
 0xa9f   : > { %v5787_v53 = vpop.f32.mrb[193].mxu1 }
 0xaa0   : > { %v5898_v37 = vpop.f32.mrb[192].mxu0  ;;  %v5788_v14 = vadd.f32 %v5787_v53, %v5786_v26  ;;  %v5789_v11 = vpop.f32.mrb[194].mxu1 }
 0xaa1   : > { %v5899_v60 = vpop.f32.mrb[193].mxu0  ;;  %v5790_v49 = vpop.f32.mrb[195].mxu1 }
 0xaa2   : > { %v5082_v63 = vadd.f32 %v5788_v14, %v10453_v61  ;;  %v5900_v34 = vadd.f32 %v5899_v60, %v5898_v37  ;;  %v5901_v8 = vpop.f32.mrb[194].mxu0  ;;  %v5791_v21 = vadd.f32 %v5790_v49, %v5789_v11 }
 0xaa3   : > { %v5902_v3 = vpop.f32.mrb[195].mxu0 }
 0xaa4   : > { %v5243_v32 = vadd.f32 %v5900_v34, %v5082_v63  ;;  %v5085_v12 = vadd.f32 %v5791_v21, %v10453_v61  ;;  %v5903_v48 = vadd.f32 %v5902_v3, %v5901_v8 }
 0xaa6   : > { %v5321_v28 = vadd.f32 %v5243_v32, %v11073_v44  ;;  %v5246_v17 = vadd.f32 %v5903_v48, %v5085_v12  ;;  %v11079_v32 = vld [vmem:[#allocation39_spill] sm:$0xff] }
 0xaa8   : > { %5353 = vst [vmem:[#allocation11 + $0x80] sm:$0xff] %v5321_v28  ;;  %v5322_v46 = vadd.f32 %v5246_v17, %v11074_v36  ;;  %v11080_v17 = vld [vmem:[#allocation40_spill] sm:$0xff] }
 0xaaa   : > { %5354 = vst [vmem:[#allocation11 + $0x88] sm:$0xff] %v5322_v46 }
 0xab3   : > { %v5792_v27 = vpop.f32.mrb[196].mxu1 }
 0xab4   : > { %v5793_v20 = vpop.f32.mrb[197].mxu1 }
 0xab5   : > { %v5904_v41 = vpop.f32.mrb[196].mxu0  ;;  %v5794_v40 = vadd.f32 %v5793_v20, %v5792_v27  ;;  %v5795_v10 = vpop.f32.mrb[198].mxu1 }
 0xab6   : > { %v5905_v45 = vpop.f32.mrb[197].mxu0  ;;  %v5796_v62 = vpop.f32.mrb[199].mxu1 }
 0xab7   : > { %v5090_v0 = vadd.f32 %v5794_v40, %v10453_v61  ;;  %v5906_v22 = vadd.f32 %v5905_v45, %v5904_v41  ;;  %v5907_v55 = vpop.f32.mrb[198].mxu0  ;;  %v5797_v51 = vadd.f32 %v5796_v62, %v5795_v10 }
 0xab8   : > { %v5908_v35 = vpop.f32.mrb[199].mxu0 }
 0xab9   : > { %v5251_v57 = vadd.f32 %v5906_v22, %v5090_v0  ;;  %v5093_v29 = vadd.f32 %v5797_v51, %v10453_v61  ;;  %v5909_v6 = vadd.f32 %v5908_v35, %v5907_v55 }
 0xabb   : > { %v5323_v5 = vadd.f32 %v5251_v57, %v11075_v19  ;;  %v5254_v42 = vadd.f32 %v5909_v6, %v5093_v29  ;;  %v11081_v57 = vld [vmem:[#allocation41_spill] sm:$0xff] }
 0xabd   : > { %5355 = vst [vmem:[#allocation11 + $0x90] sm:$0xff] %v5323_v5  ;;  %v5324_v13 = vadd.f32 %v5254_v42, %v11076_v59  ;;  %v11082_v42 = vld [vmem:[#allocation42_spill] sm:$0xff] }
 0xabf   : > { %5356 = vst [vmem:[#allocation11 + $0x98] sm:$0xff] %v5324_v13 }
 0xac9   : > { %v5798_v4 = vpop.f32.mrb[200].mxu1 }
 0xaca   : > { %v5799_v33 = vpop.f32.mrb[201].mxu1  ;;  %v5910_v7 = vpop.f32.mrb[200].mxu0 }
 0xacb   : > { %v5800_v52 = vadd.f32 %v5799_v33, %v5798_v4  ;;  %v5801_v56 = vpop.f32.mrb[202].mxu1  ;;  %v5911_v30 = vpop.f32.mrb[201].mxu0 }
 0xacc   : > { %v5802_v31 = vpop.f32.mrb[203].mxu1  ;;  %v5912_v47 = vadd.f32 %v5911_v30, %v5910_v7  ;;  %v5913_v25 = vpop.f32.mrb[202].mxu0 }
 0xacd   : > { %v5098_v15 = vadd.f32 %v5800_v52, %v10453_v61  ;;  %v5803_v38 = vadd.f32 %v5802_v31, %v5801_v56  ;;  %v5914_v2 = vpop.f32.mrb[203].mxu0 }
 0xace   : > { %v5915_v23 = vadd.f32 %v5914_v2, %v5913_v25 }
 0xacf   : > { %v5259_v16 = vadd.f32 %v5912_v47, %v5098_v15  ;;  %v5101_v54 = vadd.f32 %v5803_v38, %v10453_v61 }
 0xad1   : > { %v5325_v58 = vadd.f32 %v5259_v16, %v11077_v1  ;;  %v5262_v18 = vadd.f32 %v5915_v23, %v5101_v54  ;;  %v11083_v16 = vld [vmem:[#allocation43_spill] sm:$0xff] }
 0xad3   : > { %5357 = vst [vmem:[#allocation11 + $0xa0] sm:$0xff] %v5325_v58  ;;  %v5326_v50 = vadd.f32 %v5262_v18, %v11078_v39  ;;  %v11084_v18 = vld [vmem:[#allocation44_spill] sm:$0xff] }
 0xad5   : > { %5358 = vst [vmem:[#allocation11 + $0xa8] sm:$0xff] %v5326_v50 }
 0xade   : > { %v5804_v24 = vpop.f32.mrb[204].mxu1 }
 0xadf   : > { %v5805_v9 = vpop.f32.mrb[205].mxu1 }
 0xae0   : > { %v5916_v43 = vpop.f32.mrb[204].mxu0  ;;  %v5806_v26 = vadd.f32 %v5805_v9, %v5804_v24  ;;  %v5807_v53 = vpop.f32.mrb[206].mxu1 }
 0xae1   : > { %v5917_v37 = vpop.f32.mrb[205].mxu0  ;;  %v5808_v14 = vpop.f32.mrb[207].mxu1 }
 0xae2   : > { %v5106_v11 = vadd.f32 %v5806_v26, %v10453_v61  ;;  %v5918_v60 = vadd.f32 %v5917_v37, %v5916_v43  ;;  %v5919_v49 = vpop.f32.mrb[206].mxu0  ;;  %v5809_v63 = vadd.f32 %v5808_v14, %v5807_v53 }
 0xae3   : > { %v5920_v34 = vpop.f32.mrb[207].mxu0 }
 0xae4   : > { %v5267_v8 = vadd.f32 %v5918_v60, %v5106_v11  ;;  %v5109_v21 = vadd.f32 %v5809_v63, %v10453_v61  ;;  %v5921_v3 = vadd.f32 %v5920_v34, %v5919_v49 }
 0xae6   : > { %v5327_v12 = vadd.f32 %v5267_v8, %v11079_v32  ;;  %v5270_v48 = vadd.f32 %v5921_v3, %v5109_v21  ;;  %v5810_v44 = vpop.f32.mrb[208].mxu1  ;;  %v11085_v8 = vld [vmem:[#allocation45_spill] sm:$0xff] }
 0xae7   : > { %v5811_v28 = vpop.f32.mrb[209].mxu1 }
 0xae8   : > { %5359 = vst [vmem:[#allocation11 + $0xb0] sm:$0xff] %v5327_v12  ;;  %v5328_v36 = vadd.f32 %v5270_v48, %v11080_v17  ;;  %v5922_v46 = vpop.f32.mrb[208].mxu0  ;;  %v5812_v27 = vadd.f32 %v5811_v28, %v5810_v44  ;;  %v5813_v20 = vpop.f32.mrb[210].mxu1  ;;  %v11086_v48 = vld [vmem:[#allocation46_spill] sm:$0xff] }
 0xae9   : > { %v5923_v41 = vpop.f32.mrb[209].mxu0  ;;  %v5814_v40 = vpop.f32.mrb[211].mxu1 }
 0xaea   : > { %5360 = vst [vmem:[#allocation11 + $0xb8] sm:$0xff] %v5328_v36  ;;  %v5114_v10 = vadd.f32 %v5812_v27, %v10453_v61  ;;  %v5924_v45 = vadd.f32 %v5923_v41, %v5922_v46  ;;  %v5925_v62 = vpop.f32.mrb[210].mxu0  ;;  %v5815_v0 = vadd.f32 %v5814_v40, %v5813_v20 }
 0xaeb   : > { %v5926_v22 = vpop.f32.mrb[211].mxu0 }
 0xaec   : > { %v5275_v55 = vadd.f32 %v5924_v45, %v5114_v10  ;;  %v5117_v51 = vadd.f32 %v5815_v0, %v10453_v61  ;;  %v5927_v35 = vadd.f32 %v5926_v22, %v5925_v62 }
 0xaee   : > { %v5329_v29 = vadd.f32 %v5275_v55, %v11081_v57  ;;  %v5278_v6 = vadd.f32 %v5927_v35, %v5117_v51  ;;  %v5816_v19 = vpop.f32.mrb[212].mxu1  ;;  %v11087_v55 = vld [vmem:[#allocation47_spill] sm:$0xff]  ;;  %v11089_v57 = vld [vmem:[#allocation48_spill] sm:$0xff] }
 0xaef   : > { %v5817_v5 = vpop.f32.mrb[213].mxu1 }
 0xaf0   : > { %5361 = vst [vmem:[#allocation11 + $0xc0] sm:$0xff] %v5329_v29  ;;  %v5330_v59 = vadd.f32 %v5278_v6, %v11082_v42  ;;  %v5928_v13 = vpop.f32.mrb[212].mxu0  ;;  %v5818_v4 = vadd.f32 %v5817_v5, %v5816_v19  ;;  %v5819_v33 = vpop.f32.mrb[214].mxu1 }
 0xaf1   : > { %v5929_v7 = vpop.f32.mrb[213].mxu0  ;;  %v5820_v52 = vpop.f32.mrb[215].mxu1 }
 0xaf2   : > { %5362 = vst [vmem:[#allocation11 + $0xc8] sm:$0xff] %v5330_v59  ;;  %v5122_v56 = vadd.f32 %v5818_v4, %v10453_v61  ;;  %v5930_v30 = vadd.f32 %v5929_v7, %v5928_v13  ;;  %v5931_v31 = vpop.f32.mrb[214].mxu0  ;;  %v5821_v15 = vadd.f32 %v5820_v52, %v5819_v33 }
 0xaf3   : > { %v5932_v47 = vpop.f32.mrb[215].mxu0 }
 0xaf4   : > { %v5283_v25 = vadd.f32 %v5930_v30, %v5122_v56  ;;  %v5125_v38 = vadd.f32 %v5821_v15, %v10453_v61  ;;  %v5933_v2 = vadd.f32 %v5932_v47, %v5931_v31 }
 0xaf6   : > { %v5331_v54 = vadd.f32 %v5283_v25, %v11083_v16  ;;  %v5286_v23 = vadd.f32 %v5933_v2, %v5125_v38  ;;  %v5822_v1 = vpop.f32.mrb[216].mxu1 }
 0xaf7   : > { %v5823_v58 = vpop.f32.mrb[217].mxu1 }
 0xaf8   : > { %5363 = vst [vmem:[#allocation11 + $0xd0] sm:$0xff] %v5331_v54  ;;  %v5332_v39 = vadd.f32 %v5286_v23, %v11084_v18  ;;  %v5934_v50 = vpop.f32.mrb[216].mxu0  ;;  %v5824_v24 = vadd.f32 %v5823_v58, %v5822_v1  ;;  %v5825_v9 = vpop.f32.mrb[218].mxu1 }
 0xaf9   : > { %v5935_v43 = vpop.f32.mrb[217].mxu0  ;;  %v5826_v26 = vpop.f32.mrb[219].mxu1 }
 0xafa   : > { %5364 = vst [vmem:[#allocation11 + $0xd8] sm:$0xff] %v5332_v39  ;;  %v5130_v53 = vadd.f32 %v5824_v24, %v10453_v61  ;;  %v5936_v37 = vadd.f32 %v5935_v43, %v5934_v50  ;;  %v5937_v14 = vpop.f32.mrb[218].mxu0  ;;  %v5827_v11 = vadd.f32 %v5826_v26, %v5825_v9 }
 0xafb   : > { %v5938_v60 = vpop.f32.mrb[219].mxu0 }
 0xafc   : > { %v5291_v49 = vadd.f32 %v5936_v37, %v5130_v53  ;;  %v5133_v63 = vadd.f32 %v5827_v11, %v10453_v61  ;;  %v5939_v34 = vadd.f32 %v5938_v60, %v5937_v14 }
 0xafe   : > { %v5333_v21 = vadd.f32 %v5291_v49, %v11085_v8  ;;  %v5294_v3 = vadd.f32 %v5939_v34, %v5133_v63  ;;  %v5828_v32 = vpop.f32.mrb[220].mxu1 }
 0xaff   : > { %v5829_v12 = vpop.f32.mrb[221].mxu1 }
 0xb00   : > { %5365 = vst [vmem:[#allocation11 + $0xe0] sm:$0xff] %v5333_v21  ;;  %v5334_v44 = vadd.f32 %v5294_v3, %v11086_v48  ;;  %v5940_v28 = vpop.f32.mrb[220].mxu0  ;;  %v5830_v17 = vadd.f32 %v5829_v12, %v5828_v32  ;;  %v5831_v36 = vpop.f32.mrb[222].mxu1 }
 0xb01   : > { %v5941_v46 = vpop.f32.mrb[221].mxu0  ;;  %v5832_v27 = vpop.f32.mrb[223].mxu1 }
 0xb02   : > { %5366 = vst [vmem:[#allocation11 + $0xe8] sm:$0xff] %v5334_v44  ;;  %v5138_v20 = vadd.f32 %v5830_v17, %v10453_v61  ;;  %v5942_v41 = vadd.f32 %v5941_v46, %v5940_v28  ;;  %v5943_v40 = vpop.f32.mrb[222].mxu0  ;;  %v5833_v10 = vadd.f32 %v5832_v27, %v5831_v36 }
 0xb03   : > { %v5944_v45 = vpop.f32.mrb[223].mxu0 }
 0xb04   : > { %v5299_v62 = vadd.f32 %v5942_v41, %v5138_v20  ;;  %v5141_v0 = vadd.f32 %v5833_v10, %v10453_v61  ;;  %v5945_v22 = vadd.f32 %v5944_v45, %v5943_v40 }
 0xb06   : > { %v5335_v51 = vadd.f32 %v5299_v62, %v11087_v55  ;;  %v5302_v35 = vadd.f32 %v5945_v22, %v5141_v0 }
 0xb08   : > { %5367 = vst [vmem:[#allocation11 + $0xf0] sm:$0xff] %v5335_v51  ;;  %v5336_v29 = vadd.f32 %v5302_v35, %v11089_v57 }
 0xb0a   : > { %5368 = vst [vmem:[#allocation11 + $0xf8] sm:$0xff] %v5336_v29 }
 0xb0b   : > { %7098 = shalt.err (!%p7095_p8)
}
 0xb0c   : > { %s7099_s8 = scalar_lea.hbm %s10582_s7, 4096 }
 0xb0d   : > { %p7100_p9 = scmp.ne.s32.totalorder %s10582_s7, %s7099_s8  ;;  %p7105_p2 = scmp.lt.u32.totalorder %s7099_s8, %s10582_s7 }
 0xb0f   : > { %p7101_p10 = pnand %p7100_p9, %p10539_p7 }
 0xb11   : > { %p7102_p11 = pneg %p7101_p10 }
 0xb13   : > { %p7107_p3 = pnand %p7105_p2, %p7102_p11 }
 0xb15   : > { %7110 = shalt.err (!%p7107_p3)
}
 0xb16   : > { %s7166_s27 = smov 128   ;;  %s7167_s13 = smov 8  }
 0xb17   : > { %6207 = dma.vmem_to_hbm [thread:$0]  (%p10539_p7), %s5380_s12, 4096, %s10582_s7, [#allocation4], %s7166_s27, %s7166_s27, %s7167_s13  }
 0xb18   : > { %7136 = dma.done.wait (%p10539_p7), [#allocation4], 4096  }
 0xb19   : > { %7138 = vsyncadd (%p10539_p7), [#allocation4], 4294963200 }
 0xb1a PF: > { %s21_s26 = sadd.s32 1, %s7149_s26   ;;  %s11090_s24 = smov %s7145_s25 }
 0xb1b   : > { %p18_p5 = scmp.ge.s32.totalorder %s21_s26, 4   ;;  %s11091_s25 = smov %s11093_s23 }
 0xb1d   :  { %20 = sbr.rel (!%p18_p5) target bundleno = 5 (0x5), region = 105 }
 0xb24   :  { %5395 = vsyncpa [#allocation3], 1 }
 0xb25   :  { %5397 = vsyncpa [#allocation3 + $0x1], 1 }
 0xb26   :  { %5398 = vsyncpa [#allocation6], 1 }
 0xb27   :  { %5399 = vsyncpa [#allocation9], 1 }
 0xb28   :  { %5400 = vsyncpa [#allocation4], 1 }
 0xb29   :  { %5402 = vsyncpa [#allocation4 + $0x1], 1 }

</bundles_post_ra>
